<compile_context>
chip_gen: v7x
topology: tpu7x:2x2x1
jax: 0.10.0
libtpu: 0.0.40
codegen_flags: <defaults>
</compile_context>

<pallas_src>
import functools

import jax
import jax.numpy as jnp
from jax.experimental import pallas as pl
from jax.experimental.pallas import tpu as pltpu

ngf = 32
nz = 100
EPS = 1e-5            # nn.BatchNorm2d default eps
CPAD = 128            # lane-dense padded output-channel width
_VMEM_LIMIT = 32 * 1024 * 1024


# ---------------------------------------------------------------------------
# Kernel 1: layer-1 projection  (N, nz) @ (nz, Cout*4*4)  -> f32 (single block)
# ---------------------------------------------------------------------------
def _proj_kernel(x_ref, w_ref, o_ref):
    o_ref[...] = jnp.dot(x_ref[...], w_ref[...],
                         preferred_element_type=jnp.float32)


def pallas_project(x2, w2):
    N = x2.shape[0]
    CO = w2.shape[1]
    return pl.pallas_call(
        _proj_kernel,
        out_shape=jax.ShapeDtypeStruct((N, CO), jnp.float32),
        compiler_params=pltpu.CompilerParams(vmem_limit_bytes=_VMEM_LIMIT),
    )(x2, w2)


# ---------------------------------------------------------------------------
# Kernel 2: phase-decomposed ConvTranspose2d(k=4, s=2, p=1)
#   grid = (phase_h, phase_w); one (rows, 4*Cin) x (4*Cin, 128) matmul per
#   phase, plus per-phase partial BN statistics from the f32 accumulator.
# ---------------------------------------------------------------------------
def _deconv_kernel(xg_ref, w_ref, o_ref, sum_ref, sq_ref, *, H):
    ph = pl.program_id(0)
    nw = xg_ref.shape[1]            # N * W
    kd = xg_ref.shape[2]            # 4 * Cin
    # dynamic start only on the untiled leading (H) axis; W/Cin stay dense.
    slab = xg_ref[pl.ds(ph, H), :, :].reshape(H * nw, kd)
    acc = jnp.dot(slab, w_ref[...], preferred_element_type=jnp.float32)
    sum_ref[...] = jnp.sum(acc, axis=0, keepdims=True)
    sq_ref[...] = jnp.sum(acc * acc, axis=0, keepdims=True)
    o_ref[...] = acc.astype(o_ref.dtype)


def pallas_deconv(xg, wc, H):
    # xg: (2, H+1, N*W, 4*Cin) bf16   (one slab per W-phase)
    # wc: (2, 2, 4*Cin, CPAD)  bf16   (per-phase tap-major weights)
    _, Hp1, NW, KD = xg.shape
    M = H * NW
    kern = functools.partial(_deconv_kernel, H=H)
    return pl.pallas_call(
        kern,
        out_shape=(
            jax.ShapeDtypeStruct((2, 2, M, CPAD), jnp.bfloat16),
            jax.ShapeDtypeStruct((2, 2, 1, CPAD), jnp.float32),
            jax.ShapeDtypeStruct((2, 2, 1, CPAD), jnp.float32),
        ),
        grid_spec=pltpu.PrefetchScalarGridSpec(
            num_scalar_prefetch=0,
            grid=(2, 2),                                   # (phase_h, phase_w)
            in_specs=[
                pl.BlockSpec((None, Hp1, NW, KD), lambda ph, pw: (pw, 0, 0, 0)),
                pl.BlockSpec((None, None, KD, CPAD), lambda ph, pw: (ph, pw, 0, 0)),
            ],
            out_specs=(
                pl.BlockSpec((None, None, M, CPAD), lambda ph, pw: (ph, pw, 0, 0)),
                pl.BlockSpec((None, None, 1, CPAD), lambda ph, pw: (ph, pw, 0, 0)),
                pl.BlockSpec((None, None, 1, CPAD), lambda ph, pw: (ph, pw, 0, 0)),
            ),
        ),
        compiler_params=pltpu.CompilerParams(
            dimension_semantics=("parallel", "parallel"),
            vmem_limit_bytes=_VMEM_LIMIT),
    )(xg, wc)


# ---------------------------------------------------------------------------
# Wrapper glue (tiny XLA fusions between the pallas_calls)
# ---------------------------------------------------------------------------
def _make_phase_weights(w_t):
    # w_t: (Cin, Cout, 4, 4) PyTorch ConvTranspose2d layout.
    # Phase (ph, pw), tap (dh, dw) uses kernel element (3-ph-2*dh, 3-pw-2*dw).
    Cout = w_t.shape[1]
    phs = []
    for ph in (0, 1):
        pws = []
        for pw in (0, 1):
            taps = []
            for dh in (0, 1):
                for dw in (0, 1):
                    taps.append(w_t[:, :, 3 - ph - 2 * dh, 3 - pw - 2 * dw])
            pws.append(jnp.concatenate(taps, axis=0))        # (4*Cin, Cout)
        phs.append(jnp.stack(pws, axis=0))                   # (2, 4*Cin, Cout)
    wc = jnp.stack(phs, axis=0)                              # (2, 2, 4*Cin, Cout)
    wc = jnp.pad(wc, ((0, 0), (0, 0), (0, 0), (0, CPAD - Cout)))
    return wc.astype(jnp.bfloat16)


def _gather_phases(a):
    # a: (N, H, W, Cin) bf16  ->  (2, H+1, N*W, 4*Cin) bf16
    # xg[pw, h, n*W+j, (dh*2+dw)*Cin+ci] = xpad[n, h+dh, j+pw+dw, ci]
    N, H, W, Cin = a.shape
    xpad = jnp.pad(a, ((0, 0), (1, 1), (1, 1), (0, 0)))
    outs = []
    for pw in (0, 1):
        taps = []
        for dh in (0, 1):
            for dw in (0, 1):
                taps.append(xpad[:, dh:dh + H + 1, pw + dw:pw + dw + W, :])
        g = jnp.concatenate(taps, axis=-1)                   # (N, H+1, W, 4*Cin)
        g = g.transpose(1, 0, 2, 3).reshape(H + 1, N * W, 4 * Cin)
        outs.append(g)
    return jnp.stack(outs, axis=0)


def deconv_layer(a, w_t, *, bn):
    # a: (N, H, W, Cin) bf16 NHWC;  w_t: (Cin, Cout, 4, 4)
    N, H, W, Cin = a.shape
    Cout = w_t.shape[1]
    xg = _gather_phases(a)
    wc = _make_phase_weights(w_t)
    y, s, sq = pallas_deconv(xg, wc, H)                      # y: (2,2,M,CPAD)

    # interleave phases: [ph,pw,h,n,j,c] -> [n, 2h+ph, 2j+pw, c]
    yi = y.reshape(2, 2, H, N, W, CPAD)[..., :Cout]
    img = yi.transpose(3, 2, 0, 4, 1, 5).reshape(N, 2 * H, 2 * W, Cout)
    if not bn:
        return img                                           # raw conv output (bf16)

    m = 4 * H * N * W                                        # N * Ho * Wo
    mean = jnp.sum(s, axis=(0, 1, 2))[:Cout] / m
    var = jnp.maximum(jnp.sum(sq, axis=(0, 1, 2))[:Cout] / m - mean * mean, 0.0)
    scale = jax.lax.rsqrt(var + EPS)
    a_next = jnp.maximum((img.astype(jnp.float32) - mean) * scale, 0.0)
    return a_next.astype(jnp.bfloat16)


def input_layer(x, w1):
    # ConvTranspose2d(nz, ngf*8, 4, 1, 0) on a 1x1 input == plain matmul.
    N = x.shape[0]
    x2 = x.reshape(N, nz).astype(jnp.bfloat16)
    w2 = w1.reshape(nz, -1).astype(jnp.bfloat16)             # (nz, 256*16)
    y = pallas_project(x2, w2)                               # (N, 4096) f32
    y = y.reshape(N, ngf * 8, 4, 4).transpose(0, 2, 3, 1)    # NHWC (N,4,4,256)
    mean = jnp.mean(y, axis=(0, 1, 2))
    var = jnp.mean(jnp.square(y), axis=(0, 1, 2)) - jnp.square(mean)
    scale = jax.lax.rsqrt(jnp.maximum(var, 0.0) + EPS)
    a = jnp.maximum((y - mean) * scale, 0.0)
    return a.astype(jnp.bfloat16)


# ---------------------------------------------------------------------------
# GNet forward (training-mode BatchNorm, gamma=1, beta=0)
# ---------------------------------------------------------------------------
def gnet_forward(x, params):
    a = input_layer(x, params["w1"])                         # (N, 4, 4, 256)
    a = deconv_layer(a, params["w2"], bn=True)               # (N, 8, 8, 128)
    a = deconv_layer(a, params["w3"], bn=True)               # (N, 16, 16, 64)
    a = deconv_layer(a, params["w4"], bn=True)               # (N, 32, 32, 32)
    img = deconv_layer(a, params["w5"], bn=False)            # (N, 64, 64, 3)
    img = jnp.tanh(img.astype(jnp.float32))                  # only real channels
    return img.transpose(0, 3, 1, 2)                         # NCHW f32


def init_params(key):
    # deterministic DCGAN-style init: N(0, 0.02)
    shapes = [
        (nz, ngf * 8, 4, 4),
        (ngf * 8, ngf * 4, 4, 4),
        (ngf * 4, ngf * 2, 4, 4),
        (ngf * 2, ngf, 4, 4),
        (ngf, 3, 4, 4),
    ]
    keys = jax.random.split(key, len(shapes))
    return {f"w{i + 1}": 0.02 * jax.random.normal(keys[i], s, jnp.float32)
            for i, s in enumerate(shapes)}


# TODO(synk): BatchNorm running-stat buffer updates (eval-mode statistics) are
# not modeled; this implements the training-mode forward of the module.

if __name__ == "__main__":
    key = jax.random.PRNGKey(0)
    kx, kp = jax.random.split(key)
    x = jax.random.normal(kx, (2, nz, 1, 1), jnp.float32)    # latent noise, NCHW
    params = init_params(kp)

    out = jax.jit(gnet_forward)(x, params)
    out = jax.block_until_ready(out)
    assert out.shape == (2, 3, 64, 64), out.shape
    assert bool(jnp.all(jnp.isfinite(out)))
    print("KERNEL_OK")
</pallas_src>

<mosaic_0001>
module attributes {stable_mosaic.version = 11 : i64} {
  func.func @_proj_kernel(%arg0: memref<2x100xbf16, #tpu.memory_space<vmem>>, %arg1: memref<100x4096xbf16, #tpu.memory_space<vmem>>, %arg2: memref<2x4096xf32, #tpu.memory_space<vmem>>) attributes {dimension_semantics = [], scalar_prefetch = 0 : i64, scratch_operands = 0 : i64, tpu.core_type = #tpu.core_type<tc>} {
    %c0 = arith.constant 0 : index
    %c0_0 = arith.constant 0 : index
    %0 = vector.load %arg0[%c0, %c0_0] : memref<2x100xbf16, #tpu.memory_space<vmem>>, vector<2x100xbf16>
    %c0_1 = arith.constant 0 : index
    %c0_2 = arith.constant 0 : index
    %1 = vector.load %arg1[%c0_1, %c0_2] : memref<100x4096xbf16, #tpu.memory_space<vmem>>, vector<100x4096xbf16>
    %cst = arith.constant dense<0.000000e+00> : vector<2x4096xf32>
    %2 = tpu.matmul %0, %1, %cst {dimension_numbers = #tpu.dot_dimension_numbers<[1], [0], [0], [1], [0, 0, 1, 1], [], []>} : vector<2x100xbf16>, vector<100x4096xbf16>, vector<2x4096xf32> -> vector<2x4096xf32>
    %c0_3 = arith.constant 0 : index
    %c0_4 = arith.constant 0 : index
    %3 = vector.load %arg2[%c0_3, %c0_4] : memref<2x4096xf32, #tpu.memory_space<vmem>>, vector<2x4096xf32>
    tpu.vector_store %arg2[%c0_3, %c0_4], %2 {strides = array<i32>} : memref<2x4096xf32, #tpu.memory_space<vmem>>, vector<2x4096xf32>,
    return
  }
}

module attributes {stable_mosaic.version = 11 : i64} {
  func.func @_deconv_kernel(%arg0: i32, %arg1: i32, %arg2: memref<1x5x8x1024xbf16, #tpu.memory_space<vmem>>, %arg3: memref<1x1x1024x128xbf16, #tpu.memory_space<vmem>>, %arg4: memref<1x1x32x128xbf16, #tpu.memory_space<vmem>>, %arg5: memref<1x1x1x128xf32, #tpu.memory_space<vmem>>, %arg6: memref<1x1x1x128xf32, #tpu.memory_space<vmem>>) attributes {dimension_semantics = [#tpu.dimension_semantics<parallel>, #tpu.dimension_semantics<parallel>], iteration_bounds = array<i64: 2, 2>, scalar_prefetch = 0 : i64, scratch_operands = 0 : i64, tpu.core_type = #tpu.core_type<tc>, window_params = [{transform_indices = @transform_0, window_bounds = array<i64: 1, 5, 8, 1024>}, {transform_indices = @transform_1, window_bounds = array<i64: 1, 1, 1024, 128>}, {transform_indices = @transform_2, window_bounds = array<i64: 1, 1, 32, 128>}, {transform_indices = @transform_3, window_bounds = array<i64: 1, 1, 1, 128>}, {transform_indices = @transform_4, window_bounds = array<i64: 1, 1, 1, 128>}]} {
    %c0 = arith.constant 0 : index
    %0 = arith.index_cast %arg0 : i32 to index
    %c0_0 = arith.constant 0 : index
    %c0_1 = arith.constant 0 : index
    %1 = vector.load %arg2[%c0, %0, %c0_0, %c0_1] : memref<1x5x8x1024xbf16, #tpu.memory_space<vmem>>, vector<1x4x8x1024xbf16>
    %2 = vector.shape_cast %1 : vector<1x4x8x1024xbf16> to vector<4x8x1024xbf16>
    %3 = vector.shape_cast %2 : vector<4x8x1024xbf16> to vector<32x1024xbf16>
    %c0_2 = arith.constant 0 : index
    %c0_3 = arith.constant 0 : index
    %c0_4 = arith.constant 0 : index
    %c0_5 = arith.constant 0 : index
    %4 = vector.load %arg3[%c0_2, %c0_3, %c0_4, %c0_5] : memref<1x1x1024x128xbf16, #tpu.memory_space<vmem>>, vector<1x1x1024x128xbf16>
    %5 = vector.shape_cast %4 : vector<1x1x1024x128xbf16> to vector<1024x128xbf16>
    %cst = arith.constant dense<0.000000e+00> : vector<32x128xf32>
    %6 = tpu.matmul %3, %5, %cst {dimension_numbers = #tpu.dot_dimension_numbers<[1], [0], [0], [1], [0, 0, 1, 1], [], []>} : vector<32x1024xbf16>, vector<1024x128xbf16>, vector<32x128xf32> -> vector<32x128xf32>
    %cst_6 = arith.constant dense<0.000000e+00> : vector<128xf32>
    %7 = vector.multi_reduction <add>, %6, %cst_6 [0] : vector<32x128xf32> to vector<128xf32>
    %8 = vector.shape_cast %7 : vector<128xf32> to vector<1x128xf32>
    %c0_7 = arith.constant 0 : index
    %c0_8 = arith.constant 0 : index
    %c0_9 = arith.constant 0 : index
    %c0_10 = arith.constant 0 : index
    %9 = vector.load %arg5[%c0_7, %c0_8, %c0_9, %c0_10] : memref<1x1x1x128xf32, #tpu.memory_space<vmem>>, vector<1x1x1x128xf32>
    %10 = vector.shape_cast %9 : vector<1x1x1x128xf32> to vector<1x128xf32>
    %11 = vector.shape_cast %8 : vector<1x128xf32> to vector<1x1x1x128xf32>
    tpu.vector_store %arg5[%c0_7, %c0_8, %c0_9, %c0_10], %11 {strides = array<i32>} : memref<1x1x1x128xf32, #tpu.memory_space<vmem>>, vector<1x1x1x128xf32>,
    %12 = arith.mulf %6, %6 : vector<32x128xf32>
    %cst_11 = arith.constant dense<0.000000e+00> : vector<128xf32>
    %13 = vector.multi_reduction <add>, %12, %cst_11 [0] : vector<32x128xf32> to vector<128xf32>
    %14 = vector.shape_cast %13 : vector<128xf32> to vector<1x128xf32>
    %c0_12 = arith.constant 0 : index
    %c0_13 = arith.constant 0 : index
    %c0_14 = arith.constant 0 : index
    %c0_15 = arith.constant 0 : index
    %15 = vector.load %arg6[%c0_12, %c0_13, %c0_14, %c0_15] : memref<1x1x1x128xf32, #tpu.memory_space<vmem>>, vector<1x1x1x128xf32>
    %16 = vector.shape_cast %15 : vector<1x1x1x128xf32> to vector<1x128xf32>
    %17 = vector.shape_cast %14 : vector<1x128xf32> to vector<1x1x1x128xf32>
    tpu.vector_store %arg6[%c0_12, %c0_13, %c0_14, %c0_15], %17 {strides = array<i32>} : memref<1x1x1x128xf32, #tpu.memory_space<vmem>>, vector<1x1x1x128xf32>,
    %18 = arith.truncf %6 : vector<32x128xf32> to vector<32x128xbf16>
    %c0_16 = arith.constant 0 : index
    %c0_17 = arith.constant 0 : index
    %c0_18 = arith.constant 0 : index
    %c0_19 = arith.constant 0 : index
    %19 = vector.load %arg4[%c0_16, %c0_17, %c0_18, %c0_19] : memref<1x1x32x128xbf16, #tpu.memory_space<vmem>>, vector<1x1x32x128xbf16>
    %20 = vector.shape_cast %19 : vector<1x1x32x128xbf16> to vector<32x128xbf16>
    %21 = vector.shape_cast %18 : vector<32x128xbf16> to vector<1x1x32x128xbf16>
    tpu.vector_store %arg4[%c0_16, %c0_17, %c0_18, %c0_19], %21 {strides = array<i32>} : memref<1x1x32x128xbf16, #tpu.memory_space<vmem>>, vector<1x1x32x128xbf16>,
    return
  }
  func.func @transform_0(%arg0: i32, %arg1: i32) -> (i32, i32, i32, i32) {
    %c0_i32 = arith.constant 0 : i32
    %c0_i32_0 = arith.constant 0 : i32
    %c0_i32_1 = arith.constant 0 : i32
    %c0_i32_2 = arith.constant 0 : i32
    return %arg1, %c0_i32, %c0_i32_0, %c0_i32_1 : i32, i32, i32, i32
  }
  func.func @transform_1(%arg0: i32, %arg1: i32) -> (i32, i32, i32, i32) {
    %c0_i32 = arith.constant 0 : i32
    %c0_i32_0 = arith.constant 0 : i32
    %c0_i32_1 = arith.constant 0 : i32
    return %arg0, %arg1, %c0_i32, %c0_i32_0 : i32, i32, i32, i32
  }
  func.func @transform_2(%arg0: i32, %arg1: i32) -> (i32, i32, i32, i32) {
    %c0_i32 = arith.constant 0 : i32
    %c0_i32_0 = arith.constant 0 : i32
    %c0_i32_1 = arith.constant 0 : i32
    return %arg0, %arg1, %c0_i32, %c0_i32_0 : i32, i32, i32, i32
  }
  func.func @transform_3(%arg0: i32, %arg1: i32) -> (i32, i32, i32, i32) {
    %c0_i32 = arith.constant 0 : i32
    %c0_i32_0 = arith.constant 0 : i32
    %c0_i32_1 = arith.constant 0 : i32
    return %arg0, %arg1, %c0_i32, %c0_i32_0 : i32, i32, i32, i32
  }
  func.func @transform_4(%arg0: i32, %arg1: i32) -> (i32, i32, i32, i32) {
    %c0_i32 = arith.constant 0 : i32
    %c0_i32_0 = arith.constant 0 : i32
    %c0_i32_1 = arith.constant 0 : i32
    return %arg0, %arg1, %c0_i32, %c0_i32_0 : i32, i32, i32, i32
  }
}

module attributes {stable_mosaic.version = 11 : i64} {
  func.func @_deconv_kernel(%arg0: i32, %arg1: i32, %arg2: memref<1x9x16x512xbf16, #tpu.memory_space<vmem>>, %arg3: memref<1x1x512x128xbf16, #tpu.memory_space<vmem>>, %arg4: memref<1x1x128x128xbf16, #tpu.memory_space<vmem>>, %arg5: memref<1x1x1x128xf32, #tpu.memory_space<vmem>>, %arg6: memref<1x1x1x128xf32, #tpu.memory_space<vmem>>) attributes {dimension_semantics = [#tpu.dimension_semantics<parallel>, #tpu.dimension_semantics<parallel>], iteration_bounds = array<i64: 2, 2>, scalar_prefetch = 0 : i64, scratch_operands = 0 : i64, tpu.core_type = #tpu.core_type<tc>, window_params = [{transform_indices = @transform_0, window_bounds = array<i64: 1, 9, 16, 512>}, {transform_indices = @transform_1, window_bounds = array<i64: 1, 1, 512, 128>}, {transform_indices = @transform_2, window_bounds = array<i64: 1, 1, 128, 128>}, {transform_indices = @transform_3, window_bounds = array<i64: 1, 1, 1, 128>}, {transform_indices = @transform_4, window_bounds = array<i64: 1, 1, 1, 128>}]} {
    %c0 = arith.constant 0 : index
    %0 = arith.index_cast %arg0 : i32 to index
    %c0_0 = arith.constant 0 : index
    %c0_1 = arith.constant 0 : index
    %1 = vector.load %arg2[%c0, %0, %c0_0, %c0_1] : memref<1x9x16x512xbf16, #tpu.memory_space<vmem>>, vector<1x8x16x512xbf16>
    %2 = vector.shape_cast %1 : vector<1x8x16x512xbf16> to vector<8x16x512xbf16>
    %3 = vector.shape_cast %2 : vector<8x16x512xbf16> to vector<128x512xbf16>
    %c0_2 = arith.constant 0 : index
    %c0_3 = arith.constant 0 : index
    %c0_4 = arith.constant 0 : index
    %c0_5 = arith.constant 0 : index
    %4 = vector.load %arg3[%c0_2, %c0_3, %c0_4, %c0_5] : memref<1x1x512x128xbf16, #tpu.memory_space<vmem>>, vector<1x1x512x128xbf16>
    %5 = vector.shape_cast %4 : vector<1x1x512x128xbf16> to vector<512x128xbf16>
    %cst = arith.constant dense<0.000000e+00> : vector<128x128xf32>
    %6 = tpu.matmul %3, %5, %cst {dimension_numbers = #tpu.dot_dimension_numbers<[1], [0], [0], [1], [0, 0, 1, 1], [], []>} : vector<128x512xbf16>, vector<512x128xbf16>, vector<128x128xf32> -> vector<128x128xf32>
    %cst_6 = arith.constant dense<0.000000e+00> : vector<128xf32>
    %7 = vector.multi_reduction <add>, %6, %cst_6 [0] : vector<128x128xf32> to vector<128xf32>
    %8 = vector.shape_cast %7 : vector<128xf32> to vector<1x128xf32>
    %c0_7 = arith.constant 0 : index
    %c0_8 = arith.constant 0 : index
    %c0_9 = arith.constant 0 : index
    %c0_10 = arith.constant 0 : index
    %9 = vector.load %arg5[%c0_7, %c0_8, %c0_9, %c0_10] : memref<1x1x1x128xf32, #tpu.memory_space<vmem>>, vector<1x1x1x128xf32>
    %10 = vector.shape_cast %9 : vector<1x1x1x128xf32> to vector<1x128xf32>
    %11 = vector.shape_cast %8 : vector<1x128xf32> to vector<1x1x1x128xf32>
    tpu.vector_store %arg5[%c0_7, %c0_8, %c0_9, %c0_10], %11 {strides = array<i32>} : memref<1x1x1x128xf32, #tpu.memory_space<vmem>>, vector<1x1x1x128xf32>,
    %12 = arith.mulf %6, %6 : vector<128x128xf32>
    %cst_11 = arith.constant dense<0.000000e+00> : vector<128xf32>
    %13 = vector.multi_reduction <add>, %12, %cst_11 [0] : vector<128x128xf32> to vector<128xf32>
    %14 = vector.shape_cast %13 : vector<128xf32> to vector<1x128xf32>
    %c0_12 = arith.constant 0 : index
    %c0_13 = arith.constant 0 : index
    %c0_14 = arith.constant 0 : index
    %c0_15 = arith.constant 0 : index
    %15 = vector.load %arg6[%c0_12, %c0_13, %c0_14, %c0_15] : memref<1x1x1x128xf32, #tpu.memory_space<vmem>>, vector<1x1x1x128xf32>
    %16 = vector.shape_cast %15 : vector<1x1x1x128xf32> to vector<1x128xf32>
    %17 = vector.shape_cast %14 : vector<1x128xf32> to vector<1x1x1x128xf32>
    tpu.vector_store %arg6[%c0_12, %c0_13, %c0_14, %c0_15], %17 {strides = array<i32>} : memref<1x1x1x128xf32, #tpu.memory_space<vmem>>, vector<1x1x1x128xf32>,
    %18 = arith.truncf %6 : vector<128x128xf32> to vector<128x128xbf16>
    %c0_16 = arith.constant 0 : index
    %c0_17 = arith.constant 0 : index
    %c0_18 = arith.constant 0 : index
    %c0_19 = arith.constant 0 : index
    %19 = vector.load %arg4[%c0_16, %c0_17, %c0_18, %c0_19] : memref<1x1x128x128xbf16, #tpu.memory_space<vmem>>, vector<1x1x128x128xbf16>
    %20 = vector.shape_cast %19 : vector<1x1x128x128xbf16> to vector<128x128xbf16>
    %21 = vector.shape_cast %18 : vector<128x128xbf16> to vector<1x1x128x128xbf16>
    tpu.vector_store %arg4[%c0_16, %c0_17, %c0_18, %c0_19], %21 {strides = array<i32>} : memref<1x1x128x128xbf16, #tpu.memory_space<vmem>>, vector<1x1x128x128xbf16>,
    return
  }
  func.func @transform_0(%arg0: i32, %arg1: i32) -> (i32, i32, i32, i32) {
    %c0_i32 = arith.constant 0 : i32
    %c0_i32_0 = arith.constant 0 : i32
    %c0_i32_1 = arith.constant 0 : i32
    %c0_i32_2 = arith.constant 0 : i32
    return %arg1, %c0_i32, %c0_i32_0, %c0_i32_1 : i32, i32, i32, i32
  }
  func.func @transform_1(%arg0: i32, %arg1: i32) -> (i32, i32, i32, i32) {
    %c0_i32 = arith.constant 0 : i32
    %c0_i32_0 = arith.constant 0 : i32
    %c0_i32_1 = arith.constant 0 : i32
    return %arg0, %arg1, %c0_i32, %c0_i32_0 : i32, i32, i32, i32
  }
  func.func @transform_2(%arg0: i32, %arg1: i32) -> (i32, i32, i32, i32) {
    %c0_i32 = arith.constant 0 : i32
    %c0_i32_0 = arith.constant 0 : i32
    %c0_i32_1 = arith.constant 0 : i32
    return %arg0, %arg1, %c0_i32, %c0_i32_0 : i32, i32, i32, i32
  }
  func.func @transform_3(%arg0: i32, %arg1: i32) -> (i32, i32, i32, i32) {
    %c0_i32 = arith.constant 0 : i32
    %c0_i32_0 = arith.constant 0 : i32
    %c0_i32_1 = arith.constant 0 : i32
    return %arg0, %arg1, %c0_i32, %c0_i32_0 : i32, i32, i32, i32
  }
  func.func @transform_4(%arg0: i32, %arg1: i32) -> (i32, i32, i32, i32) {
    %c0_i32 = arith.constant 0 : i32
    %c0_i32_0 = arith.constant 0 : i32
    %c0_i32_1 = arith.constant 0 : i32
    return %arg0, %arg1, %c0_i32, %c0_i32_0 : i32, i32, i32, i32
  }
}

module attributes {stable_mosaic.version = 11 : i64} {
  func.func @_deconv_kernel(%arg0: i32, %arg1: i32, %arg2: memref<1x17x32x256xbf16, #tpu.memory_space<vmem>>, %arg3: memref<1x1x256x128xbf16, #tpu.memory_space<vmem>>, %arg4: memref<1x1x512x128xbf16, #tpu.memory_space<vmem>>, %arg5: memref<1x1x1x128xf32, #tpu.memory_space<vmem>>, %arg6: memref<1x1x1x128xf32, #tpu.memory_space<vmem>>) attributes {dimension_semantics = [#tpu.dimension_semantics<parallel>, #tpu.dimension_semantics<parallel>], iteration_bounds = array<i64: 2, 2>, scalar_prefetch = 0 : i64, scratch_operands = 0 : i64, tpu.core_type = #tpu.core_type<tc>, window_params = [{transform_indices = @transform_0, window_bounds = array<i64: 1, 17, 32, 256>}, {transform_indices = @transform_1, window_bounds = array<i64: 1, 1, 256, 128>}, {transform_indices = @transform_2, window_bounds = array<i64: 1, 1, 512, 128>}, {transform_indices = @transform_3, window_bounds = array<i64: 1, 1, 1, 128>}, {transform_indices = @transform_4, window_bounds = array<i64: 1, 1, 1, 128>}]} {
    %c0 = arith.constant 0 : index
    %0 = arith.index_cast %arg0 : i32 to index
    %c0_0 = arith.constant 0 : index
    %c0_1 = arith.constant 0 : index
    %1 = vector.load %arg2[%c0, %0, %c0_0, %c0_1] : memref<1x17x32x256xbf16, #tpu.memory_space<vmem>>, vector<1x16x32x256xbf16>
    %2 = vector.shape_cast %1 : vector<1x16x32x256xbf16> to vector<16x32x256xbf16>
    %3 = vector.shape_cast %2 : vector<16x32x256xbf16> to vector<512x256xbf16>
    %c0_2 = arith.constant 0 : index
    %c0_3 = arith.constant 0 : index
    %c0_4 = arith.constant 0 : index
    %c0_5 = arith.constant 0 : index
    %4 = vector.load %arg3[%c0_2, %c0_3, %c0_4, %c0_5] : memref<1x1x256x128xbf16, #tpu.memory_space<vmem>>, vector<1x1x256x128xbf16>
    %5 = vector.shape_cast %4 : vector<1x1x256x128xbf16> to vector<256x128xbf16>
    %cst = arith.constant dense<0.000000e+00> : vector<512x128xf32>
    %6 = tpu.matmul %3, %5, %cst {dimension_numbers = #tpu.dot_dimension_numbers<[1], [0], [0], [1], [0, 0, 1, 1], [], []>} : vector<512x256xbf16>, vector<256x128xbf16>, vector<512x128xf32> -> vector<512x128xf32>
    %cst_6 = arith.constant dense<0.000000e+00> : vector<128xf32>
    %7 = vector.multi_reduction <add>, %6, %cst_6 [0] : vector<512x128xf32> to vector<128xf32>
    %8 = vector.shape_cast %7 : vector<128xf32> to vector<1x128xf32>
    %c0_7 = arith.constant 0 : index
    %c0_8 = arith.constant 0 : index
    %c0_9 = arith.constant 0 : index
    %c0_10 = arith.constant 0 : index
    %9 = vector.load %arg5[%c0_7, %c0_8, %c0_9, %c0_10] : memref<1x1x1x128xf32, #tpu.memory_space<vmem>>, vector<1x1x1x128xf32>
    %10 = vector.shape_cast %9 : vector<1x1x1x128xf32> to vector<1x128xf32>
    %11 = vector.shape_cast %8 : vector<1x128xf32> to vector<1x1x1x128xf32>
    tpu.vector_store %arg5[%c0_7, %c0_8, %c0_9, %c0_10], %11 {strides = array<i32>} : memref<1x1x1x128xf32, #tpu.memory_space<vmem>>, vector<1x1x1x128xf32>,
    %12 = arith.mulf %6, %6 : vector<512x128xf32>
    %cst_11 = arith.constant dense<0.000000e+00> : vector<128xf32>
    %13 = vector.multi_reduction <add>, %12, %cst_11 [0] : vector<512x128xf32> to vector<128xf32>
    %14 = vector.shape_cast %13 : vector<128xf32> to vector<1x128xf32>
    %c0_12 = arith.constant 0 : index
    %c0_13 = arith.constant 0 : index
    %c0_14 = arith.constant 0 : index
    %c0_15 = arith.constant 0 : index
    %15 = vector.load %arg6[%c0_12, %c0_13, %c0_14, %c0_15] : memref<1x1x1x128xf32, #tpu.memory_space<vmem>>, vector<1x1x1x128xf32>
    %16 = vector.shape_cast %15 : vector<1x1x1x128xf32> to vector<1x128xf32>
    %17 = vector.shape_cast %14 : vector<1x128xf32> to vector<1x1x1x128xf32>
    tpu.vector_store %arg6[%c0_12, %c0_13, %c0_14, %c0_15], %17 {strides = array<i32>} : memref<1x1x1x128xf32, #tpu.memory_space<vmem>>, vector<1x1x1x128xf32>,
    %18 = arith.truncf %6 : vector<512x128xf32> to vector<512x128xbf16>
    %c0_16 = arith.constant 0 : index
    %c0_17 = arith.constant 0 : index
    %c0_18 = arith.constant 0 : index
    %c0_19 = arith.constant 0 : index
    %19 = vector.load %arg4[%c0_16, %c0_17, %c0_18, %c0_19] : memref<1x1x512x128xbf16, #tpu.memory_space<vmem>>, vector<1x1x512x128xbf16>
    %20 = vector.shape_cast %19 : vector<1x1x512x128xbf16> to vector<512x128xbf16>
    %21 = vector.shape_cast %18 : vector<512x128xbf16> to vector<1x1x512x128xbf16>
    tpu.vector_store %arg4[%c0_16, %c0_17, %c0_18, %c0_19], %21 {strides = array<i32>} : memref<1x1x512x128xbf16, #tpu.memory_space<vmem>>, vector<1x1x512x128xbf16>,
    return
  }
  func.func @transform_0(%arg0: i32, %arg1: i32) -> (i32, i32, i32, i32) {
    %c0_i32 = arith.constant 0 : i32
    %c0_i32_0 = arith.constant 0 : i32
    %c0_i32_1 = arith.constant 0 : i32
    %c0_i32_2 = arith.constant 0 : i32
    return %arg1, %c0_i32, %c0_i32_0, %c0_i32_1 : i32, i32, i32, i32
  }
  func.func @transform_1(%arg0: i32, %arg1: i32) -> (i32, i32, i32, i32) {
    %c0_i32 = arith.constant 0 : i32
    %c0_i32_0 = arith.constant 0 : i32
    %c0_i32_1 = arith.constant 0 : i32
    return %arg0, %arg1, %c0_i32, %c0_i32_0 : i32, i32, i32, i32
  }
  func.func @transform_2(%arg0: i32, %arg1: i32) -> (i32, i32, i32, i32) {
    %c0_i32 = arith.constant 0 : i32
    %c0_i32_0 = arith.constant 0 : i32
    %c0_i32_1 = arith.constant 0 : i32
    return %arg0, %arg1, %c0_i32, %c0_i32_0 : i32, i32, i32, i32
  }
  func.func @transform_3(%arg0: i32, %arg1: i32) -> (i32, i32, i32, i32) {
    %c0_i32 = arith.constant 0 : i32
    %c0_i32_0 = arith.constant 0 : i32
    %c0_i32_1 = arith.constant 0 : i32
    return %arg0, %arg1, %c0_i32, %c0_i32_0 : i32, i32, i32, i32
  }
  func.func @transform_4(%arg0: i32, %arg1: i32) -> (i32, i32, i32, i32) {
    %c0_i32 = arith.constant 0 : i32
    %c0_i32_0 = arith.constant 0 : i32
    %c0_i32_1 = arith.constant 0 : i32
    return %arg0, %arg1, %c0_i32, %c0_i32_0 : i32, i32, i32, i32
  }
}

module attributes {stable_mosaic.version = 11 : i64} {
  func.func @_deconv_kernel(%arg0: i32, %arg1: i32, %arg2: memref<1x33x64x128xbf16, #tpu.memory_space<vmem>>, %arg3: memref<1x1x128x128xbf16, #tpu.memory_space<vmem>>, %arg4: memref<1x1x2048x128xbf16, #tpu.memory_space<vmem>>, %arg5: memref<1x1x1x128xf32, #tpu.memory_space<vmem>>, %arg6: memref<1x1x1x128xf32, #tpu.memory_space<vmem>>) attributes {dimension_semantics = [#tpu.dimension_semantics<parallel>, #tpu.dimension_semantics<parallel>], iteration_bounds = array<i64: 2, 2>, scalar_prefetch = 0 : i64, scratch_operands = 0 : i64, tpu.core_type = #tpu.core_type<tc>, window_params = [{transform_indices = @transform_0, window_bounds = array<i64: 1, 33, 64, 128>}, {transform_indices = @transform_1, window_bounds = array<i64: 1, 1, 128, 128>}, {transform_indices = @transform_2, window_bounds = array<i64: 1, 1, 2048, 128>}, {transform_indices = @transform_3, window_bounds = array<i64: 1, 1, 1, 128>}, {transform_indices = @transform_4, window_bounds = array<i64: 1, 1, 1, 128>}]} {
    %c0 = arith.constant 0 : index
    %0 = arith.index_cast %arg0 : i32 to index
    %c0_0 = arith.constant 0 : index
    %c0_1 = arith.constant 0 : index
    %1 = vector.load %arg2[%c0, %0, %c0_0, %c0_1] : memref<1x33x64x128xbf16, #tpu.memory_space<vmem>>, vector<1x32x64x128xbf16>
    %2 = vector.shape_cast %1 : vector<1x32x64x128xbf16> to vector<32x64x128xbf16>
    %3 = vector.shape_cast %2 : vector<32x64x128xbf16> to vector<2048x128xbf16>
    %c0_2 = arith.constant 0 : index
    %c0_3 = arith.constant 0 : index
    %c0_4 = arith.constant 0 : index
    %c0_5 = arith.constant 0 : index
    %4 = vector.load %arg3[%c0_2, %c0_3, %c0_4, %c0_5] : memref<1x1x128x128xbf16, #tpu.memory_space<vmem>>, vector<1x1x128x128xbf16>
    %5 = vector.shape_cast %4 : vector<1x1x128x128xbf16> to vector<128x128xbf16>
    %cst = arith.constant dense<0.000000e+00> : vector<2048x128xf32>
    %6 = tpu.matmul %3, %5, %cst {dimension_numbers = #tpu.dot_dimension_numbers<[1], [0], [0], [1], [0, 0, 1, 1], [], []>} : vector<2048x128xbf16>, vector<128x128xbf16>, vector<2048x128xf32> -> vector<2048x128xf32>
    %cst_6 = arith.constant dense<0.000000e+00> : vector<128xf32>
    %7 = vector.multi_reduction <add>, %6, %cst_6 [0] : vector<2048x128xf32> to vector<128xf32>
    %8 = vector.shape_cast %7 : vector<128xf32> to vector<1x128xf32>
    %c0_7 = arith.constant 0 : index
    %c0_8 = arith.constant 0 : index
    %c0_9 = arith.constant 0 : index
    %c0_10 = arith.constant 0 : index
    %9 = vector.load %arg5[%c0_7, %c0_8, %c0_9, %c0_10] : memref<1x1x1x128xf32, #tpu.memory_space<vmem>>, vector<1x1x1x128xf32>
    %10 = vector.shape_cast %9 : vector<1x1x1x128xf32> to vector<1x128xf32>
    %11 = vector.shape_cast %8 : vector<1x128xf32> to vector<1x1x1x128xf32>
    tpu.vector_store %arg5[%c0_7, %c0_8, %c0_9, %c0_10], %11 {strides = array<i32>} : memref<1x1x1x128xf32, #tpu.memory_space<vmem>>, vector<1x1x1x128xf32>,
    %12 = arith.mulf %6, %6 : vector<2048x128xf32>
    %cst_11 = arith.constant dense<0.000000e+00> : vector<128xf32>
    %13 = vector.multi_reduction <add>, %12, %cst_11 [0] : vector<2048x128xf32> to vector<128xf32>
    %14 = vector.shape_cast %13 : vector<128xf32> to vector<1x128xf32>
    %c0_12 = arith.constant 0 : index
    %c0_13 = arith.constant 0 : index
    %c0_14 = arith.constant 0 : index
    %c0_15 = arith.constant 0 : index
    %15 = vector.load %arg6[%c0_12, %c0_13, %c0_14, %c0_15] : memref<1x1x1x128xf32, #tpu.memory_space<vmem>>, vector<1x1x1x128xf32>
    %16 = vector.shape_cast %15 : vector<1x1x1x128xf32> to vector<1x128xf32>
    %17 = vector.shape_cast %14 : vector<1x128xf32> to vector<1x1x1x128xf32>
    tpu.vector_store %arg6[%c0_12, %c0_13, %c0_14, %c0_15], %17 {strides = array<i32>} : memref<1x1x1x128xf32, #tpu.memory_space<vmem>>, vector<1x1x1x128xf32>,
    %18 = arith.truncf %6 : vector<2048x128xf32> to vector<2048x128xbf16>
    %c0_16 = arith.constant 0 : index
    %c0_17 = arith.constant 0 : index
    %c0_18 = arith.constant 0 : index
    %c0_19 = arith.constant 0 : index
    %19 = vector.load %arg4[%c0_16, %c0_17, %c0_18, %c0_19] : memref<1x1x2048x128xbf16, #tpu.memory_space<vmem>>, vector<1x1x2048x128xbf16>
    %20 = vector.shape_cast %19 : vector<1x1x2048x128xbf16> to vector<2048x128xbf16>
    %21 = vector.shape_cast %18 : vector<2048x128xbf16> to vector<1x1x2048x128xbf16>
    tpu.vector_store %arg4[%c0_16, %c0_17, %c0_18, %c0_19], %21 {strides = array<i32>} : memref<1x1x2048x128xbf16, #tpu.memory_space<vmem>>, vector<1x1x2048x128xbf16>,
    return
  }
  func.func @transform_0(%arg0: i32, %arg1: i32) -> (i32, i32, i32, i32) {
    %c0_i32 = arith.constant 0 : i32
    %c0_i32_0 = arith.constant 0 : i32
    %c0_i32_1 = arith.constant 0 : i32
    %c0_i32_2 = arith.constant 0 : i32
    return %arg1, %c0_i32, %c0_i32_0, %c0_i32_1 : i32, i32, i32, i32
  }
  func.func @transform_1(%arg0: i32, %arg1: i32) -> (i32, i32, i32, i32) {
    %c0_i32 = arith.constant 0 : i32
    %c0_i32_0 = arith.constant 0 : i32
    %c0_i32_1 = arith.constant 0 : i32
    return %arg0, %arg1, %c0_i32, %c0_i32_0 : i32, i32, i32, i32
  }
  func.func @transform_2(%arg0: i32, %arg1: i32) -> (i32, i32, i32, i32) {
    %c0_i32 = arith.constant 0 : i32
    %c0_i32_0 = arith.constant 0 : i32
    %c0_i32_1 = arith.constant 0 : i32
    return %arg0, %arg1, %c0_i32, %c0_i32_0 : i32, i32, i32, i32
  }
  func.func @transform_3(%arg0: i32, %arg1: i32) -> (i32, i32, i32, i32) {
    %c0_i32 = arith.constant 0 : i32
    %c0_i32_0 = arith.constant 0 : i32
    %c0_i32_1 = arith.constant 0 : i32
    return %arg0, %arg1, %c0_i32, %c0_i32_0 : i32, i32, i32, i32
  }
  func.func @transform_4(%arg0: i32, %arg1: i32) -> (i32, i32, i32, i32) {
    %c0_i32 = arith.constant 0 : i32
    %c0_i32_0 = arith.constant 0 : i32
    %c0_i32_1 = arith.constant 0 : i32
    return %arg0, %arg1, %c0_i32, %c0_i32_0 : i32, i32, i32, i32
  }
}

</mosaic_0001>

<bundles_post_ra>
// kernel: gnet_forward.5
= control target key start
LH: loop header
LB: loop body
LE: loop exit
PB: predicated region body
PF: predicated region fallthrough
CT: control target
= control target key end

     0   :  { %v2497_v3 = vmov 0   ;;  %vm1265_vm0 = vcmask 1041408   ;;  %vm1261_vm1 = vcmask 818176   ;;  %s3270_s1 = inlined_call_operand.vmem [shape: bf16[100,4096], index: 1, kind: input, shape index: {}]   ;;  %s3271_s0 = inlined_call_operand.vmem [shape: bf16[2,100], index: 0, kind: input, shape index: {}]   ;;  %s3272_s2 = inlined_call_operand.vmem [shape: f32[2,4096], index: 2, kind: output, shape index: {}]  }
   0x1   :  { %v13_v0 = vld [vmem:[%s3270_s1] sm:$0xff]  ;;  %v14_v2 = vld [vmem:[%s3270_s1 + $0x8] sm:$0xff]  ;;  %1394 = vmatprep.mubr.bf16.mxu0 %v2497_v3  ;;  %1435 = vmatprep.mubr.bf16.mxu1 %v2497_v3  ;;  %v15_v55 = vld [vmem:[%s3270_s1 + $0x10] sm:$0xff] }
   0x2   :  { %v29_v1 = vld [vmem:[%s3270_s1 + $0x80] sm:$0xff]  ;;  %v30_v5 = vld [vmem:[%s3270_s1 + $0x88] sm:$0xff]  ;;  %v31_v56 = vld [vmem:[%s3270_s1 + $0x90] sm:$0xff] }
   0x3   :  { %v2207_v4 = vcombine.high %v13_v0, %v29_v1  ;;  %v2206_v6 = vcombine.low %v13_v0, %v29_v1  ;;  %v45_v7 = vld [vmem:[%s3270_s1 + $0x100] sm:$0xff]  ;;  %v2209_v9 = vcombine.high %v14_v2, %v30_v5  ;;  %v2208_v10 = vcombine.low %v14_v2, %v30_v5  ;;  %v46_v12 = vld [vmem:[%s3270_s1 + $0x108] sm:$0xff]  ;;  %v16_v57 = vld [vmem:[%s3270_s1 + $0x18] sm:$0xff] }
   0x4   :  { %v61_v8 = vld [vmem:[%s3270_s1 + $0x180] sm:$0xff]  ;;  %v62_v13 = vld [vmem:[%s3270_s1 + $0x188] sm:$0xff]  ;;  %v32_v58 = vld [vmem:[%s3270_s1 + $0x98] sm:$0xff]  ;;  %v2211_v60 = vcombine.high %v15_v55, %v31_v56  ;;  %v2210_v5 = vcombine.low %v15_v55, %v31_v56 }
   0x5   :  { %v2239_v11 = vcombine.high %v45_v7, %v61_v8  ;;  %v77_v14 = vld [vmem:[%s3270_s1 + $0x200] sm:$0xff]  ;;  %1362 = vmatprep.subr.bf16.mxu0 %v2207_v4  ;;  %v2241_v15 = vcombine.high %v46_v12, %v62_v13  ;;  %v78_v17 = vld [vmem:[%s3270_s1 + $0x208] sm:$0xff]  ;;  %1403 = vmatprep.subr.bf16.mxu1 %v2209_v9  ;;  %v2238_v19 = vcombine.low %v45_v7, %v61_v8  ;;  %v47_v63 = vld [vmem:[%s3270_s1 + $0x110] sm:$0xff] }
   0x6   :  { %v93_v16 = vld [vmem:[%s3270_s1 + $0x280] sm:$0xff]  ;;  %v94_v18 = vld [vmem:[%s3270_s1 + $0x288] sm:$0xff]  ;;  %1363 = vmatpush1.bf16.msra.mxu0 %v2206_v6  ;;  %1404 = vmatpush1.bf16.msra.mxu1 %v2208_v10  ;;  %v2240_v20 = vcombine.low %v46_v12, %v62_v13  ;;  %v2213_v62 = vcombine.high %v16_v57, %v32_v58  ;;  %v63_v0 = vld [vmem:[%s3270_s1 + $0x190] sm:$0xff]  ;;  %v2212_v6 = vcombine.low %v16_v57, %v32_v58 }
   0x7   :  { %1364 = vmatprep.subr.bf16.mxu0 %v2239_v11  ;;  %v2271_v21 = vcombine.high %v77_v14, %v93_v16  ;;  %1405 = vmatprep.subr.bf16.mxu1 %v2241_v15  ;;  %v2273_v22 = vcombine.high %v78_v17, %v94_v18  ;;  %v109_v23 = vld [vmem:[%s3270_s1 + $0x300] sm:$0xff]  ;;  %v110_v25 = vld [vmem:[%s3270_s1 + $0x308] sm:$0xff]  ;;  %v2270_v27 = vcombine.low %v77_v14, %v93_v16  ;;  %v48_v1 = vld [vmem:[%s3270_s1 + $0x118] sm:$0xff] }
   0x8   :  { %v125_v24 = vld [vmem:[%s3270_s1 + $0x380] sm:$0xff]  ;;  %v126_v26 = vld [vmem:[%s3270_s1 + $0x388] sm:$0xff]  ;;  %v2272_v28 = vcombine.low %v78_v17, %v94_v18  ;;  %v64_v2 = vld [vmem:[%s3270_s1 + $0x198] sm:$0xff]  ;;  %v2243_v7 = vcombine.high %v47_v63, %v63_v0  ;;  %v2242_v13 = vcombine.low %v47_v63, %v63_v0 }
   0x9   :  { %v2303_v29 = vcombine.high %v109_v23, %v125_v24  ;;  %v2305_v30 = vcombine.high %v110_v25, %v126_v26  ;;  %v141_v31 = vld [vmem:[%s3270_s1 + $0x400] sm:$0xff]  ;;  %v142_v33 = vld [vmem:[%s3270_s1 + $0x408] sm:$0xff]  ;;  %v2302_v35 = vcombine.low %v109_v23, %v125_v24  ;;  %v2304_v36 = vcombine.low %v110_v25, %v126_v26  ;;  %v79_v9 = vld [vmem:[%s3270_s1 + $0x210] sm:$0xff] }
   0xa   :  { %1365 = vmatpush1.bf16.msra.mxu0 %v2238_v19  ;;  %1406 = vmatpush1.bf16.msra.mxu1 %v2240_v20  ;;  %v157_v32 = vld [vmem:[%s3270_s1 + $0x480] sm:$0xff]  ;;  %v158_v34 = vld [vmem:[%s3270_s1 + $0x488] sm:$0xff]  ;;  %v2245_v8 = vcombine.high %v48_v1, %v64_v2  ;;  %v95_v10 = vld [vmem:[%s3270_s1 + $0x290] sm:$0xff]  ;;  %v2244_v14 = vcombine.low %v48_v1, %v64_v2 }
   0xb   :  { %1366 = vmatprep.subr.bf16.mxu0 %v2271_v21  ;;  %1407 = vmatprep.subr.bf16.mxu1 %v2273_v22  ;;  %v2335_v37 = vcombine.high %v141_v31, %v157_v32  ;;  %v2337_v38 = vcombine.high %v142_v33, %v158_v34  ;;  %v173_v39 = vld [vmem:[%s3270_s1 + $0x500] sm:$0xff]  ;;  %v174_v41 = vld [vmem:[%s3270_s1 + $0x508] sm:$0xff]  ;;  %v2334_v43 = vcombine.low %v141_v31, %v157_v32  ;;  %v80_v11 = vld [vmem:[%s3270_s1 + $0x218] sm:$0xff] }
   0xc   :  { %v189_v40 = vld [vmem:[%s3270_s1 + $0x580] sm:$0xff]  ;;  %v190_v42 = vld [vmem:[%s3270_s1 + $0x588] sm:$0xff]  ;;  %v2336_v44 = vcombine.low %v142_v33, %v158_v34  ;;  %v96_v12 = vld [vmem:[%s3270_s1 + $0x298] sm:$0xff]  ;;  %v2275_v15 = vcombine.high %v79_v9, %v95_v10  ;;  %v2274_v21 = vcombine.low %v79_v9, %v95_v10 }
   0xd   :  { %v2367_v45 = vcombine.high %v173_v39, %v189_v40  ;;  %v2369_v46 = vcombine.high %v174_v41, %v190_v42  ;;  %v205_v47 = vld [vmem:[%s3270_s1 + $0x600] sm:$0x33]  ;;  %v206_v48 = vld [vmem:[%s3270_s1 + $0x608] sm:$0x33]  ;;  %v2366_v49 = vcombine.low %v173_v39, %v189_v40  ;;  %v2368_v50 = vcombine.low %v174_v41, %v190_v42  ;;  %v111_v17 = vld [vmem:[%s3270_s1 + $0x310] sm:$0xff] }
   0xe   :  { %1367 = vmatpush1.bf16.msra.mxu0 %v2270_v27  ;;  %1408 = vmatpush1.bf16.msra.mxu1 %v2272_v28  ;;  %v2399_v51 = vcombine.high %v205_v47, %v205_v47  ;;  %v2398_v52 = vcombine.low %v205_v47, %v205_v47  ;;  %v2401_v53 = vcombine.high %v206_v48, %v206_v48  ;;  %v2625_v4 = vld [vmem:[%s3271_s0] sm:$0x1]  ;;  %v127_v18 = vld [vmem:[%s3270_s1 + $0x390] sm:$0xff]  ;;  %v112_v19 = vld [vmem:[%s3270_s1 + $0x318] sm:$0xff] }
   0xf   :  { %1368 = vmatprep.subr.bf16.mxu0 %v2303_v29  ;;  %1409 = vmatprep.subr.bf16.mxu1 %v2305_v30  ;;  %v2400_v54 = vcombine.low %v206_v48, %v206_v48  ;;  %v2277_v16 = vcombine.high %v80_v11, %v96_v12  ;;  %v128_v20 = vld [vmem:[%s3270_s1 + $0x398] sm:$0xff]  ;;  %v2276_v22 = vcombine.low %v80_v11, %v96_v12  ;;  %v143_v25 = vld [vmem:[%s3270_s1 + $0x410] sm:$0xff]  ;;  %v49_v57 = vld [vmem:[%s3270_s1 + $0x120] sm:$0xff] }
  0x10   :  { %v1267_v59 = vsel %vm1265_vm0, %v2398_v52, 0  ;;  %v2307_v23 = vcombine.high %v111_v17, %v127_v18  ;;  %v2309_v24 = vcombine.high %v112_v19, %v128_v20  ;;  %v159_v26 = vld [vmem:[%s3270_s1 + $0x490] sm:$0xff]  ;;  %v144_v27 = vld [vmem:[%s3270_s1 + $0x418] sm:$0xff]  ;;  %v2306_v29 = vcombine.low %v111_v17, %v127_v18  ;;  %v34_v52 = vld [vmem:[%s3270_s1 + $0xa8] sm:$0xff] }
  0x11   :  { %v1273_v61 = vsel %vm1265_vm0, %v2400_v54, 0  ;;  %v160_v28 = vld [vmem:[%s3270_s1 + $0x498] sm:$0xff]  ;;  %v2308_v30 = vcombine.low %v112_v19, %v128_v20  ;;  %v2339_v31 = vcombine.high %v143_v25, %v159_v26  ;;  %v175_v33 = vld [vmem:[%s3270_s1 + $0x510] sm:$0xff]  ;;  %v65_v58 = vld [vmem:[%s3270_s1 + $0x1a0] sm:$0xff] }
  0x12   :  { %1369 = vmatpush1.bf16.msra.mxu0 %v2302_v35  ;;  %1410 = vmatpush1.bf16.msra.mxu1 %v2304_v36  ;;  %v2341_v32 = vcombine.high %v144_v27, %v160_v28  ;;  %v191_v34 = vld [vmem:[%s3270_s1 + $0x590] sm:$0xff]  ;;  %v176_v35 = vld [vmem:[%s3270_s1 + $0x518] sm:$0xff]  ;;  %v2247_v63 = vcombine.high %v49_v57, %v65_v58  ;;  %v81_v1 = vld [vmem:[%s3270_s1 + $0x220] sm:$0xff] }
  0x13   :  { %1370 = vmatprep.subr.bf16.mxu0 %v2335_v37  ;;  %1411 = vmatprep.subr.bf16.mxu1 %v2337_v38  ;;  %v192_v36 = vld [vmem:[%s3270_s1 + $0x598] sm:$0xff]  ;;  %v2338_v37 = vcombine.low %v143_v25, %v159_v26  ;;  %v2340_v38 = vcombine.low %v144_v27, %v160_v28  ;;  %v2371_v39 = vcombine.high %v175_v33, %v191_v34  ;;  %v207_v41 = vld [vmem:[%s3270_s1 + $0x610] sm:$0x33]  ;;  %v97_v2 = vld [vmem:[%s3270_s1 + $0x2a0] sm:$0xff] }
  0x14   :  { %v2373_v40 = vcombine.high %v176_v35, %v192_v36  ;;  %v208_v42 = vld [vmem:[%s3270_s1 + $0x618] sm:$0x33]  ;;  %v2279_v9 = vcombine.high %v81_v1, %v97_v2  ;;  %v113_v11 = vld [vmem:[%s3270_s1 + $0x320] sm:$0xff] }
  0x15   :  { %v2405_v47 = vcombine.high %v208_v42, %v208_v42  ;;  %v2404_v48 = vcombine.low %v208_v42, %v208_v42  ;;  %v129_v12 = vld [vmem:[%s3270_s1 + $0x3a0] sm:$0xff] }
  0x16   :  { %1371 = vmatpush1.bf16.msra.mxu0 %v2334_v43  ;;  %1412 = vmatpush1.bf16.msra.mxu1 %v2336_v44  ;;  %v2370_v43 = vcombine.low %v175_v33, %v191_v34  ;;  %v2372_v44 = vcombine.low %v176_v35, %v192_v36  ;;  %v2311_v17 = vcombine.high %v113_v11, %v129_v12  ;;  %v145_v19 = vld [vmem:[%s3270_s1 + $0x420] sm:$0xff]  ;;  %v210_v36 = vld [vmem:[%s3270_s1 + $0x628] sm:$0x33] }
  0x17   :  { %1372 = vmatprep.subr.bf16.mxu0 %v2367_v45  ;;  %1413 = vmatprep.subr.bf16.mxu1 %v2369_v46  ;;  %v2403_v45 = vcombine.high %v207_v41, %v207_v41  ;;  %v2402_v46 = vcombine.low %v207_v41, %v207_v41  ;;  %v1285_v55 = vsel %vm1265_vm0, %v2404_v48, 0  ;;  %v161_v20 = vld [vmem:[%s3270_s1 + $0x4a0] sm:$0xff]  ;;  %v2409_v41 = vcombine.high %v210_v36, %v210_v36 }
  0x18   :  { %v2343_v25 = vcombine.high %v145_v19, %v161_v20  ;;  %v177_v27 = vld [vmem:[%s3270_s1 + $0x520] sm:$0xff]  ;;  %v2408_v42 = vcombine.low %v210_v36, %v210_v36 }
  0x19   :  { %v193_v28 = vld [vmem:[%s3270_s1 + $0x5a0] sm:$0xff] }
  0x1a   :  { %1373 = vmatpush1.bf16.msra.mxu0 %v2366_v49  ;;  %1414 = vmatpush1.bf16.msra.mxu1 %v2368_v50  ;;  %v17_v49 = vld [vmem:[%s3270_s1 + $0x20] sm:$0xff]  ;;  %v2375_v33 = vcombine.high %v177_v27, %v193_v28 }
  0x1b   :  { %2430 = vmatprep.subr.msk.bf16.mxu0 %vm1265_vm0, %v2399_v51  ;;  %2432 = vmatprep.subr.msk.bf16.mxu1 %vm1265_vm0, %v2401_v53  ;;  %v33_v50 = vld [vmem:[%s3270_s1 + $0xa0] sm:$0xff]  ;;  %v18_v51 = vld [vmem:[%s3270_s1 + $0x28] sm:$0xff]  ;;  %v1279_v53 = vsel %vm1265_vm0, %v2402_v46, 0  ;;  %v36_v46 = vld [vmem:[%s3270_s1 + $0xb8] sm:$0xff] }
  0x1c   :  { %v2215_v54 = vcombine.high %v17_v49, %v33_v50  ;;  %v2217_v56 = vcombine.high %v18_v51, %v34_v52  ;;  %v209_v35 = vld [vmem:[%s3270_s1 + $0x620] sm:$0x33] }
  0x1e   :  { %1375 = vmatpush1.bf16.msra.mxu0 %v1267_v59  ;;  %1416 = vmatpush1.bf16.msra.mxu1 %v1273_v61  ;;  %v50_v59 = vld [vmem:[%s3270_s1 + $0x128] sm:$0xff]  ;;  %v2214_v61 = vcombine.low %v17_v49, %v33_v50  ;;  %v1297_v49 = vsel %vm1265_vm0, %v2408_v42, 0 }
  0x1f   :  { %1444 = vmatprep.subr.bf16.mxu0 %v2211_v60  ;;  %1485 = vmatprep.subr.bf16.mxu1 %v2213_v62  ;;  %v66_v60 = vld [vmem:[%s3270_s1 + $0x1a8] sm:$0xff]  ;;  %v2216_v62 = vcombine.low %v18_v51, %v34_v52  ;;  %v51_v51 = vld [vmem:[%s3270_s1 + $0x130] sm:$0xff] }
  0x20   :  { %v2249_v0 = vcombine.high %v50_v59, %v66_v60  ;;  %v67_v52 = vld [vmem:[%s3270_s1 + $0x1b0] sm:$0xff] }
  0x21   :  { %2431 = vmatmul.mubr.msk.bf16.vlgmr.msra.gmra.mrb[0].mxu0 %vm1261_vm1, %v2625_v4  ;;  %2433 = vmatmul.mubr.msk.bf16.vlgmr.msra.gmra.mrb[0].mxu1 %vm1261_vm1, %v2625_v4 }
  0x22   :  { %1445 = vmatpush1.bf16.msra.mxu0 %v2210_v5  ;;  %1486 = vmatpush1.bf16.msra.mxu1 %v2212_v6  ;;  %v82_v5 = vld [vmem:[%s3270_s1 + $0x228] sm:$0xff] }
  0x23   :  { %1446 = vmatprep.subr.bf16.mxu0 %v2243_v7  ;;  %1487 = vmatprep.subr.bf16.mxu1 %v2245_v8  ;;  %v98_v6 = vld [vmem:[%s3270_s1 + $0x2a8] sm:$0xff]  ;;  %v2246_v7 = vcombine.low %v49_v57, %v65_v58  ;;  %v2248_v8 = vcombine.low %v50_v59, %v66_v60  ;;  %v2251_v57 = vcombine.high %v51_v51, %v67_v52  ;;  %v83_v59 = vld [vmem:[%s3270_s1 + $0x230] sm:$0xff] }
  0x24   :  { %1476 = vmatprep.mubr.bf16.mxu0 %v2497_v3  ;;  %1517 = vmatprep.mubr.bf16.mxu1 %v2497_v3  ;;  %v2281_v10 = vcombine.high %v82_v5, %v98_v6  ;;  %v99_v60 = vld [vmem:[%s3270_s1 + $0x2b0] sm:$0xff] }
  0x26   :  { %1447 = vmatpush1.bf16.msra.mxu0 %v2242_v13  ;;  %1488 = vmatpush1.bf16.msra.mxu1 %v2244_v14  ;;  %v114_v13 = vld [vmem:[%s3270_s1 + $0x328] sm:$0xff] }
  0x27   :  { %1448 = vmatprep.subr.bf16.mxu0 %v2275_v15  ;;  %1489 = vmatprep.subr.bf16.mxu1 %v2277_v16  ;;  %v130_v14 = vld [vmem:[%s3270_s1 + $0x3a8] sm:$0xff]  ;;  %v2278_v15 = vcombine.low %v81_v1, %v97_v2  ;;  %v2280_v16 = vcombine.low %v82_v5, %v98_v6  ;;  %v2283_v1 = vcombine.high %v83_v59, %v99_v60  ;;  %v115_v5 = vld [vmem:[%s3270_s1 + $0x330] sm:$0xff] }
  0x28   :  { %v2313_v18 = vcombine.high %v114_v13, %v130_v14  ;;  %v131_v6 = vld [vmem:[%s3270_s1 + $0x3b0] sm:$0xff] }
  0x2a   :  { %1449 = vmatpush1.bf16.msra.mxu0 %v2274_v21  ;;  %1490 = vmatpush1.bf16.msra.mxu1 %v2276_v22  ;;  %v146_v21 = vld [vmem:[%s3270_s1 + $0x428] sm:$0xff] }
  0x2b   :  { %1450 = vmatprep.subr.bf16.mxu0 %v2307_v23  ;;  %1491 = vmatprep.subr.bf16.mxu1 %v2309_v24  ;;  %v162_v22 = vld [vmem:[%s3270_s1 + $0x4a8] sm:$0xff]  ;;  %v2310_v23 = vcombine.low %v113_v11, %v129_v12  ;;  %v2312_v24 = vcombine.low %v114_v13, %v130_v14  ;;  %v2315_v11 = vcombine.high %v115_v5, %v131_v6  ;;  %v147_v13 = vld [vmem:[%s3270_s1 + $0x430] sm:$0xff] }
  0x2c   :  { %v2345_v26 = vcombine.high %v146_v21, %v162_v22  ;;  %v163_v14 = vld [vmem:[%s3270_s1 + $0x4b0] sm:$0xff] }
  0x2e   :  { %1451 = vmatpush1.bf16.msra.mxu0 %v2306_v29  ;;  %1492 = vmatpush1.bf16.msra.mxu1 %v2308_v30  ;;  %v178_v29 = vld [vmem:[%s3270_s1 + $0x528] sm:$0xff] }
  0x2f   :  { %1452 = vmatprep.subr.bf16.mxu0 %v2339_v31  ;;  %1493 = vmatprep.subr.bf16.mxu1 %v2341_v32  ;;  %v194_v30 = vld [vmem:[%s3270_s1 + $0x5a8] sm:$0xff]  ;;  %v2342_v31 = vcombine.low %v145_v19, %v161_v20  ;;  %v2344_v32 = vcombine.low %v146_v21, %v162_v22  ;;  %v2347_v19 = vcombine.high %v147_v13, %v163_v14  ;;  %v179_v21 = vld [vmem:[%s3270_s1 + $0x530] sm:$0xff] }
  0x30   :  { %v2377_v34 = vcombine.high %v178_v29, %v194_v30  ;;  %v195_v22 = vld [vmem:[%s3270_s1 + $0x5b0] sm:$0xff] }
  0x32   :  { %1453 = vmatpush1.bf16.msra.mxu0 %v2338_v37  ;;  %1494 = vmatpush1.bf16.msra.mxu1 %v2340_v38  ;;  %v2374_v37 = vcombine.low %v177_v27, %v193_v28  ;;  %v2376_v38 = vcombine.low %v178_v29, %v194_v30  ;;  %v2379_v27 = vcombine.high %v179_v21, %v195_v22  ;;  %v211_v29 = vld [vmem:[%s3270_s1 + $0x630] sm:$0x33]  ;;  %v212_v30 = vld [vmem:[%s3270_s1 + $0x638] sm:$0x33] }
  0x33   :  { %1454 = vmatprep.subr.bf16.mxu0 %v2371_v39  ;;  %1495 = vmatprep.subr.bf16.mxu1 %v2373_v40  ;;  %v2407_v39 = vcombine.high %v209_v35, %v209_v35  ;;  %v2406_v40 = vcombine.low %v209_v35, %v209_v35  ;;  %v2413_v35 = vcombine.high %v212_v30, %v212_v30 }
  0x34   :  { %v2412_v36 = vcombine.low %v212_v30, %v212_v30 }
  0x36   :  { %1455 = vmatpush1.bf16.msra.mxu0 %v2370_v43  ;;  %1496 = vmatpush1.bf16.msra.mxu1 %v2372_v44  ;;  %v19_v43 = vld [vmem:[%s3270_s1 + $0x30] sm:$0xff] }
  0x37   :  { %2434 = vmatprep.subr.msk.bf16.mxu0 %vm1265_vm0, %v2403_v45  ;;  %2436 = vmatprep.subr.msk.bf16.mxu1 %vm1265_vm0, %v2405_v47  ;;  %v35_v44 = vld [vmem:[%s3270_s1 + $0xb0] sm:$0xff]  ;;  %v20_v45 = vld [vmem:[%s3270_s1 + $0x38] sm:$0xff]  ;;  %v1291_v47 = vsel %vm1265_vm0, %v2406_v40, 0  ;;  %v38_v40 = vld [vmem:[%s3270_s1 + $0xc8] sm:$0xff] }
  0x38   :  { %v2219_v48 = vcombine.high %v19_v43, %v35_v44  ;;  %v2221_v50 = vcombine.high %v20_v45, %v36_v46 }
  0x3a   :  { %1457 = vmatpush1.bf16.msra.mxu0 %v1279_v53  ;;  %1498 = vmatpush1.bf16.msra.mxu1 %v1285_v55  ;;  %v52_v53 = vld [vmem:[%s3270_s1 + $0x138] sm:$0xff]  ;;  %v2218_v55 = vcombine.low %v19_v43, %v35_v44  ;;  %v1309_v43 = vsel %vm1265_vm0, %v2412_v36, 0 }
  0x3b   :  { %1526 = vmatprep.subr.bf16.mxu0 %v2215_v54  ;;  %1567 = vmatprep.subr.bf16.mxu1 %v2217_v56  ;;  %v68_v54 = vld [vmem:[%s3270_s1 + $0x1b8] sm:$0xff]  ;;  %v2220_v56 = vcombine.low %v20_v45, %v36_v46  ;;  %v53_v45 = vld [vmem:[%s3270_s1 + $0x140] sm:$0xff] }
  0x3c   :  { %v2253_v58 = vcombine.high %v52_v53, %v68_v54  ;;  %v69_v46 = vld [vmem:[%s3270_s1 + $0x1c0] sm:$0xff] }
  0x3d   :  { %2435 = vmatmul.mubr.msk.bf16.vlgmr.msra.gmra.mrb[4].mxu0 %vm1261_vm1, %v2625_v4  ;;  %2437 = vmatmul.mubr.msk.bf16.vlgmr.msra.gmra.mrb[4].mxu1 %vm1261_vm1, %v2625_v4 }
  0x3e   :  { %1527 = vmatpush1.bf16.msra.mxu0 %v2214_v61  ;;  %1568 = vmatpush1.bf16.msra.mxu1 %v2216_v62  ;;  %v84_v61 = vld [vmem:[%s3270_s1 + $0x238] sm:$0xff] }
  0x3f   :  { %1528 = vmatprep.subr.bf16.mxu0 %v2247_v63  ;;  %1569 = vmatprep.subr.bf16.mxu1 %v2249_v0  ;;  %v100_v62 = vld [vmem:[%s3270_s1 + $0x2b8] sm:$0xff]  ;;  %v2250_v63 = vcombine.low %v51_v51, %v67_v52  ;;  %v2252_v0 = vcombine.low %v52_v53, %v68_v54  ;;  %v2255_v51 = vcombine.high %v53_v45, %v69_v46  ;;  %v85_v53 = vld [vmem:[%s3270_s1 + $0x240] sm:$0xff] }
  0x40   :  { %1558 = vmatprep.mubr.bf16.mxu0 %v2497_v3  ;;  %1599 = vmatprep.mubr.bf16.mxu1 %v2497_v3  ;;  %v2285_v2 = vcombine.high %v84_v61, %v100_v62  ;;  %v101_v54 = vld [vmem:[%s3270_s1 + $0x2c0] sm:$0xff] }
  0x42   :  { %1529 = vmatpush1.bf16.msra.mxu0 %v2246_v7  ;;  %1570 = vmatpush1.bf16.msra.mxu1 %v2248_v8  ;;  %v116_v7 = vld [vmem:[%s3270_s1 + $0x338] sm:$0xff] }
  0x43   :  { %1530 = vmatprep.subr.bf16.mxu0 %v2279_v9  ;;  %1571 = vmatprep.subr.bf16.mxu1 %v2281_v10  ;;  %v132_v8 = vld [vmem:[%s3270_s1 + $0x3b8] sm:$0xff]  ;;  %v2282_v9 = vcombine.low %v83_v59, %v99_v60  ;;  %v2284_v10 = vcombine.low %v84_v61, %v100_v62  ;;  %v2287_v59 = vcombine.high %v85_v53, %v101_v54  ;;  %v117_v61 = vld [vmem:[%s3270_s1 + $0x340] sm:$0xff] }
  0x44   :  { %v2317_v12 = vcombine.high %v116_v7, %v132_v8  ;;  %v133_v62 = vld [vmem:[%s3270_s1 + $0x3c0] sm:$0xff] }
  0x46   :  { %1531 = vmatpush1.bf16.msra.mxu0 %v2278_v15  ;;  %1572 = vmatpush1.bf16.msra.mxu1 %v2280_v16  ;;  %v148_v15 = vld [vmem:[%s3270_s1 + $0x438] sm:$0xff] }
  0x47   :  { %1532 = vmatprep.subr.bf16.mxu0 %v2311_v17  ;;  %1573 = vmatprep.subr.bf16.mxu1 %v2313_v18  ;;  %v164_v16 = vld [vmem:[%s3270_s1 + $0x4b8] sm:$0xff]  ;;  %v2314_v17 = vcombine.low %v115_v5, %v131_v6  ;;  %v2316_v18 = vcombine.low %v116_v7, %v132_v8  ;;  %v2319_v5 = vcombine.high %v117_v61, %v133_v62  ;;  %v149_v7 = vld [vmem:[%s3270_s1 + $0x440] sm:$0xff] }
  0x48   :  { %v2349_v20 = vcombine.high %v148_v15, %v164_v16  ;;  %v165_v8 = vld [vmem:[%s3270_s1 + $0x4c0] sm:$0xff] }
  0x4a   :  { %1533 = vmatpush1.bf16.msra.mxu0 %v2310_v23  ;;  %1574 = vmatpush1.bf16.msra.mxu1 %v2312_v24  ;;  %v180_v23 = vld [vmem:[%s3270_s1 + $0x538] sm:$0xff] }
  0x4b   :  { %1534 = vmatprep.subr.bf16.mxu0 %v2343_v25  ;;  %1575 = vmatprep.subr.bf16.mxu1 %v2345_v26  ;;  %v196_v24 = vld [vmem:[%s3270_s1 + $0x5b8] sm:$0xff]  ;;  %v2346_v25 = vcombine.low %v147_v13, %v163_v14  ;;  %v2348_v26 = vcombine.low %v148_v15, %v164_v16  ;;  %v2351_v13 = vcombine.high %v149_v7, %v165_v8  ;;  %v181_v15 = vld [vmem:[%s3270_s1 + $0x540] sm:$0xff] }
  0x4c   :  { %v2381_v28 = vcombine.high %v180_v23, %v196_v24  ;;  %v197_v16 = vld [vmem:[%s3270_s1 + $0x5c0] sm:$0xff] }
  0x4e   :  { %1535 = vmatpush1.bf16.msra.mxu0 %v2342_v31  ;;  %1576 = vmatpush1.bf16.msra.mxu1 %v2344_v32  ;;  %v2378_v31 = vcombine.low %v179_v21, %v195_v22  ;;  %v2380_v32 = vcombine.low %v180_v23, %v196_v24  ;;  %v2383_v21 = vcombine.high %v181_v15, %v197_v16  ;;  %v213_v23 = vld [vmem:[%s3270_s1 + $0x640] sm:$0x33]  ;;  %v214_v24 = vld [vmem:[%s3270_s1 + $0x648] sm:$0x33] }
  0x4f   :  { %1536 = vmatprep.subr.bf16.mxu0 %v2375_v33  ;;  %1577 = vmatprep.subr.bf16.mxu1 %v2377_v34  ;;  %v2411_v33 = vcombine.high %v211_v29, %v211_v29  ;;  %v2410_v34 = vcombine.low %v211_v29, %v211_v29  ;;  %v2417_v29 = vcombine.high %v214_v24, %v214_v24 }
  0x50   :  { %v2416_v30 = vcombine.low %v214_v24, %v214_v24 }
  0x52   :  { %1537 = vmatpush1.bf16.msra.mxu0 %v2374_v37  ;;  %1578 = vmatpush1.bf16.msra.mxu1 %v2376_v38  ;;  %v21_v37 = vld [vmem:[%s3270_s1 + $0x40] sm:$0xff] }
  0x53   :  { %2438 = vmatprep.subr.msk.bf16.mxu0 %vm1265_vm0, %v2407_v39  ;;  %2440 = vmatprep.subr.msk.bf16.mxu1 %vm1265_vm0, %v2409_v41  ;;  %v37_v38 = vld [vmem:[%s3270_s1 + $0xc0] sm:$0xff]  ;;  %v22_v39 = vld [vmem:[%s3270_s1 + $0x48] sm:$0xff]  ;;  %v1303_v41 = vsel %vm1265_vm0, %v2410_v34, 0  ;;  %v40_v34 = vld [vmem:[%s3270_s1 + $0xd8] sm:$0xff] }
  0x54   :  { %v2223_v42 = vcombine.high %v21_v37, %v37_v38  ;;  %v2225_v44 = vcombine.high %v22_v39, %v38_v40 }
  0x56   :  { %1539 = vmatpush1.bf16.msra.mxu0 %v1291_v47  ;;  %1580 = vmatpush1.bf16.msra.mxu1 %v1297_v49  ;;  %v54_v47 = vld [vmem:[%s3270_s1 + $0x148] sm:$0xff]  ;;  %v2222_v49 = vcombine.low %v21_v37, %v37_v38  ;;  %v1321_v37 = vsel %vm1265_vm0, %v2416_v30, 0 }
  0x57   :  { %1608 = vmatprep.subr.bf16.mxu0 %v2219_v48  ;;  %1649 = vmatprep.subr.bf16.mxu1 %v2221_v50  ;;  %v70_v48 = vld [vmem:[%s3270_s1 + $0x1c8] sm:$0xff]  ;;  %v2224_v50 = vcombine.low %v22_v39, %v38_v40  ;;  %v55_v39 = vld [vmem:[%s3270_s1 + $0x150] sm:$0xff] }
  0x58   :  { %v2257_v52 = vcombine.high %v54_v47, %v70_v48  ;;  %v71_v40 = vld [vmem:[%s3270_s1 + $0x1d0] sm:$0xff] }
  0x59   :  { %2439 = vmatmul.mubr.msk.bf16.vlgmr.msra.gmra.mrb[8].mxu0 %vm1261_vm1, %v2625_v4  ;;  %2441 = vmatmul.mubr.msk.bf16.vlgmr.msra.gmra.mrb[8].mxu1 %vm1261_vm1, %v2625_v4 }
  0x5a   :  { %1609 = vmatpush1.bf16.msra.mxu0 %v2218_v55  ;;  %1650 = vmatpush1.bf16.msra.mxu1 %v2220_v56  ;;  %v86_v55 = vld [vmem:[%s3270_s1 + $0x248] sm:$0xff] }
  0x5b   :  { %1610 = vmatprep.subr.bf16.mxu0 %v2251_v57  ;;  %1651 = vmatprep.subr.bf16.mxu1 %v2253_v58  ;;  %v102_v56 = vld [vmem:[%s3270_s1 + $0x2c8] sm:$0xff]  ;;  %v2254_v57 = vcombine.low %v53_v45, %v69_v46  ;;  %v2256_v58 = vcombine.low %v54_v47, %v70_v48  ;;  %v2259_v45 = vcombine.high %v55_v39, %v71_v40  ;;  %v87_v47 = vld [vmem:[%s3270_s1 + $0x250] sm:$0xff] }
  0x5c   :  { %1640 = vmatprep.mubr.bf16.mxu0 %v2497_v3  ;;  %1681 = vmatprep.mubr.bf16.mxu1 %v2497_v3  ;;  %v2289_v60 = vcombine.high %v86_v55, %v102_v56  ;;  %v103_v48 = vld [vmem:[%s3270_s1 + $0x2d0] sm:$0xff] }
  0x5e   :  { %1611 = vmatpush1.bf16.msra.mxu0 %v2250_v63  ;;  %1652 = vmatpush1.bf16.msra.mxu1 %v2252_v0  ;;  %v118_v63 = vld [vmem:[%s3270_s1 + $0x348] sm:$0xff] }
  0x5f   :  { %1612 = vmatprep.subr.bf16.mxu0 %v2283_v1  ;;  %1653 = vmatprep.subr.bf16.mxu1 %v2285_v2  ;;  %v134_v0 = vld [vmem:[%s3270_s1 + $0x3c8] sm:$0xff]  ;;  %v2286_v1 = vcombine.low %v85_v53, %v101_v54  ;;  %v2288_v2 = vcombine.low %v86_v55, %v102_v56  ;;  %v2291_v53 = vcombine.high %v87_v47, %v103_v48  ;;  %v119_v55 = vld [vmem:[%s3270_s1 + $0x350] sm:$0xff] }
  0x60   :  { %v2321_v6 = vcombine.high %v118_v63, %v134_v0  ;;  %v135_v56 = vld [vmem:[%s3270_s1 + $0x3d0] sm:$0xff] }
  0x62   :  { %1613 = vmatpush1.bf16.msra.mxu0 %v2282_v9  ;;  %1654 = vmatpush1.bf16.msra.mxu1 %v2284_v10  ;;  %v150_v9 = vld [vmem:[%s3270_s1 + $0x448] sm:$0xff] }
  0x63   :  { %1614 = vmatprep.subr.bf16.mxu0 %v2315_v11  ;;  %1655 = vmatprep.subr.bf16.mxu1 %v2317_v12  ;;  %v166_v10 = vld [vmem:[%s3270_s1 + $0x4c8] sm:$0xff]  ;;  %v2318_v11 = vcombine.low %v117_v61, %v133_v62  ;;  %v2320_v12 = vcombine.low %v118_v63, %v134_v0  ;;  %v2323_v61 = vcombine.high %v119_v55, %v135_v56  ;;  %v151_v63 = vld [vmem:[%s3270_s1 + $0x450] sm:$0xff] }
  0x64   :  { %v2353_v14 = vcombine.high %v150_v9, %v166_v10  ;;  %v167_v0 = vld [vmem:[%s3270_s1 + $0x4d0] sm:$0xff] }
  0x66   :  { %1615 = vmatpush1.bf16.msra.mxu0 %v2314_v17  ;;  %1656 = vmatpush1.bf16.msra.mxu1 %v2316_v18  ;;  %v182_v17 = vld [vmem:[%s3270_s1 + $0x548] sm:$0xff] }
  0x67   :  { %1616 = vmatprep.subr.bf16.mxu0 %v2347_v19  ;;  %1657 = vmatprep.subr.bf16.mxu1 %v2349_v20  ;;  %v198_v18 = vld [vmem:[%s3270_s1 + $0x5c8] sm:$0xff]  ;;  %v2350_v19 = vcombine.low %v149_v7, %v165_v8  ;;  %v2352_v20 = vcombine.low %v150_v9, %v166_v10  ;;  %v2355_v7 = vcombine.high %v151_v63, %v167_v0  ;;  %v183_v9 = vld [vmem:[%s3270_s1 + $0x550] sm:$0xff] }
  0x68   :  { %v2385_v22 = vcombine.high %v182_v17, %v198_v18  ;;  %v199_v10 = vld [vmem:[%s3270_s1 + $0x5d0] sm:$0xff] }
  0x6a   :  { %1617 = vmatpush1.bf16.msra.mxu0 %v2346_v25  ;;  %1658 = vmatpush1.bf16.msra.mxu1 %v2348_v26  ;;  %v2382_v25 = vcombine.low %v181_v15, %v197_v16  ;;  %v2384_v26 = vcombine.low %v182_v17, %v198_v18  ;;  %v2387_v15 = vcombine.high %v183_v9, %v199_v10  ;;  %v215_v17 = vld [vmem:[%s3270_s1 + $0x650] sm:$0x33]  ;;  %v216_v18 = vld [vmem:[%s3270_s1 + $0x658] sm:$0x33] }
  0x6b   :  { %1618 = vmatprep.subr.bf16.mxu0 %v2379_v27  ;;  %1659 = vmatprep.subr.bf16.mxu1 %v2381_v28  ;;  %v2415_v27 = vcombine.high %v213_v23, %v213_v23  ;;  %v2414_v28 = vcombine.low %v213_v23, %v213_v23  ;;  %v2421_v23 = vcombine.high %v216_v18, %v216_v18 }
  0x6c   :  { %v2420_v24 = vcombine.low %v216_v18, %v216_v18  ;;  %v27_v18 = vld [vmem:[%s3270_s1 + $0x70] sm:$0xff] }
  0x6e   :  { %1619 = vmatpush1.bf16.msra.mxu0 %v2378_v31  ;;  %1660 = vmatpush1.bf16.msra.mxu1 %v2380_v32  ;;  %v23_v31 = vld [vmem:[%s3270_s1 + $0x50] sm:$0xff] }
  0x6f   :  { %2442 = vmatprep.subr.msk.bf16.mxu0 %vm1265_vm0, %v2411_v33  ;;  %2444 = vmatprep.subr.msk.bf16.mxu1 %vm1265_vm0, %v2413_v35  ;;  %v39_v32 = vld [vmem:[%s3270_s1 + $0xd0] sm:$0xff]  ;;  %v24_v33 = vld [vmem:[%s3270_s1 + $0x58] sm:$0xff]  ;;  %v1315_v35 = vsel %vm1265_vm0, %v2414_v28, 0  ;;  %v42_v28 = vld [vmem:[%s3270_s1 + $0xe8] sm:$0xff] }
  0x70   :  { %v2227_v36 = vcombine.high %v23_v31, %v39_v32  ;;  %v2229_v38 = vcombine.high %v24_v33, %v40_v34 }
  0x72   :  { %1621 = vmatpush1.bf16.msra.mxu0 %v1303_v41  ;;  %1662 = vmatpush1.bf16.msra.mxu1 %v1309_v43  ;;  %v56_v41 = vld [vmem:[%s3270_s1 + $0x158] sm:$0xff]  ;;  %v2226_v43 = vcombine.low %v23_v31, %v39_v32  ;;  %v1333_v31 = vsel %vm1265_vm0, %v2420_v24, 0 }
  0x73   :  { %1690 = vmatprep.subr.bf16.mxu0 %v2223_v42  ;;  %1731 = vmatprep.subr.bf16.mxu1 %v2225_v44  ;;  %v72_v42 = vld [vmem:[%s3270_s1 + $0x1d8] sm:$0xff]  ;;  %v2228_v44 = vcombine.low %v24_v33, %v40_v34  ;;  %v57_v33 = vld [vmem:[%s3270_s1 + $0x160] sm:$0xff] }
  0x74   :  { %v2261_v46 = vcombine.high %v56_v41, %v72_v42  ;;  %v73_v34 = vld [vmem:[%s3270_s1 + $0x1e0] sm:$0xff] }
  0x75   :  { %2443 = vmatmul.mubr.msk.bf16.vlgmr.msra.gmra.mrb[12].mxu0 %vm1261_vm1, %v2625_v4  ;;  %2445 = vmatmul.mubr.msk.bf16.vlgmr.msra.gmra.mrb[12].mxu1 %vm1261_vm1, %v2625_v4 }
  0x76   :  { %1691 = vmatpush1.bf16.msra.mxu0 %v2222_v49  ;;  %1732 = vmatpush1.bf16.msra.mxu1 %v2224_v50  ;;  %v88_v49 = vld [vmem:[%s3270_s1 + $0x258] sm:$0xff] }
  0x77   :  { %1692 = vmatprep.subr.bf16.mxu0 %v2255_v51  ;;  %1733 = vmatprep.subr.bf16.mxu1 %v2257_v52  ;;  %v104_v50 = vld [vmem:[%s3270_s1 + $0x2d8] sm:$0xff]  ;;  %v2258_v51 = vcombine.low %v55_v39, %v71_v40  ;;  %v2260_v52 = vcombine.low %v56_v41, %v72_v42  ;;  %v2263_v39 = vcombine.high %v57_v33, %v73_v34  ;;  %v89_v41 = vld [vmem:[%s3270_s1 + $0x260] sm:$0xff] }
  0x78   :  { %1722 = vmatprep.mubr.bf16.mxu0 %v2497_v3  ;;  %1763 = vmatprep.mubr.bf16.mxu1 %v2497_v3  ;;  %v2293_v54 = vcombine.high %v88_v49, %v104_v50  ;;  %v105_v42 = vld [vmem:[%s3270_s1 + $0x2e0] sm:$0xff] }
  0x7a   :  { %1693 = vmatpush1.bf16.msra.mxu0 %v2254_v57  ;;  %1734 = vmatpush1.bf16.msra.mxu1 %v2256_v58  ;;  %v120_v57 = vld [vmem:[%s3270_s1 + $0x358] sm:$0xff] }
  0x7b   :  { %1694 = vmatprep.subr.bf16.mxu0 %v2287_v59  ;;  %1735 = vmatprep.subr.bf16.mxu1 %v2289_v60  ;;  %v136_v58 = vld [vmem:[%s3270_s1 + $0x3d8] sm:$0xff]  ;;  %v2290_v59 = vcombine.low %v87_v47, %v103_v48  ;;  %v2292_v60 = vcombine.low %v88_v49, %v104_v50  ;;  %v2295_v47 = vcombine.high %v89_v41, %v105_v42  ;;  %v121_v49 = vld [vmem:[%s3270_s1 + $0x360] sm:$0xff] }
  0x7c   :  { %v2325_v62 = vcombine.high %v120_v57, %v136_v58  ;;  %v137_v50 = vld [vmem:[%s3270_s1 + $0x3e0] sm:$0xff] }
  0x7e   :  { %1695 = vmatpush1.bf16.msra.mxu0 %v2286_v1  ;;  %1736 = vmatpush1.bf16.msra.mxu1 %v2288_v2  ;;  %v152_v1 = vld [vmem:[%s3270_s1 + $0x458] sm:$0xff] }
  0x7f   :  { %1696 = vmatprep.subr.bf16.mxu0 %v2319_v5  ;;  %1737 = vmatprep.subr.bf16.mxu1 %v2321_v6  ;;  %v168_v2 = vld [vmem:[%s3270_s1 + $0x4d8] sm:$0xff]  ;;  %v2322_v5 = vcombine.low %v119_v55, %v135_v56  ;;  %v2324_v6 = vcombine.low %v120_v57, %v136_v58  ;;  %v153_v56 = vld [vmem:[%s3270_s1 + $0x460] sm:$0xff]  ;;  %v154_v58 = vld [vmem:[%s3270_s1 + $0x468] sm:$0xff] }
  0x80   :  { %v2357_v8 = vcombine.high %v152_v1, %v168_v2  ;;  %v169_v57 = vld [vmem:[%s3270_s1 + $0x4e0] sm:$0xff] }
  0x82   :  { %1697 = vmatpush1.bf16.msra.mxu0 %v2318_v11  ;;  %1738 = vmatpush1.bf16.msra.mxu1 %v2320_v12  ;;  %v184_v11 = vld [vmem:[%s3270_s1 + $0x558] sm:$0xff] }
  0x83   :  { %1698 = vmatprep.subr.bf16.mxu0 %v2351_v13  ;;  %1739 = vmatprep.subr.bf16.mxu1 %v2353_v14  ;;  %v200_v12 = vld [vmem:[%s3270_s1 + $0x5d8] sm:$0xff]  ;;  %v2354_v13 = vcombine.low %v151_v63, %v167_v0  ;;  %v2356_v14 = vcombine.low %v152_v1, %v168_v2  ;;  %v185_v0 = vld [vmem:[%s3270_s1 + $0x560] sm:$0xff]  ;;  %v186_v2 = vld [vmem:[%s3270_s1 + $0x568] sm:$0xff] }
  0x84   :  { %v2389_v16 = vcombine.high %v184_v11, %v200_v12  ;;  %v201_v1 = vld [vmem:[%s3270_s1 + $0x5e0] sm:$0xff] }
  0x86   :  { %1699 = vmatpush1.bf16.msra.mxu0 %v2350_v19  ;;  %1740 = vmatpush1.bf16.msra.mxu1 %v2352_v20  ;;  %v2386_v19 = vcombine.low %v183_v9, %v199_v10  ;;  %v2388_v20 = vcombine.low %v184_v11, %v200_v12  ;;  %v217_v10 = vld [vmem:[%s3270_s1 + $0x660] sm:$0x33]  ;;  %v218_v11 = vld [vmem:[%s3270_s1 + $0x668] sm:$0x33]  ;;  %v2390_v12 = vcombine.low %v185_v0, %v201_v1 }
  0x87   :  { %1700 = vmatprep.subr.bf16.mxu0 %v2383_v21  ;;  %1741 = vmatprep.subr.bf16.mxu1 %v2385_v22  ;;  %v2419_v21 = vcombine.high %v215_v17, %v215_v17  ;;  %v2418_v22 = vcombine.low %v215_v17, %v215_v17  ;;  %v2424_v17 = vcombine.low %v218_v11, %v218_v11 }
  0x89   :  { %v1345_v24 = vsel %vm1265_vm0, %v2424_v17, 0 }
  0x8a   :  { %1701 = vmatpush1.bf16.msra.mxu0 %v2382_v25  ;;  %1742 = vmatpush1.bf16.msra.mxu1 %v2384_v26  ;;  %v25_v25 = vld [vmem:[%s3270_s1 + $0x60] sm:$0xff] }
  0x8b   :  { %2446 = vmatprep.subr.msk.bf16.mxu0 %vm1265_vm0, %v2415_v27  ;;  %2448 = vmatprep.subr.msk.bf16.mxu1 %vm1265_vm0, %v2417_v29  ;;  %v41_v26 = vld [vmem:[%s3270_s1 + $0xe0] sm:$0xff]  ;;  %v26_v27 = vld [vmem:[%s3270_s1 + $0x68] sm:$0xff]  ;;  %v1327_v29 = vsel %vm1265_vm0, %v2418_v22, 0 }
  0x8c   :  { %v2231_v30 = vcombine.high %v25_v25, %v41_v26  ;;  %v2233_v32 = vcombine.high %v26_v27, %v42_v28 }
  0x8e   :  { %1703 = vmatpush1.bf16.msra.mxu0 %v1315_v35  ;;  %1744 = vmatpush1.bf16.msra.mxu1 %v1321_v37  ;;  %v58_v35 = vld [vmem:[%s3270_s1 + $0x168] sm:$0xff]  ;;  %v2230_v37 = vcombine.low %v25_v25, %v41_v26  ;;  %v59_v26 = vld [vmem:[%s3270_s1 + $0x170] sm:$0xff] }
  0x8f   :  { %1772 = vmatprep.subr.bf16.mxu0 %v2227_v36  ;;  %1813 = vmatprep.subr.bf16.mxu1 %v2229_v38  ;;  %v74_v36 = vld [vmem:[%s3270_s1 + $0x1e8] sm:$0xff]  ;;  %v2232_v38 = vcombine.low %v26_v27, %v42_v28  ;;  %v75_v27 = vld [vmem:[%s3270_s1 + $0x1f0] sm:$0xff]  ;;  %v60_v28 = vld [vmem:[%s3270_s1 + $0x178] sm:$0xff] }
  0x90   :  { %v2265_v40 = vcombine.high %v58_v35, %v74_v36 }
  0x91   :  { %2447 = vmatmul.mubr.msk.bf16.vlgmr.msra.gmra.mrb[16].mxu0 %vm1261_vm1, %v2625_v4  ;;  %2449 = vmatmul.mubr.msk.bf16.vlgmr.msra.gmra.mrb[16].mxu1 %vm1261_vm1, %v2625_v4 }
  0x92   :  { %1773 = vmatpush1.bf16.msra.mxu0 %v2226_v43  ;;  %1814 = vmatpush1.bf16.msra.mxu1 %v2228_v44  ;;  %v90_v43 = vld [vmem:[%s3270_s1 + $0x268] sm:$0xff] }
  0x93   :  { %1774 = vmatprep.subr.bf16.mxu0 %v2259_v45  ;;  %1815 = vmatprep.subr.bf16.mxu1 %v2261_v46  ;;  %v106_v44 = vld [vmem:[%s3270_s1 + $0x2e8] sm:$0xff]  ;;  %v2262_v45 = vcombine.low %v57_v33, %v73_v34  ;;  %v2264_v46 = vcombine.low %v58_v35, %v74_v36  ;;  %v91_v34 = vld [vmem:[%s3270_s1 + $0x270] sm:$0xff]  ;;  %v3164_v36 = vld [vmem:[%s3271_s0] sm:$0x1] }
  0x94   :  { %1804 = vmatprep.mubr.bf16.mxu0 %v2497_v3  ;;  %1845 = vmatprep.mubr.bf16.mxu1 %v2497_v3  ;;  %v2297_v48 = vcombine.high %v90_v43, %v106_v44  ;;  %v107_v35 = vld [vmem:[%s3270_s1 + $0x2f0] sm:$0xff] }
  0x96   :  { %1775 = vmatpush1.bf16.msra.mxu0 %v2258_v51  ;;  %1816 = vmatpush1.bf16.msra.mxu1 %v2260_v52  ;;  %v138_v51 = vld [vmem:[%s3270_s1 + $0x3e8] sm:$0xff]  ;;  %v2294_v52 = vcombine.low %v89_v41, %v105_v42  ;;  %v2299_v41 = vcombine.high %v91_v34, %v107_v35 }
  0x97   :  { %1776 = vmatprep.subr.bf16.mxu0 %v2291_v53  ;;  %1817 = vmatprep.subr.bf16.mxu1 %v2293_v54  ;;  %v2296_v53 = vcombine.low %v90_v43, %v106_v44  ;;  %v2327_v54 = vcombine.high %v121_v49, %v137_v50  ;;  %v123_v43 = vld [vmem:[%s3270_s1 + $0x370] sm:$0xff] }
  0x98   :  { %v139_v44 = vld [vmem:[%s3270_s1 + $0x3f0] sm:$0xff] }
  0x9a   :  { %1777 = vmatpush1.bf16.msra.mxu0 %v2290_v59  ;;  %1818 = vmatpush1.bf16.msra.mxu1 %v2292_v60  ;;  %v170_v59 = vld [vmem:[%s3270_s1 + $0x4e8] sm:$0xff]  ;;  %v2326_v60 = vcombine.low %v121_v49, %v137_v50  ;;  %v2331_v49 = vcombine.high %v123_v43, %v139_v44 }
  0x9b   :  { %1778 = vmatprep.subr.bf16.mxu0 %v2323_v61  ;;  %1819 = vmatprep.subr.bf16.mxu1 %v2325_v62  ;;  %v2359_v62 = vcombine.high %v153_v56, %v169_v57  ;;  %v2361_v63 = vcombine.high %v154_v58, %v170_v59 }
  0x9e   :  { %1779 = vmatpush1.bf16.msra.mxu0 %v2322_v5  ;;  %1820 = vmatpush1.bf16.msra.mxu1 %v2324_v6  ;;  %v202_v5 = vld [vmem:[%s3270_s1 + $0x5e8] sm:$0xff]  ;;  %v2358_v6 = vcombine.low %v153_v56, %v169_v57  ;;  %v187_v57 = vld [vmem:[%s3270_s1 + $0x570] sm:$0xff] }
  0x9f   :  { %1780 = vmatprep.subr.bf16.mxu0 %v2355_v7  ;;  %1821 = vmatprep.subr.bf16.mxu1 %v2357_v8  ;;  %v2360_v7 = vcombine.low %v154_v58, %v170_v59  ;;  %v2391_v8 = vcombine.high %v185_v0, %v201_v1  ;;  %v2393_v9 = vcombine.high %v186_v2, %v202_v5  ;;  %v203_v58 = vld [vmem:[%s3270_s1 + $0x5f0] sm:$0xff]  ;;  %v188_v59 = vld [vmem:[%s3270_s1 + $0x578] sm:$0xff] }
  0xa0   :  { %v219_v1 = vld [vmem:[%s3270_s1 + $0x670] sm:$0x33] }
  0xa2   :  { %1781 = vmatpush1.bf16.msra.mxu0 %v2354_v13  ;;  %1822 = vmatpush1.bf16.msra.mxu1 %v2356_v14  ;;  %v2392_v13 = vcombine.low %v186_v2, %v202_v5  ;;  %v2423_v14 = vcombine.high %v217_v10, %v217_v10  ;;  %v220_v2 = vld [vmem:[%s3270_s1 + $0x678] sm:$0x33]  ;;  %v2394_v5 = vcombine.low %v187_v57, %v203_v58 }
  0xa3   :  { %1782 = vmatprep.subr.bf16.mxu0 %v2387_v15  ;;  %1823 = vmatprep.subr.bf16.mxu1 %v2389_v16  ;;  %v2422_v15 = vcombine.low %v217_v10, %v217_v10  ;;  %v2425_v16 = vcombine.high %v218_v11, %v218_v11  ;;  %v2428_v10 = vcombine.low %v220_v2, %v220_v2 }
  0xa5   :  { %v1339_v22 = vsel %vm1265_vm0, %v2422_v15, 0  ;;  %v2055_v15 = vlaneseq }
  0xa6   :  { %1783 = vmatpush1.bf16.msra.mxu0 %v2386_v19  ;;  %1824 = vmatpush1.bf16.msra.mxu1 %v2388_v20  ;;  %v43_v19 = vld [vmem:[%s3270_s1 + $0xf0] sm:$0xff]  ;;  %v28_v20 = vld [vmem:[%s3270_s1 + $0x78] sm:$0xff] }
  0xa7   :  { %2450 = vmatprep.subr.msk.bf16.mxu0 %vm1265_vm0, %v2419_v21  ;;  %2452 = vmatprep.subr.msk.bf16.mxu1 %vm1265_vm0, %v2421_v23  ;;  %v44_v21 = vld [vmem:[%s3270_s1 + $0xf8] sm:$0xff]  ;;  %v2235_v23 = vcombine.high %v27_v18, %v43_v19  ;;  %v2056_v17 = vshrl.u32 %v2055_v15, 7 }
  0xa8   :  { %v2237_v25 = vcombine.high %v28_v20, %v44_v21 }
  0xaa   :  { %1785 = vmatpush1.bf16.msra.mxu0 %v1327_v29  ;;  %1826 = vmatpush1.bf16.msra.mxu1 %v1333_v31  ;;  %v76_v29 = vld [vmem:[%s3270_s1 + $0x1f8] sm:$0xff]  ;;  %v2236_v31 = vcombine.low %v28_v20, %v44_v21 }
  0xab   :  { %1854 = vmatprep.subr.bf16.mxu0 %v2231_v30  ;;  %1895 = vmatprep.subr.bf16.mxu1 %v2233_v32  ;;  %v2234_v30 = vcombine.low %v27_v18, %v43_v19  ;;  %v2267_v32 = vcombine.high %v59_v26, %v75_v27  ;;  %v2269_v33 = vcombine.high %v60_v28, %v76_v29 }
  0xad   :  { %2451 = vmatmul.mubr.msk.bf16.vlgmr.msra.gmra.mrb[20].mxu0 %vm1261_vm1, %v2625_v4  ;;  %2453 = vmatmul.mubr.msk.bf16.vlgmr.msra.gmra.mrb[20].mxu1 %vm1261_vm1, %v2625_v4  ;;  %v122_v4 = vld [vmem:[%s3270_s1 + $0x368] sm:$0xff] }
  0xae   :  { %1855 = vmatpush1.bf16.msra.mxu0 %v2230_v37  ;;  %1896 = vmatpush1.bf16.msra.mxu1 %v2232_v38  ;;  %v2329_v55 = vcombine.high %v122_v4, %v138_v51  ;;  %v2328_v61 = vcombine.low %v122_v4, %v138_v51  ;;  %v92_v37 = vld [vmem:[%s3270_s1 + $0x278] sm:$0xff]  ;;  %v155_v4 = vld [vmem:[%s3270_s1 + $0x470] sm:$0xff] }
  0xaf   :  { %1856 = vmatprep.subr.bf16.mxu0 %v2263_v39  ;;  %1897 = vmatprep.subr.bf16.mxu1 %v2265_v40  ;;  %v108_v38 = vld [vmem:[%s3270_s1 + $0x2f8] sm:$0xff]  ;;  %v2266_v39 = vcombine.low %v59_v26, %v75_v27  ;;  %v2268_v40 = vcombine.low %v60_v28, %v76_v29  ;;  %v171_v51 = vld [vmem:[%s3270_s1 + $0x4f0] sm:$0xff] }
  0xb0   :  { %1886 = vmatprep.mubr.bf16.mxu0 %v2497_v3  ;;  %1927 = vmatprep.mubr.bf16.mxu1 %v2497_v3  ;;  %v2301_v42 = vcombine.high %v92_v37, %v108_v38 }
  0xb2   :  { %1857 = vmatpush1.bf16.msra.mxu0 %v2262_v45  ;;  %1898 = vmatpush1.bf16.msra.mxu1 %v2264_v46  ;;  %v124_v45 = vld [vmem:[%s3270_s1 + $0x378] sm:$0xff] }
  0xb3   :  { %1858 = vmatprep.subr.bf16.mxu0 %v2295_v47  ;;  %1899 = vmatprep.subr.bf16.mxu1 %v2297_v48  ;;  %v140_v46 = vld [vmem:[%s3270_s1 + $0x3f8] sm:$0xff]  ;;  %v2298_v47 = vcombine.low %v91_v34, %v107_v35  ;;  %v2300_v48 = vcombine.low %v92_v37, %v108_v38 }
  0xb4   :  { %v2333_v50 = vcombine.high %v124_v45, %v140_v46 }
  0xb6   :  { %1859 = vmatpush1.bf16.msra.mxu0 %v2294_v52  ;;  %1900 = vmatpush1.bf16.msra.mxu1 %v2296_v53  ;;  %v172_v52 = vld [vmem:[%s3270_s1 + $0x4f8] sm:$0xff]  ;;  %v2330_v53 = vcombine.low %v123_v43, %v139_v44 }
  0xb7   :  { %1860 = vmatprep.subr.bf16.mxu0 %v2327_v54  ;;  %1901 = vmatprep.subr.bf16.mxu1 %v2329_v55  ;;  %v2332_v54 = vcombine.low %v124_v45, %v140_v46  ;;  %v2363_v55 = vcombine.high %v155_v4, %v171_v51 }
  0xba   :  { %1861 = vmatpush1.bf16.msra.mxu0 %v2326_v60  ;;  %1902 = vmatpush1.bf16.msra.mxu1 %v2328_v61  ;;  %v204_v60 = vld [vmem:[%s3270_s1 + $0x5f8] sm:$0xff]  ;;  %v2362_v61 = vcombine.low %v155_v4, %v171_v51 }
  0xbb   :  { %1862 = vmatprep.subr.bf16.mxu0 %v2359_v62  ;;  %1903 = vmatprep.subr.bf16.mxu1 %v2361_v63  ;;  %v2395_v63 = vcombine.high %v187_v57, %v203_v58  ;;  %v2397_v0 = vcombine.high %v188_v59, %v204_v60 }
  0xbe   :  { %1863 = vmatpush1.bf16.msra.mxu0 %v2358_v6  ;;  %1904 = vmatpush1.bf16.msra.mxu1 %v2360_v7  ;;  %v2396_v6 = vcombine.low %v188_v59, %v204_v60  ;;  %v2427_v7 = vcombine.high %v219_v1, %v219_v1 }
  0xbf   :  { %1864 = vmatprep.subr.bf16.mxu0 %v2391_v8  ;;  %1905 = vmatprep.subr.bf16.mxu1 %v2393_v9  ;;  %v2426_v8 = vcombine.low %v219_v1, %v219_v1  ;;  %v2429_v9 = vcombine.high %v220_v2, %v220_v2 }
  0xc1   :  { %v1351_v11 = vsel %vm1265_vm0, %v2426_v8, 0 }
  0xc2   :  { %1865 = vmatpush1.bf16.msra.mxu0 %v2390_v12  ;;  %1906 = vmatpush1.bf16.msra.mxu1 %v2392_v13  ;;  %v1357_v12 = vsel %vm1265_vm0, %v2428_v10, 0  ;;  %v2498_v13 = vmov 1983009808  }
  0xc3   :  { %2454 = vmatprep.subr.msk.bf16.mxu0 %vm1265_vm0, %v2423_v14  ;;  %2456 = vmatprep.subr.msk.bf16.mxu1 %vm1265_vm0, %v2425_v16  ;;  %v2053_v14 = vunpack.c.l.s4 %v2498_v13 }
  0xc5   :  { %v2054_v16 = vunpack.c.0.s8 %v2053_v14 }
  0xc6   :  { %1867 = vmatpush1.bf16.msra.mxu0 %v1339_v22  ;;  %1908 = vmatpush1.bf16.msra.mxu1 %v1345_v24 }
  0xc7   :  { %1936 = vmatprep.subr.bf16.mxu0 %v2235_v23  ;;  %1977 = vmatprep.subr.bf16.mxu1 %v2237_v25  ;;  %v3228_v19 = vsub.s32 %v2054_v16, %v2056_v17 }
  0xc9   :  { %2455 = vmatmul.mubr.msk.bf16.vlgmr.msra.gmra.mrb[24].mxu0 %vm1261_vm1, %v3164_v36  ;;  %2457 = vmatmul.mubr.msk.bf16.vlgmr.msra.gmra.mrb[24].mxu1 %vm1261_vm1, %v3164_v36 }
  0xca   :  { %1937 = vmatpush1.bf16.msra.mxu0 %v2234_v30  ;;  %1978 = vmatpush1.bf16.msra.mxu1 %v2236_v31 }
  0xcb   :  { %1938 = vmatprep.subr.bf16.mxu0 %v2267_v32  ;;  %1979 = vmatprep.subr.bf16.mxu1 %v2269_v33 }
  0xcc   :  { %1968 = vmatprep.mubr.bf16.mxu0 %v2497_v3  ;;  %2009 = vmatprep.mubr.bf16.mxu1 %v2497_v3  ;;  %v156_v3 = vld [vmem:[%s3270_s1 + $0x478] sm:$0xff] }
  0xcd   :  { %v2365_v56 = vcombine.high %v156_v3, %v172_v52  ;;  %v2364_v62 = vcombine.low %v156_v3, %v172_v52 }
  0xce   :  { %1939 = vmatpush1.bf16.msra.mxu0 %v2266_v39  ;;  %1980 = vmatpush1.bf16.msra.mxu1 %v2268_v40 }
  0xcf   :  { %1940 = vmatprep.subr.bf16.mxu0 %v2299_v41  ;;  %1981 = vmatprep.subr.bf16.mxu1 %v2301_v42 }
  0xd2   :  { %1941 = vmatpush1.bf16.msra.mxu0 %v2298_v47  ;;  %1982 = vmatpush1.bf16.msra.mxu1 %v2300_v48 }
  0xd3   :  { %1942 = vmatprep.subr.bf16.mxu0 %v2331_v49  ;;  %1983 = vmatprep.subr.bf16.mxu1 %v2333_v50 }
  0xd6   :  { %1943 = vmatpush1.bf16.msra.mxu0 %v2330_v53  ;;  %1984 = vmatpush1.bf16.msra.mxu1 %v2332_v54 }
  0xd7   :  { %1944 = vmatprep.subr.bf16.mxu0 %v2363_v55  ;;  %1985 = vmatprep.subr.bf16.mxu1 %v2365_v56 }
  0xda   :  { %1945 = vmatpush1.bf16.msra.mxu0 %v2362_v61  ;;  %1986 = vmatpush1.bf16.msra.mxu1 %v2364_v62 }
  0xdb   :  { %1946 = vmatprep.subr.bf16.mxu0 %v2395_v63  ;;  %1987 = vmatprep.subr.bf16.mxu1 %v2397_v0 }
  0xde   :  { %1947 = vmatpush1.bf16.msra.mxu0 %v2394_v5  ;;  %1988 = vmatpush1.bf16.msra.mxu1 %v2396_v6 }
  0xdf   :  { %2458 = vmatprep.subr.msk.bf16.mxu0 %vm1265_vm0, %v2427_v7  ;;  %2460 = vmatprep.subr.msk.bf16.mxu1 %vm1265_vm0, %v2429_v9 }
  0xe2   :  { %1949 = vmatpush1.bf16.msra.mxu0 %v1351_v11  ;;  %1990 = vmatpush1.bf16.msra.mxu1 %v1357_v12 }
  0xe5   :  { %2459 = vmatmul.mubr.msk.bf16.vlgmr.msra.gmra.mrb[28].mxu0 %vm1261_vm1, %v3164_v36  ;;  %2461 = vmatmul.mubr.msk.bf16.vlgmr.msra.gmra.mrb[28].mxu1 %vm1261_vm1, %v3164_v36 }
  0xf4   :  { %v1396_v18 = vpop.f32.mrb[0].mxu0  ;;  %v1437_v20 = vpop.f32.mrb[0].mxu1 }
  0xf5   :  { %v1398_v21 = vpop.f32.mrb[1].mxu0  ;;  %v1439_v23 = vpop.f32.mrb[1].mxu1 }
  0xf6   :  { %v2050_v22 = vcombine.low %v1396_v18, %v1398_v21  ;;  %v1400_v24 = vpop.f32.mrb[2].mxu0  ;;  %v2051_v25 = vcombine.low %v1437_v20, %v1439_v23  ;;  %v1441_v26 = vpop.f32.mrb[2].mxu1 }
  0xf7   :  { %v1401_v27 = vpop.f32.mrb[3].mxu0  ;;  %v1442_v29 = vpop.f32.mrb[3].mxu1 }
  0xf8   :  { %v2058_v28 = vrot.slane %v2050_v22, %v3228_v19  ;;  %v2065_v30 = vrot.slane %v2051_v25, %v3228_v19 }
  0xfa   :  { %v2066_v31 = vcombine.low %v2058_v28, %v2065_v30 }
  0xfc   :  { %2194 = vst [vmem:[%s3272_s2] sm:$0xff] %v2066_v31 }
 0x110   :  { %v1478_v32 = vpop.f32.mrb[4].mxu0  ;;  %v1519_v33 = vpop.f32.mrb[4].mxu1 }
 0x111   :  { %v1480_v34 = vpop.f32.mrb[5].mxu0  ;;  %v1521_v36 = vpop.f32.mrb[5].mxu1 }
 0x112   :  { %v2067_v35 = vcombine.low %v1478_v32, %v1480_v34  ;;  %v1482_v37 = vpop.f32.mrb[6].mxu0  ;;  %v2068_v38 = vcombine.low %v1519_v33, %v1521_v36  ;;  %v1523_v39 = vpop.f32.mrb[6].mxu1 }
 0x113   :  { %v1483_v40 = vpop.f32.mrb[7].mxu0  ;;  %v1524_v42 = vpop.f32.mrb[7].mxu1 }
 0x114   :  { %v2075_v41 = vrot.slane %v2067_v35, %v3228_v19  ;;  %v2082_v43 = vrot.slane %v2068_v38, %v3228_v19 }
 0x116   :  { %v2083_v44 = vcombine.low %v2075_v41, %v2082_v43 }
 0x118   :  { %2195 = vst [vmem:[%s3272_s2 + $0x8] sm:$0xff] %v2083_v44 }
 0x12c   :  { %v1560_v45 = vpop.f32.mrb[8].mxu0  ;;  %v1601_v46 = vpop.f32.mrb[8].mxu1 }
 0x12d   :  { %v1562_v47 = vpop.f32.mrb[9].mxu0  ;;  %v1603_v49 = vpop.f32.mrb[9].mxu1 }
 0x12e   :  { %v2084_v48 = vcombine.low %v1560_v45, %v1562_v47  ;;  %v1564_v50 = vpop.f32.mrb[10].mxu0  ;;  %v2085_v4 = vcombine.low %v1601_v46, %v1603_v49  ;;  %v1605_v51 = vpop.f32.mrb[10].mxu1 }
 0x12f   :  { %v1565_v3 = vpop.f32.mrb[11].mxu0  ;;  %v1606_v53 = vpop.f32.mrb[11].mxu1 }
 0x130   :  { %v2092_v52 = vrot.slane %v2084_v48, %v3228_v19  ;;  %v2099_v54 = vrot.slane %v2085_v4, %v3228_v19 }
 0x132   :  { %v2100_v55 = vcombine.low %v2092_v52, %v2099_v54 }
 0x134   :  { %2196 = vst [vmem:[%s3272_s2 + $0x10] sm:$0xff] %v2100_v55 }
 0x148   :  { %v1642_v56 = vpop.f32.mrb[12].mxu0  ;;  %v1683_v57 = vpop.f32.mrb[12].mxu1 }
 0x149   :  { %v1644_v58 = vpop.f32.mrb[13].mxu0  ;;  %v1685_v60 = vpop.f32.mrb[13].mxu1 }
 0x14a   :  { %v2101_v59 = vcombine.low %v1642_v56, %v1644_v58  ;;  %v1646_v61 = vpop.f32.mrb[14].mxu0  ;;  %v2102_v62 = vcombine.low %v1683_v57, %v1685_v60  ;;  %v1687_v63 = vpop.f32.mrb[14].mxu1 }
 0x14b   :  { %v1647_v0 = vpop.f32.mrb[15].mxu0  ;;  %v1688_v2 = vpop.f32.mrb[15].mxu1 }
 0x14c   :  { %v2109_v1 = vrot.slane %v2101_v59, %v3228_v19  ;;  %v2116_v5 = vrot.slane %v2102_v62, %v3228_v19 }
 0x14e   :  { %v2117_v6 = vcombine.low %v2109_v1, %v2116_v5 }
 0x150   :  { %2197 = vst [vmem:[%s3272_s2 + $0x18] sm:$0xff] %v2117_v6 }
 0x164   :  { %v1724_v7 = vpop.f32.mrb[16].mxu0  ;;  %v1765_v8 = vpop.f32.mrb[16].mxu1 }
 0x165   :  { %v1726_v9 = vpop.f32.mrb[17].mxu0  ;;  %v1767_v11 = vpop.f32.mrb[17].mxu1 }
 0x166   :  { %v2118_v10 = vcombine.low %v1724_v7, %v1726_v9  ;;  %v1728_v12 = vpop.f32.mrb[18].mxu0  ;;  %v2119_v13 = vcombine.low %v1765_v8, %v1767_v11  ;;  %v1769_v14 = vpop.f32.mrb[18].mxu1 }
 0x167   :  { %v1729_v15 = vpop.f32.mrb[19].mxu0  ;;  %v1770_v17 = vpop.f32.mrb[19].mxu1 }
 0x168   :  { %v2126_v16 = vrot.slane %v2118_v10, %v3228_v19  ;;  %v2133_v18 = vrot.slane %v2119_v13, %v3228_v19 }
 0x16a   :  { %v2134_v20 = vcombine.low %v2126_v16, %v2133_v18 }
 0x16c   :  { %2198 = vst [vmem:[%s3272_s2 + $0x20] sm:$0xff] %v2134_v20 }
 0x180   :  { %v1806_v21 = vpop.f32.mrb[20].mxu0  ;;  %v1847_v22 = vpop.f32.mrb[20].mxu1 }
 0x181   :  { %v1808_v23 = vpop.f32.mrb[21].mxu0  ;;  %v1849_v25 = vpop.f32.mrb[21].mxu1 }
 0x182   :  { %v2135_v24 = vcombine.low %v1806_v21, %v1808_v23  ;;  %v1810_v26 = vpop.f32.mrb[22].mxu0  ;;  %v2136_v27 = vcombine.low %v1847_v22, %v1849_v25  ;;  %v1851_v28 = vpop.f32.mrb[22].mxu1 }
 0x183   :  { %v1811_v29 = vpop.f32.mrb[23].mxu0  ;;  %v1852_v31 = vpop.f32.mrb[23].mxu1 }
 0x184   :  { %v2143_v30 = vrot.slane %v2135_v24, %v3228_v19  ;;  %v2150_v32 = vrot.slane %v2136_v27, %v3228_v19 }
 0x186   :  { %v2151_v33 = vcombine.low %v2143_v30, %v2150_v32 }
 0x188   :  { %2199 = vst [vmem:[%s3272_s2 + $0x28] sm:$0xff] %v2151_v33 }
 0x19c   :  { %v1888_v34 = vpop.f32.mrb[24].mxu0  ;;  %v1929_v35 = vpop.f32.mrb[24].mxu1 }
 0x19d   :  { %v1890_v36 = vpop.f32.mrb[25].mxu0  ;;  %v1931_v38 = vpop.f32.mrb[25].mxu1 }
 0x19e   :  { %v2152_v37 = vcombine.low %v1888_v34, %v1890_v36  ;;  %v1892_v39 = vpop.f32.mrb[26].mxu0  ;;  %v2153_v40 = vcombine.low %v1929_v35, %v1931_v38  ;;  %v1933_v41 = vpop.f32.mrb[26].mxu1 }
 0x19f   :  { %v1893_v42 = vpop.f32.mrb[27].mxu0  ;;  %v1934_v44 = vpop.f32.mrb[27].mxu1 }
 0x1a0   :  { %v2160_v43 = vrot.slane %v2152_v37, %v3228_v19  ;;  %v2167_v45 = vrot.slane %v2153_v40, %v3228_v19 }
 0x1a2   :  { %v2168_v46 = vcombine.low %v2160_v43, %v2167_v45 }
 0x1a4   :  { %2200 = vst [vmem:[%s3272_s2 + $0x30] sm:$0xff] %v2168_v46 }
 0x1b8   :  { %v1970_v47 = vpop.f32.mrb[28].mxu0  ;;  %v2011_v48 = vpop.f32.mrb[28].mxu1 }
 0x1b9   :  { %v1972_v49 = vpop.f32.mrb[29].mxu0  ;;  %v2013_v4 = vpop.f32.mrb[29].mxu1 }
 0x1ba   :  { %v2169_v50 = vcombine.low %v1970_v47, %v1972_v49  ;;  %v1974_v51 = vpop.f32.mrb[30].mxu0  ;;  %v2170_v3 = vcombine.low %v2011_v48, %v2013_v4  ;;  %v2015_v52 = vpop.f32.mrb[30].mxu1 }
 0x1bb   :  { %v1975_v53 = vpop.f32.mrb[31].mxu0  ;;  %v2016_v55 = vpop.f32.mrb[31].mxu1 }
 0x1bc   :  { %v2177_v54 = vrot.slane %v2169_v50, %v3228_v19  ;;  %v2184_v56 = vrot.slane %v2170_v3, %v3228_v19 }
 0x1be   :  { %v2185_v57 = vcombine.low %v2177_v54, %v2184_v56 }
 0x1c0   :  { %2201 = vst [vmem:[%s3272_s2 + $0x38] sm:$0xff] %v2185_v57 }

// kernel: gnet_forward.6
= control target key start
LH: loop header
LB: loop body
LE: loop exit
PB: predicated region body
PF: predicated region fallthrough
CT: control target
= control target key end

     0   :  { %s1734_s15 = smov 0   ;;  %s1736_s16 = smov 0   ;;  %s1897_s0 = inlined_call_operand.vmem [shape: bf16[2,5,8,1024], index: 0, kind: input, shape index: {}]   ;;  %s1898_s1 = inlined_call_operand.vmem [shape: bf16[2,2,1024,128], index: 1, kind: input, shape index: {}]   ;;  %s1899_s2 = inlined_call_operand.vmem [shape: bf16[2,2,32,128], index: 2, kind: output, shape index: {0}]   ;;  %s1900_s3 = inlined_call_operand.vmem [shape: f32[2,2,1,128], index: 3, kind: output, shape index: {1}]   ;;  %s1901_s4 = inlined_call_operand.vmem [shape: f32[2,2,1,128], index: 4, kind: output, shape index: {2}]  }
   0x1   :  { %s1738_s17 = smov 0   ;;  %s1740_s18 = smov 0  }
   0x2   :  { %s1742_s19 = smov 0  }
   0x3 LB: > { %s24_s20 = sadd.s32 1, %s1699_s17  ;;  %s27_s21 = sadd.s32 1, %s1703_s18  ;;  %s1707_s19 = sphi %s1742_s19, %s15_s19   ;;  %s1703_s18 = sphi %s1740_s18, %s1905_s18   ;;  %s1699_s17 = sphi %s1738_s17, %s1904_s17   ;;  %s1695_s16 = sphi %s1736_s16, %s1903_s16   ;;  %s1691_s15 = sphi %s1734_s15, %s1902_s15  }
   0x4   : > { %p25_p0 = scmp.ge.s32.totalorder %s24_s20, 2  ;;  %p1338_p1 = scmp.ge.s32.totalorder %s1707_s19, 1 }
   0x5   : > { %p201_p2 = scmp.lt.s32.totalorder %s1707_s19, 5 }
   0x6   : > { %s1907_s20 = smov (%p25_p0, %s24_s20), 0  ;;  %s1909_s21 = smov (!%p25_p0, %s27_s21), %s1703_s18 }
   0x7   : > { %p202_p3 = pnand %p1338_p1, %p201_p2  ;;  %p29_p4 = scmp.ge.s32.totalorder %s1909_s21, 2 }
   0x8   : > { %p254_p5 = scmp.lt.s32.totalorder (!%p202_p3), %s1691_s15, 1  ;;  %p259_p6 = scmp.lt.s32.totalorder (!%p202_p3), %s1695_s16, 1 }
   0x9   : > { %s1911_s21 = smov (%p29_p4, %s1909_s21), 0  ;;  %205 = sbr.rel (%p202_p3) target bundleno = 335 (0x14f), region = 28 }
   0xa   : > { %s1436_s22 = sshll.u32 (!%p202_p3), %s1695_s16, 5 }
  0x10   : > { %s1913_s15 = smov (!%p254_p5, %s1691_s15), 1  ;;  %s1915_s16 = smov (!%p259_p6, %s1695_s16), 1 }
  0x11   : > { %s1340_s23 = sshll.u32 %s1913_s15, 7  ;;  %s1564_s24 = smul.u32 160, %s1913_s15 }
  0x12   : > { %s1341_s25 = sshll.u32 %s1915_s16, 8  ;;  %s1343_s9 = sshll.u32 %s1913_s15, 2 }
  0x13   : > { %s265_s26 = sadd.s32 %s1341_s25, %s1340_s23  ;;  %s258_s29 = scalar_lea.vmem %s1897_s0, %s1564_s24 }
  0x14   : > { %s1342_s30 = sshll.u32 %s265_s26, 2  ;;  %s1774_s5 = scalar_lea.vmem %s258_s29, %s1436_s22 }
  0x15   : > { %s1779_s8 = scalar_lea.vmem %s1898_s1, %s1342_s30  ;;  %v1782_v0 = vld [vmem:[%s1774_s5] sm:$0xff]  ;;  %v296_v32 = vld [vmem:[%s1774_s5 + $0x8] sm:$0xff]  ;;  %s1344_s10 = sshll.u32 %s1915_s16, 3 }
  0x16   : > { %v1785_v1 = vld [vmem:[%s1774_s5 + $0x20] sm:$0xff]  ;;  %v1609_v7 = vld [vmem:[%s1779_s8 + $0x48] sm:$0xff]   ;;  %v1613_v11 = vld [vmem:[%s1779_s8 + $0x50] sm:$0xff]   ;;  %s274_s11 = sadd.s32 %s1344_s10, %s1343_s9  ;;  %s1346_s23 = sshll.u32 %s1915_s16, 1 }
  0x17   : > { %v1605_v2 = vld [vmem:[%s1779_s8 + $0x40] sm:$0xff]   ;;  %v1351_v3 = vcombine.high %v1782_v0, %v1785_v1  ;;  %v1610_v8 = vld [vmem:[%s1779_s8 + $0xc8] sm:$0xff]   ;;  %v1614_v12 = vld [vmem:[%s1779_s8 + $0xd0] sm:$0xff]   ;;  %v1350_v36 = vcombine.low %v1782_v0, %v1785_v1  ;;  %s1345_s12 = sshll.u32 %s274_s11, 2  ;;  %s282_s24 = sadd.s32 %s1346_s23, %s1913_s15 }
  0x18   : > { %v1606_v4 = vld [vmem:[%s1779_s8 + $0xc0] sm:$0xff]   ;;  %1452 = vmatprep.subr.bf16.mxu0 %v1605_v2  ;;  %v1611_v9 = vld [vmem:[%s1779_s8 + $0x8] sm:$0xff]   ;;  %v1615_v13 = vld [vmem:[%s1779_s8 + $0x10] sm:$0xff]   ;;  %s276_s22 = scalar_lea.vmem %s1899_s2, %s1345_s12  ;;  %s283_s27 = scalar_lea.vmem %s1900_s3, %s282_s24 }
  0x19   : > { %v1607_v5 = vld [vmem:[%s1779_s8] sm:$0xff]   ;;  %935 = vmatprep.mubr.bf16.mxu0 %v1351_v3  ;;  %1480 = vmatprep.subr.bf16.mxu1 %v1606_v4  ;;  %v1612_v10 = vld [vmem:[%s1779_s8 + $0x88] sm:$0xff]   ;;  %v1616_v14 = vld [vmem:[%s1779_s8 + $0x90] sm:$0xff]   ;;  %s290_s30 = scalar_lea.vmem %s1901_s4, %s282_s24 }
  0x1a   : > { %v1608_v6 = vld [vmem:[%s1779_s8 + $0x80] sm:$0xff]   ;;  %1453 = vmatpush3.bf16.msra.mxu0 %v1607_v5  ;;  %v1617_v15 = vld [vmem:[%s1779_s8 + $0x58] sm:$0xff]   ;;  %v1625_v23 = vld [vmem:[%s1779_s8 + $0x68] sm:$0xff]  }
  0x1b   : > { %1481 = vmatpush3.bf16.msra.mxu1 %v1608_v6  ;;  %1454 = vmatprep.subr.bf16.mxu0 %v1609_v7  ;;  %v1618_v16 = vld [vmem:[%s1779_s8 + $0xd8] sm:$0xff]   ;;  %v1621_v19 = vld [vmem:[%s1779_s8 + $0x60] sm:$0xff]   ;;  %v1626_v24 = vld [vmem:[%s1779_s8 + $0xe8] sm:$0xff]  }
  0x1c   : > { %1482 = vmatprep.subr.bf16.mxu1 %v1610_v8  ;;  %v1619_v17 = vld [vmem:[%s1779_s8 + $0x18] sm:$0xff]   ;;  %v1622_v20 = vld [vmem:[%s1779_s8 + $0xe0] sm:$0xff]   ;;  %v1627_v25 = vld [vmem:[%s1779_s8 + $0x28] sm:$0xff]  }
  0x1d   : > { %v1620_v18 = vld [vmem:[%s1779_s8 + $0x98] sm:$0xff]   ;;  %v1623_v21 = vld [vmem:[%s1779_s8 + $0x20] sm:$0xff]   ;;  %v1628_v26 = vld [vmem:[%s1779_s8 + $0xa8] sm:$0xff]  }
  0x1e   : > { %1455 = vmatpush3.bf16.msra.mxu0 %v1611_v9  ;;  %v1624_v22 = vld [vmem:[%s1779_s8 + $0xa0] sm:$0xff]   ;;  %v1629_v27 = vld [vmem:[%s1779_s8 + $0x70] sm:$0xff]   ;;  %v1633_v31 = vld [vmem:[%s1779_s8 + $0x78] sm:$0xff]  }
  0x1f   : > { %1483 = vmatpush3.bf16.msra.mxu1 %v1612_v10  ;;  %1456 = vmatprep.subr.bf16.mxu0 %v1613_v11  ;;  %v1630_v28 = vld [vmem:[%s1779_s8 + $0xf0] sm:$0xff]   ;;  %v1634_v33 = vld [vmem:[%s1779_s8 + $0xf8] sm:$0xff]   ;;  %v300_v37 = vld [vmem:[%s1774_s5 + $0x28] sm:$0xff] }
  0x20   : > { %1484 = vmatprep.subr.bf16.mxu1 %v1614_v12  ;;  %v1631_v29 = vld [vmem:[%s1779_s8 + $0x30] sm:$0xff]   ;;  %v1635_v34 = vld [vmem:[%s1779_s8 + $0x38] sm:$0xff]   ;;  %v1352_v38 = vcombine.low %v296_v32, %v300_v37  ;;  %v1353_v39 = vcombine.high %v296_v32, %v300_v37  ;;  %v1637_v40 = vld [vmem:[%s1779_s8 + $0x140] sm:$0xff]  }
  0x21   : > { %v1632_v30 = vld [vmem:[%s1779_s8 + $0xb0] sm:$0xff]   ;;  %v1636_v35 = vld [vmem:[%s1779_s8 + $0xb8] sm:$0xff]   ;;  %v1638_v41 = vld [vmem:[%s1779_s8 + $0x1c0] sm:$0xff]  }
  0x22   : > { %1457 = vmatpush3.bf16.msra.mxu0 %v1615_v13  ;;  %984 = vmatprep.mubr.bf16.mxu1 %v1353_v39  ;;  %v1639_v42 = vld [vmem:[%s1779_s8 + $0x100] sm:$0xff]   ;;  %v1641_v44 = vld [vmem:[%s1779_s8 + $0x148] sm:$0xff]   ;;  %v1645_v48 = vld [vmem:[%s1779_s8 + $0x150] sm:$0xff]  }
  0x23   : > { %1485 = vmatpush3.bf16.msra.mxu1 %v1616_v14  ;;  %1458 = vmatprep.subr.bf16.mxu0 %v1617_v15  ;;  %v1640_v43 = vld [vmem:[%s1779_s8 + $0x180] sm:$0xff]   ;;  %v1642_v45 = vld [vmem:[%s1779_s8 + $0x1c8] sm:$0xff]   ;;  %v1646_v49 = vld [vmem:[%s1779_s8 + $0x1d0] sm:$0xff]  }
  0x24   : > { %1486 = vmatprep.subr.bf16.mxu1 %v1618_v16  ;;  %v1643_v46 = vld [vmem:[%s1779_s8 + $0x108] sm:$0xff]   ;;  %v1647_v50 = vld [vmem:[%s1779_s8 + $0x110] sm:$0xff]   ;;  %v1649_v52 = vld [vmem:[%s1779_s8 + $0x158] sm:$0xff]  }
  0x25   : > { %v1644_v47 = vld [vmem:[%s1779_s8 + $0x188] sm:$0xff]   ;;  %v1648_v51 = vld [vmem:[%s1779_s8 + $0x190] sm:$0xff]   ;;  %v1650_v53 = vld [vmem:[%s1779_s8 + $0x1d8] sm:$0xff]  }
  0x26   : > { %1459 = vmatpush3.bf16.msra.mxu0 %v1619_v17  ;;  %v1651_v54 = vld [vmem:[%s1779_s8 + $0x118] sm:$0xff]   ;;  %v1653_v56 = vld [vmem:[%s1779_s8 + $0x160] sm:$0xff]   ;;  %v304_v63 = vld [vmem:[%s1774_s5 + $0x48] sm:$0xff] }
  0x27   : > { %1487 = vmatpush3.bf16.msra.mxu1 %v1620_v18  ;;  %1460 = vmatprep.subr.bf16.mxu0 %v1621_v19  ;;  %v1652_v55 = vld [vmem:[%s1779_s8 + $0x198] sm:$0xff]   ;;  %v1654_v57 = vld [vmem:[%s1779_s8 + $0x1e0] sm:$0xff]   ;;  %v308_v0 = vld [vmem:[%s1774_s5 + $0x68] sm:$0xff] }
  0x28   : > { %1488 = vmatprep.subr.bf16.mxu1 %v1622_v20  ;;  %v1655_v58 = vld [vmem:[%s1779_s8 + $0x120] sm:$0xff]   ;;  %v1361_v2 = vcombine.high %v304_v63, %v308_v0  ;;  %v1657_v3 = vld [vmem:[%s1779_s8 + $0x168] sm:$0xff]   ;;  %v1360_v4 = vcombine.low %v304_v63, %v308_v0  ;;  %v1661_v8 = vld [vmem:[%s1779_s8 + $0x170] sm:$0xff]  }
  0x29   : > { %v1656_v59 = vld [vmem:[%s1779_s8 + $0x1a0] sm:$0xff]   ;;  %v1658_v5 = vld [vmem:[%s1779_s8 + $0x1e8] sm:$0xff]   ;;  %v1662_v9 = vld [vmem:[%s1779_s8 + $0x1f0] sm:$0xff]  }
  0x2a   : > { %1461 = vmatpush3.bf16.msra.mxu0 %v1623_v21  ;;  %v303_v60 = vld [vmem:[%s1774_s5 + $0x40] sm:$0xff]  ;;  %v1659_v6 = vld [vmem:[%s1779_s8 + $0x128] sm:$0xff]   ;;  %v1663_v10 = vld [vmem:[%s1779_s8 + $0x130] sm:$0xff]  }
  0x2b   : > { %1489 = vmatpush3.bf16.msra.mxu1 %v1624_v22  ;;  %1462 = vmatprep.subr.bf16.mxu0 %v1625_v23  ;;  %v307_v61 = vld [vmem:[%s1774_s5 + $0x60] sm:$0xff]  ;;  %v1660_v7 = vld [vmem:[%s1779_s8 + $0x1a8] sm:$0xff]   ;;  %v1664_v11 = vld [vmem:[%s1779_s8 + $0x1b0] sm:$0xff]  }
  0x2c   : > { %1490 = vmatprep.subr.bf16.mxu1 %v1626_v24  ;;  %v1359_v62 = vcombine.high %v303_v60, %v307_v61  ;;  %v1358_v1 = vcombine.low %v303_v60, %v307_v61  ;;  %v1665_v12 = vld [vmem:[%s1779_s8 + $0x178] sm:$0xff]   ;;  %v297_v16 = vld [vmem:[%s1774_s5 + $0x10] sm:$0xff] }
  0x2d   : > { %v1666_v13 = vld [vmem:[%s1779_s8 + $0x1f8] sm:$0xff]   ;;  %v301_v17 = vld [vmem:[%s1774_s5 + $0x30] sm:$0xff] }
  0x2e   : > { %1463 = vmatpush3.bf16.msra.mxu0 %v1627_v25  ;;  %v1667_v14 = vld [vmem:[%s1779_s8 + $0x138] sm:$0xff]   ;;  %v1354_v20 = vcombine.low %v297_v16, %v301_v17  ;;  %v1355_v21 = vcombine.high %v297_v16, %v301_v17  ;;  %v305_v24 = vld [vmem:[%s1774_s5 + $0x50] sm:$0xff] }
  0x2f   : > { %1491 = vmatpush3.bf16.msra.mxu1 %v1628_v26  ;;  %1464 = vmatprep.subr.bf16.mxu0 %v1629_v27  ;;  %v1668_v15 = vld [vmem:[%s1779_s8 + $0x1b8] sm:$0xff]   ;;  %v309_v25 = vld [vmem:[%s1774_s5 + $0x70] sm:$0xff] }
  0x30   : > { %1492 = vmatprep.subr.bf16.mxu1 %v1630_v28  ;;  %v298_v18 = vld [vmem:[%s1774_s5 + $0x18] sm:$0xff]  ;;  %v1363_v27 = vcombine.high %v305_v24, %v309_v25 }
  0x31   : > { %v302_v19 = vld [vmem:[%s1774_s5 + $0x38] sm:$0xff] }
  0x32   : > { %1465 = vmatpush3.bf16.msra.mxu0 %v1631_v29  ;;  %v1356_v22 = vcombine.low %v298_v18, %v302_v19  ;;  %v1357_v23 = vcombine.high %v298_v18, %v302_v19  ;;  %v306_v26 = vld [vmem:[%s1774_s5 + $0x58] sm:$0xff] }
  0x33   : > { %1493 = vmatpush3.bf16.msra.mxu1 %v1632_v30  ;;  %1466 = vmatprep.subr.bf16.mxu0 %v1633_v31  ;;  %v310_v28 = vld [vmem:[%s1774_s5 + $0x78] sm:$0xff]  ;;  %v1362_v30 = vcombine.low %v305_v24, %v309_v25 }
  0x34   : > { %1494 = vmatprep.subr.bf16.mxu1 %v1634_v33  ;;  %v1365_v29 = vcombine.high %v306_v26, %v310_v28  ;;  %v1364_v31 = vcombine.low %v306_v26, %v310_v28 }
  0x36   : > { %1467 = vmatpush3.bf16.msra.mxu0 %v1635_v34 }
  0x37   : > { %1495 = vmatpush3.bf16.msra.mxu1 %v1636_v35  ;;  %1508 = vmatprep.subr.bf16.mxu0 %v1637_v40 }
  0x38   : > { %1536 = vmatprep.subr.bf16.mxu1 %v1638_v41 }
  0x39   : > { %936 = vmatmul.mubr.bf16.vlgmr.msra.gmra.mrb[0].mxu0 %v1350_v36 }
  0x3a   : > { %985 = vmatmul.mubr.bf16.vlgmr.msra.gmra.mrb[0].mxu1 %v1352_v38  ;;  %1509 = vmatpush3.bf16.msra.mxu0 %v1639_v42 }
  0x3b   : > { %1537 = vmatpush3.bf16.msra.mxu1 %v1640_v43  ;;  %1510 = vmatprep.subr.bf16.mxu0 %v1641_v44 }
  0x3c   : > { %1538 = vmatprep.subr.bf16.mxu1 %v1642_v45  ;;  %943 = vmatprep.mubr.bf16.mxu0 %v1359_v62 }
  0x3d   : > { %992 = vmatprep.mubr.bf16.mxu1 %v1361_v2 }
  0x3e   : > { %1511 = vmatpush3.bf16.msra.mxu0 %v1643_v46 }
  0x3f   : > { %1539 = vmatpush3.bf16.msra.mxu1 %v1644_v47  ;;  %1512 = vmatprep.subr.bf16.mxu0 %v1645_v48 }
  0x40   : > { %1540 = vmatprep.subr.bf16.mxu1 %v1646_v49 }
  0x41   : > { %944 = vmatmul.mubr.bf16.gmra.mrb[4].mxu0 %v1358_v1 }
  0x42   : > { %1513 = vmatpush3.bf16.msra.mxu0 %v1647_v50  ;;  %993 = vmatmul.mubr.bf16.gmra.mrb[4].mxu1 %v1360_v4 }
  0x43   : > { %1541 = vmatpush3.bf16.msra.mxu1 %v1648_v51  ;;  %1514 = vmatprep.subr.bf16.mxu0 %v1649_v52 }
  0x44   : > { %1542 = vmatprep.subr.bf16.mxu1 %v1650_v53  ;;  %1033 = vmatprep.mubr.bf16.mxu0 %v1355_v21 }
  0x45   : > { %1082 = vmatprep.mubr.bf16.mxu1 %v1357_v23 }
  0x46   : > { %1515 = vmatpush3.bf16.msra.mxu0 %v1651_v54 }
  0x47   : > { %1543 = vmatpush3.bf16.msra.mxu1 %v1652_v55  ;;  %1516 = vmatprep.subr.bf16.mxu0 %v1653_v56 }
  0x48   : > { %1544 = vmatprep.subr.bf16.mxu1 %v1654_v57 }
  0x4a   : > { %1517 = vmatpush3.bf16.msra.mxu0 %v1655_v58 }
  0x4b   : > { %1545 = vmatpush3.bf16.msra.mxu1 %v1656_v59  ;;  %1518 = vmatprep.subr.bf16.mxu0 %v1657_v3 }
  0x4c   : > { %1546 = vmatprep.subr.bf16.mxu1 %v1658_v5 }
  0x4e   : > { %1519 = vmatpush3.bf16.msra.mxu0 %v1659_v6 }
  0x4f   : > { %1547 = vmatpush3.bf16.msra.mxu1 %v1660_v7  ;;  %1520 = vmatprep.subr.bf16.mxu0 %v1661_v8 }
  0x50   : > { %1548 = vmatprep.subr.bf16.mxu1 %v1662_v9 }
  0x52   : > { %1521 = vmatpush3.bf16.msra.mxu0 %v1663_v10 }
  0x53   : > { %1549 = vmatpush3.bf16.msra.mxu1 %v1664_v11  ;;  %1522 = vmatprep.subr.bf16.mxu0 %v1665_v12 }
  0x54   : > { %1550 = vmatprep.subr.bf16.mxu1 %v1666_v13 }
  0x56   : > { %1523 = vmatpush3.bf16.msra.mxu0 %v1667_v14 }
  0x57   : > { %1551 = vmatpush3.bf16.msra.mxu1 %v1668_v15 }
  0x59   : > { %1034 = vmatmul.mubr.bf16.vlgmr.msra.gmra.mrb[8].mxu0 %v1354_v20 }
  0x5a   : > { %1083 = vmatmul.mubr.bf16.vlgmr.msra.gmra.mrb[8].mxu1 %v1356_v22  ;;  %1041 = vmatprep.mubr.bf16.mxu0 %v1363_v27 }
  0x5b   : > { %1090 = vmatprep.mubr.bf16.mxu1 %v1365_v29 }
  0x61   : > { %1042 = vmatmul.mubr.bf16.gmra.mrb[12].mxu0 %v1362_v30 }
  0x62   : > { %1091 = vmatmul.mubr.bf16.gmra.mrb[12].mxu1 %v1364_v31 }
 0x10c   : > { %v1468_v32 = vpop.f32.mrb[0].mxu0 }
 0x10d   : > { %v1496_v33 = vpop.f32.mrb[0].mxu1  ;;  %v1469_v34 = vpop.f32.mrb[1].mxu0 }
 0x10e   : > { %v1470_v35 = vadd.f32 %v1469_v34, %v1468_v32  ;;  %v1497_v36 = vpop.f32.mrb[1].mxu1  ;;  %v1471_v37 = vpop.f32.mrb[2].mxu0 }
 0x10f   : > { %v1498_v38 = vadd.f32 %v1497_v36, %v1496_v33  ;;  %v1499_v39 = vpop.f32.mrb[2].mxu1  ;;  %v1472_v40 = vpop.f32.mrb[3].mxu0 }
 0x110   : > { %v1473_v41 = vadd.f32 %v1472_v40, %v1471_v37  ;;  %v1500_v42 = vpop.f32.mrb[3].mxu1 }
 0x111   : > { %v987_v43 = vadd.f32 %v1498_v38, %v1470_v35  ;;  %v1501_v44 = vadd.f32 %v1500_v42, %v1499_v39 }
 0x113   : > { %v990_v45 = vadd.f32 %v1501_v44, %v1473_v41 }
 0x114   : > { %v1474_v46 = vpop.f32.mrb[4].mxu0 }
 0x115   : > { %v1502_v47 = vpop.f32.mrb[4].mxu1  ;;  %v1475_v48 = vpop.f32.mrb[5].mxu0 }
 0x116   : > { %v1476_v49 = vadd.f32 %v1475_v48, %v1474_v46  ;;  %v1503_v50 = vpop.f32.mrb[5].mxu1  ;;  %v1477_v51 = vpop.f32.mrb[6].mxu0 }
 0x117   : > { %v1504_v52 = vadd.f32 %v1503_v50, %v1502_v47  ;;  %v1505_v53 = vpop.f32.mrb[6].mxu1  ;;  %v1478_v54 = vpop.f32.mrb[7].mxu0 }
 0x118   : > { %v1479_v55 = vadd.f32 %v1478_v54, %v1477_v51  ;;  %v1506_v56 = vpop.f32.mrb[7].mxu1 }
 0x119   : > { %v995_v57 = vadd.f32 %v1504_v52, %v1476_v49  ;;  %v1507_v58 = vadd.f32 %v1506_v56, %v1505_v53 }
 0x11b   : > { %v998_v59 = vadd.f32 %v1507_v58, %v1479_v55 }
 0x12c   : > { %v1524_v60 = vpop.f32.mrb[8].mxu0 }
 0x12d   : > { %v1552_v61 = vpop.f32.mrb[8].mxu1  ;;  %v1525_v62 = vpop.f32.mrb[9].mxu0 }
 0x12e   : > { %v1553_v63 = vpop.f32.mrb[9].mxu1  ;;  %v1526_v0 = vadd.f32 %v1525_v62, %v1524_v60  ;;  %v1527_v2 = vpop.f32.mrb[10].mxu0 }
 0x12f   : > { %v1554_v1 = vadd.f32 %v1553_v63, %v1552_v61  ;;  %v1555_v3 = vpop.f32.mrb[10].mxu1  ;;  %v1528_v4 = vpop.f32.mrb[11].mxu0 }
 0x130   : > { %v1556_v5 = vpop.f32.mrb[11].mxu1  ;;  %v1036_v6 = vadd.f32 %v1526_v0, %v987_v43  ;;  %v1529_v7 = vadd.f32 %v1528_v4, %v1527_v2 }
 0x131   : > { %v1557_v8 = vadd.f32 %v1556_v5, %v1555_v3 }
 0x132   : > { %v1085_v9 = vadd.f32 %v1554_v1, %v1036_v6  ;;  %v1039_v10 = vadd.f32 %v1529_v7, %v990_v45 }
 0x134   : > { %v1088_v11 = vadd.f32 %v1557_v8, %v1039_v10  ;;  %v1530_v12 = vpop.f32.mrb[12].mxu0  ;;  %v1109_v14 = vmul.f32 %v1085_v9, %v1085_v9 }
 0x135   : > { %v1558_v13 = vpop.f32.mrb[12].mxu1  ;;  %v1531_v15 = vpop.f32.mrb[13].mxu0 }
 0x136   : > { %v1559_v16 = vpop.f32.mrb[13].mxu1  ;;  %v1099_v17 = vadd.f32 %v1088_v11, %v1085_v9  ;;  %v1110_v18 = vmul.f32 %v1088_v11, %v1088_v11  ;;  %v1444_v19 = vpack.c.bf16 %v1088_v11, %v1085_v9  ;;  %v1532_v20 = vadd.f32 %v1531_v15, %v1530_v12  ;;  %v1533_v21 = vpop.f32.mrb[14].mxu0 }
 0x137   : > { %v1561_v22 = vpop.f32.mrb[14].mxu1  ;;  %v1560_v23 = vadd.f32 %v1559_v16, %v1558_v13  ;;  %v1534_v24 = vpop.f32.mrb[15].mxu0 }
 0x138   : > { %v1562_v25 = vpop.f32.mrb[15].mxu1  ;;  %v1113_v26 = vadd.f32 %v1110_v18, %v1109_v14  ;;  %1445 = vst [vmem:[%s276_s22] sm:$0xff] %v1444_v19   ;;  %v1044_v27 = vadd.f32 %v1532_v20, %v995_v57  ;;  %v1535_v28 = vadd.f32 %v1534_v24, %v1533_v21 }
 0x139   : > { %v1563_v29 = vadd.f32 %v1562_v25, %v1561_v22 }
 0x13a   : > { %v1093_v30 = vadd.f32 %v1560_v23, %v1044_v27  ;;  %v1047_v31 = vadd.f32 %v1535_v28, %v998_v59 }
 0x13c   : > { %v1100_v32 = vadd.f32 %v1099_v17, %v1093_v30  ;;  %v1111_v33 = vmul.f32 %v1093_v30, %v1093_v30  ;;  %v1096_v34 = vadd.f32 %v1563_v29, %v1047_v31 }
 0x13e   : > { %v1114_v35 = vadd.f32 %v1113_v26, %v1111_v33  ;;  %v1101_v36 = vadd.f32 %v1100_v32, %v1096_v34  ;;  %v1112_v37 = vmul.f32 %v1096_v34, %v1096_v34  ;;  %v1449_v38 = vpack.c.bf16 %v1096_v34, %v1093_v30 }
 0x140   : > { %v1102_v39 = vrot.slane %v1101_v36, 4  ;;  %v1115_v40 = vadd.f32 %v1114_v35, %v1112_v37  ;;  %1451 = vst [vmem:[%s276_s22 + $0x8] sm:$0xff] %v1449_v38  }
 0x142   : > { %v1103_v41 = vadd.f32 %v1102_v39, %v1101_v36  ;;  %v1116_v42 = vrot.slane %v1115_v40, 4 }
 0x144   : > { %v1104_v43 = vrot.slane %v1103_v41, 2  ;;  %v1117_v44 = vadd.f32 %v1116_v42, %v1115_v40 }
 0x146   : > { %v1105_v45 = vadd.f32 %v1104_v43, %v1103_v41  ;;  %v1118_v46 = vrot.slane %v1117_v44, 2 }
 0x148   : > { %v1106_v47 = vrot.slane %v1105_v45, 1  ;;  %v1119_v48 = vadd.f32 %v1118_v46, %v1117_v44 }
 0x14a   : > { %v1107_v49 = vadd.f32 %v1106_v47, %v1105_v45  ;;  %v1120_v50 = vrot.slane %v1119_v48, 1 }
 0x14c   : > { %1108 = vst [vmem:[%s283_s27] sm:$0x1] %v1107_v49  ;;  %v1121_v51 = vadd.f32 %v1120_v50, %v1119_v48 }
 0x14e   : > { %1122 = vst [vmem:[%s290_s30] sm:$0x1] %v1121_v51 }
 0x14f PF: > { %s15_s19 = sadd.s32 1, %s1707_s19   ;;  %s1902_s15 = smov %s1699_s17 }
 0x150   : > { %p12_p7 = scmp.ge.s32.totalorder %s15_s19, 6   ;;  %s1903_s16 = smov %s1703_s18 }
 0x151   : > { %s1904_s17 = smov %s1907_s20  ;;  %s1905_s18 = smov %s1911_s21 }
 0x152   :  { %14 = sbr.rel (!%p12_p7) target bundleno = 3 (0x3), region = 86 }

// kernel: gnet_forward.7
= control target key start
LH: loop header
LB: loop body
LE: loop exit
PB: predicated region body
PF: predicated region fallthrough
CT: control target
= control target key end

     0   :  { %s1744_s15 = smov 0   ;;  %s1746_s16 = smov 0   ;;  %s1893_s0 = inlined_call_operand.vmem [shape: bf16[2,9,16,512], index: 0, kind: input, shape index: {}]   ;;  %s1894_s1 = inlined_call_operand.vmem [shape: bf16[2,2,512,128], index: 1, kind: input, shape index: {}]   ;;  %s1895_s2 = inlined_call_operand.vmem [shape: bf16[2,2,128,128], index: 2, kind: output, shape index: {0}]   ;;  %s1896_s3 = inlined_call_operand.vmem [shape: f32[2,2,1,128], index: 3, kind: output, shape index: {1}]   ;;  %s1897_s4 = inlined_call_operand.vmem [shape: f32[2,2,1,128], index: 4, kind: output, shape index: {2}]  }
   0x1   :  { %s1748_s17 = smov 0   ;;  %s1750_s18 = smov 0  }
   0x2   :  { %s1752_s19 = smov 0  }
   0x3 LB: > { %s24_s20 = sadd.s32 1, %s1709_s17  ;;  %s27_s21 = sadd.s32 1, %s1713_s18  ;;  %s1717_s19 = sphi %s1752_s19, %s15_s19   ;;  %s1713_s18 = sphi %s1750_s18, %s1901_s18   ;;  %s1709_s17 = sphi %s1748_s17, %s1900_s17   ;;  %s1705_s16 = sphi %s1746_s16, %s1899_s16   ;;  %s1701_s15 = sphi %s1744_s15, %s1898_s15  }
   0x4   : > { %p25_p0 = scmp.ge.s32.totalorder %s24_s20, 2  ;;  %p1272_p1 = scmp.ge.s32.totalorder %s1717_s19, 1 }
   0x5   : > { %p201_p2 = scmp.lt.s32.totalorder %s1717_s19, 5 }
   0x6   : > { %s1903_s20 = smov (%p25_p0, %s24_s20), 0  ;;  %s1905_s21 = smov (!%p25_p0, %s27_s21), %s1713_s18 }
   0x7   : > { %p202_p3 = pnand %p1272_p1, %p201_p2  ;;  %p29_p4 = scmp.ge.s32.totalorder %s1905_s21, 2 }
   0x8   : > { %p254_p5 = scmp.lt.s32.totalorder (!%p202_p3), %s1701_s15, 1  ;;  %p259_p6 = scmp.lt.s32.totalorder (!%p202_p3), %s1705_s16, 1 }
   0x9   : > { %s1907_s21 = smov (%p29_p4, %s1905_s21), 0  ;;  %205 = sbr.rel (%p202_p3) target bundleno = 349 (0x15d), region = 28 }
   0xa   : > { %s1366_s22 = sshll.u32 (!%p202_p3), %s1705_s16, 5 }
  0x10   : > { %s1909_s15 = smov (!%p254_p5, %s1701_s15), 1  ;;  %s1911_s16 = smov (!%p259_p6, %s1705_s16), 1 }
  0x11   : > { %s1274_s23 = sshll.u32 %s1909_s15, 6  ;;  %s1558_s24 = smul.u32 288, %s1909_s15 }
  0x12   : > { %s1275_s25 = sshll.u32 %s1911_s16, 7  ;;  %s1277_s9 = sshll.u32 %s1909_s15, 4 }
  0x13   : > { %s265_s26 = sadd.s32 %s1275_s25, %s1274_s23  ;;  %s258_s29 = scalar_lea.vmem %s1893_s0, %s1558_s24 }
  0x14   : > { %s1276_s30 = sshll.u32 %s265_s26, 2  ;;  %s1784_s5 = scalar_lea.vmem %s258_s29, %s1366_s22 }
  0x15   : > { %s1789_s8 = scalar_lea.vmem %s1894_s1, %s1276_s30  ;;  %v1631_v30 = vld [vmem:[%s1784_s5] ss:$16 sps:$4 sm:$0xff]   ;;  %v1633_v33 = vld [vmem:[%s1784_s5 + $0x4] ss:$16 sps:$4 sm:$0xff]   ;;  %v1634_v34 = vld [vmem:[%s1784_s5 + $0x8] ss:$16 sps:$4 sm:$0xff]  }
  0x16   : > { %v1599_v0 = vld [vmem:[%s1789_s8 + $0x40] sm:$0xff]   ;;  %v1603_v4 = vld [vmem:[%s1789_s8 + $0x48] sm:$0xff]   ;;  %v1607_v8 = vld [vmem:[%s1789_s8 + $0x50] sm:$0xff]   ;;  %775 = vmatprep.mubr.bf16.mxu0 %v1633_v33  ;;  %s1278_s10 = sshll.u32 %s1911_s16, 5  ;;  %s1280_s23 = sshll.u32 %s1911_s16, 1 }
  0x17   : > { %v1600_v1 = vld [vmem:[%s1789_s8 + $0xc0] sm:$0xff]   ;;  %1430 = vmatprep.subr.bf16.mxu0 %v1599_v0  ;;  %v1604_v5 = vld [vmem:[%s1789_s8 + $0xc8] sm:$0xff]   ;;  %v1608_v9 = vld [vmem:[%s1789_s8 + $0xd0] sm:$0xff]   ;;  %s274_s11 = sadd.s32 %s1278_s10, %s1277_s9  ;;  %s282_s24 = sadd.s32 %s1280_s23, %s1909_s15 }
  0x18   : > { %v1601_v2 = vld [vmem:[%s1789_s8] sm:$0xff]   ;;  %1494 = vmatprep.subr.bf16.mxu1 %v1600_v1  ;;  %v1605_v6 = vld [vmem:[%s1789_s8 + $0x8] sm:$0xff]   ;;  %v1609_v10 = vld [vmem:[%s1789_s8 + $0x10] sm:$0xff]   ;;  %s1279_s12 = sshll.u32 %s274_s11, 2  ;;  %s283_s27 = scalar_lea.vmem %s1896_s3, %s282_s24 }
  0x19   : > { %v1602_v3 = vld [vmem:[%s1789_s8 + $0x80] sm:$0xff]   ;;  %1431 = vmatpush3.bf16.msra.mxu0 %v1601_v2  ;;  %v1606_v7 = vld [vmem:[%s1789_s8 + $0x88] sm:$0xff]   ;;  %v1610_v11 = vld [vmem:[%s1789_s8 + $0x90] sm:$0xff]   ;;  %s1860_s22 = scalar_lea.vmem %s1895_s2, %s1279_s12  ;;  %s290_s30 = scalar_lea.vmem %s1897_s4, %s282_s24 }
  0x1a   : > { %1495 = vmatpush3.bf16.msra.mxu1 %v1602_v3  ;;  %1432 = vmatprep.subr.bf16.mxu0 %v1603_v4  ;;  %v1611_v12 = vld [vmem:[%s1789_s8 + $0x58] sm:$0xff]   ;;  %v1615_v16 = vld [vmem:[%s1789_s8 + $0x60] sm:$0xff]   ;;  %v1619_v20 = vld [vmem:[%s1789_s8 + $0x68] sm:$0xff]  }
  0x1b   : > { %1496 = vmatprep.subr.bf16.mxu1 %v1604_v5  ;;  %v1612_v13 = vld [vmem:[%s1789_s8 + $0xd8] sm:$0xff]   ;;  %v1616_v17 = vld [vmem:[%s1789_s8 + $0xe0] sm:$0xff]   ;;  %v1620_v21 = vld [vmem:[%s1789_s8 + $0xe8] sm:$0xff]  }
  0x1c   : > { %v1613_v14 = vld [vmem:[%s1789_s8 + $0x18] sm:$0xff]   ;;  %v1617_v18 = vld [vmem:[%s1789_s8 + $0x20] sm:$0xff]   ;;  %v1621_v22 = vld [vmem:[%s1789_s8 + $0x28] sm:$0xff]  }
  0x1d   : > { %1433 = vmatpush3.bf16.msra.mxu0 %v1605_v6  ;;  %v1614_v15 = vld [vmem:[%s1789_s8 + $0x98] sm:$0xff]   ;;  %v1618_v19 = vld [vmem:[%s1789_s8 + $0xa0] sm:$0xff]   ;;  %v1622_v23 = vld [vmem:[%s1789_s8 + $0xa8] sm:$0xff]  }
  0x1e   : > { %1497 = vmatpush3.bf16.msra.mxu1 %v1606_v7  ;;  %1434 = vmatprep.subr.bf16.mxu0 %v1607_v8  ;;  %v1623_v24 = vld [vmem:[%s1789_s8 + $0x70] sm:$0xff]   ;;  %v1627_v28 = vld [vmem:[%s1789_s8 + $0x78] sm:$0xff]  }
  0x1f   : > { %1498 = vmatprep.subr.bf16.mxu1 %v1608_v9  ;;  %v1624_v25 = vld [vmem:[%s1789_s8 + $0xf0] sm:$0xff]   ;;  %v1628_v29 = vld [vmem:[%s1789_s8 + $0xf8] sm:$0xff]  }
  0x20   : > { %v1625_v26 = vld [vmem:[%s1789_s8 + $0x30] sm:$0xff]   ;;  %v1629_v31 = vld [vmem:[%s1789_s8 + $0x38] sm:$0xff]  }
  0x21   : > { %1435 = vmatpush3.bf16.msra.mxu0 %v1609_v10  ;;  %v1626_v27 = vld [vmem:[%s1789_s8 + $0xb0] sm:$0xff]   ;;  %v1630_v32 = vld [vmem:[%s1789_s8 + $0xb8] sm:$0xff]  }
  0x22   : > { %1499 = vmatpush3.bf16.msra.mxu1 %v1610_v11  ;;  %1436 = vmatprep.subr.bf16.mxu0 %v1611_v12  ;;  %v1636_v35 = vld [vmem:[%s1784_s5 + $0xc] ss:$16 sps:$4 sm:$0xff]   ;;  %v1637_v36 = vld [vmem:[%s1784_s5 + $0x24] ss:$16 sps:$4 sm:$0xff]   ;;  %v1641_v38 = vld [vmem:[%s1784_s5 + $0x20] ss:$16 sps:$4 sm:$0xff]  }
  0x23   : > { %1500 = vmatprep.subr.bf16.mxu1 %v1612_v13  ;;  %872 = vmatprep.mubr.bf16.mxu1 %v1636_v35  ;;  %v1639_v37 = vld [vmem:[%s1784_s5 + $0x2c] ss:$16 sps:$4 sm:$0xff]   ;;  %v1642_v39 = vld [vmem:[%s1784_s5 + $0x28] ss:$16 sps:$4 sm:$0xff]   ;;  %v1643_v40 = vld [vmem:[%s1784_s5 + $0x44] ss:$16 sps:$4 sm:$0xff]  }
  0x24   : > { %v1645_v41 = vld [vmem:[%s1784_s5 + $0x4c] ss:$16 sps:$4 sm:$0xff]   ;;  %v1647_v42 = vld [vmem:[%s1784_s5 + $0x40] ss:$16 sps:$4 sm:$0xff]   ;;  %v1648_v43 = vld [vmem:[%s1784_s5 + $0x48] ss:$16 sps:$4 sm:$0xff]  }
  0x25   : > { %1437 = vmatpush3.bf16.msra.mxu0 %v1613_v14  ;;  %v1649_v44 = vld [vmem:[%s1784_s5 + $0x64] ss:$16 sps:$4 sm:$0xff]   ;;  %v1651_v45 = vld [vmem:[%s1784_s5 + $0x6c] ss:$16 sps:$4 sm:$0xff]   ;;  %v1653_v46 = vld [vmem:[%s1784_s5 + $0x60] ss:$16 sps:$4 sm:$0xff]  }
  0x26   : > { %1501 = vmatpush3.bf16.msra.mxu1 %v1614_v15  ;;  %1438 = vmatprep.subr.bf16.mxu0 %v1615_v16  ;;  %v1654_v47 = vld [vmem:[%s1784_s5 + $0x68] ss:$16 sps:$4 sm:$0xff]   ;;  %v1655_v48 = vld [vmem:[%s1784_s5 + $0x84] ss:$16 sps:$4 sm:$0xff]   ;;  %v1657_v49 = vld [vmem:[%s1784_s5 + $0x8c] ss:$16 sps:$4 sm:$0xff]  }
  0x27   : > { %1502 = vmatprep.subr.bf16.mxu1 %v1616_v17  ;;  %v1659_v50 = vld [vmem:[%s1784_s5 + $0x80] ss:$16 sps:$4 sm:$0xff]   ;;  %v1660_v51 = vld [vmem:[%s1784_s5 + $0x88] ss:$16 sps:$4 sm:$0xff]   ;;  %v1661_v52 = vld [vmem:[%s1784_s5 + $0xa4] ss:$16 sps:$4 sm:$0xff]  }
  0x28   : > { %v1663_v53 = vld [vmem:[%s1784_s5 + $0xac] ss:$16 sps:$4 sm:$0xff]   ;;  %v1665_v54 = vld [vmem:[%s1784_s5 + $0xa0] ss:$16 sps:$4 sm:$0xff]   ;;  %v1666_v55 = vld [vmem:[%s1784_s5 + $0xa8] ss:$16 sps:$4 sm:$0xff]  }
  0x29   : > { %1439 = vmatpush3.bf16.msra.mxu0 %v1617_v18  ;;  %v1667_v56 = vld [vmem:[%s1784_s5 + $0xc4] ss:$16 sps:$4 sm:$0xff]   ;;  %v1669_v57 = vld [vmem:[%s1784_s5 + $0xcc] ss:$16 sps:$4 sm:$0xff]   ;;  %v1671_v58 = vld [vmem:[%s1784_s5 + $0xc0] ss:$16 sps:$4 sm:$0xff]  }
  0x2a   : > { %1503 = vmatpush3.bf16.msra.mxu1 %v1618_v19  ;;  %1440 = vmatprep.subr.bf16.mxu0 %v1619_v20  ;;  %v1672_v59 = vld [vmem:[%s1784_s5 + $0xc8] ss:$16 sps:$4 sm:$0xff]   ;;  %v1673_v60 = vld [vmem:[%s1784_s5 + $0xe4] ss:$16 sps:$4 sm:$0xff]   ;;  %v1675_v61 = vld [vmem:[%s1784_s5 + $0xec] ss:$16 sps:$4 sm:$0xff]  }
  0x2b   : > { %1504 = vmatprep.subr.bf16.mxu1 %v1620_v21  ;;  %v1677_v62 = vld [vmem:[%s1784_s5 + $0xe0] ss:$16 sps:$4 sm:$0xff]   ;;  %v1678_v63 = vld [vmem:[%s1784_s5 + $0xe8] ss:$16 sps:$4 sm:$0xff]  }
  0x2d   : > { %1441 = vmatpush3.bf16.msra.mxu0 %v1621_v22 }
  0x2e   : > { %1505 = vmatpush3.bf16.msra.mxu1 %v1622_v23  ;;  %1442 = vmatprep.subr.bf16.mxu0 %v1623_v24 }
  0x2f   : > { %1506 = vmatprep.subr.bf16.mxu1 %v1624_v25 }
  0x31   : > { %1443 = vmatpush3.bf16.msra.mxu0 %v1625_v26 }
  0x32   : > { %1507 = vmatpush3.bf16.msra.mxu1 %v1626_v27  ;;  %1444 = vmatprep.subr.bf16.mxu0 %v1627_v28 }
  0x33   : > { %1508 = vmatprep.subr.bf16.mxu1 %v1628_v29 }
  0x35   : > { %1445 = vmatpush3.bf16.msra.mxu0 %v1629_v31 }
  0x36   : > { %1509 = vmatpush3.bf16.msra.mxu1 %v1630_v32 }
  0x38   : > { %776 = vmatmul.mubr.bf16.vlgmr.msra.gmra.mrb[0].mxu0 %v1631_v30 }
  0x39   : > { %873 = vmatmul.mubr.bf16.vlgmr.msra.gmra.mrb[0].mxu1 %v1634_v34  ;;  %783 = vmatprep.mubr.bf16.mxu0 %v1637_v36 }
  0x3a   : > { %880 = vmatprep.mubr.bf16.mxu1 %v1639_v37 }
  0x40   : > { %784 = vmatmul.mubr.bf16.gmra.mrb[4].mxu0 %v1641_v38 }
  0x41   : > { %881 = vmatmul.mubr.bf16.gmra.mrb[4].mxu1 %v1642_v39  ;;  %791 = vmatprep.mubr.bf16.mxu0 %v1643_v40 }
  0x42   : > { %888 = vmatprep.mubr.bf16.mxu1 %v1645_v41 }
  0x48   : > { %792 = vmatmul.mubr.bf16.gmra.mrb[8].mxu0 %v1647_v42 }
  0x49   : > { %889 = vmatmul.mubr.bf16.gmra.mrb[8].mxu1 %v1648_v43  ;;  %799 = vmatprep.mubr.bf16.mxu0 %v1649_v44 }
  0x4a   : > { %896 = vmatprep.mubr.bf16.mxu1 %v1651_v45 }
  0x50   : > { %800 = vmatmul.mubr.bf16.gmra.mrb[12].mxu0 %v1653_v46 }
  0x51   : > { %897 = vmatmul.mubr.bf16.gmra.mrb[12].mxu1 %v1654_v47  ;;  %807 = vmatprep.mubr.bf16.mxu0 %v1655_v48 }
  0x52   : > { %904 = vmatprep.mubr.bf16.mxu1 %v1657_v49 }
  0x58   : > { %808 = vmatmul.mubr.bf16.gmra.mrb[16].mxu0 %v1659_v50 }
  0x59   : > { %905 = vmatmul.mubr.bf16.gmra.mrb[16].mxu1 %v1660_v51  ;;  %815 = vmatprep.mubr.bf16.mxu0 %v1661_v52 }
  0x5a   : > { %912 = vmatprep.mubr.bf16.mxu1 %v1663_v53 }
  0x60   : > { %816 = vmatmul.mubr.bf16.gmra.mrb[20].mxu0 %v1665_v54 }
  0x61   : > { %913 = vmatmul.mubr.bf16.gmra.mrb[20].mxu1 %v1666_v55  ;;  %823 = vmatprep.mubr.bf16.mxu0 %v1667_v56 }
  0x62   : > { %920 = vmatprep.mubr.bf16.mxu1 %v1669_v57 }
  0x68   : > { %824 = vmatmul.mubr.bf16.gmra.mrb[24].mxu0 %v1671_v58 }
  0x69   : > { %921 = vmatmul.mubr.bf16.gmra.mrb[24].mxu1 %v1672_v59  ;;  %831 = vmatprep.mubr.bf16.mxu0 %v1673_v60 }
  0x6a   : > { %928 = vmatprep.mubr.bf16.mxu1 %v1675_v61 }
  0x70   : > { %832 = vmatmul.mubr.bf16.gmra.mrb[28].mxu0 %v1677_v62 }
  0x71   : > { %929 = vmatmul.mubr.bf16.gmra.mrb[28].mxu1 %v1678_v63 }
 0x10b   : > { %v1446_v0 = vpop.f32.mrb[0].mxu0 }
 0x10c   : > { %v1510_v1 = vpop.f32.mrb[0].mxu1  ;;  %v1447_v2 = vpop.f32.mrb[1].mxu0 }
 0x10d   : > { %v1448_v3 = vadd.f32 %v1447_v2, %v1446_v0  ;;  %v1511_v4 = vpop.f32.mrb[1].mxu1  ;;  %v1449_v5 = vpop.f32.mrb[2].mxu0 }
 0x10e   : > { %v1512_v6 = vadd.f32 %v1511_v4, %v1510_v1  ;;  %v1513_v7 = vpop.f32.mrb[2].mxu1  ;;  %v1450_v8 = vpop.f32.mrb[3].mxu0 }
 0x10f   : > { %v1451_v9 = vadd.f32 %v1450_v8, %v1449_v5  ;;  %v1514_v10 = vpop.f32.mrb[3].mxu1 }
 0x110   : > { %v875_v11 = vadd.f32 %v1512_v6, %v1448_v3  ;;  %v1515_v12 = vadd.f32 %v1514_v10, %v1513_v7 }
 0x112   : > { %v878_v13 = vadd.f32 %v1515_v12, %v1451_v9  ;;  %v959_v15 = vmul.f32 %v875_v11, %v875_v11 }
 0x113   : > { %v1452_v14 = vpop.f32.mrb[4].mxu0 }
 0x114   : > { %v937_v16 = vadd.f32 %v878_v13, %v875_v11  ;;  %v960_v17 = vmul.f32 %v878_v13, %v878_v13  ;;  %v1386_v18 = vpack.c.bf16 %v878_v13, %v875_v11  ;;  %v1516_v19 = vpop.f32.mrb[4].mxu1  ;;  %v1453_v20 = vpop.f32.mrb[5].mxu0 }
 0x115   : > { %v1454_v21 = vadd.f32 %v1453_v20, %v1452_v14  ;;  %v1517_v22 = vpop.f32.mrb[5].mxu1  ;;  %v1455_v23 = vpop.f32.mrb[6].mxu0 }
 0x116   : > { %v975_v24 = vadd.f32 %v960_v17, %v959_v15  ;;  %1387 = vst [vmem:[%s1860_s22] sm:$0xff] %v1386_v18   ;;  %v1518_v25 = vadd.f32 %v1517_v22, %v1516_v19  ;;  %v1519_v26 = vpop.f32.mrb[6].mxu1  ;;  %v1456_v27 = vpop.f32.mrb[7].mxu0 }
 0x117   : > { %v1457_v28 = vadd.f32 %v1456_v27, %v1455_v23  ;;  %v1520_v29 = vpop.f32.mrb[7].mxu1 }
 0x118   : > { %v883_v30 = vadd.f32 %v1518_v25, %v1454_v21  ;;  %v1521_v31 = vadd.f32 %v1520_v29, %v1519_v26 }
 0x11a   : > { %v938_v32 = vadd.f32 %v937_v16, %v883_v30  ;;  %v961_v33 = vmul.f32 %v883_v30, %v883_v30  ;;  %v886_v34 = vadd.f32 %v1521_v31, %v1457_v28 }
 0x11b   : > { %v1458_v35 = vpop.f32.mrb[8].mxu0 }
 0x11c   : > { %v976_v36 = vadd.f32 %v975_v24, %v961_v33  ;;  %v939_v37 = vadd.f32 %v938_v32, %v886_v34  ;;  %v962_v38 = vmul.f32 %v886_v34, %v886_v34  ;;  %v1391_v39 = vpack.c.bf16 %v886_v34, %v883_v30  ;;  %v1522_v40 = vpop.f32.mrb[8].mxu1  ;;  %v1459_v41 = vpop.f32.mrb[9].mxu0 }
 0x11d   : > { %v1460_v42 = vadd.f32 %v1459_v41, %v1458_v35  ;;  %v1523_v43 = vpop.f32.mrb[9].mxu1  ;;  %v1461_v44 = vpop.f32.mrb[10].mxu0 }
 0x11e   : > { %v977_v45 = vadd.f32 %v976_v36, %v962_v38  ;;  %1423 = vst [vmem:[%s1860_s22 + $0x8] sm:$0xff] %v1391_v39   ;;  %v1524_v46 = vadd.f32 %v1523_v43, %v1522_v40  ;;  %v1525_v47 = vpop.f32.mrb[10].mxu1  ;;  %v1462_v48 = vpop.f32.mrb[11].mxu0 }
 0x11f   : > { %v1463_v49 = vadd.f32 %v1462_v48, %v1461_v44  ;;  %v1526_v50 = vpop.f32.mrb[11].mxu1 }
 0x120   : > { %v891_v51 = vadd.f32 %v1524_v46, %v1460_v42  ;;  %v1527_v52 = vadd.f32 %v1526_v50, %v1525_v47 }
 0x122   : > { %v940_v53 = vadd.f32 %v939_v37, %v891_v51  ;;  %v963_v54 = vmul.f32 %v891_v51, %v891_v51  ;;  %v894_v55 = vadd.f32 %v1527_v52, %v1463_v49 }
 0x123   : > { %v1464_v56 = vpop.f32.mrb[12].mxu0 }
 0x124   : > { %v978_v57 = vadd.f32 %v977_v45, %v963_v54  ;;  %v941_v58 = vadd.f32 %v940_v53, %v894_v55  ;;  %v964_v59 = vmul.f32 %v894_v55, %v894_v55  ;;  %v1396_v60 = vpack.c.bf16 %v894_v55, %v891_v51  ;;  %v1528_v61 = vpop.f32.mrb[12].mxu1  ;;  %v1465_v62 = vpop.f32.mrb[13].mxu0 }
 0x125   : > { %v1466_v63 = vadd.f32 %v1465_v62, %v1464_v56  ;;  %v1529_v0 = vpop.f32.mrb[13].mxu1  ;;  %v1467_v1 = vpop.f32.mrb[14].mxu0 }
 0x126   : > { %v979_v2 = vadd.f32 %v978_v57, %v964_v59  ;;  %1424 = vst [vmem:[%s1860_s22 + $0x10] sm:$0xff] %v1396_v60   ;;  %v1530_v3 = vadd.f32 %v1529_v0, %v1528_v61  ;;  %v1531_v4 = vpop.f32.mrb[14].mxu1  ;;  %v1468_v5 = vpop.f32.mrb[15].mxu0 }
 0x127   : > { %v1469_v6 = vadd.f32 %v1468_v5, %v1467_v1  ;;  %v1532_v7 = vpop.f32.mrb[15].mxu1 }
 0x128   : > { %v899_v8 = vadd.f32 %v1530_v3, %v1466_v63  ;;  %v1533_v9 = vadd.f32 %v1532_v7, %v1531_v4 }
 0x12a   : > { %v942_v10 = vadd.f32 %v941_v58, %v899_v8  ;;  %v965_v11 = vmul.f32 %v899_v8, %v899_v8  ;;  %v902_v12 = vadd.f32 %v1533_v9, %v1469_v6 }
 0x12b   : > { %v1470_v13 = vpop.f32.mrb[16].mxu0 }
 0x12c   : > { %v980_v14 = vadd.f32 %v979_v2, %v965_v11  ;;  %v943_v15 = vadd.f32 %v942_v10, %v902_v12  ;;  %v966_v16 = vmul.f32 %v902_v12, %v902_v12  ;;  %v1401_v17 = vpack.c.bf16 %v902_v12, %v899_v8  ;;  %v1534_v18 = vpop.f32.mrb[16].mxu1  ;;  %v1471_v19 = vpop.f32.mrb[17].mxu0 }
 0x12d   : > { %v1472_v20 = vadd.f32 %v1471_v19, %v1470_v13  ;;  %v1535_v21 = vpop.f32.mrb[17].mxu1  ;;  %v1473_v22 = vpop.f32.mrb[18].mxu0 }
 0x12e   : > { %v981_v23 = vadd.f32 %v980_v14, %v966_v16  ;;  %1425 = vst [vmem:[%s1860_s22 + $0x18] sm:$0xff] %v1401_v17   ;;  %v1536_v24 = vadd.f32 %v1535_v21, %v1534_v18  ;;  %v1537_v25 = vpop.f32.mrb[18].mxu1  ;;  %v1474_v26 = vpop.f32.mrb[19].mxu0 }
 0x12f   : > { %v1475_v27 = vadd.f32 %v1474_v26, %v1473_v22  ;;  %v1538_v28 = vpop.f32.mrb[19].mxu1 }
 0x130   : > { %v907_v29 = vadd.f32 %v1536_v24, %v1472_v20  ;;  %v1539_v30 = vadd.f32 %v1538_v28, %v1537_v25 }
 0x132   : > { %v944_v31 = vadd.f32 %v943_v15, %v907_v29  ;;  %v967_v32 = vmul.f32 %v907_v29, %v907_v29  ;;  %v910_v33 = vadd.f32 %v1539_v30, %v1475_v27 }
 0x133   : > { %v1476_v34 = vpop.f32.mrb[20].mxu0 }
 0x134   : > { %v982_v35 = vadd.f32 %v981_v23, %v967_v32  ;;  %v945_v36 = vadd.f32 %v944_v31, %v910_v33  ;;  %v968_v37 = vmul.f32 %v910_v33, %v910_v33  ;;  %v1406_v38 = vpack.c.bf16 %v910_v33, %v907_v29  ;;  %v1540_v39 = vpop.f32.mrb[20].mxu1  ;;  %v1477_v40 = vpop.f32.mrb[21].mxu0 }
 0x135   : > { %v1478_v41 = vadd.f32 %v1477_v40, %v1476_v34  ;;  %v1541_v42 = vpop.f32.mrb[21].mxu1  ;;  %v1479_v43 = vpop.f32.mrb[22].mxu0 }
 0x136   : > { %v983_v44 = vadd.f32 %v982_v35, %v968_v37  ;;  %1426 = vst [vmem:[%s1860_s22 + $0x20] sm:$0xff] %v1406_v38   ;;  %v1542_v45 = vadd.f32 %v1541_v42, %v1540_v39  ;;  %v1543_v46 = vpop.f32.mrb[22].mxu1  ;;  %v1480_v47 = vpop.f32.mrb[23].mxu0 }
 0x137   : > { %v1481_v48 = vadd.f32 %v1480_v47, %v1479_v43  ;;  %v1544_v49 = vpop.f32.mrb[23].mxu1 }
 0x138   : > { %v915_v50 = vadd.f32 %v1542_v45, %v1478_v41  ;;  %v1545_v51 = vadd.f32 %v1544_v49, %v1543_v46 }
 0x13a   : > { %v946_v52 = vadd.f32 %v945_v36, %v915_v50  ;;  %v969_v53 = vmul.f32 %v915_v50, %v915_v50  ;;  %v918_v54 = vadd.f32 %v1545_v51, %v1481_v48 }
 0x13b   : > { %v1482_v55 = vpop.f32.mrb[24].mxu0 }
 0x13c   : > { %v984_v56 = vadd.f32 %v983_v44, %v969_v53  ;;  %v947_v57 = vadd.f32 %v946_v52, %v918_v54  ;;  %v970_v58 = vmul.f32 %v918_v54, %v918_v54  ;;  %v1411_v59 = vpack.c.bf16 %v918_v54, %v915_v50  ;;  %v1546_v60 = vpop.f32.mrb[24].mxu1  ;;  %v1483_v61 = vpop.f32.mrb[25].mxu0 }
 0x13d   : > { %v1484_v62 = vadd.f32 %v1483_v61, %v1482_v55  ;;  %v1547_v63 = vpop.f32.mrb[25].mxu1  ;;  %v1485_v0 = vpop.f32.mrb[26].mxu0 }
 0x13e   : > { %v985_v1 = vadd.f32 %v984_v56, %v970_v58  ;;  %1427 = vst [vmem:[%s1860_s22 + $0x28] sm:$0xff] %v1411_v59   ;;  %v1548_v2 = vadd.f32 %v1547_v63, %v1546_v60  ;;  %v1549_v3 = vpop.f32.mrb[26].mxu1  ;;  %v1486_v4 = vpop.f32.mrb[27].mxu0 }
 0x13f   : > { %v1487_v5 = vadd.f32 %v1486_v4, %v1485_v0  ;;  %v1550_v6 = vpop.f32.mrb[27].mxu1 }
 0x140   : > { %v923_v7 = vadd.f32 %v1548_v2, %v1484_v62  ;;  %v1551_v8 = vadd.f32 %v1550_v6, %v1549_v3 }
 0x142   : > { %v948_v9 = vadd.f32 %v947_v57, %v923_v7  ;;  %v971_v10 = vmul.f32 %v923_v7, %v923_v7  ;;  %v926_v11 = vadd.f32 %v1551_v8, %v1487_v5 }
 0x143   : > { %v1488_v12 = vpop.f32.mrb[28].mxu0 }
 0x144   : > { %v986_v13 = vadd.f32 %v985_v1, %v971_v10  ;;  %v949_v14 = vadd.f32 %v948_v9, %v926_v11  ;;  %v972_v15 = vmul.f32 %v926_v11, %v926_v11  ;;  %v1416_v16 = vpack.c.bf16 %v926_v11, %v923_v7  ;;  %v1552_v17 = vpop.f32.mrb[28].mxu1  ;;  %v1489_v18 = vpop.f32.mrb[29].mxu0 }
 0x145   : > { %v1490_v19 = vadd.f32 %v1489_v18, %v1488_v12  ;;  %v1553_v20 = vpop.f32.mrb[29].mxu1  ;;  %v1491_v21 = vpop.f32.mrb[30].mxu0 }
 0x146   : > { %v987_v22 = vadd.f32 %v986_v13, %v972_v15  ;;  %1428 = vst [vmem:[%s1860_s22 + $0x30] sm:$0xff] %v1416_v16   ;;  %v1554_v23 = vadd.f32 %v1553_v20, %v1552_v17  ;;  %v1555_v24 = vpop.f32.mrb[30].mxu1  ;;  %v1492_v25 = vpop.f32.mrb[31].mxu0 }
 0x147   : > { %v1493_v26 = vadd.f32 %v1492_v25, %v1491_v21  ;;  %v1556_v27 = vpop.f32.mrb[31].mxu1 }
 0x148   : > { %v931_v28 = vadd.f32 %v1554_v23, %v1490_v19  ;;  %v1557_v29 = vadd.f32 %v1556_v27, %v1555_v24 }
 0x14a   : > { %v950_v30 = vadd.f32 %v949_v14, %v931_v28  ;;  %v973_v31 = vmul.f32 %v931_v28, %v931_v28  ;;  %v934_v32 = vadd.f32 %v1557_v29, %v1493_v26 }
 0x14c   : > { %v988_v33 = vadd.f32 %v987_v22, %v973_v31  ;;  %v951_v34 = vadd.f32 %v950_v30, %v934_v32  ;;  %v974_v35 = vmul.f32 %v934_v32, %v934_v32  ;;  %v1421_v36 = vpack.c.bf16 %v934_v32, %v931_v28 }
 0x14e   : > { %v952_v37 = vrot.slane %v951_v34, 4  ;;  %v989_v38 = vadd.f32 %v988_v33, %v974_v35  ;;  %1429 = vst [vmem:[%s1860_s22 + $0x38] sm:$0xff] %v1421_v36  }
 0x150   : > { %v953_v39 = vadd.f32 %v952_v37, %v951_v34  ;;  %v990_v40 = vrot.slane %v989_v38, 4 }
 0x152   : > { %v954_v41 = vrot.slane %v953_v39, 2  ;;  %v991_v42 = vadd.f32 %v990_v40, %v989_v38 }
 0x154   : > { %v955_v43 = vadd.f32 %v954_v41, %v953_v39  ;;  %v992_v44 = vrot.slane %v991_v42, 2 }
 0x156   : > { %v956_v45 = vrot.slane %v955_v43, 1  ;;  %v993_v46 = vadd.f32 %v992_v44, %v991_v42 }
 0x158   : > { %v957_v47 = vadd.f32 %v956_v45, %v955_v43  ;;  %v994_v48 = vrot.slane %v993_v46, 1 }
 0x15a   : > { %958 = vst [vmem:[%s283_s27] sm:$0x1] %v957_v47  ;;  %v995_v49 = vadd.f32 %v994_v48, %v993_v46 }
 0x15c   : > { %996 = vst [vmem:[%s290_s30] sm:$0x1] %v995_v49 }
 0x15d PF: > { %s15_s19 = sadd.s32 1, %s1717_s19   ;;  %s1898_s15 = smov %s1709_s17 }
 0x15e   : > { %p12_p7 = scmp.ge.s32.totalorder %s15_s19, 6   ;;  %s1899_s16 = smov %s1713_s18 }
 0x15f   : > { %s1900_s17 = smov %s1903_s20  ;;  %s1901_s18 = smov %s1907_s21 }
 0x160   :  { %14 = sbr.rel (!%p12_p7) target bundleno = 3 (0x3), region = 86 }

// kernel: gnet_forward.8
= control target key start
LH: loop header
LB: loop body
LE: loop exit
PB: predicated region body
PF: predicated region fallthrough
CT: control target
= control target key end

     0   :  { %s2481_s15 = smov 0   ;;  %s2483_s16 = smov 0   ;;  %s2899_s0 = inlined_call_operand.vmem [shape: bf16[2,17,32,256], index: 0, kind: input, shape index: {}]   ;;  %s2900_s1 = inlined_call_operand.vmem [shape: bf16[2,2,256,128], index: 1, kind: input, shape index: {}]   ;;  %s2901_s2 = inlined_call_operand.vmem [shape: bf16[2,2,512,128], index: 2, kind: output, shape index: {0}]   ;;  %s2902_s3 = inlined_call_operand.vmem [shape: f32[2,2,1,128], index: 3, kind: output, shape index: {1}]   ;;  %s2903_s4 = inlined_call_operand.vmem [shape: f32[2,2,1,128], index: 4, kind: output, shape index: {2}]  }
   0x1   :  { %s2485_s17 = smov 0   ;;  %s2487_s18 = smov 0  }
   0x2   :  { %s2489_s19 = smov 0  }
   0x3 LB: > { %s24_s20 = sadd.s32 1, %s2445_s17  ;;  %s27_s21 = sadd.s32 1, %s2449_s18  ;;  %s2453_s19 = sphi %s2489_s19, %s15_s19   ;;  %s2449_s18 = sphi %s2487_s18, %s2907_s18   ;;  %s2445_s17 = sphi %s2485_s17, %s2906_s17   ;;  %s2441_s16 = sphi %s2483_s16, %s2905_s16   ;;  %s2437_s15 = sphi %s2481_s15, %s2904_s15  }
   0x4   : > { %p25_p0 = scmp.ge.s32.totalorder %s24_s20, 2  ;;  %p1815_p1 = scmp.ge.s32.totalorder %s2453_s19, 1 }
   0x5   : > { %p201_p2 = scmp.lt.s32.totalorder %s2453_s19, 5 }
   0x6   : > { %s2909_s20 = smov (%p25_p0, %s24_s20), 0  ;;  %s2911_s21 = smov (!%p25_p0, %s27_s21), %s2449_s18 }
   0x7   : > { %p202_p3 = pnand %p1815_p1, %p201_p2  ;;  %p29_p4 = scmp.ge.s32.totalorder %s2911_s21, 2 }
   0x8   : > { %p254_p5 = scmp.lt.s32.totalorder (!%p202_p3), %s2437_s15, 1  ;;  %p259_p6 = scmp.lt.s32.totalorder (!%p202_p3), %s2441_s16, 1  ;;  %v2455_v0 = vmov (!%p202_p3), 0  }
   0x9   : > { %s2913_s21 = smov (%p29_p4, %s2911_s21), 0  ;;  %205 = sbr.rel (%p202_p3) target bundleno = 501 (0x1f5), region = 28 }
   0xa   : > { %807 = vmatprep.subr.bf16.mxu0 (!%p202_p3), %v2455_v0  ;;  %s1973_s22 = sshll.u32 (!%p202_p3), %s2441_s16, 5  ;;  %2229 = vmatprep.subr.bf16.mxu1 (!%p202_p3), %v2455_v0 }
  0x10   : > { %s2915_s15 = smov (!%p254_p5, %s2437_s15), 1  ;;  %s2917_s16 = smov (!%p259_p6, %s2441_s16), 1 }
  0x11   : > { %s2261_s23 = smul.u32 544, %s2915_s15  ;;  %s1817_s24 = sshll.u32 %s2915_s15, 5 }
  0x12   : > { %s1818_s25 = sshll.u32 %s2917_s16, 6  ;;  %s1820_s9 = sshll.u32 %s2915_s15, 6 }
  0x13   : > { %s258_s28 = scalar_lea.vmem %s2899_s0, %s2261_s23  ;;  %s265_s29 = sadd.s32 %s1818_s25, %s1817_s24 }
  0x14   : > { %s1819_s30 = sshll.u32 %s265_s29, 2  ;;  %s2528_s5 = scalar_lea.vmem %s258_s28, %s1973_s22 }
  0x15   : > { %s2533_s8 = scalar_lea.vmem %s2900_s1, %s1819_s30  ;;  %v2321_v6 = vld [vmem:[%s2528_s5 + $0x4] ss:$8 sps:$4 sm:$0xff]   ;;  %v2319_v19 = vld [vmem:[%s2528_s5] ss:$8 sps:$4 sm:$0xff]   ;;  %v2322_v20 = vld [vmem:[%s2528_s5 + $0x14] ss:$8 sps:$4 sm:$0xff]  }
  0x16   : > { %v2303_v1 = vld [vmem:[%s2533_s8] sm:$0xff]   ;;  %v2304_v2 = vld [vmem:[%s2533_s8 + $0x8] sm:$0xff]   ;;  %v2305_v3 = vld [vmem:[%s2533_s8 + $0x10] sm:$0xff]   ;;  %839 = vmatprep.mubr.bf16.mxu0 %v2321_v6  ;;  %s1821_s10 = sshll.u32 %s2917_s16, 7  ;;  %s1823_s23 = sshll.u32 %s2917_s16, 1 }
  0x17   : > { %808 = vmatpush1.bf16.msra.mxu0 %v2303_v1  ;;  %2245 = vmatpush1.bf16.msra.mxu1 %v2303_v1  ;;  %v2306_v4 = vld [vmem:[%s2533_s8 + $0x18] sm:$0xff]   ;;  %v2307_v5 = vld [vmem:[%s2533_s8 + $0x20] sm:$0xff]   ;;  %v2308_v7 = vld [vmem:[%s2533_s8 + $0x28] sm:$0xff]   ;;  %s274_s11 = sadd.s32 %s1821_s10, %s1820_s9  ;;  %s282_s24 = sadd.s32 %s1823_s23, %s2915_s15 }
  0x18   : > { %809 = vmatprep.subr.bf16.mxu0 %v2455_v0  ;;  %2230 = vmatprep.subr.bf16.mxu1 %v2455_v0  ;;  %v2309_v8 = vld [vmem:[%s2533_s8 + $0x30] sm:$0xff]   ;;  %v2310_v9 = vld [vmem:[%s2533_s8 + $0x38] sm:$0xff]   ;;  %v2345_v10 = vld [vmem:[%s2528_s5 + $0x104] ss:$8 sps:$4 sm:$0xff]   ;;  %s1822_s12 = sshll.u32 %s274_s11, 2  ;;  %s283_s27 = scalar_lea.vmem %s2902_s3, %s282_s24 }
  0x19   : > { %967 = vmatprep.mubr.bf16.mxu1 %v2345_v10  ;;  %v2311_v11 = vld [vmem:[%s2533_s8 + $0x40] sm:$0xff]   ;;  %v2312_v12 = vld [vmem:[%s2533_s8 + $0x48] sm:$0xff]   ;;  %v2313_v13 = vld [vmem:[%s2533_s8 + $0x50] sm:$0xff]   ;;  %s2652_s22 = scalar_lea.vmem %s2901_s2, %s1822_s12  ;;  %s290_s30 = scalar_lea.vmem %s2903_s4, %s282_s24 }
  0x1a   : > { %v2314_v14 = vld [vmem:[%s2533_s8 + $0x58] sm:$0xff]   ;;  %v2315_v15 = vld [vmem:[%s2533_s8 + $0x60] sm:$0xff]   ;;  %v2316_v16 = vld [vmem:[%s2533_s8 + $0x68] sm:$0xff]  }
  0x1b   : > { %810 = vmatpush1.bf16.msra.mxu0 %v2304_v2  ;;  %2246 = vmatpush1.bf16.msra.mxu1 %v2304_v2  ;;  %v2317_v17 = vld [vmem:[%s2533_s8 + $0x70] sm:$0xff]   ;;  %v2318_v18 = vld [vmem:[%s2533_s8 + $0x78] sm:$0xff]   ;;  %v2343_v21 = vld [vmem:[%s2528_s5 + $0x100] ss:$8 sps:$4 sm:$0xff]  }
  0x1c   : > { %811 = vmatprep.subr.bf16.mxu0 %v2455_v0  ;;  %2231 = vmatprep.subr.bf16.mxu1 %v2455_v0  ;;  %v2349_v22 = vld [vmem:[%s2528_s5 + $0x114] ss:$8 sps:$4 sm:$0xff]   ;;  %v2324_v23 = vld [vmem:[%s2528_s5 + $0x10] ss:$8 sps:$4 sm:$0xff]   ;;  %v2325_v24 = vld [vmem:[%s2528_s5 + $0x24] ss:$8 sps:$4 sm:$0xff]  }
  0x1d   : > { %v2351_v25 = vld [vmem:[%s2528_s5 + $0x110] ss:$8 sps:$4 sm:$0xff]   ;;  %v2355_v26 = vld [vmem:[%s2528_s5 + $0x124] ss:$8 sps:$4 sm:$0xff]   ;;  %v2327_v27 = vld [vmem:[%s2528_s5 + $0x20] ss:$8 sps:$4 sm:$0xff]  }
  0x1e   : > { %v2328_v28 = vld [vmem:[%s2528_s5 + $0x34] ss:$8 sps:$4 sm:$0xff]   ;;  %v2357_v29 = vld [vmem:[%s2528_s5 + $0x120] ss:$8 sps:$4 sm:$0xff]   ;;  %v2330_v31 = vld [vmem:[%s2528_s5 + $0x30] ss:$8 sps:$4 sm:$0xff]  }
  0x1f   : > { %812 = vmatpush1.bf16.msra.mxu0 %v2305_v3  ;;  %2247 = vmatpush1.bf16.msra.mxu1 %v2305_v3  ;;  %v2361_v30 = vld [vmem:[%s2528_s5 + $0x134] ss:$8 sps:$4 sm:$0xff]   ;;  %v2331_v32 = vld [vmem:[%s2528_s5 + $0x44] ss:$8 sps:$4 sm:$0xff]   ;;  %v2363_v33 = vld [vmem:[%s2528_s5 + $0x130] ss:$8 sps:$4 sm:$0xff]  }
  0x20   : > { %813 = vmatprep.subr.bf16.mxu0 %v2455_v0  ;;  %2232 = vmatprep.subr.bf16.mxu1 %v2455_v0  ;;  %v2367_v34 = vld [vmem:[%s2528_s5 + $0x144] ss:$8 sps:$4 sm:$0xff]   ;;  %v2333_v35 = vld [vmem:[%s2528_s5 + $0x40] ss:$8 sps:$4 sm:$0xff]   ;;  %v2334_v36 = vld [vmem:[%s2528_s5 + $0x54] ss:$8 sps:$4 sm:$0xff]  }
  0x21   : > { %v2369_v37 = vld [vmem:[%s2528_s5 + $0x140] ss:$8 sps:$4 sm:$0xff]   ;;  %v2373_v38 = vld [vmem:[%s2528_s5 + $0x154] ss:$8 sps:$4 sm:$0xff]   ;;  %v2336_v39 = vld [vmem:[%s2528_s5 + $0x50] ss:$8 sps:$4 sm:$0xff]  }
  0x22   : > { %v2337_v40 = vld [vmem:[%s2528_s5 + $0x64] ss:$8 sps:$4 sm:$0xff]   ;;  %v2375_v41 = vld [vmem:[%s2528_s5 + $0x150] ss:$8 sps:$4 sm:$0xff]   ;;  %v2339_v43 = vld [vmem:[%s2528_s5 + $0x60] ss:$8 sps:$4 sm:$0xff]  }
  0x23   : > { %814 = vmatpush1.bf16.msra.mxu0 %v2306_v4  ;;  %2248 = vmatpush1.bf16.msra.mxu1 %v2306_v4  ;;  %v2379_v42 = vld [vmem:[%s2528_s5 + $0x164] ss:$8 sps:$4 sm:$0xff]   ;;  %v2340_v44 = vld [vmem:[%s2528_s5 + $0x74] ss:$8 sps:$4 sm:$0xff]   ;;  %v2381_v45 = vld [vmem:[%s2528_s5 + $0x160] ss:$8 sps:$4 sm:$0xff]  }
  0x24   : > { %815 = vmatprep.subr.bf16.mxu0 %v2455_v0  ;;  %2233 = vmatprep.subr.bf16.mxu1 %v2455_v0  ;;  %v2385_v46 = vld [vmem:[%s2528_s5 + $0x174] ss:$8 sps:$4 sm:$0xff]   ;;  %v2342_v47 = vld [vmem:[%s2528_s5 + $0x70] ss:$8 sps:$4 sm:$0xff]   ;;  %v2346_v48 = vld [vmem:[%s2528_s5 + $0x84] ss:$8 sps:$4 sm:$0xff]  }
  0x25   : > { %v2387_v49 = vld [vmem:[%s2528_s5 + $0x170] ss:$8 sps:$4 sm:$0xff]   ;;  %v2391_v50 = vld [vmem:[%s2528_s5 + $0x184] ss:$8 sps:$4 sm:$0xff]   ;;  %v2348_v51 = vld [vmem:[%s2528_s5 + $0x80] ss:$8 sps:$4 sm:$0xff]  }
  0x26   : > { %v2352_v52 = vld [vmem:[%s2528_s5 + $0x94] ss:$8 sps:$4 sm:$0xff]   ;;  %v2393_v53 = vld [vmem:[%s2528_s5 + $0x180] ss:$8 sps:$4 sm:$0xff]   ;;  %v2354_v55 = vld [vmem:[%s2528_s5 + $0x90] ss:$8 sps:$4 sm:$0xff]  }
  0x27   : > { %816 = vmatpush1.bf16.msra.mxu0 %v2307_v5  ;;  %2249 = vmatpush1.bf16.msra.mxu1 %v2307_v5  ;;  %v2394_v54 = vld [vmem:[%s2528_s5 + $0x194] ss:$8 sps:$4 sm:$0xff]   ;;  %v2358_v56 = vld [vmem:[%s2528_s5 + $0xa4] ss:$8 sps:$4 sm:$0xff]   ;;  %v2396_v57 = vld [vmem:[%s2528_s5 + $0x190] ss:$8 sps:$4 sm:$0xff]  }
  0x28   : > { %817 = vmatprep.subr.bf16.mxu0 %v2455_v0  ;;  %2234 = vmatprep.subr.bf16.mxu1 %v2455_v0  ;;  %v2397_v58 = vld [vmem:[%s2528_s5 + $0x1a4] ss:$8 sps:$4 sm:$0xff]   ;;  %v2360_v59 = vld [vmem:[%s2528_s5 + $0xa0] ss:$8 sps:$4 sm:$0xff]   ;;  %v2364_v60 = vld [vmem:[%s2528_s5 + $0xb4] ss:$8 sps:$4 sm:$0xff]  }
  0x29   : > { %v2399_v61 = vld [vmem:[%s2528_s5 + $0x1a0] ss:$8 sps:$4 sm:$0xff]   ;;  %v2400_v62 = vld [vmem:[%s2528_s5 + $0x1b4] ss:$8 sps:$4 sm:$0xff]   ;;  %v2366_v63 = vld [vmem:[%s2528_s5 + $0xb0] ss:$8 sps:$4 sm:$0xff]  }
  0x2a   : > { %v2402_v1 = vld [vmem:[%s2528_s5 + $0x1b0] ss:$8 sps:$4 sm:$0xff]   ;;  %v2403_v2 = vld [vmem:[%s2528_s5 + $0x1c4] ss:$8 sps:$4 sm:$0xff]   ;;  %v2372_v3 = vld [vmem:[%s2528_s5 + $0xc0] ss:$8 sps:$4 sm:$0xff]  }
  0x2b   : > { %818 = vmatpush1.bf16.msra.mxu0 %v2308_v7  ;;  %2250 = vmatpush1.bf16.msra.mxu1 %v2308_v7  ;;  %v2376_v4 = vld [vmem:[%s2528_s5 + $0xd4] ss:$8 sps:$4 sm:$0xff]   ;;  %v2405_v5 = vld [vmem:[%s2528_s5 + $0x1c0] ss:$8 sps:$4 sm:$0xff]   ;;  %v2378_v7 = vld [vmem:[%s2528_s5 + $0xd0] ss:$8 sps:$4 sm:$0xff]  }
  0x2c   : > { %819 = vmatprep.subr.bf16.mxu0 %v2455_v0  ;;  %2235 = vmatprep.subr.bf16.mxu1 %v2455_v0  ;;  %v2406_v6 = vld [vmem:[%s2528_s5 + $0x1d4] ss:$8 sps:$4 sm:$0xff]   ;;  %v2409_v10 = vld [vmem:[%s2528_s5 + $0x1e4] ss:$8 sps:$4 sm:$0xff]  }
  0x2f   : > { %820 = vmatpush1.bf16.msra.mxu0 %v2309_v8  ;;  %2251 = vmatpush1.bf16.msra.mxu1 %v2309_v8  ;;  %v2382_v8 = vld [vmem:[%s2528_s5 + $0xe4] ss:$8 sps:$4 sm:$0xff]  }
  0x30   : > { %821 = vmatprep.subr.bf16.mxu0 %v2455_v0  ;;  %2236 = vmatprep.subr.bf16.mxu1 %v2455_v0 }
  0x33   : > { %822 = vmatpush1.bf16.msra.mxu0 %v2310_v9  ;;  %2252 = vmatpush1.bf16.msra.mxu1 %v2310_v9  ;;  %v2408_v9 = vld [vmem:[%s2528_s5 + $0x1d0] ss:$8 sps:$4 sm:$0xff]  }
  0x34   : > { %823 = vmatprep.subr.bf16.mxu0 %v2455_v0  ;;  %2237 = vmatprep.subr.bf16.mxu1 %v2455_v0 }
  0x37   : > { %824 = vmatpush1.bf16.msra.mxu0 %v2311_v11  ;;  %2253 = vmatpush1.bf16.msra.mxu1 %v2311_v11  ;;  %v2384_v11 = vld [vmem:[%s2528_s5 + $0xe0] ss:$8 sps:$4 sm:$0xff]  }
  0x38   : > { %825 = vmatprep.subr.bf16.mxu0 %v2455_v0  ;;  %2238 = vmatprep.subr.bf16.mxu1 %v2455_v0 }
  0x3b   : > { %826 = vmatpush1.bf16.msra.mxu0 %v2312_v12  ;;  %2254 = vmatpush1.bf16.msra.mxu1 %v2312_v12  ;;  %v2388_v12 = vld [vmem:[%s2528_s5 + $0xf4] ss:$8 sps:$4 sm:$0xff]  }
  0x3c   : > { %827 = vmatprep.subr.bf16.mxu0 %v2455_v0  ;;  %2239 = vmatprep.subr.bf16.mxu1 %v2455_v0 }
  0x3f   : > { %828 = vmatpush1.bf16.msra.mxu0 %v2313_v13  ;;  %2255 = vmatpush1.bf16.msra.mxu1 %v2313_v13  ;;  %v2411_v13 = vld [vmem:[%s2528_s5 + $0x1e0] ss:$8 sps:$4 sm:$0xff]  }
  0x40   : > { %829 = vmatprep.subr.bf16.mxu0 %v2455_v0  ;;  %2240 = vmatprep.subr.bf16.mxu1 %v2455_v0 }
  0x43   : > { %830 = vmatpush1.bf16.msra.mxu0 %v2314_v14  ;;  %2256 = vmatpush1.bf16.msra.mxu1 %v2314_v14  ;;  %v2412_v14 = vld [vmem:[%s2528_s5 + $0x1f4] ss:$8 sps:$4 sm:$0xff]  }
  0x44   : > { %831 = vmatprep.subr.bf16.mxu0 %v2455_v0  ;;  %2241 = vmatprep.subr.bf16.mxu1 %v2455_v0 }
  0x47   : > { %832 = vmatpush1.bf16.msra.mxu0 %v2315_v15  ;;  %2257 = vmatpush1.bf16.msra.mxu1 %v2315_v15  ;;  %v2390_v15 = vld [vmem:[%s2528_s5 + $0xf0] ss:$8 sps:$4 sm:$0xff]  }
  0x48   : > { %833 = vmatprep.subr.bf16.mxu0 %v2455_v0  ;;  %2242 = vmatprep.subr.bf16.mxu1 %v2455_v0 }
  0x4b   : > { %834 = vmatpush1.bf16.msra.mxu0 %v2316_v16  ;;  %2258 = vmatpush1.bf16.msra.mxu1 %v2316_v16  ;;  %v2414_v16 = vld [vmem:[%s2528_s5 + $0x1f0] ss:$8 sps:$4 sm:$0xff]  }
  0x4c   : > { %835 = vmatprep.subr.bf16.mxu0 %v2455_v0  ;;  %2243 = vmatprep.subr.bf16.mxu1 %v2455_v0 }
  0x4f   : > { %836 = vmatpush1.bf16.msra.mxu0 %v2317_v17  ;;  %2259 = vmatpush1.bf16.msra.mxu1 %v2317_v17 }
  0x50   : > { %837 = vmatprep.subr.bf16.mxu0 %v2455_v0  ;;  %2244 = vmatprep.subr.bf16.mxu1 %v2455_v0  ;;  %v2370_v0 = vld [vmem:[%s2528_s5 + $0xc4] ss:$8 sps:$4 sm:$0xff]  }
  0x53   : > { %838 = vmatpush1.bf16.msra.mxu0 %v2318_v18  ;;  %2260 = vmatpush1.bf16.msra.mxu1 %v2318_v18 }
  0x56   : > { %840 = vmatmul.mubr.bf16.vlgmr.msra.gmra.mrb[0].mxu0 %v2319_v19  ;;  %968 = vmatmul.mubr.bf16.vlgmr.msra.gmra.mrb[0].mxu1 %v2343_v21 }
  0x57   : > { %847 = vmatprep.mubr.bf16.mxu0 %v2322_v20  ;;  %975 = vmatprep.mubr.bf16.mxu1 %v2349_v22 }
  0x5e   : > { %848 = vmatmul.mubr.bf16.gmra.mrb[4].mxu0 %v2324_v23  ;;  %976 = vmatmul.mubr.bf16.gmra.mrb[4].mxu1 %v2351_v25 }
  0x5f   : > { %855 = vmatprep.mubr.bf16.mxu0 %v2325_v24  ;;  %983 = vmatprep.mubr.bf16.mxu1 %v2355_v26 }
  0x66   : > { %856 = vmatmul.mubr.bf16.gmra.mrb[8].mxu0 %v2327_v27  ;;  %984 = vmatmul.mubr.bf16.gmra.mrb[8].mxu1 %v2357_v29 }
  0x67   : > { %863 = vmatprep.mubr.bf16.mxu0 %v2328_v28  ;;  %991 = vmatprep.mubr.bf16.mxu1 %v2361_v30 }
  0x6e   : > { %864 = vmatmul.mubr.bf16.gmra.mrb[12].mxu0 %v2330_v31  ;;  %992 = vmatmul.mubr.bf16.gmra.mrb[12].mxu1 %v2363_v33 }
  0x6f   : > { %871 = vmatprep.mubr.bf16.mxu0 %v2331_v32  ;;  %999 = vmatprep.mubr.bf16.mxu1 %v2367_v34 }
  0x76   : > { %872 = vmatmul.mubr.bf16.gmra.mrb[16].mxu0 %v2333_v35  ;;  %1000 = vmatmul.mubr.bf16.gmra.mrb[16].mxu1 %v2369_v37 }
  0x77   : > { %879 = vmatprep.mubr.bf16.mxu0 %v2334_v36  ;;  %1007 = vmatprep.mubr.bf16.mxu1 %v2373_v38 }
  0x7e   : > { %880 = vmatmul.mubr.bf16.gmra.mrb[20].mxu0 %v2336_v39  ;;  %1008 = vmatmul.mubr.bf16.gmra.mrb[20].mxu1 %v2375_v41 }
  0x7f   : > { %887 = vmatprep.mubr.bf16.mxu0 %v2337_v40  ;;  %1015 = vmatprep.mubr.bf16.mxu1 %v2379_v42 }
  0x86   : > { %888 = vmatmul.mubr.bf16.gmra.mrb[24].mxu0 %v2339_v43  ;;  %1016 = vmatmul.mubr.bf16.gmra.mrb[24].mxu1 %v2381_v45 }
  0x87   : > { %895 = vmatprep.mubr.bf16.mxu0 %v2340_v44  ;;  %1023 = vmatprep.mubr.bf16.mxu1 %v2385_v46 }
  0x8e   : > { %896 = vmatmul.mubr.bf16.gmra.mrb[28].mxu0 %v2342_v47  ;;  %1024 = vmatmul.mubr.bf16.gmra.mrb[28].mxu1 %v2387_v49 }
  0x8f   : > { %903 = vmatprep.mubr.bf16.mxu0 %v2346_v48  ;;  %1031 = vmatprep.mubr.bf16.mxu1 %v2391_v50 }
  0x96   : > { %904 = vmatmul.mubr.bf16.gmra.mrb[32].mxu0 %v2348_v51  ;;  %1032 = vmatmul.mubr.bf16.gmra.mrb[32].mxu1 %v2393_v53 }
  0x97   : > { %911 = vmatprep.mubr.bf16.mxu0 %v2352_v52  ;;  %1039 = vmatprep.mubr.bf16.mxu1 %v2394_v54 }
  0x9e   : > { %912 = vmatmul.mubr.bf16.gmra.mrb[36].mxu0 %v2354_v55  ;;  %1040 = vmatmul.mubr.bf16.gmra.mrb[36].mxu1 %v2396_v57 }
  0x9f   : > { %919 = vmatprep.mubr.bf16.mxu0 %v2358_v56  ;;  %1047 = vmatprep.mubr.bf16.mxu1 %v2397_v58 }
  0xa6   : > { %920 = vmatmul.mubr.bf16.gmra.mrb[40].mxu0 %v2360_v59  ;;  %1048 = vmatmul.mubr.bf16.gmra.mrb[40].mxu1 %v2399_v61 }
  0xa7   : > { %927 = vmatprep.mubr.bf16.mxu0 %v2364_v60  ;;  %1055 = vmatprep.mubr.bf16.mxu1 %v2400_v62 }
  0xae   : > { %928 = vmatmul.mubr.bf16.gmra.mrb[44].mxu0 %v2366_v63  ;;  %1056 = vmatmul.mubr.bf16.gmra.mrb[44].mxu1 %v2402_v1 }
  0xaf   : > { %935 = vmatprep.mubr.bf16.mxu0 %v2370_v0  ;;  %1063 = vmatprep.mubr.bf16.mxu1 %v2403_v2 }
  0xb6   : > { %936 = vmatmul.mubr.bf16.gmra.mrb[48].mxu0 %v2372_v3  ;;  %1064 = vmatmul.mubr.bf16.gmra.mrb[48].mxu1 %v2405_v5 }
  0xb7   : > { %943 = vmatprep.mubr.bf16.mxu0 %v2376_v4  ;;  %1071 = vmatprep.mubr.bf16.mxu1 %v2406_v6 }
  0xbe   : > { %944 = vmatmul.mubr.bf16.gmra.mrb[52].mxu0 %v2378_v7  ;;  %1072 = vmatmul.mubr.bf16.gmra.mrb[52].mxu1 %v2408_v9 }
  0xbf   : > { %951 = vmatprep.mubr.bf16.mxu0 %v2382_v8  ;;  %1079 = vmatprep.mubr.bf16.mxu1 %v2409_v10 }
  0xc6   : > { %952 = vmatmul.mubr.bf16.gmra.mrb[56].mxu0 %v2384_v11  ;;  %1080 = vmatmul.mubr.bf16.gmra.mrb[56].mxu1 %v2411_v13 }
  0xc7   : > { %959 = vmatprep.mubr.bf16.mxu0 %v2388_v12  ;;  %1087 = vmatprep.mubr.bf16.mxu1 %v2412_v14 }
  0xce   : > { %960 = vmatmul.mubr.bf16.gmra.mrb[60].mxu0 %v2390_v15  ;;  %1088 = vmatmul.mubr.bf16.gmra.mrb[60].mxu1 %v2414_v16 }
 0x129   : > { %v841_v17 = vpop.f32.mrb[0].mxu0  ;;  %v2647_v19 = vpop.f32.mrb[0].mxu1 }
 0x12a   : > { %v843_v18 = vpop.f32.mrb[1].mxu0  ;;  %v971_v21 = vpop.f32.mrb[1].mxu1  ;;  %v1166_v22 = vmul.f32 %v841_v17, %v841_v17 }
 0x12b   : > { %v844_v20 = vpop.f32.mrb[2].mxu0  ;;  %v2654_v27 = vpop.f32.mrb[2].mxu1 }
 0x12c   : > { %v1096_v23 = vadd.f32 %v844_v20, %v841_v17  ;;  %v1167_v24 = vmul.f32 %v844_v20, %v844_v20  ;;  %v2041_v25 = vpack.c.bf16 %v844_v20, %v841_v17  ;;  %v846_v26 = vpop.f32.mrb[3].mxu0  ;;  %v2121_v28 = vpack.c.bf16 %v2654_v27, %v2647_v19  ;;  %v974_v29 = vpop.f32.mrb[3].mxu1 }
 0x12e   : > { %v1230_v30 = vadd.f32 %v1167_v24, %v1166_v22  ;;  %2042 = vst [vmem:[%s2652_s22] sm:$0xff] %v2041_v25   ;;  %2213 = vst [vmem:[%s2652_s22 + $0x80] sm:$0xff] %v2121_v28  }
 0x131   : > { %v849_v31 = vpop.f32.mrb[4].mxu0  ;;  %v2660_v35 = vpop.f32.mrb[4].mxu1 }
 0x132   : > { %v1097_v32 = vadd.f32 %v1096_v23, %v849_v31  ;;  %v1168_v33 = vmul.f32 %v849_v31, %v849_v31  ;;  %v851_v34 = vpop.f32.mrb[5].mxu0  ;;  %v979_v37 = vpop.f32.mrb[5].mxu1 }
 0x133   : > { %v852_v36 = vpop.f32.mrb[6].mxu0  ;;  %v2662_v43 = vpop.f32.mrb[6].mxu1 }
 0x134   : > { %v1231_v38 = vadd.f32 %v1230_v30, %v1168_v33  ;;  %v1098_v39 = vadd.f32 %v1097_v32, %v852_v36  ;;  %v1169_v40 = vmul.f32 %v852_v36, %v852_v36  ;;  %v2046_v41 = vpack.c.bf16 %v852_v36, %v849_v31  ;;  %v854_v42 = vpop.f32.mrb[7].mxu0  ;;  %v982_v45 = vpop.f32.mrb[7].mxu1 }
 0x135   : > { %v2126_v44 = vpack.c.bf16 %v2662_v43, %v2660_v35 }
 0x136   : > { %v1232_v46 = vadd.f32 %v1231_v38, %v1169_v40  ;;  %2198 = vst [vmem:[%s2652_s22 + $0x8] sm:$0xff] %v2046_v41  }
 0x137   : > { %2214 = vst [vmem:[%s2652_s22 + $0x88] sm:$0xff] %v2126_v44  }
 0x139   : > { %v857_v47 = vpop.f32.mrb[8].mxu0  ;;  %v2668_v51 = vpop.f32.mrb[8].mxu1 }
 0x13a   : > { %v1099_v48 = vadd.f32 %v1098_v39, %v857_v47  ;;  %v1170_v49 = vmul.f32 %v857_v47, %v857_v47  ;;  %v859_v50 = vpop.f32.mrb[9].mxu0  ;;  %v987_v53 = vpop.f32.mrb[9].mxu1 }
 0x13b   : > { %v860_v52 = vpop.f32.mrb[10].mxu0  ;;  %v2670_v59 = vpop.f32.mrb[10].mxu1 }
 0x13c   : > { %v1233_v54 = vadd.f32 %v1232_v46, %v1170_v49  ;;  %v1100_v55 = vadd.f32 %v1099_v48, %v860_v52  ;;  %v1171_v56 = vmul.f32 %v860_v52, %v860_v52  ;;  %v2051_v57 = vpack.c.bf16 %v860_v52, %v857_v47  ;;  %v862_v58 = vpop.f32.mrb[11].mxu0  ;;  %v990_v61 = vpop.f32.mrb[11].mxu1 }
 0x13d   : > { %v2131_v60 = vpack.c.bf16 %v2670_v59, %v2668_v51 }
 0x13e   : > { %v1234_v62 = vadd.f32 %v1233_v54, %v1171_v56  ;;  %2199 = vst [vmem:[%s2652_s22 + $0x10] sm:$0xff] %v2051_v57  }
 0x13f   : > { %2215 = vst [vmem:[%s2652_s22 + $0x90] sm:$0xff] %v2131_v60  }
 0x141   : > { %v865_v63 = vpop.f32.mrb[12].mxu0  ;;  %v2676_v3 = vpop.f32.mrb[12].mxu1 }
 0x142   : > { %v1101_v0 = vadd.f32 %v1100_v55, %v865_v63  ;;  %v1172_v1 = vmul.f32 %v865_v63, %v865_v63  ;;  %v867_v2 = vpop.f32.mrb[13].mxu0  ;;  %v995_v5 = vpop.f32.mrb[13].mxu1 }
 0x143   : > { %v868_v4 = vpop.f32.mrb[14].mxu0  ;;  %v2678_v11 = vpop.f32.mrb[14].mxu1 }
 0x144   : > { %v1235_v6 = vadd.f32 %v1234_v62, %v1172_v1  ;;  %v1102_v7 = vadd.f32 %v1101_v0, %v868_v4  ;;  %v1173_v8 = vmul.f32 %v868_v4, %v868_v4  ;;  %v2056_v9 = vpack.c.bf16 %v868_v4, %v865_v63  ;;  %v870_v10 = vpop.f32.mrb[15].mxu0  ;;  %v998_v13 = vpop.f32.mrb[15].mxu1 }
 0x145   : > { %v2136_v12 = vpack.c.bf16 %v2678_v11, %v2676_v3 }
 0x146   : > { %v1236_v14 = vadd.f32 %v1235_v6, %v1173_v8  ;;  %2200 = vst [vmem:[%s2652_s22 + $0x18] sm:$0xff] %v2056_v9  }
 0x147   : > { %2216 = vst [vmem:[%s2652_s22 + $0x98] sm:$0xff] %v2136_v12  }
 0x149   : > { %v873_v15 = vpop.f32.mrb[16].mxu0  ;;  %v2684_v20 = vpop.f32.mrb[16].mxu1 }
 0x14a   : > { %v1103_v16 = vadd.f32 %v1102_v7, %v873_v15  ;;  %v1174_v17 = vmul.f32 %v873_v15, %v873_v15  ;;  %v875_v18 = vpop.f32.mrb[17].mxu0  ;;  %v1003_v22 = vpop.f32.mrb[17].mxu1 }
 0x14b   : > { %v876_v21 = vpop.f32.mrb[18].mxu0  ;;  %v2686_v29 = vpop.f32.mrb[18].mxu1 }
 0x14c   : > { %v1237_v23 = vadd.f32 %v1236_v14, %v1174_v17  ;;  %v1104_v24 = vadd.f32 %v1103_v16, %v876_v21  ;;  %v1175_v25 = vmul.f32 %v876_v21, %v876_v21  ;;  %v2061_v26 = vpack.c.bf16 %v876_v21, %v873_v15  ;;  %v878_v28 = vpop.f32.mrb[19].mxu0  ;;  %v1006_v31 = vpop.f32.mrb[19].mxu1 }
 0x14d   : > { %v2141_v30 = vpack.c.bf16 %v2686_v29, %v2684_v20 }
 0x14e   : > { %v1238_v32 = vadd.f32 %v1237_v23, %v1175_v25  ;;  %2201 = vst [vmem:[%s2652_s22 + $0x20] sm:$0xff] %v2061_v26  }
 0x14f   : > { %2217 = vst [vmem:[%s2652_s22 + $0xa0] sm:$0xff] %v2141_v30  }
 0x151   : > { %v881_v33 = vpop.f32.mrb[20].mxu0  ;;  %v2692_v38 = vpop.f32.mrb[20].mxu1 }
 0x152   : > { %v1105_v34 = vadd.f32 %v1104_v24, %v881_v33  ;;  %v1176_v36 = vmul.f32 %v881_v33, %v881_v33  ;;  %v883_v37 = vpop.f32.mrb[21].mxu0  ;;  %v1011_v40 = vpop.f32.mrb[21].mxu1 }
 0x153   : > { %v884_v39 = vpop.f32.mrb[22].mxu0  ;;  %v2694_v47 = vpop.f32.mrb[22].mxu1 }
 0x154   : > { %v1239_v41 = vadd.f32 %v1238_v32, %v1176_v36  ;;  %v1106_v42 = vadd.f32 %v1105_v34, %v884_v39  ;;  %v1177_v44 = vmul.f32 %v884_v39, %v884_v39  ;;  %v2066_v45 = vpack.c.bf16 %v884_v39, %v881_v33  ;;  %v886_v46 = vpop.f32.mrb[23].mxu0  ;;  %v1014_v49 = vpop.f32.mrb[23].mxu1 }
 0x155   : > { %v2146_v48 = vpack.c.bf16 %v2694_v47, %v2692_v38 }
 0x156   : > { %v1240_v50 = vadd.f32 %v1239_v41, %v1177_v44  ;;  %2202 = vst [vmem:[%s2652_s22 + $0x28] sm:$0xff] %v2066_v45  }
 0x157   : > { %2218 = vst [vmem:[%s2652_s22 + $0xa8] sm:$0xff] %v2146_v48  }
 0x159   : > { %v889_v52 = vpop.f32.mrb[24].mxu0  ;;  %v2700_v56 = vpop.f32.mrb[24].mxu1 }
 0x15a   : > { %v1107_v53 = vadd.f32 %v1106_v42, %v889_v52  ;;  %v1178_v54 = vmul.f32 %v889_v52, %v889_v52  ;;  %v891_v55 = vpop.f32.mrb[25].mxu0  ;;  %v1019_v58 = vpop.f32.mrb[25].mxu1 }
 0x15b   : > { %v892_v57 = vpop.f32.mrb[26].mxu0  ;;  %v2702_v1 = vpop.f32.mrb[26].mxu1 }
 0x15c   : > { %v1241_v60 = vadd.f32 %v1240_v50, %v1178_v54  ;;  %v1108_v61 = vadd.f32 %v1107_v53, %v892_v57  ;;  %v1179_v62 = vmul.f32 %v892_v57, %v892_v57  ;;  %v2071_v63 = vpack.c.bf16 %v892_v57, %v889_v52  ;;  %v894_v0 = vpop.f32.mrb[27].mxu0  ;;  %v1022_v4 = vpop.f32.mrb[27].mxu1 }
 0x15d   : > { %v2151_v2 = vpack.c.bf16 %v2702_v1, %v2700_v56 }
 0x15e   : > { %v1242_v5 = vadd.f32 %v1241_v60, %v1179_v62  ;;  %2203 = vst [vmem:[%s2652_s22 + $0x30] sm:$0xff] %v2071_v63  }
 0x15f   : > { %2219 = vst [vmem:[%s2652_s22 + $0xb0] sm:$0xff] %v2151_v2  }
 0x161   : > { %v897_v6 = vpop.f32.mrb[28].mxu0  ;;  %v2708_v10 = vpop.f32.mrb[28].mxu1 }
 0x162   : > { %v1109_v7 = vadd.f32 %v1108_v61, %v897_v6  ;;  %v1180_v8 = vmul.f32 %v897_v6, %v897_v6  ;;  %v899_v9 = vpop.f32.mrb[29].mxu0  ;;  %v1027_v13 = vpop.f32.mrb[29].mxu1 }
 0x163   : > { %v900_v12 = vpop.f32.mrb[30].mxu0  ;;  %v2710_v21 = vpop.f32.mrb[30].mxu1 }
 0x164   : > { %v1243_v14 = vadd.f32 %v1242_v5, %v1180_v8  ;;  %v1110_v15 = vadd.f32 %v1109_v7, %v900_v12  ;;  %v1181_v16 = vmul.f32 %v900_v12, %v900_v12  ;;  %v2076_v17 = vpack.c.bf16 %v900_v12, %v897_v6  ;;  %v902_v18 = vpop.f32.mrb[31].mxu0  ;;  %v1030_v23 = vpop.f32.mrb[31].mxu1 }
 0x165   : > { %v2156_v22 = vpack.c.bf16 %v2710_v21, %v2708_v10 }
 0x166   : > { %v1244_v24 = vadd.f32 %v1243_v14, %v1181_v16  ;;  %2204 = vst [vmem:[%s2652_s22 + $0x38] sm:$0xff] %v2076_v17  }
 0x167   : > { %2220 = vst [vmem:[%s2652_s22 + $0xb8] sm:$0xff] %v2156_v22  }
 0x169   : > { %v905_v25 = vpop.f32.mrb[32].mxu0  ;;  %v2716_v31 = vpop.f32.mrb[32].mxu1 }
 0x16a   : > { %v1111_v26 = vadd.f32 %v1110_v15, %v905_v25  ;;  %v1182_v28 = vmul.f32 %v905_v25, %v905_v25  ;;  %v907_v30 = vpop.f32.mrb[33].mxu0  ;;  %v1035_v33 = vpop.f32.mrb[33].mxu1 }
 0x16b   : > { %v908_v32 = vpop.f32.mrb[34].mxu0  ;;  %v2718_v41 = vpop.f32.mrb[34].mxu1 }
 0x16c   : > { %v1245_v34 = vadd.f32 %v1244_v24, %v1182_v28  ;;  %v1112_v36 = vadd.f32 %v1111_v26, %v908_v32  ;;  %v1183_v37 = vmul.f32 %v908_v32, %v908_v32  ;;  %v2081_v39 = vpack.c.bf16 %v908_v32, %v905_v25  ;;  %v910_v40 = vpop.f32.mrb[35].mxu0  ;;  %v1038_v44 = vpop.f32.mrb[35].mxu1 }
 0x16d   : > { %v2161_v42 = vpack.c.bf16 %v2718_v41, %v2716_v31 }
 0x16e   : > { %v1246_v45 = vadd.f32 %v1245_v34, %v1183_v37  ;;  %2205 = vst [vmem:[%s2652_s22 + $0x40] sm:$0xff] %v2081_v39  }
 0x16f   : > { %2221 = vst [vmem:[%s2652_s22 + $0xc0] sm:$0xff] %v2161_v42  }
 0x171   : > { %v913_v46 = vpop.f32.mrb[36].mxu0  ;;  %v2724_v52 = vpop.f32.mrb[36].mxu1 }
 0x172   : > { %v1113_v48 = vadd.f32 %v1112_v36, %v913_v46  ;;  %v1184_v49 = vmul.f32 %v913_v46, %v913_v46  ;;  %v915_v50 = vpop.f32.mrb[37].mxu0  ;;  %v1043_v54 = vpop.f32.mrb[37].mxu1 }
 0x173   : > { %v916_v53 = vpop.f32.mrb[38].mxu0  ;;  %v2726_v62 = vpop.f32.mrb[38].mxu1 }
 0x174   : > { %v1247_v55 = vadd.f32 %v1246_v45, %v1184_v49  ;;  %v1114_v57 = vadd.f32 %v1113_v48, %v916_v53  ;;  %v1185_v58 = vmul.f32 %v916_v53, %v916_v53  ;;  %v2086_v60 = vpack.c.bf16 %v916_v53, %v913_v46  ;;  %v918_v61 = vpop.f32.mrb[39].mxu0  ;;  %v1046_v0 = vpop.f32.mrb[39].mxu1 }
 0x175   : > { %v2166_v63 = vpack.c.bf16 %v2726_v62, %v2724_v52 }
 0x176   : > { %v1248_v2 = vadd.f32 %v1247_v55, %v1185_v58  ;;  %2206 = vst [vmem:[%s2652_s22 + $0x48] sm:$0xff] %v2086_v60  }
 0x177   : > { %2222 = vst [vmem:[%s2652_s22 + $0xc8] sm:$0xff] %v2166_v63  }
 0x179   : > { %v921_v4 = vpop.f32.mrb[40].mxu0  ;;  %v2732_v8 = vpop.f32.mrb[40].mxu1 }
 0x17a   : > { %v1115_v5 = vadd.f32 %v1114_v57, %v921_v4  ;;  %v1186_v6 = vmul.f32 %v921_v4, %v921_v4  ;;  %v923_v7 = vpop.f32.mrb[41].mxu0  ;;  %v1051_v12 = vpop.f32.mrb[41].mxu1 }
 0x17b   : > { %v924_v9 = vpop.f32.mrb[42].mxu0  ;;  %v2734_v18 = vpop.f32.mrb[42].mxu1 }
 0x17c   : > { %v1249_v13 = vadd.f32 %v1248_v2, %v1186_v6  ;;  %v1116_v14 = vadd.f32 %v1115_v5, %v924_v9  ;;  %v1187_v15 = vmul.f32 %v924_v9, %v924_v9  ;;  %v2091_v16 = vpack.c.bf16 %v924_v9, %v921_v4  ;;  %v926_v17 = vpop.f32.mrb[43].mxu0  ;;  %v1054_v23 = vpop.f32.mrb[43].mxu1 }
 0x17d   : > { %v2171_v22 = vpack.c.bf16 %v2734_v18, %v2732_v8 }
 0x17e   : > { %v1250_v24 = vadd.f32 %v1249_v13, %v1187_v15  ;;  %2207 = vst [vmem:[%s2652_s22 + $0x50] sm:$0xff] %v2091_v16  }
 0x17f   : > { %2223 = vst [vmem:[%s2652_s22 + $0xd0] sm:$0xff] %v2171_v22  }
 0x181   : > { %v929_v25 = vpop.f32.mrb[44].mxu0  ;;  %v2740_v32 = vpop.f32.mrb[44].mxu1 }
 0x182   : > { %v1117_v26 = vadd.f32 %v1116_v14, %v929_v25  ;;  %v1188_v28 = vmul.f32 %v929_v25, %v929_v25  ;;  %v931_v30 = vpop.f32.mrb[45].mxu0  ;;  %v1059_v34 = vpop.f32.mrb[45].mxu1 }
 0x183   : > { %v932_v33 = vpop.f32.mrb[46].mxu0  ;;  %v2742_v44 = vpop.f32.mrb[46].mxu1 }
 0x184   : > { %v1251_v36 = vadd.f32 %v1250_v24, %v1188_v28  ;;  %v1118_v37 = vadd.f32 %v1117_v26, %v932_v33  ;;  %v1189_v39 = vmul.f32 %v932_v33, %v932_v33  ;;  %v2096_v40 = vpack.c.bf16 %v932_v33, %v929_v25  ;;  %v934_v42 = vpop.f32.mrb[47].mxu0  ;;  %v1062_v46 = vpop.f32.mrb[47].mxu1 }
 0x185   : > { %v2176_v45 = vpack.c.bf16 %v2742_v44, %v2740_v32 }
 0x186   : > { %v1252_v48 = vadd.f32 %v1251_v36, %v1189_v39  ;;  %2208 = vst [vmem:[%s2652_s22 + $0x58] sm:$0xff] %v2096_v40  }
 0x187   : > { %2224 = vst [vmem:[%s2652_s22 + $0xd8] sm:$0xff] %v2176_v45  }
 0x189   : > { %v937_v49 = vpop.f32.mrb[48].mxu0  ;;  %v2748_v55 = vpop.f32.mrb[48].mxu1 }
 0x18a   : > { %v1119_v50 = vadd.f32 %v1118_v37, %v937_v49  ;;  %v1190_v53 = vmul.f32 %v937_v49, %v937_v49  ;;  %v939_v54 = vpop.f32.mrb[49].mxu0  ;;  %v1067_v58 = vpop.f32.mrb[49].mxu1 }
 0x18b   : > { %v940_v57 = vpop.f32.mrb[50].mxu0  ;;  %v2750_v4 = vpop.f32.mrb[50].mxu1 }
 0x18c   : > { %v1253_v60 = vadd.f32 %v1252_v48, %v1190_v53  ;;  %v1120_v61 = vadd.f32 %v1119_v50, %v940_v57  ;;  %v1191_v63 = vmul.f32 %v940_v57, %v940_v57  ;;  %v2101_v0 = vpack.c.bf16 %v940_v57, %v937_v49  ;;  %v942_v2 = vpop.f32.mrb[51].mxu0  ;;  %v1070_v6 = vpop.f32.mrb[51].mxu1 }
 0x18d   : > { %v2181_v5 = vpack.c.bf16 %v2750_v4, %v2748_v55 }
 0x18e   : > { %v1254_v7 = vadd.f32 %v1253_v60, %v1191_v63  ;;  %2209 = vst [vmem:[%s2652_s22 + $0x60] sm:$0xff] %v2101_v0  }
 0x18f   : > { %2225 = vst [vmem:[%s2652_s22 + $0xe0] sm:$0xff] %v2181_v5  }
 0x191   : > { %v945_v9 = vpop.f32.mrb[52].mxu0  ;;  %v2756_v15 = vpop.f32.mrb[52].mxu1 }
 0x192   : > { %v1121_v12 = vadd.f32 %v1120_v61, %v945_v9  ;;  %v1192_v13 = vmul.f32 %v945_v9, %v945_v9  ;;  %v947_v14 = vpop.f32.mrb[53].mxu0  ;;  %v1075_v17 = vpop.f32.mrb[53].mxu1 }
 0x193   : > { %v948_v16 = vpop.f32.mrb[54].mxu0  ;;  %v2758_v28 = vpop.f32.mrb[54].mxu1 }
 0x194   : > { %v1255_v22 = vadd.f32 %v1254_v7, %v1192_v13  ;;  %v1122_v23 = vadd.f32 %v1121_v12, %v948_v16  ;;  %v1193_v24 = vmul.f32 %v948_v16, %v948_v16  ;;  %v2106_v25 = vpack.c.bf16 %v948_v16, %v945_v9  ;;  %v950_v26 = vpop.f32.mrb[55].mxu0  ;;  %v1078_v33 = vpop.f32.mrb[55].mxu1 }
 0x195   : > { %v2186_v30 = vpack.c.bf16 %v2758_v28, %v2756_v15  ;;  %v1199_v33 = vmul.f32 %v2654_v27, %v2654_v27 }
 0x196   : > { %v1256_v34 = vadd.f32 %v1255_v22, %v1193_v24  ;;  %2210 = vst [vmem:[%s2652_s22 + $0x68] sm:$0xff] %v2106_v25   ;;  %v1198_v25 = vmul.f32 %v2647_v19, %v2647_v19 }
 0x197   : > { %2226 = vst [vmem:[%s2652_s22 + $0xe8] sm:$0xff] %v2186_v30  }
 0x199   : > { %v953_v36 = vpop.f32.mrb[56].mxu0  ;;  %v2764_v42 = vpop.f32.mrb[56].mxu1 }
 0x19a   : > { %v1123_v37 = vadd.f32 %v1122_v23, %v953_v36  ;;  %v1194_v39 = vmul.f32 %v953_v36, %v953_v36  ;;  %v955_v40 = vpop.f32.mrb[57].mxu0  ;;  %v1083_v46 = vpop.f32.mrb[57].mxu1 }
 0x19b   : > { %v956_v45 = vpop.f32.mrb[58].mxu0  ;;  %v2766_v57 = vpop.f32.mrb[58].mxu1 }
 0x19c   : > { %v1257_v48 = vadd.f32 %v1256_v34, %v1194_v39  ;;  %v1124_v49 = vadd.f32 %v1123_v37, %v956_v45  ;;  %v1195_v50 = vmul.f32 %v956_v45, %v956_v45  ;;  %v2111_v53 = vpack.c.bf16 %v956_v45, %v953_v36  ;;  %v958_v54 = vpop.f32.mrb[59].mxu0  ;;  %v1086_v60 = vpop.f32.mrb[59].mxu1 }
 0x19d   : > { %v2191_v58 = vpack.c.bf16 %v2766_v57, %v2764_v42  ;;  %v1200_v37 = vmul.f32 %v2660_v35, %v2660_v35  ;;  %v1201_v45 = vmul.f32 %v2662_v43, %v2662_v43 }
 0x19e   : > { %v1258_v61 = vadd.f32 %v1257_v48, %v1195_v50  ;;  %2211 = vst [vmem:[%s2652_s22 + $0x70] sm:$0xff] %v2111_v53   ;;  %v1202_v48 = vmul.f32 %v2668_v51, %v2668_v51 }
 0x19f   : > { %2227 = vst [vmem:[%s2652_s22 + $0xf0] sm:$0xff] %v2191_v58  }
 0x1a1   : > { %v961_v63 = vpop.f32.mrb[60].mxu0  ;;  %v2772_v6 = vpop.f32.mrb[60].mxu1 }
 0x1a2   : > { %v1125_v0 = vadd.f32 %v1124_v49, %v961_v63  ;;  %v1196_v2 = vmul.f32 %v961_v63, %v961_v63  ;;  %v963_v5 = vpop.f32.mrb[61].mxu0  ;;  %v1091_v9 = vpop.f32.mrb[61].mxu1 }
 0x1a3   : > { %v964_v7 = vpop.f32.mrb[62].mxu0  ;;  %v2774_v22 = vpop.f32.mrb[62].mxu1 }
 0x1a4   : > { %v1259_v12 = vadd.f32 %v1258_v61, %v1196_v2  ;;  %v1126_v13 = vadd.f32 %v1125_v0, %v964_v7  ;;  %v1197_v14 = vmul.f32 %v964_v7, %v964_v7  ;;  %v2116_v16 = vpack.c.bf16 %v964_v7, %v961_v63  ;;  %v966_v17 = vpop.f32.mrb[63].mxu0  ;;  %v1094_v24 = vpop.f32.mrb[63].mxu1 }
 0x1a5   : > { %v2196_v23 = vpack.c.bf16 %v2774_v22, %v2772_v6 }
 0x1a6   : > { %v1127_v26 = vadd.f32 %v1126_v13, %v2647_v19  ;;  %v1260_v30 = vadd.f32 %v1259_v12, %v1197_v14  ;;  %2212 = vst [vmem:[%s2652_s22 + $0x78] sm:$0xff] %v2116_v16  }
 0x1a7   : > { %2228 = vst [vmem:[%s2652_s22 + $0xf8] sm:$0xff] %v2196_v23  }
 0x1a8   : > { %v1128_v34 = vadd.f32 %v1127_v26, %v2654_v27  ;;  %v1261_v36 = vadd.f32 %v1260_v30, %v1198_v25  ;;  %v1203_v27 = vmul.f32 %v2670_v59, %v2670_v59 }
 0x1aa   : > { %v1129_v39 = vadd.f32 %v1128_v34, %v2660_v35  ;;  %v1262_v40 = vadd.f32 %v1261_v36, %v1199_v33  ;;  %v1204_v35 = vmul.f32 %v2676_v3, %v2676_v3  ;;  %v1214_v34 = vmul.f32 %v2716_v31, %v2716_v31 }
 0x1ac   : > { %v1130_v19 = vadd.f32 %v1129_v39, %v2662_v43  ;;  %v1263_v46 = vadd.f32 %v1262_v40, %v1200_v37  ;;  %v1205_v43 = vmul.f32 %v2678_v11, %v2678_v11  ;;  %v1215_v39 = vmul.f32 %v2718_v41, %v2718_v41 }
 0x1ae   : > { %v1131_v49 = vadd.f32 %v1130_v19, %v2668_v51  ;;  %v1264_v50 = vadd.f32 %v1263_v46, %v1201_v45  ;;  %v1206_v51 = vmul.f32 %v2684_v20, %v2684_v20  ;;  %v1216_v45 = vmul.f32 %v2724_v52, %v2724_v52 }
 0x1af   : > { %v1217_v46 = vmul.f32 %v2726_v62, %v2726_v62 }
 0x1b0   : > { %v1132_v53 = vadd.f32 %v1131_v49, %v2670_v59  ;;  %v1265_v54 = vadd.f32 %v1264_v50, %v1202_v48  ;;  %v1207_v59 = vmul.f32 %v2686_v29, %v2686_v29  ;;  %v1218_v49 = vmul.f32 %v2732_v8, %v2732_v8 }
 0x1b2   : > { %v1133_v58 = vadd.f32 %v1132_v53, %v2676_v3  ;;  %v1266_v60 = vadd.f32 %v1265_v54, %v1203_v27  ;;  %v1208_v3 = vmul.f32 %v2692_v38, %v2692_v38  ;;  %v1219_v27 = vmul.f32 %v2734_v18, %v2734_v18 }
 0x1b3   : > { %v1220_v54 = vmul.f32 %v2740_v32, %v2740_v32 }
 0x1b4   : > { %v1134_v61 = vadd.f32 %v1133_v58, %v2678_v11  ;;  %v1267_v63 = vadd.f32 %v1266_v60, %v1204_v35  ;;  %v1209_v11 = vmul.f32 %v2694_v47, %v2694_v47  ;;  %v1221_v58 = vmul.f32 %v2742_v44, %v2742_v44 }
 0x1b6   : > { %v1268_v0 = vadd.f32 %v1267_v63, %v1205_v43  ;;  %v1135_v2 = vadd.f32 %v1134_v61, %v2684_v20  ;;  %v1210_v20 = vmul.f32 %v2700_v56, %v2700_v56  ;;  %v1222_v43 = vmul.f32 %v2748_v55, %v2748_v55 }
 0x1b7   : > { %v1223_v63 = vmul.f32 %v2750_v4, %v2750_v4 }
 0x1b8   : > { %v1136_v5 = vadd.f32 %v1135_v2, %v2686_v29  ;;  %v1269_v7 = vadd.f32 %v1268_v0, %v1206_v51  ;;  %v1211_v29 = vmul.f32 %v2702_v1, %v2702_v1  ;;  %v1224_v0 = vmul.f32 %v2756_v15, %v2756_v15 }
 0x1ba   : > { %v1137_v9 = vadd.f32 %v1136_v5, %v2692_v38  ;;  %v1270_v12 = vadd.f32 %v1269_v7, %v1207_v59  ;;  %v1212_v38 = vmul.f32 %v2708_v10, %v2708_v10  ;;  %v1225_v59 = vmul.f32 %v2758_v28, %v2758_v28 }
 0x1bb   : > { %v1226_v7 = vmul.f32 %v2764_v42, %v2764_v42 }
 0x1bc   : > { %v1138_v13 = vadd.f32 %v1137_v9, %v2694_v47  ;;  %v1271_v14 = vadd.f32 %v1270_v12, %v1208_v3  ;;  %v1213_v47 = vmul.f32 %v2710_v21, %v2710_v21  ;;  %v1228_v9 = vmul.f32 %v2772_v6, %v2772_v6 }
 0x1be   : > { %v1139_v16 = vadd.f32 %v1138_v13, %v2700_v56  ;;  %v1272_v17 = vadd.f32 %v1271_v14, %v1209_v11  ;;  %v1229_v14 = vmul.f32 %v2774_v22, %v2774_v22 }
 0x1c0   : > { %v1140_v23 = vadd.f32 %v1139_v16, %v2702_v1  ;;  %v1273_v24 = vadd.f32 %v1272_v17, %v1210_v20 }
 0x1c2   : > { %v1141_v25 = vadd.f32 %v1140_v23, %v2708_v10  ;;  %v1274_v26 = vadd.f32 %v1273_v24, %v1211_v29 }
 0x1c4   : > { %v1142_v30 = vadd.f32 %v1141_v25, %v2710_v21  ;;  %v1275_v33 = vadd.f32 %v1274_v26, %v1212_v38 }
 0x1c6   : > { %v1143_v56 = vadd.f32 %v1142_v30, %v2716_v31  ;;  %v1276_v36 = vadd.f32 %v1275_v33, %v1213_v47 }
 0x1c8   : > { %v1277_v1 = vadd.f32 %v1276_v36, %v1214_v34  ;;  %v1144_v37 = vadd.f32 %v1143_v56, %v2718_v41 }
 0x1ca   : > { %v1278_v10 = vadd.f32 %v1277_v1, %v1215_v39  ;;  %v1145_v40 = vadd.f32 %v1144_v37, %v2724_v52 }
 0x1cc   : > { %v1279_v21 = vadd.f32 %v1278_v10, %v1216_v45  ;;  %v1146_v19 = vadd.f32 %v1145_v40, %v2726_v62 }
 0x1ce   : > { %v1280_v31 = vadd.f32 %v1279_v21, %v1217_v46  ;;  %v1147_v48 = vadd.f32 %v1146_v19, %v2732_v8 }
 0x1d0   : > { %v1281_v50 = vadd.f32 %v1280_v31, %v1218_v49  ;;  %v1148_v41 = vadd.f32 %v1147_v48, %v2734_v18 }
 0x1d2   : > { %v1282_v53 = vadd.f32 %v1281_v50, %v1219_v27  ;;  %v1149_v52 = vadd.f32 %v1148_v41, %v2740_v32 }
 0x1d4   : > { %v1283_v35 = vadd.f32 %v1282_v53, %v1220_v54  ;;  %v1150_v62 = vadd.f32 %v1149_v52, %v2742_v44 }
 0x1d6   : > { %v1284_v60 = vadd.f32 %v1283_v35, %v1221_v58  ;;  %v1151_v8 = vadd.f32 %v1150_v62, %v2748_v55 }
 0x1d8   : > { %v1285_v61 = vadd.f32 %v1284_v60, %v1222_v43  ;;  %v1152_v18 = vadd.f32 %v1151_v8, %v2750_v4 }
 0x1da   : > { %v1286_v51 = vadd.f32 %v1285_v61, %v1223_v63  ;;  %v1153_v32 = vadd.f32 %v1152_v18, %v2756_v15  ;;  %v1227_v15 = vmul.f32 %v2766_v57, %v2766_v57 }
 0x1dc   : > { %v1287_v2 = vadd.f32 %v1286_v51, %v1224_v0  ;;  %v1154_v44 = vadd.f32 %v1153_v32, %v2758_v28 }
 0x1de   : > { %v1288_v5 = vadd.f32 %v1287_v2, %v1225_v59  ;;  %v1155_v55 = vadd.f32 %v1154_v44, %v2764_v42 }
 0x1e0   : > { %v1289_v4 = vadd.f32 %v1288_v5, %v1226_v7  ;;  %v1156_v3 = vadd.f32 %v1155_v55, %v2766_v57 }
 0x1e2   : > { %v1290_v12 = vadd.f32 %v1289_v4, %v1227_v15  ;;  %v1157_v28 = vadd.f32 %v1156_v3, %v2772_v6 }
 0x1e4   : > { %v1291_v11 = vadd.f32 %v1290_v12, %v1228_v9  ;;  %v1158_v13 = vadd.f32 %v1157_v28, %v2774_v22 }
 0x1e6   : > { %v1159_v42 = vrot.slane %v1158_v13, 4  ;;  %v1292_v20 = vadd.f32 %v1291_v11, %v1229_v14 }
 0x1e8   : > { %v1160_v16 = vadd.f32 %v1159_v42, %v1158_v13  ;;  %v1293_v17 = vrot.slane %v1292_v20, 4 }
 0x1ea   : > { %v1161_v29 = vrot.slane %v1160_v16, 2  ;;  %v1294_v23 = vadd.f32 %v1293_v17, %v1292_v20 }
 0x1ec   : > { %v1162_v57 = vadd.f32 %v1161_v29, %v1160_v16  ;;  %v1295_v24 = vrot.slane %v1294_v23, 2 }
 0x1ee   : > { %v1163_v38 = vrot.slane %v1162_v57, 1  ;;  %v1296_v25 = vadd.f32 %v1295_v24, %v1294_v23 }
 0x1f0   : > { %v1164_v6 = vadd.f32 %v1163_v38, %v1162_v57  ;;  %v1297_v26 = vrot.slane %v1296_v25, 1 }
 0x1f2   : > { %1165 = vst [vmem:[%s283_s27] sm:$0x1] %v1164_v6  ;;  %v1298_v22 = vadd.f32 %v1297_v26, %v1296_v25 }
 0x1f4   : > { %1299 = vst [vmem:[%s290_s30] sm:$0x1] %v1298_v22 }
 0x1f5 PF: > { %s15_s19 = sadd.s32 1, %s2453_s19   ;;  %s2904_s15 = smov %s2445_s17 }
 0x1f6   : > { %p12_p7 = scmp.ge.s32.totalorder %s15_s19, 6   ;;  %s2905_s16 = smov %s2449_s18 }
 0x1f7   : > { %s2906_s17 = smov %s2909_s20  ;;  %s2907_s18 = smov %s2913_s21 }
 0x1f8   :  { %14 = sbr.rel (!%p12_p7) target bundleno = 3 (0x3), region = 86 }

// kernel: gnet_forward.9
= control target key start
LH: loop header
LB: loop body
LE: loop exit
PB: predicated region body
PF: predicated region fallthrough
CT: control target
= control target key end

     0   :  { %10 = vsyncpa [#allocation3], 0  ;;  %s8145_s0 = inlined_call_operand.vmem [shape: bf16[2,33,64,128], index: 0, kind: input, shape index: {}]   ;;  %s8146_s1 = inlined_call_operand.vmem [shape: bf16[2,2,128,128], index: 1, kind: input, shape index: {}]   ;;  %s8147_s2 = inlined_call_operand.vmem [shape: bf16[2,2,2048,128], index: 2, kind: output, shape index: {0}]   ;;  %s8148_s3 = inlined_call_operand.hbm [shape: f32[2,2,1,128], index: 3, kind: output, shape index: {1}]   ;;  %s8149_s4 = inlined_call_operand.hbm [shape: f32[2,2,1,128], index: 4, kind: output, shape index: {2}]  }
   0x1   :  { %12 = vsyncpa [#allocation3 + $0x1], 0 }
   0x2   :  { %13 = vsyncpa [#allocation5], 0 }
   0x3   :  { %15 = vsyncpa [#allocation5 + $0x1], 0  ;;  %s6922_s15 = smov 0   ;;  %s6924_s16 = smov 0  }
   0x4   :  { %s6926_s17 = smov 0   ;;  %s6928_s18 = smov 0  }
   0x5   :  { %s6930_s19 = smov 0   ;;  %s6932_s20 = smov 0  }
   0x6   :  { %s6934_s21 = smov 0   ;;  %s6936_s22 = smov 0  }
   0x7 LB: > { %s4694_s23 = sadd.s32 4294967295, %s6893_s22   ;;  %s4695_s24 = sadd.s32 4294967294, %s6893_s22   ;;  %s6893_s22 = sphi %s6936_s22, %s21_s22   ;;  %s6889_s21 = sphi %s6934_s21, %s8316_s21   ;;  %s6885_s20 = sphi %s6932_s20, %s8315_s20   ;;  %s6881_s19 = sphi %s6930_s19, %s8314_s19   ;;  %s6877_s18 = sphi %s6928_s18, %s8313_s18   ;;  %s6873_s17 = sphi %s6926_s17, %s8312_s17   ;;  %s6869_s16 = sphi %s6924_s16, %s8311_s16   ;;  %s6865_s15 = sphi %s6922_s15, %s8310_s15  }
   0x8   : > { %s30_s25 = sadd.s32 1, %s6885_s20  ;;  %s33_s26 = sadd.s32 1, %s6889_s21 }
   0x9   : > { %p31_p0 = scmp.ge.s32.totalorder %s30_s25, 2  ;;  %p134_p1 = scmp.ne.s32.totalorder %s6873_s17, %s6869_s16 }
   0xa   : > { %p135_p2 = scmp.eq.s32.totalorder %s4694_s23, 3  ;;  %p140_p5 = scmp.ne.s32.totalorder %s6869_s16, %s6865_s15 }
   0xb   : > { %s8318_s25 = smov (%p31_p0, %s30_s25), 0  ;;  %s8320_s26 = smov (!%p31_p0, %s33_s26), %s6889_s21 }
   0xc   : > { %8228 = sst [smem:[#allocation8_spill]] %s8318_s25  ;;  %s120_s27 = ssub.s32 %s6885_s20, %s8318_s25 }
   0xd   : > { %p6973_p3 = por %p135_p2, %p134_p1  ;;  %p35_p4 = scmp.ge.s32.totalorder %s8320_s26, 2 }
   0xe   : > { %p141_p6 = scmp.eq.s32.totalorder %s4695_s24, 3  ;;  %p4698_p7 = scmp.ge.s32.totalorder %s6893_s22, 1 }
   0xf   : > { %s8322_s26 = smov (%p35_p4, %s8320_s26), 0  ;;  %p207_p9 = scmp.lt.s32.totalorder %s6893_s22, 5 }
  0x10   : > { %8230 = sst [smem:[#allocation9_spill]] %s8322_s26  ;;  %p6982_p8 = por %p141_p6, %p140_p5 }
  0x11   : > { %s119_s30 = ssub.s32 %s6889_s21, %s8322_s26  ;;  %s124_s5 = sadd.s32 1, %s6873_s17 }
  0x12   : > { %s121_s6 = sor.u32 %s120_s27, %s119_s30  ;;  %p208_p10 = pnand %p4698_p7, %p207_p9 }
  0x13   : > { %p122_p11 = scmp.eq.s32.totalorder %s121_s6, 0 }
  0x14   : > { %211 = sbr.rel (%p208_p10) target bundleno = 843 (0x34b), region = 28 }
  0x15   : > { %s6991_s7 = scalar_select %p122_p11, %s6873_s17, %s124_s5  }
  0x1b   : > { %p254_p12 = scmp.lt.s32.totalorder %s6877_s18, 1  ;;  %p259_p13 = scmp.lt.s32.totalorder %s6881_s19, 1 }
  0x1d   : > { %s255_s8 = scalar_select %p254_p12, %s6877_s18, 1 }
  0x1e   : > { %s260_s9 = scalar_select %p259_p13, %s6881_s19, 1 }
  0x1f   : > { %s4700_s10 = sshll.u32 %s255_s8, 4  ;;  %s4703_s12 = sshll.u32 %s255_s8, 8 }
  0x20   : > { %s4701_s11 = sshll.u32 %s260_s9, 5  ;;  %s6554_s13 = smul.u32 1056, %s255_s8 }
  0x21   : > { %s265_s14 = sadd.s32 %s4701_s11, %s4700_s10  ;;  %s4704_s24 = sshll.u32 %s260_s9, 9 }
  0x22   : > { %s4702_s23 = sshll.u32 %s265_s14, 2  ;;  %s7002_s6 = sadd.s32 %s4704_s24, %s4703_s12 }
  0x23   : > { %s7000_s5 = scalar_lea.vmem %s8146_s1, %s4702_s23  ;;  %s258_s8 = scalar_lea.vmem %s8145_s0, %s6554_s13 }
  0x24   : > { %v6631_v0 = vld [vmem:[%s7000_s5] sm:$0xff]   ;;  %v6632_v1 = vld [vmem:[%s7000_s5 + $0x8] sm:$0xff]   ;;  %s5106_s10 = sshll.u32 %s6881_s19, 5  ;;  %v6633_v2 = vld [vmem:[%s7000_s5 + $0x10] sm:$0xff]   ;;  %s4705_s25 = sshll.u32 %s7002_s6, 2 }
  0x25   : > { %6266 = vmatprep.subr.bf16.mxu0 %v6631_v0  ;;  %6538 = vmatprep.subr.bf16.mxu1 %v6631_v0  ;;  %s7011_s9 = scalar_lea.vmem %s258_s8, %s5106_s10  ;;  %v6634_v3 = vld [vmem:[%s7000_s5 + $0x18] sm:$0xff]   ;;  %v6635_v5 = vld [vmem:[%s7000_s5 + $0x20] sm:$0xff]   ;;  %v6636_v6 = vld [vmem:[%s7000_s5 + $0x28] sm:$0xff]   ;;  %s7102_s12 = scalar_lea.vmem %s8147_s2, %s4705_s25 }
  0x26   : > { %6267 = vmatpush3.bf16.msra.mxu0 %v6631_v0  ;;  %6546 = vmatpush3.bf16.msra.mxu1 %v6631_v0  ;;  %v6639_v4 = vld [vmem:[%s7011_s9] sm:$0xff]   ;;  %v6637_v7 = vld [vmem:[%s7000_s5 + $0x30] sm:$0xff]   ;;  %v6638_v8 = vld [vmem:[%s7000_s5 + $0x38] sm:$0xff]   ;;  %s8049_s13 = sand.u32 1, %s6869_s16   ;;  %s5100_s14 = sshll.u32 %s6881_s19, 1 }
  0x27   : > { %6268 = vmatprep.subr.bf16.mxu0 %v6632_v1  ;;  %6539 = vmatprep.subr.bf16.mxu1 %v6632_v1  ;;  %v6640_v9 = vld [vmem:[%s7011_s9 + $0x8] sm:$0xff]   ;;  %v6641_v10 = vld [vmem:[%s7011_s9 + $0x10] sm:$0xff]   ;;  %v6642_v11 = vld [vmem:[%s7011_s9 + $0x18] sm:$0xff]   ;;  %s4513_s23 = sadd.s32 %s6877_s18, %s5100_s14  ;;  %s247_s27 = scalar_lea.vmem [#allocation2], %s8049_s13 }
  0x28   : > { %6282 = vmatprep.mubr.bf16.mxu0 %v6639_v4  ;;  %v6643_v12 = vld [vmem:[%s7011_s9 + $0x20] sm:$0xff]   ;;  %v6644_v13 = vld [vmem:[%s7011_s9 + $0x28] sm:$0xff]   ;;  %v6645_v14 = vld [vmem:[%s7011_s9 + $0x30] sm:$0xff]   ;;  %s5101_s24 = sshll.u32 %s4513_s23, 4  ;;  %s4517_s30 = sshll.u32 %s247_s27, 4  ;;  %s8062_s30 = int_to_ptr.vmem [resolvable:$true] %s4517_s30 }
  0x29   : > { %v6646_v15 = vld [vmem:[%s7011_s9 + $0x38] sm:$0xff]   ;;  %v6647_v16 = vld [vmem:[%s7011_s9 + $0x40] sm:$0xff]   ;;  %v6648_v17 = vld [vmem:[%s7011_s9 + $0x48] sm:$0xff]   ;;  %s253_s5 = scalar_lea.vmem [#allocation4], %s8049_s13  ;;  %s8060_s10 = scalar_lea.hbm %s8148_s3, %s5101_s24 }
  0x2a   : > { %6269 = vmatpush3.bf16.msra.mxu0 %v6632_v1  ;;  %6547 = vmatpush3.bf16.msra.mxu1 %v6632_v1  ;;  %v6649_v18 = vld [vmem:[%s7011_s9 + $0x50] sm:$0xff]   ;;  %v6650_v19 = vld [vmem:[%s7011_s9 + $0x58] sm:$0xff]   ;;  %v6651_v20 = vld [vmem:[%s7011_s9 + $0x60] sm:$0xff]   ;;  %s4532_s6 = sshll.u32 %s253_s5, 4  ;;  %s8067_s25 = scalar_lea.hbm %s8149_s4, %s5101_s24  ;;  %s8069_s6 = int_to_ptr.vmem [resolvable:$true] %s4532_s6 }
  0x2b   : > { %6270 = vmatprep.subr.bf16.mxu0 %v6633_v2  ;;  %6540 = vmatprep.subr.bf16.mxu1 %v6633_v2  ;;  %v6652_v21 = vld [vmem:[%s7011_s9 + $0x68] sm:$0xff]   ;;  %v6653_v22 = vld [vmem:[%s7011_s9 + $0x70] sm:$0xff]   ;;  %v6654_v23 = vld [vmem:[%s7011_s9 + $0x78] sm:$0xff]   ;;  %s4496_s26 = scalar_lea.sflag [#allocation3], %s8049_s13  ;;  %s6767_s11 = scalar_lea.vmem %s8062_s30, 16 }
  0x2c   : > { %v6655_v24 = vld [vmem:[%s7011_s9 + $0x80] sm:$0xff]   ;;  %v6656_v25 = vld [vmem:[%s7011_s9 + $0x88] sm:$0xff]   ;;  %v6657_v26 = vld [vmem:[%s7011_s9 + $0x90] sm:$0xff]   ;;  %p6768_p0 = scmp.ne.s32.totalorder %s8062_s30, %s6767_s11 }
  0x2d   : > { %v6658_v27 = vld [vmem:[%s7011_s9 + $0x98] sm:$0xff]   ;;  %v6659_v28 = vld [vmem:[%s7011_s9 + $0xa0] sm:$0xff]   ;;  %v6660_v29 = vld [vmem:[%s7011_s9 + $0xa8] sm:$0xff]  }
  0x2e   : > { %6271 = vmatpush3.bf16.msra.mxu0 %v6633_v2  ;;  %6548 = vmatpush3.bf16.msra.mxu1 %v6633_v2  ;;  %v6661_v30 = vld [vmem:[%s7011_s9 + $0xb0] sm:$0xff]   ;;  %v6662_v31 = vld [vmem:[%s7011_s9 + $0xb8] sm:$0xff]   ;;  %v6663_v32 = vld [vmem:[%s7011_s9 + $0xc0] sm:$0xff]   ;;  %p6769_p1 = pnand %p6768_p0, %p6973_p3 }
  0x2f   : > { %6272 = vmatprep.subr.bf16.mxu0 %v6634_v3  ;;  %6541 = vmatprep.subr.bf16.mxu1 %v6634_v3  ;;  %v6664_v33 = vld [vmem:[%s7011_s9 + $0xc8] sm:$0xff]   ;;  %v6665_v34 = vld [vmem:[%s7011_s9 + $0xd0] sm:$0xff]   ;;  %v6666_v35 = vld [vmem:[%s7011_s9 + $0xd8] sm:$0xff]  }
  0x30   : > { %v6667_v36 = vld [vmem:[%s7011_s9 + $0xe0] sm:$0xff]   ;;  %v6668_v37 = vld [vmem:[%s7011_s9 + $0xe8] sm:$0xff]   ;;  %v6669_v38 = vld [vmem:[%s7011_s9 + $0xf0] sm:$0xff]   ;;  %p6770_p2 = pneg %p6769_p1 }
  0x31   : > { %v6670_v39 = vld [vmem:[%s7011_s9 + $0xf8] sm:$0xff]   ;;  %v6671_v40 = vld [vmem:[%s7011_s9 + $0x100] sm:$0xff]   ;;  %v6704_v42 = vld [vmem:[%s7011_s9 + $0x208] sm:$0xff]  }
  0x32   : > { %6273 = vmatpush3.bf16.msra.mxu0 %v6634_v3  ;;  %6549 = vmatpush3.bf16.msra.mxu1 %v6634_v3  ;;  %v6703_v41 = vld [vmem:[%s7011_s9 + $0x200] sm:$0xff]   ;;  %v6672_v43 = vld [vmem:[%s7011_s9 + $0x108] sm:$0xff]   ;;  %v6673_v44 = vld [vmem:[%s7011_s9 + $0x110] sm:$0xff]  }
  0x33   : > { %6274 = vmatprep.subr.bf16.mxu0 %v6635_v5  ;;  %6542 = vmatprep.subr.bf16.mxu1 %v6635_v5  ;;  %v6705_v45 = vld [vmem:[%s7011_s9 + $0x210] sm:$0xff]   ;;  %v6706_v46 = vld [vmem:[%s7011_s9 + $0x218] sm:$0xff]   ;;  %v6675_v48 = vld [vmem:[%s7011_s9 + $0x120] sm:$0xff]  }
  0x34   : > { %6410 = vmatprep.mubr.bf16.mxu1 %v6703_v41  ;;  %v6674_v47 = vld [vmem:[%s7011_s9 + $0x118] sm:$0xff]   ;;  %v6707_v49 = vld [vmem:[%s7011_s9 + $0x220] sm:$0xff]   ;;  %v6708_v50 = vld [vmem:[%s7011_s9 + $0x228] sm:$0xff]  }
  0x35   : > { %v6676_v51 = vld [vmem:[%s7011_s9 + $0x128] sm:$0xff]   ;;  %v6677_v52 = vld [vmem:[%s7011_s9 + $0x130] sm:$0xff]   ;;  %v6710_v54 = vld [vmem:[%s7011_s9 + $0x238] sm:$0xff]  }
  0x36   : > { %6275 = vmatpush3.bf16.msra.mxu0 %v6635_v5  ;;  %6550 = vmatpush3.bf16.msra.mxu1 %v6635_v5  ;;  %v6709_v53 = vld [vmem:[%s7011_s9 + $0x230] sm:$0xff]   ;;  %v6678_v55 = vld [vmem:[%s7011_s9 + $0x138] sm:$0xff]   ;;  %v6679_v56 = vld [vmem:[%s7011_s9 + $0x140] sm:$0xff]  }
  0x37   : > { %6276 = vmatprep.subr.bf16.mxu0 %v6636_v6  ;;  %6543 = vmatprep.subr.bf16.mxu1 %v6636_v6  ;;  %v6711_v57 = vld [vmem:[%s7011_s9 + $0x240] sm:$0xff]   ;;  %v6712_v58 = vld [vmem:[%s7011_s9 + $0x248] sm:$0xff]   ;;  %v6681_v60 = vld [vmem:[%s7011_s9 + $0x150] sm:$0xff]  }
  0x38   : > { %v6680_v59 = vld [vmem:[%s7011_s9 + $0x148] sm:$0xff]   ;;  %v6713_v61 = vld [vmem:[%s7011_s9 + $0x250] sm:$0xff]   ;;  %v6714_v62 = vld [vmem:[%s7011_s9 + $0x258] sm:$0xff]  }
  0x39   : > { %v6682_v63 = vld [vmem:[%s7011_s9 + $0x158] sm:$0xff]   ;;  %v6683_v0 = vld [vmem:[%s7011_s9 + $0x160] sm:$0xff]   ;;  %v6716_v2 = vld [vmem:[%s7011_s9 + $0x268] sm:$0xff]  }
  0x3a   : > { %6277 = vmatpush3.bf16.msra.mxu0 %v6636_v6  ;;  %6551 = vmatpush3.bf16.msra.mxu1 %v6636_v6  ;;  %v6715_v1 = vld [vmem:[%s7011_s9 + $0x260] sm:$0xff]   ;;  %v6684_v3 = vld [vmem:[%s7011_s9 + $0x168] sm:$0xff]   ;;  %v6685_v4 = vld [vmem:[%s7011_s9 + $0x170] sm:$0xff]  }
  0x3b   : > { %6278 = vmatprep.subr.bf16.mxu0 %v6637_v7  ;;  %6544 = vmatprep.subr.bf16.mxu1 %v6637_v7  ;;  %v6717_v5 = vld [vmem:[%s7011_s9 + $0x270] sm:$0xff]   ;;  %v6718_v6 = vld [vmem:[%s7011_s9 + $0x278] sm:$0xff]  }
  0x3e   : > { %6279 = vmatpush3.bf16.msra.mxu0 %v6637_v7  ;;  %6552 = vmatpush3.bf16.msra.mxu1 %v6637_v7  ;;  %v6686_v7 = vld [vmem:[%s7011_s9 + $0x178] sm:$0xff]  }
  0x3f   : > { %6280 = vmatprep.subr.bf16.mxu0 %v6638_v8  ;;  %6545 = vmatprep.subr.bf16.mxu1 %v6638_v8 }
  0x42   : > { %6281 = vmatpush3.bf16.msra.mxu0 %v6638_v8  ;;  %6553 = vmatpush3.bf16.msra.mxu1 %v6638_v8  ;;  %v6687_v8 = vld [vmem:[%s7011_s9 + $0x180] sm:$0xff]  }
  0x45   : > { %6283 = vmatmul.mubr.bf16.vlgmr.msra.gmra.mrb[0].mxu0 %v6640_v9  ;;  %6411 = vmatmul.mubr.bf16.vlgmr.msra.gmra.mrb[0].mxu1 %v6704_v42  ;;  %v6719_v9 = vld [vmem:[%s7011_s9 + $0x280] sm:$0xff]   ;;  %v6728_v42 = vld [vmem:[%s7011_s9 + $0x2c8] sm:$0xff]  }
  0x46   : > { %6286 = vmatprep.mubr.bf16.mxu0 %v6641_v10  ;;  %6414 = vmatprep.mubr.bf16.mxu1 %v6705_v45  ;;  %v6720_v10 = vld [vmem:[%s7011_s9 + $0x288] sm:$0xff]  }
  0x4d   : > { %6287 = vmatmul.mubr.bf16.gmra.mrb[4].mxu0 %v6642_v11  ;;  %6415 = vmatmul.mubr.bf16.gmra.mrb[4].mxu1 %v6706_v46  ;;  %v6688_v11 = vld [vmem:[%s7011_s9 + $0x188] sm:$0xff]  }
  0x4e   : > { %6290 = vmatprep.mubr.bf16.mxu0 %v6643_v12  ;;  %6418 = vmatprep.mubr.bf16.mxu1 %v6707_v49  ;;  %v6689_v12 = vld [vmem:[%s7011_s9 + $0x190] sm:$0xff]  }
  0x4f   : > { %v6697_v49 = vld [vmem:[%s7011_s9 + $0x1d0] sm:$0xff]  }
  0x55   : > { %6291 = vmatmul.mubr.bf16.gmra.mrb[8].mxu0 %v6644_v13  ;;  %6419 = vmatmul.mubr.bf16.gmra.mrb[8].mxu1 %v6708_v50  ;;  %v6721_v13 = vld [vmem:[%s7011_s9 + $0x290] sm:$0xff]  }
  0x56   : > { %6294 = vmatprep.mubr.bf16.mxu0 %v6645_v14  ;;  %6422 = vmatprep.mubr.bf16.mxu1 %v6709_v53  ;;  %v6722_v14 = vld [vmem:[%s7011_s9 + $0x298] sm:$0xff]  }
  0x5d   : > { %6295 = vmatmul.mubr.bf16.gmra.mrb[12].mxu0 %v6646_v15  ;;  %6423 = vmatmul.mubr.bf16.gmra.mrb[12].mxu1 %v6710_v54  ;;  %v6690_v15 = vld [vmem:[%s7011_s9 + $0x198] sm:$0xff]  }
  0x5e   : > { %6298 = vmatprep.mubr.bf16.mxu0 %v6647_v16  ;;  %6426 = vmatprep.mubr.bf16.mxu1 %v6711_v57  ;;  %v6691_v16 = vld [vmem:[%s7011_s9 + $0x1a0] sm:$0xff]  }
  0x65   : > { %6299 = vmatmul.mubr.bf16.gmra.mrb[16].mxu0 %v6648_v17  ;;  %6427 = vmatmul.mubr.bf16.gmra.mrb[16].mxu1 %v6712_v58  ;;  %v6723_v17 = vld [vmem:[%s7011_s9 + $0x2a0] sm:$0xff]  }
  0x66   : > { %6302 = vmatprep.mubr.bf16.mxu0 %v6649_v18  ;;  %6430 = vmatprep.mubr.bf16.mxu1 %v6713_v61  ;;  %v6724_v18 = vld [vmem:[%s7011_s9 + $0x2a8] sm:$0xff]  }
  0x6d   : > { %6303 = vmatmul.mubr.bf16.gmra.mrb[20].mxu0 %v6650_v19  ;;  %6431 = vmatmul.mubr.bf16.gmra.mrb[20].mxu1 %v6714_v62  ;;  %v6692_v19 = vld [vmem:[%s7011_s9 + $0x1a8] sm:$0xff]  }
  0x6e   : > { %6306 = vmatprep.mubr.bf16.mxu0 %v6651_v20  ;;  %6434 = vmatprep.mubr.bf16.mxu1 %v6715_v1  ;;  %v6693_v20 = vld [vmem:[%s7011_s9 + $0x1b0] sm:$0xff]  }
  0x75   : > { %6307 = vmatmul.mubr.bf16.gmra.mrb[24].mxu0 %v6652_v21  ;;  %6435 = vmatmul.mubr.bf16.gmra.mrb[24].mxu1 %v6716_v2  ;;  %v6725_v21 = vld [vmem:[%s7011_s9 + $0x2b0] sm:$0xff]   ;;  %v6698_v2 = vld [vmem:[%s7011_s9 + $0x1d8] sm:$0xff]  }
  0x76   : > { %6310 = vmatprep.mubr.bf16.mxu0 %v6653_v22  ;;  %6438 = vmatprep.mubr.bf16.mxu1 %v6717_v5 }
  0x7d   : > { %6311 = vmatmul.mubr.bf16.gmra.mrb[28].mxu0 %v6654_v23  ;;  %6439 = vmatmul.mubr.bf16.gmra.mrb[28].mxu1 %v6718_v6  ;;  %v6726_v23 = vld [vmem:[%s7011_s9 + $0x2b8] sm:$0xff]  }
  0x7e   : > { %6314 = vmatprep.mubr.bf16.mxu0 %v6655_v24  ;;  %6442 = vmatprep.mubr.bf16.mxu1 %v6719_v9 }
  0x85   : > { %6315 = vmatmul.mubr.bf16.gmra.mrb[32].mxu0 %v6656_v25  ;;  %6443 = vmatmul.mubr.bf16.gmra.mrb[32].mxu1 %v6720_v10  ;;  %v6694_v25 = vld [vmem:[%s7011_s9 + $0x1b8] sm:$0xff]  }
  0x86   : > { %6318 = vmatprep.mubr.bf16.mxu0 %v6657_v26  ;;  %6446 = vmatprep.mubr.bf16.mxu1 %v6721_v13 }
  0x8d   : > { %6319 = vmatmul.mubr.bf16.gmra.mrb[36].mxu0 %v6658_v27  ;;  %6447 = vmatmul.mubr.bf16.gmra.mrb[36].mxu1 %v6722_v14  ;;  %v6695_v27 = vld [vmem:[%s7011_s9 + $0x1c0] sm:$0xff]  }
  0x8e   : > { %6322 = vmatprep.mubr.bf16.mxu0 %v6659_v28  ;;  %6450 = vmatprep.mubr.bf16.mxu1 %v6723_v17  ;;  %v6731_v17 = vld [vmem:[%s7011_s9 + $0x2e0] sm:$0xff]  }
  0x95   : > { %6323 = vmatmul.mubr.bf16.gmra.mrb[40].mxu0 %v6660_v29  ;;  %6451 = vmatmul.mubr.bf16.gmra.mrb[40].mxu1 %v6724_v18 }
  0x96   : > { %6326 = vmatprep.mubr.bf16.mxu0 %v6661_v30  ;;  %6454 = vmatprep.mubr.bf16.mxu1 %v6725_v21 }
  0x9d   : > { %6327 = vmatmul.mubr.bf16.gmra.mrb[44].mxu0 %v6662_v31  ;;  %6455 = vmatmul.mubr.bf16.gmra.mrb[44].mxu1 %v6726_v23 }
  0x9e   : > { %6330 = vmatprep.mubr.bf16.mxu0 %v6663_v32 }
  0xa5   : > { %6331 = vmatmul.mubr.bf16.gmra.mrb[48].mxu0 %v6664_v33 }
  0xa6   : > { %6334 = vmatprep.mubr.bf16.mxu0 %v6665_v34 }
  0xad   : > { %6335 = vmatmul.mubr.bf16.gmra.mrb[52].mxu0 %v6666_v35 }
  0xae   : > { %6338 = vmatprep.mubr.bf16.mxu0 %v6667_v36 }
  0xb5   : > { %6339 = vmatmul.mubr.bf16.gmra.mrb[56].mxu0 %v6668_v37  ;;  %v6727_v37 = vld [vmem:[%s7011_s9 + $0x2c0] sm:$0xff]  }
  0xb6   : > { %6342 = vmatprep.mubr.bf16.mxu0 %v6669_v38  ;;  %6458 = vmatprep.mubr.bf16.mxu1 %v6727_v37 }
  0xb7   : > { %6459 = vmatmul.mubr.bf16.gmra.mrb[48].mxu1 %v6728_v42 }
  0xbd   : > { %6343 = vmatmul.mubr.bf16.gmra.mrb[60].mxu0 %v6670_v39 }
  0xbe   : > { %6346 = vmatprep.mubr.bf16.mxu0 %v6671_v40 }
  0xc5   : > { %6347 = vmatmul.mubr.bf16.gmra.mrb[64].mxu0 %v6672_v43 }
  0xc6   : > { %6350 = vmatprep.mubr.bf16.mxu0 %v6673_v44  ;;  %v6696_v44 = vld [vmem:[%s7011_s9 + $0x1c8] sm:$0xff]  }
  0xcd   : > { %6351 = vmatmul.mubr.bf16.gmra.mrb[68].mxu0 %v6674_v47 }
  0xce   : > { %6354 = vmatprep.mubr.bf16.mxu0 %v6675_v48 }
  0xd5   : > { %6355 = vmatmul.mubr.bf16.gmra.mrb[72].mxu0 %v6676_v51 }
  0xd6   : > { %6358 = vmatprep.mubr.bf16.mxu0 %v6677_v52 }
  0xdd   : > { %6359 = vmatmul.mubr.bf16.gmra.mrb[76].mxu0 %v6678_v55 }
  0xde   : > { %6362 = vmatprep.mubr.bf16.mxu0 %v6679_v56 }
  0xe5   : > { %6363 = vmatmul.mubr.bf16.gmra.mrb[80].mxu0 %v6680_v59  ;;  %v6729_v59 = vld [vmem:[%s7011_s9 + $0x2d0] sm:$0xff]  }
  0xe6   : > { %6366 = vmatprep.mubr.bf16.mxu0 %v6681_v60  ;;  %6462 = vmatprep.mubr.bf16.mxu1 %v6729_v59 }
  0xed   : > { %6367 = vmatmul.mubr.bf16.gmra.mrb[84].mxu0 %v6682_v63 }
  0xee   : > { %6370 = vmatprep.mubr.bf16.mxu0 %v6683_v0  ;;  %v6730_v0 = vld [vmem:[%s7011_s9 + $0x2d8] sm:$0xff]  }
  0xef   : > { %6463 = vmatmul.mubr.bf16.gmra.mrb[52].mxu1 %v6730_v0 }
  0xf0   : > { %6466 = vmatprep.mubr.bf16.mxu1 %v6731_v17 }
  0xf5   : > { %6371 = vmatmul.mubr.bf16.gmra.mrb[88].mxu0 %v6684_v3 }
  0xf6   : > { %6374 = vmatprep.mubr.bf16.mxu0 %v6685_v4 }
  0xfd   : > { %6375 = vmatmul.mubr.bf16.gmra.mrb[92].mxu0 %v6686_v7  ;;  %v6699_v7 = vld [vmem:[%s7011_s9 + $0x1e0] sm:$0xff]  }
  0xfe   : > { %6378 = vmatprep.mubr.bf16.mxu0 %v6687_v8 }
 0x105   : > { %6379 = vmatmul.mubr.bf16.gmra.mrb[96].mxu0 %v6688_v11 }
 0x106   : > { %6382 = vmatprep.mubr.bf16.mxu0 %v6689_v12 }
 0x10d   : > { %6383 = vmatmul.mubr.bf16.gmra.mrb[100].mxu0 %v6690_v15 }
 0x10e   : > { %6386 = vmatprep.mubr.bf16.mxu0 %v6691_v16 }
 0x115   : > { %6387 = vmatmul.mubr.bf16.gmra.mrb[104].mxu0 %v6692_v19 }
 0x116   : > { %6390 = vmatprep.mubr.bf16.mxu0 %v6693_v20 }
 0x118   : > { %v6284_v22 = vpop.f32.mrb[0].mxu0 }
 0x119   : > { %v1403_v24 = vpop.f32.mrb[1].mxu0  ;;  %v2690_v34 = vmul.f32 %v6284_v22, %v6284_v22 }
 0x11a   : > { %v6285_v26 = vpop.f32.mrb[2].mxu0  ;;  %v2688_v30 = vmul.f32 %v1403_v24, %v1403_v24 }
 0x11b   : > { %v5371_v28 = vpack.c.bf16 %v6285_v26, %v6284_v22  ;;  %v1406_v29 = vpop.f32.mrb[3].mxu0  ;;  %v2691_v38 = vmul.f32 %v6285_v26, %v6285_v26 }
 0x11c   : > { %v2426_v31 = vadd.f32 %v1406_v29, %v1403_v24  ;;  %v2689_v32 = vmul.f32 %v1406_v29, %v1406_v29  ;;  %v5366_v33 = vpack.c.bf16 %v1406_v29, %v1403_v24  ;;  %v6700_v24 = vld [vmem:[%s7011_s9 + $0x1e8] sm:$0xff]   ;;  %v6701_v29 = vld [vmem:[%s7011_s9 + $0x1f0] sm:$0xff]  }
 0x11d   : > { %6003 = vst [vmem:[%s7102_s12 + $0x8] sm:$0xff] %v5371_v28   ;;  %6391 = vmatmul.mubr.bf16.gmra.mrb[108].mxu0 %v6694_v25 }
 0x11e   : > { %v2427_v35 = vadd.f32 %v6284_v22, %v2426_v31  ;;  %v2944_v36 = vadd.f32 %v2689_v32, %v2688_v30  ;;  %5367 = vst [vmem:[%s7102_s12] sm:$0xff] %v5366_v33   ;;  %6394 = vmatprep.mubr.bf16.mxu0 %v6695_v27  ;;  %v6732_v22 = vld [vmem:[%s7011_s9 + $0x2e8] sm:$0xff]  }
 0x11f   : > { %6467 = vmatmul.mubr.bf16.gmra.mrb[56].mxu1 %v6732_v22 }
 0x120   : > { %v2428_v39 = vadd.f32 %v6285_v26, %v2427_v35  ;;  %v2945_v40 = vadd.f32 %v2944_v36, %v2690_v34  ;;  %v6288_v41 = vpop.f32.mrb[4].mxu0 }
 0x121   : > { %v1419_v43 = vpop.f32.mrb[5].mxu0  ;;  %v2694_v56 = vmul.f32 %v6288_v41, %v6288_v41 }
 0x122   : > { %v2946_v45 = vadd.f32 %v2945_v40, %v2691_v38  ;;  %v2429_v46 = vadd.f32 %v2428_v39, %v1419_v43  ;;  %v2692_v47 = vmul.f32 %v1419_v43, %v1419_v43  ;;  %v6289_v48 = vpop.f32.mrb[6].mxu0  ;;  %v6733_v39 = vld [vmem:[%s7011_s9 + $0x2f0] sm:$0xff]  }
 0x123   : > { %v5381_v50 = vpack.c.bf16 %v6289_v48, %v6288_v41  ;;  %v1422_v51 = vpop.f32.mrb[7].mxu0  ;;  %v2695_v60 = vmul.f32 %v6289_v48, %v6289_v48  ;;  %6470 = vmatprep.mubr.bf16.mxu1 %v6733_v39 }
 0x124   : > { %v2947_v52 = vadd.f32 %v2946_v45, %v2692_v47  ;;  %v2430_v53 = vadd.f32 %v2429_v46, %v1422_v51  ;;  %v2693_v54 = vmul.f32 %v1422_v51, %v1422_v51  ;;  %v5376_v55 = vpack.c.bf16 %v1422_v51, %v1419_v43  ;;  %v6702_v46 = vld [vmem:[%s7011_s9 + $0x1f8] sm:$0xff]  }
 0x125   : > { %6005 = vst [vmem:[%s7102_s12 + $0x18] sm:$0xff] %v5381_v50   ;;  %6395 = vmatmul.mubr.bf16.gmra.mrb[112].mxu0 %v6696_v44  ;;  %v6734_v44 = vld [vmem:[%s7011_s9 + $0x2f8] sm:$0xff]  }
 0x126   : > { %v2431_v57 = vadd.f32 %v6288_v41, %v2430_v53  ;;  %v2948_v58 = vadd.f32 %v2947_v52, %v2693_v54  ;;  %6004 = vst [vmem:[%s7102_s12 + $0x10] sm:$0xff] %v5376_v55   ;;  %6398 = vmatprep.mubr.bf16.mxu0 %v6697_v49 }
 0x127   : > { %6471 = vmatmul.mubr.bf16.gmra.mrb[60].mxu1 %v6734_v44 }
 0x128   : > { %v2432_v61 = vadd.f32 %v6289_v48, %v2431_v57  ;;  %v2949_v62 = vadd.f32 %v2948_v58, %v2694_v56  ;;  %v6292_v63 = vpop.f32.mrb[8].mxu0 }
 0x129   : > { %v1435_v1 = vpop.f32.mrb[9].mxu0  ;;  %v2698_v14 = vmul.f32 %v6292_v63, %v6292_v63 }
 0x12a   : > { %v2950_v3 = vadd.f32 %v2949_v62, %v2695_v60  ;;  %v2433_v4 = vadd.f32 %v2432_v61, %v1435_v1  ;;  %v2696_v5 = vmul.f32 %v1435_v1, %v1435_v1  ;;  %v6293_v6 = vpop.f32.mrb[10].mxu0  ;;  %v6735_v60 = vld [vmem:[%s7011_s9 + $0x300] sm:$0xff]  }
 0x12b   : > { %v5391_v8 = vpack.c.bf16 %v6293_v6, %v6292_v63  ;;  %v1438_v9 = vpop.f32.mrb[11].mxu0  ;;  %v2699_v18 = vmul.f32 %v6293_v6, %v6293_v6  ;;  %6474 = vmatprep.mubr.bf16.mxu1 %v6735_v60 }
 0x12c   : > { %v2951_v10 = vadd.f32 %v2950_v3, %v2696_v5  ;;  %v2434_v11 = vadd.f32 %v2433_v4, %v1438_v9  ;;  %v2697_v12 = vmul.f32 %v1438_v9, %v1438_v9  ;;  %v5386_v13 = vpack.c.bf16 %v1438_v9, %v1435_v1  ;;  %v6736_v1 = vld [vmem:[%s7011_s9 + $0x308] sm:$0xff]  }
 0x12d   : > { %6007 = vst [vmem:[%s7102_s12 + $0x28] sm:$0xff] %v5391_v8   ;;  %6399 = vmatmul.mubr.bf16.gmra.mrb[116].mxu0 %v6698_v2 }
 0x12e   : > { %v2435_v15 = vadd.f32 %v6292_v63, %v2434_v11  ;;  %v2952_v16 = vadd.f32 %v2951_v10, %v2697_v12  ;;  %6006 = vst [vmem:[%s7102_s12 + $0x20] sm:$0xff] %v5386_v13   ;;  %6402 = vmatprep.mubr.bf16.mxu0 %v6699_v7 }
 0x12f   : > { %6475 = vmatmul.mubr.bf16.gmra.mrb[64].mxu1 %v6736_v1 }
 0x130   : > { %v2436_v19 = vadd.f32 %v6293_v6, %v2435_v15  ;;  %v2953_v20 = vadd.f32 %v2952_v16, %v2698_v14  ;;  %v6296_v21 = vpop.f32.mrb[12].mxu0  ;;  %v6737_v16 = vld [vmem:[%s7011_s9 + $0x310] sm:$0xff]  }
 0x131   : > { %v1451_v23 = vpop.f32.mrb[13].mxu0  ;;  %v2702_v36 = vmul.f32 %v6296_v21, %v6296_v21  ;;  %6478 = vmatprep.mubr.bf16.mxu1 %v6737_v16 }
 0x132   : > { %v2954_v25 = vadd.f32 %v2953_v20, %v2699_v18  ;;  %v2437_v26 = vadd.f32 %v2436_v19, %v1451_v23  ;;  %v2700_v27 = vmul.f32 %v1451_v23, %v1451_v23  ;;  %v6297_v28 = vpop.f32.mrb[14].mxu0 }
 0x133   : > { %v5401_v30 = vpack.c.bf16 %v6297_v28, %v6296_v21  ;;  %v1454_v31 = vpop.f32.mrb[15].mxu0  ;;  %v2703_v40 = vmul.f32 %v6297_v28, %v6297_v28 }
 0x134   : > { %v2955_v32 = vadd.f32 %v2954_v25, %v2700_v27  ;;  %v2438_v33 = vadd.f32 %v2437_v26, %v1454_v31  ;;  %v2701_v34 = vmul.f32 %v1454_v31, %v1454_v31  ;;  %v5396_v35 = vpack.c.bf16 %v1454_v31, %v1451_v23 }
 0x135   : > { %6009 = vst [vmem:[%s7102_s12 + $0x38] sm:$0xff] %v5401_v30   ;;  %6403 = vmatmul.mubr.bf16.gmra.mrb[120].mxu0 %v6700_v24 }
 0x136   : > { %v2439_v37 = vadd.f32 %v6296_v21, %v2438_v33  ;;  %v2956_v38 = vadd.f32 %v2955_v32, %v2701_v34  ;;  %6008 = vst [vmem:[%s7102_s12 + $0x30] sm:$0xff] %v5396_v35   ;;  %6406 = vmatprep.mubr.bf16.mxu0 %v6701_v29  ;;  %v6738_v21 = vld [vmem:[%s7011_s9 + $0x318] sm:$0xff]  }
 0x137   : > { %6479 = vmatmul.mubr.bf16.gmra.mrb[68].mxu1 %v6738_v21 }
 0x138   : > { %v2440_v41 = vadd.f32 %v6297_v28, %v2439_v37  ;;  %v2957_v42 = vadd.f32 %v2956_v38, %v2702_v36  ;;  %v6300_v43 = vpop.f32.mrb[16].mxu0  ;;  %v6739_v36 = vld [vmem:[%s7011_s9 + $0x320] sm:$0xff]  }
 0x139   : > { %v1467_v45 = vpop.f32.mrb[17].mxu0  ;;  %v2706_v57 = vmul.f32 %v6300_v43, %v6300_v43  ;;  %6482 = vmatprep.mubr.bf16.mxu1 %v6739_v36 }
 0x13a   : > { %v2958_v47 = vadd.f32 %v2957_v42, %v2703_v40  ;;  %v2441_v48 = vadd.f32 %v2440_v41, %v1467_v45  ;;  %v2704_v49 = vmul.f32 %v1467_v45, %v1467_v45  ;;  %v6301_v50 = vpop.f32.mrb[18].mxu0  ;;  %v6740_v41 = vld [vmem:[%s7011_s9 + $0x328] sm:$0xff]  }
 0x13b   : > { %v5411_v51 = vpack.c.bf16 %v6301_v50, %v6300_v43  ;;  %v1470_v52 = vpop.f32.mrb[19].mxu0  ;;  %v2707_v61 = vmul.f32 %v6301_v50, %v6301_v50 }
 0x13c   : > { %v2959_v53 = vadd.f32 %v2958_v47, %v2704_v49  ;;  %v2442_v54 = vadd.f32 %v2441_v48, %v1470_v52  ;;  %v2705_v55 = vmul.f32 %v1470_v52, %v1470_v52  ;;  %v5406_v56 = vpack.c.bf16 %v1470_v52, %v1467_v45 }
 0x13d   : > { %6011 = vst [vmem:[%s7102_s12 + $0x48] sm:$0xff] %v5411_v51   ;;  %6407 = vmatmul.mubr.bf16.gmra.mrb[124].mxu0 %v6702_v46 }
 0x13e   : > { %v2443_v58 = vadd.f32 %v6300_v43, %v2442_v54  ;;  %v2960_v59 = vadd.f32 %v2959_v53, %v2705_v55  ;;  %6010 = vst [vmem:[%s7102_s12 + $0x40] sm:$0xff] %v5406_v56   ;;  %v6741_v56 = vld [vmem:[%s7011_s9 + $0x330] sm:$0xff]  }
 0x13f   : > { %6483 = vmatmul.mubr.bf16.gmra.mrb[72].mxu1 %v6740_v41 }
 0x140   : > { %v2444_v62 = vadd.f32 %v6301_v50, %v2443_v58  ;;  %v2961_v63 = vadd.f32 %v2960_v59, %v2706_v57  ;;  %v6304_v0 = vpop.f32.mrb[20].mxu0  ;;  %6486 = vmatprep.mubr.bf16.mxu1 %v6741_v56 }
 0x141   : > { %v1483_v2 = vpop.f32.mrb[21].mxu0  ;;  %v2710_v13 = vmul.f32 %v6304_v0, %v6304_v0 }
 0x142   : > { %v2962_v3 = vadd.f32 %v2961_v63, %v2707_v61  ;;  %v2445_v4 = vadd.f32 %v2444_v62, %v1483_v2  ;;  %v2708_v5 = vmul.f32 %v1483_v2, %v1483_v2  ;;  %v6305_v6 = vpop.f32.mrb[22].mxu0  ;;  %v6742_v61 = vld [vmem:[%s7011_s9 + $0x338] sm:$0xff]  }
 0x143   : > { %v5421_v7 = vpack.c.bf16 %v6305_v6, %v6304_v0  ;;  %v1486_v8 = vpop.f32.mrb[23].mxu0  ;;  %v2711_v17 = vmul.f32 %v6305_v6, %v6305_v6 }
 0x144   : > { %v2963_v9 = vadd.f32 %v2962_v3, %v2708_v5  ;;  %v2446_v10 = vadd.f32 %v2445_v4, %v1486_v8  ;;  %v2709_v11 = vmul.f32 %v1486_v8, %v1486_v8  ;;  %v5416_v12 = vpack.c.bf16 %v1486_v8, %v1483_v2 }
 0x145   : > { %6013 = vst [vmem:[%s7102_s12 + $0x58] sm:$0xff] %v5421_v7  }
 0x146   : > { %v2447_v14 = vadd.f32 %v6304_v0, %v2446_v10  ;;  %v2964_v15 = vadd.f32 %v2963_v9, %v2709_v11  ;;  %6012 = vst [vmem:[%s7102_s12 + $0x50] sm:$0xff] %v5416_v12   ;;  %v6743_v12 = vld [vmem:[%s7011_s9 + $0x340] sm:$0xff]  }
 0x147   : > { %6487 = vmatmul.mubr.bf16.gmra.mrb[76].mxu1 %v6742_v61 }
 0x148   : > { %v2448_v18 = vadd.f32 %v6305_v6, %v2447_v14  ;;  %v2965_v19 = vadd.f32 %v2964_v15, %v2710_v13  ;;  %v6308_v20 = vpop.f32.mrb[24].mxu0  ;;  %6490 = vmatprep.mubr.bf16.mxu1 %v6743_v12 }
 0x149   : > { %v1499_v22 = vpop.f32.mrb[25].mxu0  ;;  %v2714_v33 = vmul.f32 %v6308_v20, %v6308_v20 }
 0x14a   : > { %v2966_v23 = vadd.f32 %v2965_v19, %v2711_v17  ;;  %v2449_v24 = vadd.f32 %v2448_v18, %v1499_v22  ;;  %v2712_v25 = vmul.f32 %v1499_v22, %v1499_v22  ;;  %v6309_v26 = vpop.f32.mrb[26].mxu0  ;;  %v6744_v17 = vld [vmem:[%s7011_s9 + $0x348] sm:$0xff]  }
 0x14b   : > { %v5431_v27 = vpack.c.bf16 %v6309_v26, %v6308_v20  ;;  %v1502_v28 = vpop.f32.mrb[27].mxu0  ;;  %v2715_v37 = vmul.f32 %v6309_v26, %v6309_v26 }
 0x14c   : > { %v2967_v29 = vadd.f32 %v2966_v23, %v2712_v25  ;;  %v2450_v30 = vadd.f32 %v2449_v24, %v1502_v28  ;;  %v2713_v31 = vmul.f32 %v1502_v28, %v1502_v28  ;;  %v5426_v32 = vpack.c.bf16 %v1502_v28, %v1499_v22 }
 0x14d   : > { %6015 = vst [vmem:[%s7102_s12 + $0x68] sm:$0xff] %v5431_v27  }
 0x14e   : > { %v2451_v34 = vadd.f32 %v6308_v20, %v2450_v30  ;;  %v2968_v35 = vadd.f32 %v2967_v29, %v2713_v31  ;;  %6014 = vst [vmem:[%s7102_s12 + $0x60] sm:$0xff] %v5426_v32   ;;  %v6745_v32 = vld [vmem:[%s7011_s9 + $0x350] sm:$0xff]  }
 0x14f   : > { %6491 = vmatmul.mubr.bf16.gmra.mrb[80].mxu1 %v6744_v17 }
 0x150   : > { %v2452_v38 = vadd.f32 %v6309_v26, %v2451_v34  ;;  %v2969_v39 = vadd.f32 %v2968_v35, %v2714_v33  ;;  %v6312_v40 = vpop.f32.mrb[28].mxu0  ;;  %6494 = vmatprep.mubr.bf16.mxu1 %v6745_v32 }
 0x151   : > { %v1515_v42 = vpop.f32.mrb[29].mxu0  ;;  %v2718_v53 = vmul.f32 %v6312_v40, %v6312_v40 }
 0x152   : > { %v2970_v43 = vadd.f32 %v2969_v39, %v2715_v37  ;;  %v2453_v44 = vadd.f32 %v2452_v38, %v1515_v42  ;;  %v2716_v45 = vmul.f32 %v1515_v42, %v1515_v42  ;;  %v6313_v46 = vpop.f32.mrb[30].mxu0  ;;  %v6746_v37 = vld [vmem:[%s7011_s9 + $0x358] sm:$0xff]  }
 0x153   : > { %v5441_v47 = vpack.c.bf16 %v6313_v46, %v6312_v40  ;;  %v1518_v48 = vpop.f32.mrb[31].mxu0  ;;  %v2719_v57 = vmul.f32 %v6313_v46, %v6313_v46 }
 0x154   : > { %v2971_v49 = vadd.f32 %v2970_v43, %v2716_v45  ;;  %v2454_v50 = vadd.f32 %v2453_v44, %v1518_v48  ;;  %v2717_v51 = vmul.f32 %v1518_v48, %v1518_v48  ;;  %v5436_v52 = vpack.c.bf16 %v1518_v48, %v1515_v42 }
 0x155   : > { %6017 = vst [vmem:[%s7102_s12 + $0x78] sm:$0xff] %v5441_v47  }
 0x156   : > { %v2455_v54 = vadd.f32 %v6312_v40, %v2454_v50  ;;  %v2972_v55 = vadd.f32 %v2971_v49, %v2717_v51  ;;  %6016 = vst [vmem:[%s7102_s12 + $0x70] sm:$0xff] %v5436_v52   ;;  %v6747_v52 = vld [vmem:[%s7011_s9 + $0x360] sm:$0xff]  }
 0x157   : > { %6495 = vmatmul.mubr.bf16.gmra.mrb[84].mxu1 %v6746_v37 }
 0x158   : > { %v2456_v58 = vadd.f32 %v6313_v46, %v2455_v54  ;;  %v2973_v59 = vadd.f32 %v2972_v55, %v2718_v53  ;;  %v6316_v60 = vpop.f32.mrb[32].mxu0  ;;  %6498 = vmatprep.mubr.bf16.mxu1 %v6747_v52 }
 0x159   : > { %v1531_v62 = vpop.f32.mrb[33].mxu0  ;;  %v2722_v9 = vmul.f32 %v6316_v60, %v6316_v60 }
 0x15a   : > { %v2974_v63 = vadd.f32 %v2973_v59, %v2719_v57  ;;  %v2457_v0 = vadd.f32 %v2456_v58, %v1531_v62  ;;  %v2720_v1 = vmul.f32 %v1531_v62, %v1531_v62  ;;  %v6317_v2 = vpop.f32.mrb[34].mxu0  ;;  %v6748_v57 = vld [vmem:[%s7011_s9 + $0x368] sm:$0xff]  }
 0x15b   : > { %v5451_v3 = vpack.c.bf16 %v6317_v2, %v6316_v60  ;;  %v1534_v4 = vpop.f32.mrb[35].mxu0  ;;  %v2723_v13 = vmul.f32 %v6317_v2, %v6317_v2 }
 0x15c   : > { %v2975_v5 = vadd.f32 %v2974_v63, %v2720_v1  ;;  %v2458_v6 = vadd.f32 %v2457_v0, %v1534_v4  ;;  %v2721_v7 = vmul.f32 %v1534_v4, %v1534_v4  ;;  %v5446_v8 = vpack.c.bf16 %v1534_v4, %v1531_v62 }
 0x15d   : > { %6019 = vst [vmem:[%s7102_s12 + $0x88] sm:$0xff] %v5451_v3  }
 0x15e   : > { %v2459_v10 = vadd.f32 %v6316_v60, %v2458_v6  ;;  %v2976_v11 = vadd.f32 %v2975_v5, %v2721_v7  ;;  %6018 = vst [vmem:[%s7102_s12 + $0x80] sm:$0xff] %v5446_v8   ;;  %v6749_v8 = vld [vmem:[%s7011_s9 + $0x370] sm:$0xff]  }
 0x15f   : > { %6499 = vmatmul.mubr.bf16.gmra.mrb[88].mxu1 %v6748_v57 }
 0x160   : > { %v2460_v14 = vadd.f32 %v6317_v2, %v2459_v10  ;;  %v2977_v15 = vadd.f32 %v2976_v11, %v2722_v9  ;;  %v6320_v16 = vpop.f32.mrb[36].mxu0  ;;  %6502 = vmatprep.mubr.bf16.mxu1 %v6749_v8 }
 0x161   : > { %v1547_v18 = vpop.f32.mrb[37].mxu0  ;;  %v2726_v29 = vmul.f32 %v6320_v16, %v6320_v16 }
 0x162   : > { %v2978_v19 = vadd.f32 %v2977_v15, %v2723_v13  ;;  %v2461_v20 = vadd.f32 %v2460_v14, %v1547_v18  ;;  %v2724_v21 = vmul.f32 %v1547_v18, %v1547_v18  ;;  %v6321_v22 = vpop.f32.mrb[38].mxu0  ;;  %v6750_v13 = vld [vmem:[%s7011_s9 + $0x378] sm:$0xff]  }
 0x163   : > { %v5461_v23 = vpack.c.bf16 %v6321_v22, %v6320_v16  ;;  %v1550_v24 = vpop.f32.mrb[39].mxu0  ;;  %v2727_v33 = vmul.f32 %v6321_v22, %v6321_v22 }
 0x164   : > { %v2979_v25 = vadd.f32 %v2978_v19, %v2724_v21  ;;  %v2462_v26 = vadd.f32 %v2461_v20, %v1550_v24  ;;  %v2725_v27 = vmul.f32 %v1550_v24, %v1550_v24  ;;  %v5456_v28 = vpack.c.bf16 %v1550_v24, %v1547_v18 }
 0x165   : > { %6021 = vst [vmem:[%s7102_s12 + $0x98] sm:$0xff] %v5461_v23  }
 0x166   : > { %v2463_v30 = vadd.f32 %v6320_v16, %v2462_v26  ;;  %v2980_v31 = vadd.f32 %v2979_v25, %v2725_v27  ;;  %6020 = vst [vmem:[%s7102_s12 + $0x90] sm:$0xff] %v5456_v28   ;;  %v6751_v28 = vld [vmem:[%s7011_s9 + $0x380] sm:$0xff]  }
 0x167   : > { %6503 = vmatmul.mubr.bf16.gmra.mrb[92].mxu1 %v6750_v13 }
 0x168   : > { %v2464_v34 = vadd.f32 %v6321_v22, %v2463_v30  ;;  %v2981_v35 = vadd.f32 %v2980_v31, %v2726_v29  ;;  %v6324_v36 = vpop.f32.mrb[40].mxu0  ;;  %6506 = vmatprep.mubr.bf16.mxu1 %v6751_v28 }
 0x169   : > { %v1563_v38 = vpop.f32.mrb[41].mxu0  ;;  %v2730_v49 = vmul.f32 %v6324_v36, %v6324_v36 }
 0x16a   : > { %v2982_v39 = vadd.f32 %v2981_v35, %v2727_v33  ;;  %v2465_v40 = vadd.f32 %v2464_v34, %v1563_v38  ;;  %v2728_v41 = vmul.f32 %v1563_v38, %v1563_v38  ;;  %v6325_v42 = vpop.f32.mrb[42].mxu0  ;;  %v6752_v33 = vld [vmem:[%s7011_s9 + $0x388] sm:$0xff]  }
 0x16b   : > { %v5471_v43 = vpack.c.bf16 %v6325_v42, %v6324_v36  ;;  %v1566_v44 = vpop.f32.mrb[43].mxu0  ;;  %v2731_v53 = vmul.f32 %v6325_v42, %v6325_v42 }
 0x16c   : > { %v2983_v45 = vadd.f32 %v2982_v39, %v2728_v41  ;;  %v2466_v46 = vadd.f32 %v2465_v40, %v1566_v44  ;;  %v2729_v47 = vmul.f32 %v1566_v44, %v1566_v44  ;;  %v5466_v48 = vpack.c.bf16 %v1566_v44, %v1563_v38 }
 0x16d   : > { %6023 = vst [vmem:[%s7102_s12 + $0xa8] sm:$0xff] %v5471_v43  }
 0x16e   : > { %v2467_v50 = vadd.f32 %v6324_v36, %v2466_v46  ;;  %v2984_v51 = vadd.f32 %v2983_v45, %v2729_v47  ;;  %6022 = vst [vmem:[%s7102_s12 + $0xa0] sm:$0xff] %v5466_v48   ;;  %v6753_v48 = vld [vmem:[%s7011_s9 + $0x390] sm:$0xff]  }
 0x16f   : > { %6507 = vmatmul.mubr.bf16.gmra.mrb[96].mxu1 %v6752_v33  ;;  %v6758_v33 = vld [vmem:[%s7011_s9 + $0x3b8] sm:$0xff]  }
 0x170   : > { %v2468_v54 = vadd.f32 %v6325_v42, %v2467_v50  ;;  %v2985_v55 = vadd.f32 %v2984_v51, %v2730_v49  ;;  %v6328_v56 = vpop.f32.mrb[44].mxu0  ;;  %6510 = vmatprep.mubr.bf16.mxu1 %v6753_v48 }
 0x171   : > { %v1579_v58 = vpop.f32.mrb[45].mxu0  ;;  %v2734_v5 = vmul.f32 %v6328_v56, %v6328_v56 }
 0x172   : > { %v2986_v59 = vadd.f32 %v2985_v55, %v2731_v53  ;;  %v2469_v60 = vadd.f32 %v2468_v54, %v1579_v58  ;;  %v2732_v61 = vmul.f32 %v1579_v58, %v1579_v58  ;;  %v6329_v62 = vpop.f32.mrb[46].mxu0  ;;  %v6754_v53 = vld [vmem:[%s7011_s9 + $0x398] sm:$0xff]  }
 0x173   : > { %v5481_v63 = vpack.c.bf16 %v6329_v62, %v6328_v56  ;;  %v1582_v0 = vpop.f32.mrb[47].mxu0  ;;  %v2735_v9 = vmul.f32 %v6329_v62, %v6329_v62 }
 0x174   : > { %v2987_v1 = vadd.f32 %v2986_v59, %v2732_v61  ;;  %v2470_v2 = vadd.f32 %v2469_v60, %v1582_v0  ;;  %v2733_v3 = vmul.f32 %v1582_v0, %v1582_v0  ;;  %v5476_v4 = vpack.c.bf16 %v1582_v0, %v1579_v58 }
 0x175   : > { %6025 = vst [vmem:[%s7102_s12 + $0xb8] sm:$0xff] %v5481_v63  }
 0x176   : > { %v2471_v6 = vadd.f32 %v6328_v56, %v2470_v2  ;;  %v2988_v7 = vadd.f32 %v2987_v1, %v2733_v3  ;;  %6024 = vst [vmem:[%s7102_s12 + $0xb0] sm:$0xff] %v5476_v4   ;;  %v6755_v4 = vld [vmem:[%s7011_s9 + $0x3a0] sm:$0xff]  }
 0x177   : > { %6511 = vmatmul.mubr.bf16.gmra.mrb[100].mxu1 %v6754_v53  ;;  %v6759_v53 = vld [vmem:[%s7011_s9 + $0x3c0] sm:$0xff]  }
 0x178   : > { %v2472_v10 = vadd.f32 %v6329_v62, %v2471_v6  ;;  %v2989_v11 = vadd.f32 %v2988_v7, %v2734_v5  ;;  %v6332_v12 = vpop.f32.mrb[48].mxu0  ;;  %6514 = vmatprep.mubr.bf16.mxu1 %v6755_v4 }
 0x179   : > { %v1595_v14 = vpop.f32.mrb[49].mxu0  ;;  %v2738_v25 = vmul.f32 %v6332_v12, %v6332_v12 }
 0x17a   : > { %v2990_v15 = vadd.f32 %v2989_v11, %v2735_v9  ;;  %v2473_v16 = vadd.f32 %v2472_v10, %v1595_v14  ;;  %v2736_v17 = vmul.f32 %v1595_v14, %v1595_v14  ;;  %v6333_v18 = vpop.f32.mrb[50].mxu0  ;;  %v6756_v9 = vld [vmem:[%s7011_s9 + $0x3a8] sm:$0xff]  }
 0x17b   : > { %v5491_v19 = vpack.c.bf16 %v6333_v18, %v6332_v12  ;;  %v1598_v20 = vpop.f32.mrb[51].mxu0  ;;  %v2739_v29 = vmul.f32 %v6333_v18, %v6333_v18 }
 0x17c   : > { %v2991_v21 = vadd.f32 %v2990_v15, %v2736_v17  ;;  %v2474_v22 = vadd.f32 %v2473_v16, %v1598_v20  ;;  %v2737_v23 = vmul.f32 %v1598_v20, %v1598_v20  ;;  %v5486_v24 = vpack.c.bf16 %v1598_v20, %v1595_v14 }
 0x17d   : > { %6027 = vst [vmem:[%s7102_s12 + $0xc8] sm:$0xff] %v5491_v19  }
 0x17e   : > { %v2475_v26 = vadd.f32 %v6332_v12, %v2474_v22  ;;  %v2992_v27 = vadd.f32 %v2991_v21, %v2737_v23  ;;  %6026 = vst [vmem:[%s7102_s12 + $0xc0] sm:$0xff] %v5486_v24   ;;  %v7173_v21 = vpop.f32.mrb[0].mxu1 }
 0x17f   : > { %6515 = vmatmul.mubr.bf16.gmra.mrb[104].mxu1 %v6756_v9 }
 0x180   : > { %v2476_v30 = vadd.f32 %v6333_v18, %v2475_v26  ;;  %v2993_v31 = vadd.f32 %v2992_v27, %v2738_v25  ;;  %v6336_v32 = vpop.f32.mrb[52].mxu0  ;;  %v7176_v25 = vpop.f32.mrb[1].mxu1  ;;  %v6757_v27 = vld [vmem:[%s7011_s9 + $0x3b0] sm:$0xff]  }
 0x181   : > { %v1611_v34 = vpop.f32.mrb[53].mxu0  ;;  %v2742_v45 = vmul.f32 %v6336_v32, %v6336_v32  ;;  %v7178_v26 = vpop.f32.mrb[2].mxu1  ;;  %6518 = vmatprep.mubr.bf16.mxu1 %v6757_v27 }
 0x182   : > { %v2994_v35 = vadd.f32 %v2993_v31, %v2739_v29  ;;  %v2477_v36 = vadd.f32 %v2476_v30, %v1611_v34  ;;  %v2740_v37 = vmul.f32 %v1611_v34, %v1611_v34  ;;  %v6337_v38 = vpop.f32.mrb[54].mxu0 }
 0x183   : > { %v5501_v39 = vpack.c.bf16 %v6337_v38, %v6336_v32  ;;  %v1614_v40 = vpop.f32.mrb[55].mxu0  ;;  %v2743_v49 = vmul.f32 %v6337_v38, %v6337_v38 }
 0x184   : > { %v2995_v41 = vadd.f32 %v2994_v35, %v2740_v37  ;;  %v2478_v42 = vadd.f32 %v2477_v36, %v1614_v40  ;;  %v2741_v43 = vmul.f32 %v1614_v40, %v1614_v40  ;;  %v5496_v44 = vpack.c.bf16 %v1614_v40, %v1611_v34 }
 0x185   : > { %6029 = vst [vmem:[%s7102_s12 + $0xd8] sm:$0xff] %v5501_v39   ;;  %v5691_v39 = vpack.c.bf16 %v7178_v26, %v7173_v21 }
 0x186   : > { %v2479_v46 = vadd.f32 %v6336_v32, %v2478_v42  ;;  %v2996_v47 = vadd.f32 %v2995_v41, %v2741_v43  ;;  %6028 = vst [vmem:[%s7102_s12 + $0xd0] sm:$0xff] %v5496_v44   ;;  %v7181_v32 = vpop.f32.mrb[3].mxu1 }
 0x187   : > { %6519 = vmatmul.mubr.bf16.gmra.mrb[108].mxu1 %v6758_v33  ;;  %v5686_v42 = vpack.c.bf16 %v7181_v32, %v7176_v25  ;;  %6067 = vst [vmem:[%s7102_s12 + $0x208] sm:$0xff] %v5691_v39  }
 0x188   : > { %v2480_v50 = vadd.f32 %v6337_v38, %v2479_v46  ;;  %v2997_v51 = vadd.f32 %v2996_v47, %v2742_v45  ;;  %v6340_v52 = vpop.f32.mrb[56].mxu0  ;;  %v7191_v47 = vpop.f32.mrb[4].mxu1  ;;  %6522 = vmatprep.mubr.bf16.mxu1 %v6759_v53 }
 0x189   : > { %v1627_v54 = vpop.f32.mrb[57].mxu0  ;;  %v2746_v1 = vmul.f32 %v6340_v52, %v6340_v52  ;;  %6066 = vst [vmem:[%s7102_s12 + $0x200] sm:$0xff] %v5686_v42  }
 0x18a   : > { %v2998_v55 = vadd.f32 %v2997_v51, %v2743_v49  ;;  %v2481_v56 = vadd.f32 %v2480_v50, %v1627_v54  ;;  %v2744_v57 = vmul.f32 %v1627_v54, %v1627_v54  ;;  %v6341_v58 = vpop.f32.mrb[58].mxu0  ;;  %v7194_v51 = vpop.f32.mrb[5].mxu1 }
 0x18b   : > { %v5511_v59 = vpack.c.bf16 %v6341_v58, %v6340_v52  ;;  %v1630_v60 = vpop.f32.mrb[59].mxu0  ;;  %v2747_v5 = vmul.f32 %v6341_v58, %v6341_v58 }
 0x18c   : > { %v2999_v61 = vadd.f32 %v2998_v55, %v2744_v57  ;;  %v2482_v62 = vadd.f32 %v2481_v56, %v1630_v60  ;;  %v2745_v63 = vmul.f32 %v1630_v60, %v1630_v60  ;;  %v5506_v0 = vpack.c.bf16 %v1630_v60, %v1627_v54 }
 0x18d   : > { %6031 = vst [vmem:[%s7102_s12 + $0xe8] sm:$0xff] %v5511_v59   ;;  %v6760_v59 = vld [vmem:[%s7011_s9 + $0x3c8] sm:$0xff]  }
 0x18e   : > { %v2483_v2 = vadd.f32 %v6340_v52, %v2482_v62  ;;  %v3000_v3 = vadd.f32 %v2999_v61, %v2745_v63  ;;  %6030 = vst [vmem:[%s7102_s12 + $0xe0] sm:$0xff] %v5506_v0   ;;  %v7196_v52 = vpop.f32.mrb[6].mxu1 }
 0x18f   : > { %6523 = vmatmul.mubr.bf16.gmra.mrb[112].mxu1 %v6760_v59 }
 0x190   : > { %v2484_v6 = vadd.f32 %v6341_v58, %v2483_v2  ;;  %v3001_v7 = vadd.f32 %v3000_v3, %v2746_v1  ;;  %v6344_v8 = vpop.f32.mrb[60].mxu0  ;;  %v7199_v58 = vpop.f32.mrb[7].mxu1  ;;  %v5701_v1 = vpack.c.bf16 %v7196_v52, %v7191_v47 }
 0x191   : > { %v1643_v10 = vpop.f32.mrb[61].mxu0  ;;  %v2750_v22 = vmul.f32 %v6344_v8, %v6344_v8  ;;  %v5696_v4 = vpack.c.bf16 %v7199_v58, %v7194_v51  ;;  %v7209_v9 = vpop.f32.mrb[8].mxu1 }
 0x192   : > { %v3002_v11 = vadd.f32 %v3001_v7, %v2747_v5  ;;  %v2485_v12 = vadd.f32 %v2484_v6, %v1643_v10  ;;  %v2748_v13 = vmul.f32 %v1643_v10, %v1643_v10  ;;  %v6345_v14 = vpop.f32.mrb[62].mxu0  ;;  %6069 = vst [vmem:[%s7102_s12 + $0x218] sm:$0xff] %v5701_v1  }
 0x193   : > { %v5521_v15 = vpack.c.bf16 %v6345_v14, %v6344_v8  ;;  %v1646_v16 = vpop.f32.mrb[63].mxu0  ;;  %v2751_v28 = vmul.f32 %v6345_v14, %v6345_v14  ;;  %6068 = vst [vmem:[%s7102_s12 + $0x210] sm:$0xff] %v5696_v4  }
 0x194   : > { %v3003_v17 = vadd.f32 %v3002_v11, %v2748_v13  ;;  %v2486_v18 = vadd.f32 %v2485_v12, %v1646_v16  ;;  %v2749_v19 = vmul.f32 %v1646_v16, %v1646_v16  ;;  %v5516_v20 = vpack.c.bf16 %v1646_v16, %v1643_v10  ;;  %v7212_v13 = vpop.f32.mrb[9].mxu1 }
 0x195   : > { %6033 = vst [vmem:[%s7102_s12 + $0xf8] sm:$0xff] %v5521_v15   ;;  %v6761_v15 = vld [vmem:[%s7011_s9 + $0x3d0] sm:$0xff]  }
 0x196   : > { %v2487_v23 = vadd.f32 %v6344_v8, %v2486_v18  ;;  %v3004_v24 = vadd.f32 %v3003_v17, %v2749_v19  ;;  %6032 = vst [vmem:[%s7102_s12 + $0xf0] sm:$0xff] %v5516_v20   ;;  %6526 = vmatprep.mubr.bf16.mxu1 %v6761_v15 }
 0x198   : > { %v2488_v29 = vadd.f32 %v6345_v14, %v2487_v23  ;;  %v3005_v30 = vadd.f32 %v3004_v24, %v2750_v22  ;;  %v6348_v31 = vpop.f32.mrb[64].mxu0  ;;  %v7214_v14 = vpop.f32.mrb[10].mxu1  ;;  %v6762_v22 = vld [vmem:[%s7011_s9 + $0x3d8] sm:$0xff]  }
 0x199   : > { %v1659_v34 = vpop.f32.mrb[65].mxu0  ;;  %v2754_v48 = vmul.f32 %v6348_v31, %v6348_v31  ;;  %v7217_v20 = vpop.f32.mrb[11].mxu1  ;;  %6527 = vmatmul.mubr.bf16.gmra.mrb[116].mxu1 %v6762_v22  ;;  %v6766_v22 = vld [vmem:[%s7011_s9 + $0x3f8] sm:$0xff]  }
 0x19a   : > { %v3006_v35 = vadd.f32 %v3005_v30, %v2751_v28  ;;  %v2489_v36 = vadd.f32 %v2488_v29, %v1659_v34  ;;  %v2752_v37 = vmul.f32 %v1659_v34, %v1659_v34  ;;  %v6349_v38 = vpop.f32.mrb[66].mxu0  ;;  %v5711_v30 = vpack.c.bf16 %v7214_v14, %v7209_v9  ;;  %v7227_v39 = vpop.f32.mrb[12].mxu1 }
 0x19b   : > { %v5531_v40 = vpack.c.bf16 %v6349_v38, %v6348_v31  ;;  %v1662_v41 = vpop.f32.mrb[67].mxu0  ;;  %v2755_v54 = vmul.f32 %v6349_v38, %v6349_v38 }
 0x19c   : > { %v3007_v43 = vadd.f32 %v3006_v35, %v2752_v37  ;;  %v2490_v44 = vadd.f32 %v2489_v36, %v1662_v41  ;;  %v2753_v45 = vmul.f32 %v1662_v41, %v1662_v41  ;;  %v5526_v46 = vpack.c.bf16 %v1662_v41, %v1659_v34  ;;  %6071 = vst [vmem:[%s7102_s12 + $0x228] sm:$0xff] %v5711_v30  }
 0x19d   : > { %6035 = vst [vmem:[%s7102_s12 + $0x108] sm:$0xff] %v5531_v40   ;;  %v5706_v34 = vpack.c.bf16 %v7217_v20, %v7212_v13 }
 0x19e   : > { %v2491_v49 = vadd.f32 %v6348_v31, %v2490_v44  ;;  %v3008_v50 = vadd.f32 %v3007_v43, %v2753_v45  ;;  %6034 = vst [vmem:[%s7102_s12 + $0x100] sm:$0xff] %v5526_v46   ;;  %v7230_v43 = vpop.f32.mrb[13].mxu1  ;;  %v6763_v45 = vld [vmem:[%s7011_s9 + $0x3e0] sm:$0xff]  }
 0x19f   : > { %6070 = vst [vmem:[%s7102_s12 + $0x220] sm:$0xff] %v5706_v34   ;;  %v7232_v44 = vpop.f32.mrb[14].mxu1  ;;  %6530 = vmatprep.mubr.bf16.mxu1 %v6763_v45 }
 0x1a0   : > { %v2492_v55 = vadd.f32 %v6349_v38, %v2491_v49  ;;  %v3009_v56 = vadd.f32 %v3008_v50, %v2754_v48  ;;  %v6352_v57 = vpop.f32.mrb[68].mxu0  ;;  %v7235_v53 = vpop.f32.mrb[15].mxu1 }
 0x1a1   : > { %v1675_v60 = vpop.f32.mrb[69].mxu0  ;;  %v2758_v10 = vmul.f32 %v6352_v57, %v6352_v57 }
 0x1a2   : > { %v3010_v61 = vadd.f32 %v3009_v56, %v2755_v54  ;;  %v2493_v62 = vadd.f32 %v2492_v55, %v1675_v60  ;;  %v2756_v63 = vmul.f32 %v1675_v60, %v1675_v60  ;;  %v6353_v0 = vpop.f32.mrb[70].mxu0  ;;  %v6764_v54 = vld [vmem:[%s7011_s9 + $0x3e8] sm:$0xff]  }
 0x1a3   : > { %v5541_v2 = vpack.c.bf16 %v6353_v0, %v6352_v57  ;;  %v1678_v3 = vpop.f32.mrb[71].mxu0  ;;  %v2759_v16 = vmul.f32 %v6353_v0, %v6353_v0  ;;  %6531 = vmatmul.mubr.bf16.gmra.mrb[120].mxu1 %v6764_v54 }
 0x1a4   : > { %v3011_v5 = vadd.f32 %v3010_v61, %v2756_v63  ;;  %v2494_v6 = vadd.f32 %v2493_v62, %v1678_v3  ;;  %v2757_v7 = vmul.f32 %v1678_v3, %v1678_v3  ;;  %v5536_v8 = vpack.c.bf16 %v1678_v3, %v1675_v60 }
 0x1a5   : > { %6037 = vst [vmem:[%s7102_s12 + $0x118] sm:$0xff] %v5541_v2   ;;  %v5721_v61 = vpack.c.bf16 %v7232_v44, %v7227_v39 }
 0x1a6   : > { %v2495_v11 = vadd.f32 %v6352_v57, %v2494_v6  ;;  %v3012_v12 = vadd.f32 %v3011_v5, %v2757_v7  ;;  %6036 = vst [vmem:[%s7102_s12 + $0x110] sm:$0xff] %v5536_v8   ;;  %v7245_v5 = vpop.f32.mrb[16].mxu1 }
 0x1a7   : > { %6073 = vst [vmem:[%s7102_s12 + $0x238] sm:$0xff] %v5721_v61  }
 0x1a8   : > { %v3013_v17 = vadd.f32 %v3012_v12, %v2758_v10  ;;  %v6356_v18 = vpop.f32.mrb[72].mxu0  ;;  %v2496_v19 = vadd.f32 %v6353_v0, %v2495_v11  ;;  %v5716_v0 = vpack.c.bf16 %v7235_v53, %v7230_v43  ;;  %v7248_v10 = vpop.f32.mrb[17].mxu1  ;;  %v6765_v12 = vld [vmem:[%s7011_s9 + $0x3f0] sm:$0xff]  }
 0x1a9   : > { %v1691_v23 = vpop.f32.mrb[73].mxu0  ;;  %v2762_v40 = vmul.f32 %v6356_v18, %v6356_v18  ;;  %v7250_v11 = vpop.f32.mrb[18].mxu1  ;;  %6534 = vmatprep.mubr.bf16.mxu1 %v6765_v12 }
 0x1aa   : > { %v2497_v24 = vadd.f32 %v2496_v19, %v1691_v23  ;;  %v2760_v27 = vmul.f32 %v1691_v23, %v1691_v23  ;;  %v3014_v28 = vadd.f32 %v3013_v17, %v2759_v16  ;;  %v6357_v29 = vpop.f32.mrb[74].mxu0  ;;  %6072 = vst [vmem:[%s7102_s12 + $0x230] sm:$0xff] %v5716_v0   ;;  %v7253_v19 = vpop.f32.mrb[19].mxu1  ;;  %v5731_v30 = vpack.c.bf16 %v7250_v11, %v7245_v5 }
 0x1ab   : > { %v5551_v31 = vpack.c.bf16 %v6357_v29, %v6356_v18  ;;  %v1694_v33 = vpop.f32.mrb[75].mxu0  ;;  %v2763_v46 = vmul.f32 %v6357_v29, %v6357_v29  ;;  %6535 = vmatmul.mubr.bf16.gmra.mrb[124].mxu1 %v6766_v22  ;;  %v5726_v34 = vpack.c.bf16 %v7253_v19, %v7248_v10 }
 0x1ac   : > { %v3015_v35 = vadd.f32 %v3014_v28, %v2760_v27  ;;  %v2498_v36 = vadd.f32 %v2497_v24, %v1694_v33  ;;  %v2761_v37 = vmul.f32 %v1694_v33, %v1694_v33  ;;  %v5546_v38 = vpack.c.bf16 %v1694_v33, %v1691_v23  ;;  %6075 = vst [vmem:[%s7102_s12 + $0x248] sm:$0xff] %v5731_v30  }
 0x1ad   : > { %6039 = vst [vmem:[%s7102_s12 + $0x128] sm:$0xff] %v5551_v31   ;;  %6074 = vst [vmem:[%s7102_s12 + $0x240] sm:$0xff] %v5726_v34  }
 0x1ae   : > { %v2499_v41 = vadd.f32 %v6356_v18, %v2498_v36  ;;  %v3016_v42 = vadd.f32 %v3015_v35, %v2761_v37  ;;  %6038 = vst [vmem:[%s7102_s12 + $0x120] sm:$0xff] %v5546_v38  }
 0x1b0   : > { %v3017_v48 = vadd.f32 %v3016_v42, %v2762_v40  ;;  %v6360_v49 = vpop.f32.mrb[76].mxu0  ;;  %v2500_v50 = vadd.f32 %v6357_v29, %v2499_v41  ;;  %v7263_v40 = vpop.f32.mrb[20].mxu1 }
 0x1b1   : > { %v1707_v55 = vpop.f32.mrb[77].mxu0  ;;  %v2766_v6 = vmul.f32 %v6360_v49, %v6360_v49 }
 0x1b2   : > { %v2501_v56 = vadd.f32 %v2500_v50, %v1707_v55  ;;  %v2764_v57 = vmul.f32 %v1707_v55, %v1707_v55  ;;  %v3018_v59 = vadd.f32 %v3017_v48, %v2763_v46  ;;  %v6361_v60 = vpop.f32.mrb[78].mxu0  ;;  %v7266_v46 = vpop.f32.mrb[21].mxu1 }
 0x1b3   : > { %v5561_v62 = vpack.c.bf16 %v6361_v60, %v6360_v49  ;;  %v1710_v63 = vpop.f32.mrb[79].mxu0  ;;  %v2767_v15 = vmul.f32 %v6361_v60, %v6361_v60  ;;  %v7268_v48 = vpop.f32.mrb[22].mxu1 }
 0x1b4   : > { %v3019_v1 = vadd.f32 %v3018_v59, %v2764_v57  ;;  %v2502_v2 = vadd.f32 %v2501_v56, %v1710_v63  ;;  %v2765_v3 = vmul.f32 %v1710_v63, %v1710_v63  ;;  %v5556_v4 = vpack.c.bf16 %v1710_v63, %v1707_v55  ;;  %v7270_v56 = vpop.f32.mrb[23].mxu1 }
 0x1b5   : > { %6041 = vst [vmem:[%s7102_s12 + $0x138] sm:$0xff] %v5561_v62   ;;  %v5741_v63 = vpack.c.bf16 %v7268_v48, %v7263_v40 }
 0x1b6   : > { %v2503_v7 = vadd.f32 %v6360_v49, %v2502_v2  ;;  %v3020_v8 = vadd.f32 %v3019_v1, %v2765_v3  ;;  %6040 = vst [vmem:[%s7102_s12 + $0x130] sm:$0xff] %v5556_v4   ;;  %v5736_v2 = vpack.c.bf16 %v7270_v56, %v7266_v46 }
 0x1b7   : > { %6077 = vst [vmem:[%s7102_s12 + $0x258] sm:$0xff] %v5741_v63  }
 0x1b8   : > { %v3021_v16 = vadd.f32 %v3020_v8, %v2766_v6  ;;  %v6364_v17 = vpop.f32.mrb[80].mxu0  ;;  %v2504_v18 = vadd.f32 %v6361_v60, %v2503_v7  ;;  %6076 = vst [vmem:[%s7102_s12 + $0x250] sm:$0xff] %v5736_v2   ;;  %v7279_v8 = vpop.f32.mrb[24].mxu1 }
 0x1b9   : > { %v1723_v23 = vpop.f32.mrb[81].mxu0  ;;  %v2770_v41 = vmul.f32 %v6364_v17, %v6364_v17 }
 0x1ba   : > { %v2505_v24 = vadd.f32 %v2504_v18, %v1723_v23  ;;  %v2768_v27 = vmul.f32 %v1723_v23, %v1723_v23  ;;  %v3022_v28 = vadd.f32 %v3021_v16, %v2767_v15  ;;  %v6365_v29 = vpop.f32.mrb[82].mxu0 }
 0x1bb   : > { %v5571_v31 = vpack.c.bf16 %v6365_v29, %v6364_v17  ;;  %v1726_v33 = vpop.f32.mrb[83].mxu0  ;;  %v2771_v49 = vmul.f32 %v6365_v29, %v6365_v29 }
 0x1bc   : > { %v3023_v35 = vadd.f32 %v3022_v28, %v2768_v27  ;;  %v2506_v36 = vadd.f32 %v2505_v24, %v1726_v33  ;;  %v2769_v37 = vmul.f32 %v1726_v33, %v1726_v33  ;;  %v5566_v38 = vpack.c.bf16 %v1726_v33, %v1723_v23 }
 0x1bd   : > { %6043 = vst [vmem:[%s7102_s12 + $0x148] sm:$0xff] %v5571_v31  }
 0x1be   : > { %v2507_v42 = vadd.f32 %v6364_v17, %v2506_v36  ;;  %v3024_v45 = vadd.f32 %v3023_v35, %v2769_v37  ;;  %6042 = vst [vmem:[%s7102_s12 + $0x140] sm:$0xff] %v5566_v38   ;;  %v7282_v17 = vpop.f32.mrb[25].mxu1 }
 0x1bf   : > { %v7284_v18 = vpop.f32.mrb[26].mxu1 }
 0x1c0   : > { %v3025_v50 = vadd.f32 %v3024_v45, %v2770_v41  ;;  %v6368_v54 = vpop.f32.mrb[84].mxu0  ;;  %v2508_v55 = vadd.f32 %v6365_v29, %v2507_v42  ;;  %v7286_v28 = vpop.f32.mrb[27].mxu1  ;;  %v5751_v35 = vpack.c.bf16 %v7284_v18, %v7279_v8 }
 0x1c1   : > { %v1739_v57 = vpop.f32.mrb[85].mxu0  ;;  %v2774_v12 = vmul.f32 %v6368_v54, %v6368_v54  ;;  %v5746_v38 = vpack.c.bf16 %v7286_v28, %v7282_v17 }
 0x1c2   : > { %v2509_v59 = vadd.f32 %v2508_v55, %v1739_v57  ;;  %v2772_v60 = vmul.f32 %v1739_v57, %v1739_v57  ;;  %v3026_v61 = vadd.f32 %v3025_v50, %v2771_v49  ;;  %v6369_v62 = vpop.f32.mrb[86].mxu0  ;;  %6079 = vst [vmem:[%s7102_s12 + $0x268] sm:$0xff] %v5751_v35   ;;  %v7295_v50 = vpop.f32.mrb[28].mxu1 }
 0x1c3   : > { %v5581_v0 = vpack.c.bf16 %v6369_v62, %v6368_v54  ;;  %v1742_v1 = vpop.f32.mrb[87].mxu0  ;;  %v2775_v22 = vmul.f32 %v6369_v62, %v6369_v62  ;;  %6078 = vst [vmem:[%s7102_s12 + $0x260] sm:$0xff] %v5746_v38  }
 0x1c4   : > { %v3027_v3 = vadd.f32 %v3026_v61, %v2772_v60  ;;  %v2510_v4 = vadd.f32 %v2509_v59, %v1742_v1  ;;  %v2773_v6 = vmul.f32 %v1742_v1, %v1742_v1  ;;  %v5576_v7 = vpack.c.bf16 %v1742_v1, %v1739_v57  ;;  %v7298_v59 = vpop.f32.mrb[29].mxu1 }
 0x1c5   : > { %6045 = vst [vmem:[%s7102_s12 + $0x158] sm:$0xff] %v5581_v0   ;;  %v7300_v60 = vpop.f32.mrb[30].mxu1 }
 0x1c6   : > { %v2511_v15 = vadd.f32 %v6368_v54, %v2510_v4  ;;  %v3028_v16 = vadd.f32 %v3027_v3, %v2773_v6  ;;  %6044 = vst [vmem:[%s7102_s12 + $0x150] sm:$0xff] %v5576_v7   ;;  %v7302_v1 = vpop.f32.mrb[31].mxu1 }
 0x1c8   : > { %v3029_v23 = vadd.f32 %v3028_v16, %v2774_v12  ;;  %v6372_v24 = vpop.f32.mrb[88].mxu0  ;;  %v2512_v27 = vadd.f32 %v6369_v62, %v2511_v15  ;;  %v5761_v12 = vpack.c.bf16 %v7300_v60, %v7295_v50 }
 0x1c9   : > { %v1755_v29 = vpop.f32.mrb[89].mxu0  ;;  %v2778_v54 = vmul.f32 %v6372_v24, %v6372_v24 }
 0x1ca   : > { %v2513_v30 = vadd.f32 %v2512_v27, %v1755_v29  ;;  %v2776_v31 = vmul.f32 %v1755_v29, %v1755_v29  ;;  %v3030_v33 = vadd.f32 %v3029_v23, %v2775_v22  ;;  %v6373_v34 = vpop.f32.mrb[90].mxu0  ;;  %v5756_v22 = vpack.c.bf16 %v7302_v1, %v7298_v59  ;;  %6081 = vst [vmem:[%s7102_s12 + $0x278] sm:$0xff] %v5761_v12  }
 0x1cb   : > { %v5591_v36 = vpack.c.bf16 %v6373_v34, %v6372_v24  ;;  %v1758_v37 = vpop.f32.mrb[91].mxu0  ;;  %v2779_v61 = vmul.f32 %v6373_v34, %v6373_v34 }
 0x1cc   : > { %v3031_v41 = vadd.f32 %v3030_v33, %v2776_v31  ;;  %v2514_v42 = vadd.f32 %v2513_v30, %v1758_v37  ;;  %v2777_v45 = vmul.f32 %v1758_v37, %v1758_v37  ;;  %v5586_v49 = vpack.c.bf16 %v1758_v37, %v1755_v29  ;;  %6080 = vst [vmem:[%s7102_s12 + $0x270] sm:$0xff] %v5756_v22   ;;  %v7311_v30 = vpop.f32.mrb[32].mxu1 }
 0x1cd   : > { %6047 = vst [vmem:[%s7102_s12 + $0x168] sm:$0xff] %v5591_v36   ;;  %v7314_v35 = vpop.f32.mrb[33].mxu1 }
 0x1ce   : > { %v2515_v55 = vadd.f32 %v6372_v24, %v2514_v42  ;;  %v3032_v57 = vadd.f32 %v3031_v41, %v2777_v45  ;;  %6046 = vst [vmem:[%s7102_s12 + $0x160] sm:$0xff] %v5586_v49   ;;  %v7316_v36 = vpop.f32.mrb[34].mxu1 }
 0x1cf   : > { %v7318_v45 = vpop.f32.mrb[35].mxu1 }
 0x1d0   : > { %v3033_v62 = vadd.f32 %v3032_v57, %v2778_v54  ;;  %v6376_v63 = vpop.f32.mrb[92].mxu0  ;;  %v2516_v0 = vadd.f32 %v6373_v34, %v2515_v55  ;;  %v7327_v12 = vpop.f32.mrb[36].mxu1 }
 0x1d1   : > { %v1771_v2 = vpop.f32.mrb[93].mxu0  ;;  %v2782_v31 = vmul.f32 %v6376_v63, %v6376_v63 }
 0x1d2   : > { %v2517_v3 = vadd.f32 %v2516_v0, %v1771_v2  ;;  %v2780_v4 = vmul.f32 %v1771_v2, %v1771_v2  ;;  %v3034_v6 = vadd.f32 %v3033_v62, %v2779_v61  ;;  %v6377_v7 = vpop.f32.mrb[94].mxu0  ;;  %v5771_v62 = vpack.c.bf16 %v7316_v36, %v7311_v30 }
 0x1d3   : > { %v5601_v15 = vpack.c.bf16 %v6377_v7, %v6376_v63  ;;  %v1774_v16 = vpop.f32.mrb[95].mxu0  ;;  %v2783_v37 = vmul.f32 %v6377_v7, %v6377_v7 }
 0x1d4   : > { %v3035_v23 = vadd.f32 %v3034_v6, %v2780_v4  ;;  %v2518_v24 = vadd.f32 %v2517_v3, %v1774_v16  ;;  %v2781_v27 = vmul.f32 %v1774_v16, %v1774_v16  ;;  %v5596_v29 = vpack.c.bf16 %v1774_v16, %v1771_v2  ;;  %6083 = vst [vmem:[%s7102_s12 + $0x288] sm:$0xff] %v5771_v62  }
 0x1d5   : > { %6049 = vst [vmem:[%s7102_s12 + $0x178] sm:$0xff] %v5601_v15   ;;  %v5766_v2 = vpack.c.bf16 %v7318_v45, %v7314_v35 }
 0x1d6   : > { %v2519_v33 = vadd.f32 %v6376_v63, %v2518_v24  ;;  %v3036_v34 = vadd.f32 %v3035_v23, %v2781_v27  ;;  %6048 = vst [vmem:[%s7102_s12 + $0x170] sm:$0xff] %v5596_v29   ;;  %v7330_v23 = vpop.f32.mrb[37].mxu1 }
 0x1d7   : > { %6082 = vst [vmem:[%s7102_s12 + $0x280] sm:$0xff] %v5766_v2   ;;  %v7332_v24 = vpop.f32.mrb[38].mxu1 }
 0x1d8   : > { %v3037_v38 = vadd.f32 %v3036_v34, %v2782_v31  ;;  %v6380_v41 = vpop.f32.mrb[96].mxu0  ;;  %v2520_v42 = vadd.f32 %v6377_v7, %v2519_v33  ;;  %v7334_v34 = vpop.f32.mrb[39].mxu1 }
 0x1d9   : > { %v1787_v49 = vpop.f32.mrb[97].mxu0  ;;  %v2786_v15 = vmul.f32 %v6380_v41, %v6380_v41  ;;  %v5776_v62 = vpack.c.bf16 %v7334_v34, %v7330_v23 }
 0x1da   : > { %v2521_v54 = vadd.f32 %v2520_v42, %v1787_v49  ;;  %v2784_v55 = vmul.f32 %v1787_v49, %v1787_v49  ;;  %v3038_v57 = vadd.f32 %v3037_v38, %v2783_v37  ;;  %v6381_v61 = vpop.f32.mrb[98].mxu0 }
 0x1db   : > { %v5611_v63 = vpack.c.bf16 %v6381_v61, %v6380_v41  ;;  %v1790_v0 = vpop.f32.mrb[99].mxu0  ;;  %v2787_v27 = vmul.f32 %v6381_v61, %v6381_v61  ;;  %6084 = vst [vmem:[%s7102_s12 + $0x290] sm:$0xff] %v5776_v62  }
 0x1dc   : > { %v3039_v3 = vadd.f32 %v3038_v57, %v2784_v55  ;;  %v2522_v4 = vadd.f32 %v2521_v54, %v1790_v0  ;;  %v2785_v6 = vmul.f32 %v1790_v0, %v1790_v0  ;;  %v5606_v7 = vpack.c.bf16 %v1790_v0, %v1787_v49 }
 0x1dd   : > { %6051 = vst [vmem:[%s7102_s12 + $0x188] sm:$0xff] %v5611_v63   ;;  %v5781_v54 = vpack.c.bf16 %v7332_v24, %v7327_v12 }
 0x1de   : > { %v2523_v16 = vadd.f32 %v6380_v41, %v2522_v4  ;;  %v3040_v22 = vadd.f32 %v3039_v3, %v2785_v6  ;;  %6050 = vst [vmem:[%s7102_s12 + $0x180] sm:$0xff] %v5606_v7   ;;  %v7343_v3 = vpop.f32.mrb[40].mxu1 }
 0x1df   : > { %6085 = vst [vmem:[%s7102_s12 + $0x298] sm:$0xff] %v5781_v54   ;;  %8232 = vst [vmem:[#allocation10_spill] sm:$0xff] %v7343_v3 }
 0x1e0   : > { %v3041_v29 = vadd.f32 %v3040_v22, %v2786_v15  ;;  %v6384_v31 = vpop.f32.mrb[100].mxu0  ;;  %v2524_v33 = vadd.f32 %v6381_v61, %v2523_v16  ;;  %v7346_v15 = vpop.f32.mrb[41].mxu1 }
 0x1e1   : > { %v1803_v37 = vpop.f32.mrb[101].mxu0  ;;  %v2790_v4 = vmul.f32 %v6384_v31, %v6384_v31  ;;  %8233 = vst [vmem:[#allocation11_spill] sm:$0xff] %v7346_v15  ;;  %v7348_v16 = vpop.f32.mrb[42].mxu1 }
 0x1e2   : > { %v2525_v38 = vadd.f32 %v2524_v33, %v1803_v37  ;;  %v2788_v42 = vmul.f32 %v1803_v37, %v1803_v37  ;;  %v3042_v49 = vadd.f32 %v3041_v29, %v2787_v27  ;;  %v6385_v41 = vpop.f32.mrb[102].mxu0  ;;  %8234 = vst [vmem:[#allocation12_spill] sm:$0xff] %v7348_v16 }
 0x1e3   : > { %v5621_v55 = vpack.c.bf16 %v6385_v41, %v6384_v31  ;;  %v1806_v57 = vpop.f32.mrb[103].mxu0  ;;  %v2791_v22 = vmul.f32 %v6385_v41, %v6385_v41 }
 0x1e4   : > { %v3043_v63 = vadd.f32 %v3042_v49, %v2788_v42  ;;  %v2526_v61 = vadd.f32 %v2525_v38, %v1806_v57  ;;  %v2789_v0 = vmul.f32 %v1806_v57, %v1806_v57  ;;  %v5616_v2 = vpack.c.bf16 %v1806_v57, %v1803_v37  ;;  %v7350_v37 = vpop.f32.mrb[43].mxu1 }
 0x1e5   : > { %6053 = vst [vmem:[%s7102_s12 + $0x198] sm:$0xff] %v5621_v55   ;;  %8235 = vst [vmem:[#allocation13_spill] sm:$0xff] %v7350_v37  ;;  %v5791_v55 = vpack.c.bf16 %v7348_v16, %v7343_v3 }
 0x1e6   : > { %v2527_v6 = vadd.f32 %v6384_v31, %v2526_v61  ;;  %v3044_v7 = vadd.f32 %v3043_v63, %v2789_v0  ;;  %6052 = vst [vmem:[%s7102_s12 + $0x190] sm:$0xff] %v5616_v2   ;;  %v5786_v63 = vpack.c.bf16 %v7350_v37, %v7346_v15 }
 0x1e7   : > { %6087 = vst [vmem:[%s7102_s12 + $0x2a8] sm:$0xff] %v5791_v55  }
 0x1e8   : > { %v3045_v27 = vadd.f32 %v3044_v7, %v2790_v4  ;;  %v6388_v29 = vpop.f32.mrb[104].mxu0  ;;  %v2528_v33 = vadd.f32 %v6385_v41, %v2527_v6  ;;  %6086 = vst [vmem:[%s7102_s12 + $0x2a0] sm:$0xff] %v5786_v63   ;;  %v7359_v4 = vpop.f32.mrb[44].mxu1 }
 0x1e9   : > { %v1819_v38 = vpop.f32.mrb[105].mxu0  ;;  %8236 = vst [vmem:[#allocation14_spill] sm:$0xff] %v7359_v4  ;;  %v2794_v6 = vmul.f32 %v6388_v29, %v6388_v29 }
 0x1ea   : > { %v2529_v42 = vadd.f32 %v2528_v33, %v1819_v38  ;;  %v2792_v49 = vmul.f32 %v1819_v38, %v1819_v38  ;;  %v3046_v54 = vadd.f32 %v3045_v27, %v2791_v22  ;;  %v6389_v31 = vpop.f32.mrb[106].mxu0  ;;  %v7362_v27 = vpop.f32.mrb[45].mxu1 }
 0x1eb   : > { %v5631_v57 = vpack.c.bf16 %v6389_v31, %v6388_v29  ;;  %v1822_v62 = vpop.f32.mrb[107].mxu0  ;;  %8237 = vst [vmem:[#allocation15_spill] sm:$0xff] %v7362_v27  ;;  %v7364_v33 = vpop.f32.mrb[46].mxu1  ;;  %v2795_v16 = vmul.f32 %v6389_v31, %v6389_v31 }
 0x1ec   : > { %v3047_v61 = vadd.f32 %v3046_v54, %v2792_v49  ;;  %v2530_v41 = vadd.f32 %v2529_v42, %v1822_v62  ;;  %v2793_v0 = vmul.f32 %v1822_v62, %v1822_v62  ;;  %v5626_v2 = vpack.c.bf16 %v1822_v62, %v1819_v38  ;;  %8238 = vst [vmem:[#allocation16_spill] sm:$0xff] %v7364_v33  ;;  %v7366_v38 = vpop.f32.mrb[47].mxu1 }
 0x1ed   : > { %6055 = vst [vmem:[%s7102_s12 + $0x1a8] sm:$0xff] %v5631_v57   ;;  %8239 = vst [vmem:[#allocation17_spill] sm:$0xff] %v7366_v38  ;;  %v5801_v62 = vpack.c.bf16 %v7364_v33, %v7359_v4 }
 0x1ee   : > { %v2531_v7 = vadd.f32 %v6388_v29, %v2530_v41  ;;  %v3048_v22 = vadd.f32 %v3047_v61, %v2793_v0  ;;  %6054 = vst [vmem:[%s7102_s12 + $0x1a0] sm:$0xff] %v5626_v2   ;;  %v5796_v41 = vpack.c.bf16 %v7366_v38, %v7362_v27 }
 0x1ef   : > { %6089 = vst [vmem:[%s7102_s12 + $0x2b8] sm:$0xff] %v5801_v62  }
 0x1f0   : > { %v3049_v3 = vadd.f32 %v3048_v22, %v2794_v6  ;;  %v6392_v37 = vpop.f32.mrb[108].mxu0  ;;  %v2532_v42 = vadd.f32 %v6389_v31, %v2531_v7  ;;  %6088 = vst [vmem:[%s7102_s12 + $0x2b0] sm:$0xff] %v5796_v41   ;;  %v7375_v7 = vpop.f32.mrb[48].mxu1 }
 0x1f1   : > { %v1835_v49 = vpop.f32.mrb[109].mxu0  ;;  %8240 = vst [vmem:[#allocation18_spill] sm:$0xff] %v7375_v7 }
 0x1f2   : > { %v2533_v54 = vadd.f32 %v2532_v42, %v1835_v49  ;;  %v2796_v55 = vmul.f32 %v1835_v49, %v1835_v49  ;;  %v3050_v57 = vadd.f32 %v3049_v3, %v2795_v16  ;;  %v6393_v29 = vpop.f32.mrb[110].mxu0  ;;  %v2798_v3 = vmul.f32 %v6392_v37, %v6392_v37  ;;  %v7378_v42 = vpop.f32.mrb[49].mxu1 }
 0x1f3   : > { %v5641_v63 = vpack.c.bf16 %v6393_v29, %v6392_v37  ;;  %v1838_v61 = vpop.f32.mrb[111].mxu0  ;;  %8241 = vst [vmem:[#allocation19_spill] sm:$0xff] %v7378_v42  ;;  %v7380_v33 = vpop.f32.mrb[50].mxu1  ;;  %v2799_v4 = vmul.f32 %v6393_v29, %v6393_v29 }
 0x1f4   : > { %v3051_v0 = vadd.f32 %v3050_v57, %v2796_v55  ;;  %v2534_v31 = vadd.f32 %v2533_v54, %v1838_v61  ;;  %v2797_v2 = vmul.f32 %v1838_v61, %v1838_v61  ;;  %v5636_v6 = vpack.c.bf16 %v1838_v61, %v1835_v49  ;;  %8242 = vst [vmem:[#allocation20_spill] sm:$0xff] %v7380_v33  ;;  %v7382_v49 = vpop.f32.mrb[51].mxu1 }
 0x1f5   : > { %6057 = vst [vmem:[%s7102_s12 + $0x1b8] sm:$0xff] %v5641_v63   ;;  %8243 = vst [vmem:[#allocation21_spill] sm:$0xff] %v7382_v49  ;;  %v5811_v61 = vpack.c.bf16 %v7380_v33, %v7375_v7 }
 0x1f6   : > { %v2535_v16 = vadd.f32 %v6392_v37, %v2534_v31  ;;  %v3052_v22 = vadd.f32 %v3051_v0, %v2797_v2  ;;  %6056 = vst [vmem:[%s7102_s12 + $0x1b0] sm:$0xff] %v5636_v6   ;;  %v5806_v31 = vpack.c.bf16 %v7382_v49, %v7378_v42 }
 0x1f7   : > { %6091 = vst [vmem:[%s7102_s12 + $0x2c8] sm:$0xff] %v5811_v61  }
 0x1f8   : > { %v3053_v15 = vadd.f32 %v3052_v22, %v2798_v3  ;;  %v6396_v38 = vpop.f32.mrb[112].mxu0  ;;  %v2536_v54 = vadd.f32 %v6393_v29, %v2535_v16  ;;  %6090 = vst [vmem:[%s7102_s12 + $0x2c0] sm:$0xff] %v5806_v31   ;;  %v7391_v16 = vpop.f32.mrb[52].mxu1 }
 0x1f9   : > { %v1851_v55 = vpop.f32.mrb[113].mxu0  ;;  %8244 = vst [vmem:[#allocation22_spill] sm:$0xff] %v7391_v16 }
 0x1fa   : > { %v2537_v57 = vadd.f32 %v2536_v54, %v1851_v55  ;;  %v2800_v62 = vmul.f32 %v1851_v55, %v1851_v55  ;;  %v3054_v63 = vadd.f32 %v3053_v15, %v2799_v4  ;;  %v6397_v37 = vpop.f32.mrb[114].mxu0  ;;  %v2802_v15 = vmul.f32 %v6396_v38, %v6396_v38  ;;  %v7394_v54 = vpop.f32.mrb[53].mxu1 }
 0x1fb   : > { %v5651_v41 = vpack.c.bf16 %v6397_v37, %v6396_v38  ;;  %v1854_v0 = vpop.f32.mrb[115].mxu0  ;;  %8245 = vst [vmem:[#allocation23_spill] sm:$0xff] %v7394_v54  ;;  %v7396_v33 = vpop.f32.mrb[54].mxu1  ;;  %v2803_v7 = vmul.f32 %v6397_v37, %v6397_v37 }
 0x1fc   : > { %v3055_v2 = vadd.f32 %v3054_v63, %v2800_v62  ;;  %v2538_v29 = vadd.f32 %v2537_v57, %v1854_v0  ;;  %v2801_v6 = vmul.f32 %v1854_v0, %v1854_v0  ;;  %v5646_v3 = vpack.c.bf16 %v1854_v0, %v1851_v55  ;;  %8246 = vst [vmem:[#allocation24_spill] sm:$0xff] %v7396_v33  ;;  %v7398_v55 = vpop.f32.mrb[55].mxu1 }
 0x1fd   : > { %6059 = vst [vmem:[%s7102_s12 + $0x1c8] sm:$0xff] %v5651_v41   ;;  %8247 = vst [vmem:[#allocation25_spill] sm:$0xff] %v7398_v55  ;;  %v5821_v0 = vpack.c.bf16 %v7396_v33, %v7391_v16 }
 0x1fe   : > { %v2539_v4 = vadd.f32 %v6396_v38, %v2538_v29  ;;  %v3056_v22 = vadd.f32 %v3055_v2, %v2801_v6  ;;  %6058 = vst [vmem:[%s7102_s12 + $0x1c0] sm:$0xff] %v5646_v3   ;;  %v5816_v29 = vpack.c.bf16 %v7398_v55, %v7394_v54 }
 0x1ff   : > { %6093 = vst [vmem:[%s7102_s12 + $0x2d8] sm:$0xff] %v5821_v0  }
 0x200   : > { %v3057_v27 = vadd.f32 %v3056_v22, %v2802_v15  ;;  %v6400_v49 = vpop.f32.mrb[116].mxu0  ;;  %v2540_v57 = vadd.f32 %v6397_v37, %v2539_v4  ;;  %6092 = vst [vmem:[%s7102_s12 + $0x2d0] sm:$0xff] %v5816_v29   ;;  %v7407_v4 = vpop.f32.mrb[56].mxu1 }
 0x201   : > { %v1867_v62 = vpop.f32.mrb[117].mxu0  ;;  %8248 = vst [vmem:[#allocation26_spill] sm:$0xff] %v7407_v4 }
 0x202   : > { %v2541_v63 = vadd.f32 %v2540_v57, %v1867_v62  ;;  %v2804_v61 = vmul.f32 %v1867_v62, %v1867_v62  ;;  %v3058_v41 = vadd.f32 %v3057_v27, %v2803_v7  ;;  %v6401_v38 = vpop.f32.mrb[118].mxu0  ;;  %v2806_v27 = vmul.f32 %v6400_v49, %v6400_v49  ;;  %v7410_v57 = vpop.f32.mrb[57].mxu1 }
 0x203   : > { %v5661_v31 = vpack.c.bf16 %v6401_v38, %v6400_v49  ;;  %v1870_v2 = vpop.f32.mrb[119].mxu0  ;;  %v7412_v33 = vpop.f32.mrb[58].mxu1  ;;  %v2807_v16 = vmul.f32 %v6401_v38, %v6401_v38 }
 0x204   : > { %v3059_v6 = vadd.f32 %v3058_v41, %v2804_v61  ;;  %v2542_v37 = vadd.f32 %v2541_v63, %v1870_v2  ;;  %v2805_v3 = vmul.f32 %v1870_v2, %v1870_v2  ;;  %v5656_v15 = vpack.c.bf16 %v1870_v2, %v1867_v62  ;;  %8249 = vst [vmem:[#allocation27_spill] sm:$0xff] %v7412_v33  ;;  %v7414_v62 = vpop.f32.mrb[59].mxu1 }
 0x205   : > { %6061 = vst [vmem:[%s7102_s12 + $0x1d8] sm:$0xff] %v5661_v31   ;;  %8250 = vst [vmem:[#allocation28_spill] sm:$0xff] %v7414_v62  ;;  %v5831_v2 = vpack.c.bf16 %v7412_v33, %v7407_v4 }
 0x206   : > { %v2543_v7 = vadd.f32 %v6400_v49, %v2542_v37  ;;  %v3060_v22 = vadd.f32 %v3059_v6, %v2805_v3  ;;  %6060 = vst [vmem:[%s7102_s12 + $0x1d0] sm:$0xff] %v5656_v15   ;;  %v5826_v37 = vpack.c.bf16 %v7414_v62, %v7410_v57 }
 0x207   : > { %6095 = vst [vmem:[%s7102_s12 + $0x2e8] sm:$0xff] %v5831_v2  }
 0x208   : > { %v3061_v42 = vadd.f32 %v3060_v22, %v2806_v27  ;;  %v6404_v55 = vpop.f32.mrb[120].mxu0  ;;  %v2544_v63 = vadd.f32 %v6401_v38, %v2543_v7  ;;  %6094 = vst [vmem:[%s7102_s12 + $0x2e0] sm:$0xff] %v5826_v37   ;;  %v7423_v7 = vpop.f32.mrb[60].mxu1 }
 0x209   : > { %v1883_v61 = vpop.f32.mrb[121].mxu0  ;;  %8251 = vst [vmem:[#allocation29_spill] sm:$0xff] %v7423_v7 }
 0x20a   : > { %v2545_v41 = vadd.f32 %v2544_v63, %v1883_v61  ;;  %v2808_v0 = vmul.f32 %v1883_v61, %v1883_v61  ;;  %v3062_v31 = vadd.f32 %v3061_v42, %v2807_v16  ;;  %v6405_v49 = vpop.f32.mrb[122].mxu0  ;;  %v2810_v42 = vmul.f32 %v6404_v55, %v6404_v55  ;;  %v7426_v63 = vpop.f32.mrb[61].mxu1 }
 0x20b   : > { %v5671_v29 = vpack.c.bf16 %v6405_v49, %v6404_v55  ;;  %v1886_v6 = vpop.f32.mrb[123].mxu0  ;;  %v7428_v33 = vpop.f32.mrb[62].mxu1  ;;  %v2811_v4 = vmul.f32 %v6405_v49, %v6405_v49 }
 0x20c   : > { %v3063_v3 = vadd.f32 %v3062_v31, %v2808_v0  ;;  %v2546_v38 = vadd.f32 %v2545_v41, %v1886_v6  ;;  %v2809_v15 = vmul.f32 %v1886_v6, %v1886_v6  ;;  %v5666_v27 = vpack.c.bf16 %v1886_v6, %v1883_v61  ;;  %8252 = vst [vmem:[#allocation30_spill] sm:$0xff] %v7428_v33  ;;  %v7430_v61 = vpop.f32.mrb[63].mxu1 }
 0x20d   : > { %6063 = vst [vmem:[%s7102_s12 + $0x1e8] sm:$0xff] %v5671_v29   ;;  %v5841_v6 = vpack.c.bf16 %v7428_v33, %v7423_v7 }
 0x20e   : > { %v2547_v16 = vadd.f32 %v6404_v55, %v2546_v38  ;;  %v3064_v22 = vadd.f32 %v3063_v3, %v2809_v15  ;;  %6062 = vst [vmem:[%s7102_s12 + $0x1e0] sm:$0xff] %v5666_v27   ;;  %v5836_v38 = vpack.c.bf16 %v7430_v61, %v7426_v63 }
 0x20f   : > { %6097 = vst [vmem:[%s7102_s12 + $0x2f8] sm:$0xff] %v5841_v6  }
 0x210   : > { %v3065_v54 = vadd.f32 %v3064_v22, %v2810_v42  ;;  %v6408_v62 = vpop.f32.mrb[124].mxu0  ;;  %v2548_v41 = vadd.f32 %v6405_v49, %v2547_v16  ;;  %6096 = vst [vmem:[%s7102_s12 + $0x2f0] sm:$0xff] %v5836_v38   ;;  %v7439_v16 = vpop.f32.mrb[64].mxu1 }
 0x211   : > { %v1899_v0 = vpop.f32.mrb[125].mxu0 }
 0x212   : > { %v2549_v31 = vadd.f32 %v2548_v41, %v1899_v0  ;;  %v2812_v2 = vmul.f32 %v1899_v0, %v1899_v0  ;;  %v3066_v29 = vadd.f32 %v3065_v54, %v2811_v4  ;;  %v6409_v55 = vpop.f32.mrb[126].mxu0  ;;  %v2814_v54 = vmul.f32 %v6408_v62, %v6408_v62  ;;  %v7442_v41 = vpop.f32.mrb[65].mxu1 }
 0x213   : > { %v5681_v37 = vpack.c.bf16 %v6409_v55, %v6408_v62  ;;  %v1902_v3 = vpop.f32.mrb[127].mxu0  ;;  %v7444_v33 = vpop.f32.mrb[66].mxu1  ;;  %v2815_v7 = vmul.f32 %v6409_v55, %v6409_v55 }
 0x214   : > { %v3067_v15 = vadd.f32 %v3066_v29, %v2812_v2  ;;  %v2550_v49 = vadd.f32 %v2549_v31, %v1902_v3  ;;  %v2813_v27 = vmul.f32 %v1902_v3, %v1902_v3  ;;  %v5676_v42 = vpack.c.bf16 %v1902_v3, %v1899_v0  ;;  %v7448_v29 = vpop.f32.mrb[67].mxu1 }
 0x215   : > { %6065 = vst [vmem:[%s7102_s12 + $0x1f8] sm:$0xff] %v5681_v37   ;;  %v2816_v0 = vmul.f32 %v7176_v25, %v7176_v25  ;;  %v5851_v6 = vpack.c.bf16 %v7444_v33, %v7439_v16  ;;  %v5846_v3 = vpack.c.bf16 %v7448_v29, %v7442_v41 }
 0x216   : > { %v2551_v4 = vadd.f32 %v6408_v62, %v2550_v49  ;;  %v3068_v22 = vadd.f32 %v3067_v15, %v2813_v27  ;;  %6064 = vst [vmem:[%s7102_s12 + $0x1f0] sm:$0xff] %v5676_v42   ;;  %v7460_v49 = vpop.f32.mrb[68].mxu1  ;;  %v2818_v27 = vmul.f32 %v7173_v21, %v7173_v21 }
 0x217   : > { %6099 = vst [vmem:[%s7102_s12 + $0x308] sm:$0xff] %v5851_v6   ;;  %6098 = vst [vmem:[%s7102_s12 + $0x300] sm:$0xff] %v5846_v3   ;;  %v7465_v42 = vpop.f32.mrb[69].mxu1 }
 0x218   : > { %v2552_v2 = vadd.f32 %v6409_v55, %v2551_v4  ;;  %v3069_v31 = vadd.f32 %v3068_v22, %v2814_v54  ;;  %v2817_v55 = vmul.f32 %v7181_v32, %v7181_v32  ;;  %v7467_v54 = vpop.f32.mrb[70].mxu1  ;;  %v2819_v4 = vmul.f32 %v7178_v26, %v7178_v26 }
 0x21a   : > { %v3070_v37 = vadd.f32 %v3069_v31, %v2815_v7  ;;  %v2553_v62 = vadd.f32 %v2552_v2, %v7176_v25  ;;  %v2820_v2 = vmul.f32 %v7194_v51, %v7194_v51  ;;  %v7474_v31 = vpop.f32.mrb[71].mxu1 }
 0x21c   : > { %v3071_v38 = vadd.f32 %v3070_v37, %v2816_v0  ;;  %v2554_v15 = vadd.f32 %v2553_v62, %v7181_v32  ;;  %v5856_v37 = vpack.c.bf16 %v7474_v31, %v7465_v42 }
 0x21e   : > { %v2555_v7 = vadd.f32 %v7173_v21, %v2554_v15  ;;  %v3072_v25 = vadd.f32 %v3071_v38, %v2817_v55  ;;  %v5861_v21 = vpack.c.bf16 %v7467_v54, %v7460_v49  ;;  %6100 = vst [vmem:[%s7102_s12 + $0x310] sm:$0xff] %v5856_v37   ;;  %v7486_v38 = vpop.f32.mrb[72].mxu1  ;;  %v2822_v15 = vmul.f32 %v7191_v47, %v7191_v47 }
 0x220   : > { %v2556_v32 = vadd.f32 %v7178_v26, %v2555_v7  ;;  %v3073_v22 = vadd.f32 %v3072_v25, %v2818_v27  ;;  %6101 = vst [vmem:[%s7102_s12 + $0x318] sm:$0xff] %v5861_v21   ;;  %v2821_v26 = vmul.f32 %v7199_v58, %v7199_v58  ;;  %v7491_v27 = vpop.f32.mrb[73].mxu1  ;;  %v2823_v25 = vmul.f32 %v7196_v52, %v7196_v52 }
 0x221   : > { %v7493_v7 = vpop.f32.mrb[74].mxu1 }
 0x222   : > { %v3074_v0 = vadd.f32 %v3073_v22, %v2819_v4  ;;  %v2557_v6 = vadd.f32 %v2556_v32, %v7194_v51  ;;  %v2824_v32 = vmul.f32 %v7212_v13, %v7212_v13  ;;  %v7500_v22 = vpop.f32.mrb[75].mxu1 }
 0x224   : > { %v3075_v62 = vadd.f32 %v3074_v0, %v2820_v2  ;;  %v2558_v3 = vadd.f32 %v2557_v6, %v7199_v58  ;;  %v5866_v0 = vpack.c.bf16 %v7500_v22, %v7491_v27 }
 0x226   : > { %v2559_v55 = vadd.f32 %v7191_v47, %v2558_v3  ;;  %v3076_v51 = vadd.f32 %v3075_v62, %v2821_v26  ;;  %v5871_v47 = vpack.c.bf16 %v7493_v7, %v7486_v38  ;;  %6102 = vst [vmem:[%s7102_s12 + $0x320] sm:$0xff] %v5866_v0   ;;  %v7512_v62 = vpop.f32.mrb[76].mxu1  ;;  %v2826_v3 = vmul.f32 %v7209_v9, %v7209_v9 }
 0x228   : > { %v2560_v58 = vadd.f32 %v7196_v52, %v2559_v55  ;;  %v3077_v4 = vadd.f32 %v3076_v51, %v2822_v15  ;;  %6103 = vst [vmem:[%s7102_s12 + $0x328] sm:$0xff] %v5871_v47   ;;  %v2825_v52 = vmul.f32 %v7217_v20, %v7217_v20  ;;  %v7517_v15 = vpop.f32.mrb[77].mxu1  ;;  %v2827_v51 = vmul.f32 %v7214_v14, %v7214_v14 }
 0x229   : > { %v7519_v55 = vpop.f32.mrb[78].mxu1 }
 0x22a   : > { %v3078_v2 = vadd.f32 %v3077_v4, %v2823_v25  ;;  %v2561_v21 = vadd.f32 %v2560_v58, %v7212_v13  ;;  %v2828_v58 = vmul.f32 %v7230_v43, %v7230_v43  ;;  %v7526_v4 = vpop.f32.mrb[79].mxu1 }
 0x22c   : > { %v3079_v6 = vadd.f32 %v3078_v2, %v2824_v32  ;;  %v2562_v37 = vadd.f32 %v2561_v21, %v7217_v20  ;;  %v5876_v2 = vpack.c.bf16 %v7526_v4, %v7517_v15 }
 0x22e   : > { %v2563_v26 = vadd.f32 %v7209_v9, %v2562_v37  ;;  %v3080_v13 = vadd.f32 %v3079_v6, %v2825_v52  ;;  %v5881_v9 = vpack.c.bf16 %v7519_v55, %v7512_v62  ;;  %6104 = vst [vmem:[%s7102_s12 + $0x330] sm:$0xff] %v5876_v2   ;;  %v7538_v6 = vpop.f32.mrb[80].mxu1  ;;  %v2830_v37 = vmul.f32 %v7227_v39, %v7227_v39 }
 0x230   : > { %v2564_v20 = vadd.f32 %v7214_v14, %v2563_v26  ;;  %v3081_v25 = vadd.f32 %v3080_v13, %v2826_v3  ;;  %6105 = vst [vmem:[%s7102_s12 + $0x338] sm:$0xff] %v5881_v9   ;;  %v2829_v14 = vmul.f32 %v7235_v53, %v7235_v53  ;;  %v7543_v3 = vpop.f32.mrb[81].mxu1  ;;  %v2831_v13 = vmul.f32 %v7232_v44, %v7232_v44 }
 0x231   : > { %v7545_v26 = vpop.f32.mrb[82].mxu1 }
 0x232   : > { %v3082_v32 = vadd.f32 %v3081_v25, %v2827_v51  ;;  %v2565_v47 = vadd.f32 %v2564_v20, %v7230_v43  ;;  %v2832_v20 = vmul.f32 %v7248_v10, %v7248_v10  ;;  %v7552_v25 = vpop.f32.mrb[83].mxu1 }
 0x234   : > { %v3083_v21 = vadd.f32 %v3082_v32, %v2828_v58  ;;  %v2566_v0 = vadd.f32 %v2565_v47, %v7235_v53  ;;  %v5886_v32 = vpack.c.bf16 %v7552_v25, %v7543_v3 }
 0x236   : > { %v2567_v52 = vadd.f32 %v7227_v39, %v2566_v0  ;;  %v3084_v43 = vadd.f32 %v3083_v21, %v2829_v14  ;;  %v5891_v39 = vpack.c.bf16 %v7545_v26, %v7538_v6  ;;  %6106 = vst [vmem:[%s7102_s12 + $0x340] sm:$0xff] %v5886_v32   ;;  %v7564_v21 = vpop.f32.mrb[84].mxu1  ;;  %v2834_v0 = vmul.f32 %v7245_v5, %v7245_v5 }
 0x238   : > { %v2568_v53 = vadd.f32 %v7232_v44, %v2567_v52  ;;  %v3085_v51 = vadd.f32 %v3084_v43, %v2830_v37  ;;  %6107 = vst [vmem:[%s7102_s12 + $0x348] sm:$0xff] %v5891_v39   ;;  %v2833_v44 = vmul.f32 %v7253_v19, %v7253_v19  ;;  %v7569_v37 = vpop.f32.mrb[85].mxu1  ;;  %v2835_v43 = vmul.f32 %v7250_v11, %v7250_v11 }
 0x239   : > { %v7571_v52 = vpop.f32.mrb[86].mxu1 }
 0x23a   : > { %v3086_v58 = vadd.f32 %v3085_v51, %v2831_v13  ;;  %v2569_v9 = vadd.f32 %v2568_v53, %v7248_v10  ;;  %v2836_v53 = vmul.f32 %v7266_v46, %v7266_v46  ;;  %v7578_v51 = vpop.f32.mrb[87].mxu1 }
 0x23c   : > { %v3087_v47 = vadd.f32 %v3086_v58, %v2832_v20  ;;  %v2570_v2 = vadd.f32 %v2569_v9, %v7253_v19  ;;  %v5896_v58 = vpack.c.bf16 %v7578_v51, %v7569_v37 }
 0x23e   : > { %v2571_v14 = vadd.f32 %v7245_v5, %v2570_v2  ;;  %v3088_v10 = vadd.f32 %v3087_v47, %v2833_v44  ;;  %v5901_v5 = vpack.c.bf16 %v7571_v52, %v7564_v21  ;;  %6108 = vst [vmem:[%s7102_s12 + $0x350] sm:$0xff] %v5896_v58   ;;  %v7590_v47 = vpop.f32.mrb[88].mxu1  ;;  %v2838_v2 = vmul.f32 %v7263_v40, %v7263_v40 }
 0x240   : > { %v2572_v19 = vadd.f32 %v7250_v11, %v2571_v14  ;;  %v3089_v13 = vadd.f32 %v3088_v10, %v2834_v0  ;;  %6109 = vst [vmem:[%s7102_s12 + $0x358] sm:$0xff] %v5901_v5   ;;  %v2837_v11 = vmul.f32 %v7270_v56, %v7270_v56  ;;  %v7595_v0 = vpop.f32.mrb[89].mxu1  ;;  %v2839_v10 = vmul.f32 %v7268_v48, %v7268_v48 }
 0x241   : > { %v7597_v14 = vpop.f32.mrb[90].mxu1 }
 0x242   : > { %v3090_v20 = vadd.f32 %v3089_v13, %v2835_v43  ;;  %v2573_v39 = vadd.f32 %v2572_v19, %v7266_v46  ;;  %v2840_v19 = vmul.f32 %v7282_v17, %v7282_v17  ;;  %v7604_v13 = vpop.f32.mrb[91].mxu1 }
 0x244   : > { %v3091_v9 = vadd.f32 %v3090_v20, %v2836_v53  ;;  %v2574_v32 = vadd.f32 %v2573_v39, %v7270_v56  ;;  %v5906_v20 = vpack.c.bf16 %v7604_v13, %v7595_v0 }
 0x246   : > { %v2575_v44 = vadd.f32 %v7263_v40, %v2574_v32  ;;  %v3092_v46 = vadd.f32 %v3091_v9, %v2837_v11  ;;  %v5911_v40 = vpack.c.bf16 %v7597_v14, %v7590_v47  ;;  %6110 = vst [vmem:[%s7102_s12 + $0x360] sm:$0xff] %v5906_v20   ;;  %v7616_v9 = vpop.f32.mrb[92].mxu1  ;;  %v2842_v32 = vmul.f32 %v7279_v8, %v7279_v8 }
 0x248   : > { %v2576_v56 = vadd.f32 %v7268_v48, %v2575_v44  ;;  %v3093_v43 = vadd.f32 %v3092_v46, %v2838_v2  ;;  %6111 = vst [vmem:[%s7102_s12 + $0x368] sm:$0xff] %v5911_v40   ;;  %v2841_v48 = vmul.f32 %v7286_v28, %v7286_v28  ;;  %v7621_v2 = vpop.f32.mrb[93].mxu1  ;;  %v2843_v46 = vmul.f32 %v7284_v18, %v7284_v18 }
 0x249   : > { %v7623_v44 = vpop.f32.mrb[94].mxu1 }
 0x24a   : > { %v3094_v53 = vadd.f32 %v3093_v43, %v2839_v10  ;;  %v2577_v5 = vadd.f32 %v2576_v56, %v7282_v17  ;;  %v2844_v56 = vmul.f32 %v7298_v59, %v7298_v59  ;;  %v7630_v43 = vpop.f32.mrb[95].mxu1 }
 0x24c   : > { %v3095_v39 = vadd.f32 %v3094_v53, %v2840_v19  ;;  %v2578_v58 = vadd.f32 %v2577_v5, %v7286_v28  ;;  %v5916_v53 = vpack.c.bf16 %v7630_v43, %v7621_v2 }
 0x24e   : > { %v2579_v11 = vadd.f32 %v7279_v8, %v2578_v58  ;;  %v3096_v17 = vadd.f32 %v3095_v39, %v2841_v48  ;;  %v5921_v8 = vpack.c.bf16 %v7623_v44, %v7616_v9  ;;  %6112 = vst [vmem:[%s7102_s12 + $0x370] sm:$0xff] %v5916_v53   ;;  %v7642_v39 = vpop.f32.mrb[96].mxu1  ;;  %v2846_v58 = vmul.f32 %v7295_v50, %v7295_v50 }
 0x250   : > { %v2580_v28 = vadd.f32 %v7284_v18, %v2579_v11  ;;  %v3097_v10 = vadd.f32 %v3096_v17, %v2842_v32  ;;  %6113 = vst [vmem:[%s7102_s12 + $0x378] sm:$0xff] %v5921_v8   ;;  %v2845_v18 = vmul.f32 %v7302_v1, %v7302_v1  ;;  %v7647_v32 = vpop.f32.mrb[97].mxu1  ;;  %v2847_v17 = vmul.f32 %v7300_v60, %v7300_v60 }
 0x251   : > { %v7649_v11 = vpop.f32.mrb[98].mxu1 }
 0x252   : > { %v3098_v19 = vadd.f32 %v3097_v10, %v2843_v46  ;;  %v2581_v40 = vadd.f32 %v2580_v28, %v7298_v59  ;;  %v2848_v28 = vmul.f32 %v7314_v35, %v7314_v35  ;;  %v7656_v10 = vpop.f32.mrb[99].mxu1 }
 0x254   : > { %v3099_v5 = vadd.f32 %v3098_v19, %v2844_v56  ;;  %v2582_v20 = vadd.f32 %v2581_v40, %v7302_v1  ;;  %v5926_v19 = vpack.c.bf16 %v7656_v10, %v7647_v32 }
 0x256   : > { %v2583_v48 = vadd.f32 %v7295_v50, %v2582_v20  ;;  %v3100_v59 = vadd.f32 %v3099_v5, %v2845_v18  ;;  %v5931_v50 = vpack.c.bf16 %v7649_v11, %v7642_v39  ;;  %6114 = vst [vmem:[%s7102_s12 + $0x380] sm:$0xff] %v5926_v19   ;;  %v7668_v5 = vpop.f32.mrb[100].mxu1  ;;  %v2850_v20 = vmul.f32 %v7311_v30, %v7311_v30 }
 0x258   : > { %v2584_v1 = vadd.f32 %v7300_v60, %v2583_v48  ;;  %v3101_v46 = vadd.f32 %v3100_v59, %v2846_v58  ;;  %6115 = vst [vmem:[%s7102_s12 + $0x388] sm:$0xff] %v5931_v50   ;;  %v2849_v60 = vmul.f32 %v7318_v45, %v7318_v45  ;;  %v7673_v58 = vpop.f32.mrb[101].mxu1  ;;  %v2851_v59 = vmul.f32 %v7316_v36, %v7316_v36 }
 0x259   : > { %v7675_v48 = vpop.f32.mrb[102].mxu1 }
 0x25a   : > { %v3102_v56 = vadd.f32 %v3101_v46, %v2847_v17  ;;  %v2585_v8 = vadd.f32 %v2584_v1, %v7314_v35  ;;  %v2852_v1 = vmul.f32 %v7330_v23, %v7330_v23  ;;  %v7682_v46 = vpop.f32.mrb[103].mxu1 }
 0x25c   : > { %v3103_v40 = vadd.f32 %v3102_v56, %v2848_v28  ;;  %v2586_v53 = vadd.f32 %v2585_v8, %v7318_v45  ;;  %v5936_v56 = vpack.c.bf16 %v7682_v46, %v7673_v58 }
 0x25e   : > { %v2587_v18 = vadd.f32 %v7311_v30, %v2586_v53  ;;  %v3104_v35 = vadd.f32 %v3103_v40, %v2849_v60  ;;  %v5941_v30 = vpack.c.bf16 %v7675_v48, %v7668_v5  ;;  %6116 = vst [vmem:[%s7102_s12 + $0x390] sm:$0xff] %v5936_v56   ;;  %v7694_v40 = vpop.f32.mrb[104].mxu1  ;;  %v2854_v53 = vmul.f32 %v7327_v12, %v7327_v12 }
 0x25f   : > { %8253 = vst [vmem:[#allocation31_spill] sm:$0xff] %v7694_v40 }
 0x260   : > { %v2588_v45 = vadd.f32 %v7316_v36, %v2587_v18  ;;  %v3105_v17 = vadd.f32 %v3104_v35, %v2850_v20  ;;  %6117 = vst [vmem:[%s7102_s12 + $0x398] sm:$0xff] %v5941_v30   ;;  %v2853_v36 = vmul.f32 %v7334_v34, %v7334_v34  ;;  %v7699_v20 = vpop.f32.mrb[105].mxu1  ;;  %v2855_v35 = vmul.f32 %v7332_v24, %v7332_v24 }
 0x261   : > { %v7701_v18 = vpop.f32.mrb[106].mxu1 }
 0x262   : > { %v3106_v28 = vadd.f32 %v3105_v17, %v2851_v59  ;;  %v2589_v50 = vadd.f32 %v2588_v45, %v7330_v23  ;;  %8254 = vst [vmem:[#allocation32_spill] sm:$0xff] %v7701_v18  ;;  %v8255_v45 = vld [vmem:[#allocation11_spill] sm:$0xff] }
 0x263   : > { %v2856_v17 = vmul.f32 %v8255_v45, %v8255_v45 }
 0x264   : > { %v3107_v8 = vadd.f32 %v3106_v28, %v2852_v1  ;;  %v2590_v19 = vadd.f32 %v2589_v50, %v7334_v34  ;;  %v7708_v1 = vpop.f32.mrb[107].mxu1 }
 0x265   : > { %8256 = vst [vmem:[#allocation11_spill] sm:$0xff] %v7708_v1  ;;  %v5946_v50 = vpack.c.bf16 %v7708_v1, %v7699_v20 }
 0x266   : > { %v2591_v60 = vadd.f32 %v7327_v12, %v2590_v19  ;;  %v3108_v23 = vadd.f32 %v3107_v8, %v2853_v36  ;;  %v5951_v12 = vpack.c.bf16 %v7701_v18, %v7694_v40  ;;  %v8257_v8 = vld [vmem:[#allocation13_spill] sm:$0xff]  ;;  %v7720_v36 = vpop.f32.mrb[108].mxu1 }
 0x267   : > { %6118 = vst [vmem:[%s7102_s12 + $0x3a0] sm:$0xff] %v5946_v50   ;;  %8258 = vst [vmem:[#allocation13_spill] sm:$0xff] %v7720_v36  ;;  %v8265_v40 = vld [vmem:[#allocation17_spill] sm:$0xff] }
 0x268   : > { %v2592_v34 = vadd.f32 %v7332_v24, %v2591_v60  ;;  %v3109_v59 = vadd.f32 %v3108_v23, %v2854_v53  ;;  %6119 = vst [vmem:[%s7102_s12 + $0x3a8] sm:$0xff] %v5951_v12   ;;  %v2857_v24 = vmul.f32 %v8257_v8, %v8257_v8  ;;  %v8259_v53 = vld [vmem:[#allocation10_spill] sm:$0xff] }
 0x269   : > { %v2858_v60 = vmul.f32 %v8259_v53, %v8259_v53 }
 0x26a   : > { %v3110_v30 = vadd.f32 %v3109_v59, %v2855_v35  ;;  %v2593_v28 = vadd.f32 %v2592_v34, %v8255_v45  ;;  %v7725_v34 = vpop.f32.mrb[109].mxu1  ;;  %v8262_v45 = vld [vmem:[#allocation12_spill] sm:$0xff] }
 0x26b   : > { %8260 = vst [vmem:[#allocation10_spill] sm:$0xff] %v7725_v34  ;;  %v7727_v59 = vpop.f32.mrb[110].mxu1 }
 0x26c   : > { %v3111_v56 = vadd.f32 %v3110_v30, %v2856_v17  ;;  %v2594_v19 = vadd.f32 %v2593_v28, %v8257_v8  ;;  %8261 = vst [vmem:[#allocation33_spill] sm:$0xff] %v7727_v59  ;;  %v2859_v17 = vmul.f32 %v8262_v45, %v8262_v45  ;;  %v8263_v28 = vld [vmem:[#allocation15_spill] sm:$0xff]  ;;  %v7734_v8 = vpop.f32.mrb[111].mxu1 }
 0x26d   : > { %v2860_v50 = vmul.f32 %v8263_v28, %v8263_v28  ;;  %8264 = vst [vmem:[#allocation12_spill] sm:$0xff] %v7734_v8 }
 0x26e   : > { %v2595_v23 = vadd.f32 %v8259_v53, %v2594_v19  ;;  %v3112_v35 = vadd.f32 %v3111_v56, %v2857_v24  ;;  %v5961_v19 = vpack.c.bf16 %v7727_v59, %v7720_v36  ;;  %v5956_v53 = vpack.c.bf16 %v7734_v8, %v7725_v34  ;;  %v8273_v8 = vld [vmem:[#allocation21_spill] sm:$0xff] }
 0x270   : > { %v2596_v12 = vadd.f32 %v8262_v45, %v2595_v23  ;;  %v3113_v30 = vadd.f32 %v3112_v35, %v2858_v60  ;;  %6121 = vst [vmem:[%s7102_s12 + $0x3b8] sm:$0xff] %v5961_v19   ;;  %v2861_v60 = vmul.f32 %v8265_v40, %v8265_v40  ;;  %6120 = vst [vmem:[%s7102_s12 + $0x3b0] sm:$0xff] %v5956_v53   ;;  %v7746_v23 = vpop.f32.mrb[112].mxu1  ;;  %v8267_v35 = vld [vmem:[#allocation14_spill] sm:$0xff] }
 0x271   : > { %8266 = vst [vmem:[#allocation15_spill] sm:$0xff] %v7746_v23  ;;  %v2862_v45 = vmul.f32 %v8267_v35, %v8267_v35 }
 0x272   : > { %v3114_v56 = vadd.f32 %v3113_v30, %v2859_v17  ;;  %v2597_v24 = vadd.f32 %v2596_v12, %v8263_v28  ;;  %v7751_v30 = vpop.f32.mrb[113].mxu1 }
 0x273   : > { %8268 = vst [vmem:[#allocation17_spill] sm:$0xff] %v7751_v30  ;;  %v7753_v28 = vpop.f32.mrb[114].mxu1 }
 0x274   : > { %v3115_v18 = vadd.f32 %v3114_v56, %v2860_v50  ;;  %v2598_v1 = vadd.f32 %v2597_v24, %v8265_v40  ;;  %8269 = vst [vmem:[#allocation14_spill] sm:$0xff] %v7753_v28  ;;  %v8270_v50 = vld [vmem:[#allocation16_spill] sm:$0xff]  ;;  %v8271_v24 = vld [vmem:[#allocation19_spill] sm:$0xff]  ;;  %v7760_v59 = vpop.f32.mrb[115].mxu1 }
 0x275   : > { %v2863_v19 = vmul.f32 %v8270_v50, %v8270_v50  ;;  %v2864_v53 = vmul.f32 %v8271_v24, %v8271_v24  ;;  %8272 = vst [vmem:[#allocation16_spill] sm:$0xff] %v7760_v59 }
 0x276   : > { %v2599_v17 = vadd.f32 %v8267_v35, %v2598_v1  ;;  %v3116_v12 = vadd.f32 %v3115_v18, %v2861_v60  ;;  %v5971_v1 = vpack.c.bf16 %v7753_v28, %v7746_v23  ;;  %v5966_v35 = vpack.c.bf16 %v7760_v59, %v7751_v30  ;;  %v8280_v59 = vld [vmem:[#allocation25_spill] sm:$0xff] }
 0x278   : > { %v2600_v40 = vadd.f32 %v8270_v50, %v2599_v17  ;;  %v3117_v56 = vadd.f32 %v3116_v12, %v2862_v45  ;;  %6123 = vst [vmem:[%s7102_s12 + $0x3c8] sm:$0xff] %v5971_v1   ;;  %v2865_v45 = vmul.f32 %v8273_v8, %v8273_v8  ;;  %6122 = vst [vmem:[%s7102_s12 + $0x3c0] sm:$0xff] %v5966_v35   ;;  %v7772_v17 = vpop.f32.mrb[116].mxu1  ;;  %v8275_v12 = vld [vmem:[#allocation18_spill] sm:$0xff] }
 0x279   : > { %8274 = vst [vmem:[#allocation19_spill] sm:$0xff] %v7772_v17  ;;  %v2866_v50 = vmul.f32 %v8275_v12, %v8275_v12 }
 0x27a   : > { %v3118_v18 = vadd.f32 %v3117_v56, %v2863_v19  ;;  %v2601_v60 = vadd.f32 %v2600_v40, %v8271_v24  ;;  %v7777_v56 = vpop.f32.mrb[117].mxu1 }
 0x27b   : > { %v7779_v24 = vpop.f32.mrb[118].mxu1 }
 0x27c   : > { %v3119_v36 = vadd.f32 %v3118_v18, %v2864_v53  ;;  %v2602_v34 = vadd.f32 %v2601_v60, %v8273_v8  ;;  %8276 = vst [vmem:[#allocation21_spill] sm:$0xff] %v7779_v24  ;;  %v8277_v53 = vld [vmem:[#allocation20_spill] sm:$0xff]  ;;  %v8278_v60 = vld [vmem:[#allocation23_spill] sm:$0xff]  ;;  %v7786_v28 = vpop.f32.mrb[119].mxu1 }
 0x27d   : > { %v2867_v1 = vmul.f32 %v8277_v53, %v8277_v53  ;;  %v2868_v35 = vmul.f32 %v8278_v60, %v8278_v60  ;;  %8279 = vst [vmem:[#allocation18_spill] sm:$0xff] %v7786_v28 }
 0x27e   : > { %v2603_v19 = vadd.f32 %v8275_v12, %v2602_v34  ;;  %v3120_v40 = vadd.f32 %v3119_v36, %v2865_v45  ;;  %v5981_v34 = vpack.c.bf16 %v7779_v24, %v7772_v17  ;;  %v5976_v12 = vpack.c.bf16 %v7786_v28, %v7777_v56  ;;  %v8285_v17 = vld [vmem:[#allocation28_spill] sm:$0xff] }
 0x280   : > { %v2604_v8 = vadd.f32 %v8277_v53, %v2603_v19  ;;  %v3121_v18 = vadd.f32 %v3120_v40, %v2866_v50  ;;  %6125 = vst [vmem:[%s7102_s12 + $0x3d8] sm:$0xff] %v5981_v34   ;;  %v2869_v50 = vmul.f32 %v8280_v59, %v8280_v59  ;;  %6124 = vst [vmem:[%s7102_s12 + $0x3d0] sm:$0xff] %v5976_v12   ;;  %v7798_v19 = vpop.f32.mrb[120].mxu1  ;;  %v8282_v40 = vld [vmem:[#allocation22_spill] sm:$0xff] }
 0x281   : > { %8281 = vst [vmem:[#allocation20_spill] sm:$0xff] %v7798_v19  ;;  %v2870_v53 = vmul.f32 %v8282_v40, %v8282_v40 }
 0x282   : > { %v3122_v36 = vadd.f32 %v3121_v18, %v2867_v1  ;;  %v2605_v45 = vadd.f32 %v2604_v8, %v8278_v60  ;;  %v7803_v18 = vpop.f32.mrb[121].mxu1 }
 0x283   : > { %v7805_v60 = vpop.f32.mrb[122].mxu1 }
 0x284   : > { %v3123_v23 = vadd.f32 %v3122_v36, %v2868_v35  ;;  %v2606_v30 = vadd.f32 %v2605_v45, %v8280_v59  ;;  %8283 = vst [vmem:[#allocation23_spill] sm:$0xff] %v7805_v60  ;;  %v8284_v35 = vld [vmem:[#allocation24_spill] sm:$0xff]  ;;  %v2872_v45 = vmul.f32 %v7410_v57, %v7410_v57  ;;  %v7812_v12 = vpop.f32.mrb[123].mxu1 }
 0x285   : > { %v2871_v34 = vmul.f32 %v8284_v35, %v8284_v35 }
 0x286   : > { %v2607_v1 = vadd.f32 %v8282_v40, %v2606_v30  ;;  %v3124_v8 = vadd.f32 %v3123_v23, %v2869_v50  ;;  %v5991_v30 = vpack.c.bf16 %v7805_v60, %v7798_v19  ;;  %v5986_v40 = vpack.c.bf16 %v7812_v12, %v7803_v18 }
 0x288   : > { %v2608_v59 = vadd.f32 %v8284_v35, %v2607_v1  ;;  %v3125_v36 = vadd.f32 %v3124_v8, %v2870_v53  ;;  %6127 = vst [vmem:[%s7102_s12 + $0x3e8] sm:$0xff] %v5991_v30   ;;  %v2873_v53 = vmul.f32 %v8285_v17, %v8285_v17  ;;  %6126 = vst [vmem:[%s7102_s12 + $0x3e0] sm:$0xff] %v5986_v40   ;;  %v7824_v1 = vpop.f32.mrb[124].mxu1  ;;  %v8286_v8 = vld [vmem:[#allocation26_spill] sm:$0xff] }
 0x289   : > { %v2874_v35 = vmul.f32 %v8286_v8, %v8286_v8 }
 0x28a   : > { %v3126_v23 = vadd.f32 %v3125_v36, %v2871_v34  ;;  %v2609_v50 = vadd.f32 %v2608_v59, %v7410_v57  ;;  %v7829_v59 = vpop.f32.mrb[125].mxu1 }
 0x28b   : > { %v7831_v36 = vpop.f32.mrb[126].mxu1 }
 0x28c   : > { %v3127_v24 = vadd.f32 %v3126_v23, %v2872_v45  ;;  %v2610_v28 = vadd.f32 %v2609_v50, %v8285_v17  ;;  %8287 = vst [vmem:[#allocation25_spill] sm:$0xff] %v7831_v36  ;;  %v8288_v45 = vld [vmem:[#allocation27_spill] sm:$0xff]  ;;  %v2876_v50 = vmul.f32 %v7426_v63, %v7426_v63  ;;  %v7838_v40 = vpop.f32.mrb[127].mxu1 }
 0x28d   : > { %v2875_v30 = vmul.f32 %v8288_v45, %v8288_v45 }
 0x28e   : > { %v2611_v34 = vadd.f32 %v8286_v8, %v2610_v28  ;;  %v3128_v57 = vadd.f32 %v3127_v24, %v2873_v53  ;;  %v6001_v28 = vpack.c.bf16 %v7831_v36, %v7824_v1  ;;  %v5996_v8 = vpack.c.bf16 %v7838_v40, %v7829_v59 }
 0x290   : > { %v2612_v17 = vadd.f32 %v8288_v45, %v2611_v34  ;;  %v3129_v23 = vadd.f32 %v3128_v57, %v2874_v35  ;;  %6129 = vst [vmem:[%s7102_s12 + $0x3f8] sm:$0xff] %v6001_v28   ;;  %v2877_v35 = vmul.f32 %v7430_v61, %v7430_v61  ;;  %6128 = vst [vmem:[%s7102_s12 + $0x3f0] sm:$0xff] %v5996_v8   ;;  %v8289_v34 = vld [vmem:[#allocation29_spill] sm:$0xff]  ;;  %s6895_s12 = smov [#allocation2]  }
 0x291   : > { %v2878_v57 = vmul.f32 %v8289_v34, %v8289_v34  ;;  %v2881_v8 = vmul.f32 %v7448_v29, %v7448_v29  ;;  %s6771_s14 = sshll.u32 %s6895_s12, 4  ;;  %s6772_s14 = int_to_ptr.vmem [resolvable:$false] %s6771_s14 }
 0x292   : > { %v3130_v24 = vadd.f32 %v3129_v23, %v2875_v30  ;;  %v2613_v53 = vadd.f32 %v2612_v17, %v7426_v63  ;;  %v8290_v30 = vld [vmem:[#allocation30_spill] sm:$0xff]  ;;  %s6773_s23 = scalar_lea.vmem %s6772_s14, 32  ;;  %p6774_p4 = scmp.lt.s32.totalorder %s8062_s30, %s6772_s14 }
 0x293   : > { %v2879_v63 = vmul.f32 %v8290_v30, %v8290_v30  ;;  %p6775_p5 = scmp.lt.s32.totalorder %s6773_s23, %s6767_s11 }
 0x294   : > { %v3131_v60 = vadd.f32 %v3130_v24, %v2876_v50  ;;  %v2614_v19 = vadd.f32 %v2613_v53, %v7430_v61  ;;  %v2880_v50 = vmul.f32 %v7442_v41, %v7442_v41 }
 0x295   : > { %p6776_p6 = por %p6775_p5, %p6774_p4 }
 0x296   : > { %v2615_v45 = vadd.f32 %v8289_v34, %v2614_v19  ;;  %v3132_v36 = vadd.f32 %v3131_v60, %v2877_v35  ;;  %v2882_v19 = vmul.f32 %v7439_v16, %v7439_v16 }
 0x297   : > { %p6777_p7 = pnand %p6776_p6, %p6770_p2 }
 0x298   : > { %v2616_v17 = vadd.f32 %v8290_v30, %v2615_v45  ;;  %v3133_v23 = vadd.f32 %v3132_v36, %v2878_v57  ;;  %v2883_v36 = vmul.f32 %v7444_v33, %v7444_v33 }
 0x29a   : > { %v3134_v28 = vadd.f32 %v3133_v23, %v2879_v63  ;;  %v2617_v24 = vadd.f32 %v2616_v17, %v7442_v41  ;;  %v2884_v41 = vmul.f32 %v7465_v42, %v7465_v42  ;;  %v2885_v17 = vmul.f32 %v7474_v31, %v7474_v31 }
 0x29c   : > { %v3135_v61 = vadd.f32 %v3134_v28, %v2880_v50  ;;  %v2618_v53 = vadd.f32 %v2617_v24, %v7448_v29 }
 0x29e   : > { %v2619_v60 = vadd.f32 %v7439_v16, %v2618_v53  ;;  %v3136_v35 = vadd.f32 %v3135_v61, %v2881_v8  ;;  %v2886_v16 = vmul.f32 %v7460_v49, %v7460_v49 }
 0x2a0   : > { %v3137_v34 = vadd.f32 %v3136_v35, %v2882_v19  ;;  %v2620_v57 = vadd.f32 %v7444_v33, %v2619_v60  ;;  %v2887_v33 = vmul.f32 %v7467_v54, %v7467_v54  ;;  %v2889_v19 = vmul.f32 %v7500_v22, %v7500_v22 }
 0x2a2   : > { %v2621_v45 = vadd.f32 %v2620_v57, %v7465_v42  ;;  %v3138_v30 = vadd.f32 %v3137_v34, %v2883_v36  ;;  %v2888_v42 = vmul.f32 %v7491_v27, %v7491_v27 }
 0x2a4   : > { %v3139_v63 = vadd.f32 %v3138_v30, %v2884_v41  ;;  %v2622_v29 = vadd.f32 %v2621_v45, %v7474_v31  ;;  %v2893_v30 = vmul.f32 %v7526_v4, %v7526_v4 }
 0x2a6   : > { %v2623_v23 = vadd.f32 %v7460_v49, %v2622_v29  ;;  %v3140_v50 = vadd.f32 %v3139_v63, %v2885_v17  ;;  %v2890_v49 = vmul.f32 %v7486_v38, %v7486_v38 }
 0x2a8   : > { %v3141_v28 = vadd.f32 %v3140_v50, %v2886_v16  ;;  %v2624_v24 = vadd.f32 %v7467_v54, %v2623_v23  ;;  %v2891_v54 = vmul.f32 %v7493_v7, %v7493_v7 }
 0x2aa   : > { %v2625_v61 = vadd.f32 %v2624_v24, %v7491_v27  ;;  %v3142_v53 = vadd.f32 %v3141_v28, %v2887_v33  ;;  %v2892_v27 = vmul.f32 %v7517_v15, %v7517_v15  ;;  %v2897_v28 = vmul.f32 %v7552_v25, %v7552_v25 }
 0x2ac   : > { %v3143_v8 = vadd.f32 %v3142_v53, %v2888_v42  ;;  %v2626_v31 = vadd.f32 %v2625_v61, %v7500_v22 }
 0x2ae   : > { %v2627_v60 = vadd.f32 %v7486_v38, %v2626_v31  ;;  %v3144_v35 = vadd.f32 %v3143_v8, %v2889_v19  ;;  %v2894_v38 = vmul.f32 %v7512_v62, %v7512_v62 }
 0x2b0   : > { %v3145_v36 = vadd.f32 %v3144_v35, %v2890_v49  ;;  %v2628_v34 = vadd.f32 %v7493_v7, %v2627_v60  ;;  %v2895_v7 = vmul.f32 %v7519_v55, %v7519_v55  ;;  %v2901_v49 = vmul.f32 %v7578_v51, %v7578_v51 }
 0x2b2   : > { %v2629_v57 = vadd.f32 %v2628_v34, %v7517_v15  ;;  %v3146_v41 = vadd.f32 %v3145_v36, %v2891_v54  ;;  %v2896_v15 = vmul.f32 %v7543_v3, %v7543_v3 }
 0x2b4   : > { %v3147_v45 = vadd.f32 %v3146_v41, %v2892_v27  ;;  %v2630_v22 = vadd.f32 %v2629_v57, %v7526_v4  ;;  %v2905_v41 = vmul.f32 %v7604_v13, %v7604_v13 }
 0x2b6   : > { %v2631_v63 = vadd.f32 %v7512_v62, %v2630_v22  ;;  %v3148_v29 = vadd.f32 %v3147_v45, %v2893_v30  ;;  %v2898_v62 = vmul.f32 %v7538_v6, %v7538_v6 }
 0x2b8   : > { %v3149_v17 = vadd.f32 %v3148_v29, %v2894_v38  ;;  %v2632_v16 = vadd.f32 %v7519_v55, %v2631_v63  ;;  %v2899_v55 = vmul.f32 %v7545_v26, %v7545_v26 }
 0x2ba   : > { %v2633_v23 = vadd.f32 %v2632_v16, %v7543_v3  ;;  %v3150_v50 = vadd.f32 %v3149_v17, %v2895_v7  ;;  %v2900_v3 = vmul.f32 %v7569_v37, %v7569_v37  ;;  %v2909_v17 = vmul.f32 %v7630_v43, %v7630_v43 }
 0x2bc   : > { %v3151_v33 = vadd.f32 %v3150_v50, %v2896_v15  ;;  %v2634_v4 = vadd.f32 %v2633_v23, %v7552_v25 }
 0x2be   : > { %v2635_v24 = vadd.f32 %v7538_v6, %v2634_v4  ;;  %v3152_v42 = vadd.f32 %v3151_v33, %v2897_v28  ;;  %v2902_v6 = vmul.f32 %v7564_v21, %v7564_v21 }
 0x2c0   : > { %v3153_v61 = vadd.f32 %v3152_v42, %v2898_v62  ;;  %v2636_v53 = vadd.f32 %v7545_v26, %v2635_v24  ;;  %v2903_v26 = vmul.f32 %v7571_v52, %v7571_v52  ;;  %v2913_v62 = vmul.f32 %v7656_v10, %v7656_v10 }
 0x2c2   : > { %v2637_v8 = vadd.f32 %v2636_v53, %v7569_v37  ;;  %v3154_v31 = vadd.f32 %v3153_v61, %v2899_v55  ;;  %v2904_v37 = vmul.f32 %v7595_v0, %v7595_v0 }
 0x2c4   : > { %v3155_v19 = vadd.f32 %v3154_v31, %v2900_v3  ;;  %v2638_v25 = vadd.f32 %v2637_v8, %v7578_v51  ;;  %v2917_v31 = vmul.f32 %v7682_v46, %v7682_v46 }
 0x2c6   : > { %v2639_v60 = vadd.f32 %v7564_v21, %v2638_v25  ;;  %v3156_v35 = vadd.f32 %v3155_v19, %v2901_v49  ;;  %v2906_v21 = vmul.f32 %v7590_v47, %v7590_v47 }
 0x2c8   : > { %v3157_v54 = vadd.f32 %v3156_v35, %v2902_v6  ;;  %v2640_v36 = vadd.f32 %v7571_v52, %v2639_v60  ;;  %v2907_v52 = vmul.f32 %v7597_v14, %v7597_v14 }
 0x2ca   : > { %v2641_v34 = vadd.f32 %v2640_v36, %v7595_v0  ;;  %v3158_v27 = vadd.f32 %v3157_v54, %v2903_v26  ;;  %v2908_v0 = vmul.f32 %v7621_v2, %v7621_v2 }
 0x2cc   : > { %v3159_v57 = vadd.f32 %v3158_v27, %v2904_v37  ;;  %v2642_v51 = vadd.f32 %v2641_v34, %v7604_v13 }
 0x2ce   : > { %v2643_v45 = vadd.f32 %v7590_v47, %v2642_v51  ;;  %v3160_v22 = vadd.f32 %v3159_v57, %v2905_v41  ;;  %v2910_v47 = vmul.f32 %v7616_v9, %v7616_v9  ;;  %v8293_v57 = vld [vmem:[#allocation32_spill] sm:$0xff] }
 0x2d0   : > { %v3161_v30 = vadd.f32 %v3160_v22, %v2906_v21  ;;  %v2644_v38 = vadd.f32 %v7597_v14, %v2643_v45  ;;  %v2911_v14 = vmul.f32 %v7623_v44, %v7623_v44 }
 0x2d2   : > { %v2645_v63 = vadd.f32 %v2644_v38, %v7621_v2  ;;  %v3162_v29 = vadd.f32 %v3161_v30, %v2907_v52  ;;  %v2912_v2 = vmul.f32 %v7647_v32, %v7647_v32  ;;  %v8295_v30 = vld [vmem:[#allocation12_spill] sm:$0xff] }
 0x2d4   : > { %v3163_v7 = vadd.f32 %v3162_v29, %v2908_v0  ;;  %v2646_v13 = vadd.f32 %v2645_v63, %v7630_v43  ;;  %v2925_v0 = vmul.f32 %v8295_v30, %v8295_v30  ;;  %v8296_v63 = vld [vmem:[#allocation13_spill] sm:$0xff] }
 0x2d5   : > { %v2926_v29 = vmul.f32 %v8296_v63, %v8296_v63 }
 0x2d6   : > { %v2647_v16 = vadd.f32 %v7616_v9, %v2646_v13  ;;  %v3164_v15 = vadd.f32 %v3163_v7, %v2909_v17  ;;  %v2914_v9 = vmul.f32 %v7642_v39, %v7642_v39  ;;  %v8297_v17 = vld [vmem:[#allocation33_spill] sm:$0xff] }
 0x2d8   : > { %v3165_v23 = vadd.f32 %v3164_v15, %v2910_v47  ;;  %v2648_v50 = vadd.f32 %v7623_v44, %v2647_v16  ;;  %v2915_v44 = vmul.f32 %v7649_v11, %v7649_v11  ;;  %v2927_v47 = vmul.f32 %v8297_v17, %v8297_v17 }
 0x2da   : > { %v2649_v33 = vadd.f32 %v2648_v50, %v7647_v32  ;;  %v3166_v4 = vadd.f32 %v3165_v23, %v2911_v14  ;;  %v2916_v32 = vmul.f32 %v7673_v58, %v7673_v58  ;;  %v8298_v14 = vld [vmem:[#allocation17_spill] sm:$0xff] }
 0x2db   : > { %v2928_v23 = vmul.f32 %v8298_v14, %v8298_v14 }
 0x2dc   : > { %v3167_v28 = vadd.f32 %v3166_v4, %v2912_v2  ;;  %v2650_v43 = vadd.f32 %v2649_v33, %v7656_v10  ;;  %v8299_v4 = vld [vmem:[#allocation16_spill] sm:$0xff] }
 0x2de   : > { %v2651_v24 = vadd.f32 %v7642_v39, %v2650_v43  ;;  %v3168_v42 = vadd.f32 %v3167_v28, %v2913_v62  ;;  %v2918_v39 = vmul.f32 %v7668_v5, %v7668_v5  ;;  %v2929_v43 = vmul.f32 %v8299_v4, %v8299_v4  ;;  %v8300_v62 = vld [vmem:[#allocation15_spill] sm:$0xff] }
 0x2e0   : > { %v3169_v55 = vadd.f32 %v3168_v42, %v2914_v9  ;;  %v2652_v61 = vadd.f32 %v7649_v11, %v2651_v24  ;;  %v2919_v11 = vmul.f32 %v7675_v48, %v7675_v48  ;;  %v2930_v9 = vmul.f32 %v8300_v62, %v8300_v62 }
 0x2e2   : > { %v2653_v53 = vadd.f32 %v2652_v61, %v7673_v58  ;;  %v3170_v3 = vadd.f32 %v3169_v55, %v2915_v44  ;;  %v2920_v58 = vmul.f32 %v7699_v20, %v7699_v20  ;;  %v8301_v44 = vld [vmem:[#allocation14_spill] sm:$0xff] }
 0x2e3   : > { %v2931_v55 = vmul.f32 %v8301_v44, %v8301_v44 }
 0x2e4   : > { %v3171_v8 = vadd.f32 %v3170_v3, %v2916_v32  ;;  %v2654_v10 = vadd.f32 %v2653_v53, %v7682_v46  ;;  %v8291_v46 = vld [vmem:[#allocation11_spill] sm:$0xff]  ;;  %v2932_v53 = vmul.f32 %v7777_v56, %v7777_v56 }
 0x2e5   : > { %v2921_v36 = vmul.f32 %v8291_v46, %v8291_v46 }
 0x2e6   : > { %v2655_v19 = vadd.f32 %v7668_v5, %v2654_v10  ;;  %v3172_v25 = vadd.f32 %v3171_v8, %v2917_v31  ;;  %v8292_v5 = vld [vmem:[#allocation31_spill] sm:$0xff]  ;;  %v8302_v31 = vld [vmem:[#allocation18_spill] sm:$0xff] }
 0x2e7   : > { %v2922_v37 = vmul.f32 %v8292_v5, %v8292_v5 }
 0x2e8   : > { %v3173_v49 = vadd.f32 %v3172_v25, %v2918_v39  ;;  %v2656_v6 = vadd.f32 %v7675_v48, %v2655_v19  ;;  %v2923_v48 = vmul.f32 %v8293_v57, %v8293_v57  ;;  %v2933_v19 = vmul.f32 %v8302_v31, %v8302_v31  ;;  %v8303_v25 = vld [vmem:[#allocation19_spill] sm:$0xff] }
 0x2ea   : > { %v2657_v60 = vadd.f32 %v2656_v6, %v7699_v20  ;;  %v3174_v35 = vadd.f32 %v3173_v49, %v2919_v11  ;;  %v8294_v20 = vld [vmem:[#allocation10_spill] sm:$0xff]  ;;  %v2934_v11 = vmul.f32 %v8303_v25, %v8303_v25 }
 0x2eb   : > { %v2924_v21 = vmul.f32 %v8294_v20, %v8294_v20 }
 0x2ec   : > { %v3175_v26 = vadd.f32 %v3174_v35, %v2920_v58  ;;  %v2658_v54 = vadd.f32 %v2657_v60, %v8291_v46  ;;  %v8304_v58 = vld [vmem:[#allocation21_spill] sm:$0xff] }
 0x2ed   : > { %v2935_v60 = vmul.f32 %v8304_v58, %v8304_v58 }
 0x2ee   : > { %v2659_v34 = vadd.f32 %v8292_v5, %v2658_v54  ;;  %v3176_v27 = vadd.f32 %v3175_v26, %v2921_v36 }
 0x2f0   : > { %v3177_v51 = vadd.f32 %v3176_v27, %v2922_v37  ;;  %v2660_v41 = vadd.f32 %v8293_v57, %v2659_v34  ;;  %v2937_v37 = vmul.f32 %v7812_v12, %v7812_v12  ;;  %v8305_v34 = vld [vmem:[#allocation20_spill] sm:$0xff] }
 0x2f1   : > { %v2938_v27 = vmul.f32 %v8305_v34, %v8305_v34 }
 0x2f2   : > { %v2661_v45 = vadd.f32 %v2660_v41, %v8294_v20  ;;  %v3178_v22 = vadd.f32 %v3177_v51, %v2923_v48  ;;  %v8306_v51 = vld [vmem:[#allocation23_spill] sm:$0xff] }
 0x2f3   : > { %v2939_v41 = vmul.f32 %v8306_v51, %v8306_v51 }
 0x2f4   : > { %v3179_v52 = vadd.f32 %v3178_v22, %v2924_v21  ;;  %v2662_v38 = vadd.f32 %v2661_v45, %v8295_v30  ;;  %v2940_v21 = vmul.f32 %v7829_v59, %v7829_v59  ;;  %v2941_v30 = vmul.f32 %v7838_v40, %v7838_v40 }
 0x2f6   : > { %v2663_v7 = vadd.f32 %v8296_v63, %v2662_v38  ;;  %v3180_v13 = vadd.f32 %v3179_v52, %v2925_v0  ;;  %v2942_v38 = vmul.f32 %v7824_v1, %v7824_v1 }
 0x2f8   : > { %v3181_v16 = vadd.f32 %v3180_v13, %v2926_v29  ;;  %v2664_v15 = vadd.f32 %v8297_v17, %v2663_v7  ;;  %v8307_v29 = vld [vmem:[#allocation25_spill] sm:$0xff] }
 0x2f9   : > { %v2943_v7 = vmul.f32 %v8307_v29, %v8307_v29 }
 0x2fa   : > { %v2665_v50 = vadd.f32 %v2664_v15, %v8298_v14  ;;  %v3182_v2 = vadd.f32 %v3181_v16, %v2927_v47 }
 0x2fc   : > { %v3183_v33 = vadd.f32 %v3182_v2, %v2928_v23  ;;  %v2666_v28 = vadd.f32 %v2665_v50, %v8299_v4 }
 0x2fe   : > { %v2667_v24 = vadd.f32 %v8300_v62, %v2666_v28  ;;  %v3184_v42 = vadd.f32 %v3183_v33, %v2929_v43 }
 0x300   : > { %v3185_v61 = vadd.f32 %v3184_v42, %v2930_v9  ;;  %v2668_v32 = vadd.f32 %v8301_v44, %v2667_v24 }
 0x302   : > { %v2669_v3 = vadd.f32 %v2668_v32, %v7777_v56  ;;  %v3186_v8 = vadd.f32 %v3185_v61, %v2931_v55  ;;  %v2936_v56 = vmul.f32 %v7803_v18, %v7803_v18 }
 0x304   : > { %v3187_v10 = vadd.f32 %v3186_v8, %v2932_v53  ;;  %v2670_v39 = vadd.f32 %v2669_v3, %v8302_v31 }
 0x306   : > { %v2671_v49 = vadd.f32 %v8303_v25, %v2670_v39  ;;  %v3188_v6 = vadd.f32 %v3187_v10, %v2933_v19 }
 0x308   : > { %v3189_v35 = vadd.f32 %v3188_v6, %v2934_v11  ;;  %v2672_v26 = vadd.f32 %v8304_v58, %v2671_v49 }
 0x30a   : > { %v2673_v46 = vadd.f32 %v2672_v26, %v7803_v18  ;;  %v3190_v54 = vadd.f32 %v3189_v35, %v2935_v60 }
 0x30c   : > { %v3191_v36 = vadd.f32 %v3190_v54, %v2936_v56  ;;  %v2674_v5 = vadd.f32 %v2673_v46, %v7812_v12 }
 0x30e   : > { %v2675_v57 = vadd.f32 %v8305_v34, %v2674_v5  ;;  %v3192_v48 = vadd.f32 %v3191_v36, %v2937_v37 }
 0x310   : > { %v3193_v20 = vadd.f32 %v3192_v48, %v2938_v27  ;;  %v2676_v18 = vadd.f32 %v8306_v51, %v2675_v57 }
 0x312   : > { %v2677_v45 = vadd.f32 %v2676_v18, %v7829_v59  ;;  %v3194_v12 = vadd.f32 %v3193_v20, %v2939_v41 }
 0x314   : > { %v3195_v22 = vadd.f32 %v3194_v12, %v2940_v21  ;;  %v2678_v52 = vadd.f32 %v2677_v45, %v7838_v40 }
 0x316   : > { %v2679_v0 = vadd.f32 %v7824_v1, %v2678_v52  ;;  %v3196_v63 = vadd.f32 %v3195_v22, %v2941_v30 }
 0x318   : > { %v2680_v13 = vadd.f32 %v8307_v29, %v2679_v0  ;;  %v3197_v59 = vadd.f32 %v3196_v63, %v2942_v38 }
 0x31a   : > { %v2681_v17 = vrot.slane %v2680_v13, 4  ;;  %v3198_v47 = vadd.f32 %v3197_v59, %v2943_v7 }
 0x31c   : > { %v2682_v40 = vadd.f32 %v2681_v17, %v2680_v13  ;;  %v3199_v16 = vrot.slane %v3198_v47, 4 }
 0x31e   : > { %v2683_v15 = vrot.slane %v2682_v40, 2  ;;  %v3200_v1 = vadd.f32 %v3199_v16, %v3198_v47 }
 0x320   : > { %v2684_v14 = vadd.f32 %v2683_v15, %v2682_v40  ;;  %v3201_v23 = vrot.slane %v3200_v1, 2 }
 0x322   : > { %v2685_v50 = vrot.slane %v2684_v14, 1  ;;  %v3202_v2 = vadd.f32 %v3201_v23, %v3200_v1 }
 0x324   : > { %v2686_v33 = vadd.f32 %v2685_v50, %v2684_v14  ;;  %v3203_v4 = vrot.slane %v3202_v2, 1 }
 0x326   : > { %2687 = vst [vmem:[%s247_s27] sm:$0x1] %v2686_v33  ;;  %v3204_v28 = vadd.f32 %v3203_v4, %v3202_v2 }
 0x327   : > { %6780 = shalt.err (!%p6777_p7)
}
 0x328   : > { %s6781_s24 = scalar_lea.hbm %s8060_s10, 16  ;;  %s6785_s19 = scalar_lea.hbm %s8148_s3, 64 }
 0x329   : > { %p6782_p9 = scmp.ne.s32.totalorder %s8060_s10, %s6781_s24  ;;  %p6786_p12 = scmp.lt.u32.totalorder %s8060_s10, %s8148_s3 }
 0x32a   : > { %p6787_p13 = scmp.lt.u32.totalorder %s6785_s19, %s6781_s24  ;;  %p6789_p1 = scmp.lt.u32.totalorder %s6781_s24, %s8060_s10 }
 0x32b   : > { %p6783_p10 = pnand %p6782_p9, %p6973_p3 }
 0x32c   : > { %p6788_p0 = por %p6787_p13, %p6786_p12 }
 0x32d   : > { %p6784_p11 = pneg %p6783_p10 }
 0x32e   : > { %p6790_p2 = por %p6789_p1, %p6788_p0 }
 0x330   : > { %p6791_p4 = pnand %p6790_p2, %p6784_p11 }
 0x332   : > { %6794 = shalt.err (!%p6791_p4)
}
 0x333   : > { %6555 = dma.vmem_to_hbm [thread:$0]  (%p6973_p3), %s8062_s30, 16, %s8060_s10, %s4496_s26   ;;  %3205 = vst [vmem:[%s253_s5] sm:$0x1] %v3204_v28 }
 0x334   : > { %s4500_s11 = scalar_lea.sflag [#allocation5], %s8049_s13  ;;  %s6795_s12 = scalar_lea.vmem %s8069_s6, 16 }
 0x335   : > { %p6796_p5 = scmp.ne.s32.totalorder %s8069_s6, %s6795_s12  ;;  %s6896_s14 = smov [#allocation4]  }
 0x336   : > { %s6799_s23 = sshll.u32 %s6896_s14, 4  ;;  %s6800_s23 = int_to_ptr.vmem [resolvable:$false] %s6799_s23 }
 0x337   : > { %p6797_p6 = pnand %p6796_p5, %p6973_p3  ;;  %s6801_s24 = scalar_lea.vmem %s6800_s23, 32 }
 0x338   : > { %p6802_p9 = scmp.lt.s32.totalorder %s8069_s6, %s6800_s23  ;;  %p6803_p10 = scmp.lt.s32.totalorder %s6801_s24, %s6795_s12 }
 0x339   : > { %p6798_p7 = pneg %p6797_p6 }
 0x33a   : > { %p6804_p11 = por %p6803_p10, %p6802_p9 }
 0x33c   : > { %p6805_p12 = pnand %p6804_p11, %p6798_p7 }
 0x33e   : > { %6808 = shalt.err (!%p6805_p12)
}
 0x33f   : > { %s6809_s13 = scalar_lea.hbm %s8067_s25, 16  ;;  %s6813_s10 = scalar_lea.hbm %s8149_s4, 64 }
 0x340   : > { %p6810_p13 = scmp.ne.s32.totalorder %s8067_s25, %s6809_s13  ;;  %p6814_p2 = scmp.lt.u32.totalorder %s8067_s25, %s8149_s4 }
 0x341   : > { %p6815_p4 = scmp.lt.u32.totalorder %s6813_s10, %s6809_s13  ;;  %p6817_p6 = scmp.lt.u32.totalorder %s6809_s13, %s8067_s25 }
 0x342   : > { %p6811_p0 = pnand %p6810_p13, %p6973_p3 }
 0x343   : > { %p6816_p5 = por %p6815_p4, %p6814_p2 }
 0x344   : > { %p6812_p1 = pneg %p6811_p0 }
 0x345   : > { %p6818_p7 = por %p6817_p6, %p6816_p5 }
 0x347   : > { %p6819_p9 = pnand %p6818_p7, %p6812_p1 }
 0x349   : > { %6822 = shalt.err (!%p6819_p9)
}
 0x34a   : > { %6556 = dma.vmem_to_hbm [thread:$0]  (%p6973_p3), %s8069_s6, 16, %s8067_s25, %s4500_s11  }
 0x34b PF: > { %p6566_p10 = scmp.ge.s32.totalorder %s6893_s22, 2  ;;  %s4556_s8 = sand.u32 1, %s6865_s15  }
 0x34c   : > { %s4557_s19 = scalar_lea.sflag [#allocation3], %s4556_s8 }
 0x34d   : > { %p6560_p11 = pnand %p6566_p10, %p6982_p8 }
 0x34f   : > { %6856 = dma.done.wait (!%p6560_p11), %s4557_s19, 16  }
 0x350   : > { %6858 = vsyncadd (!%p6560_p11), %s4557_s19, 4294967280  ;;  %s4565_s18 = scalar_lea.sflag [#allocation5], %s4556_s8 }
 0x351   : > { %6860 = dma.done.wait (!%p6560_p11), %s4565_s18, 16  }
 0x352   : > { %6862 = vsyncadd (!%p6560_p11), %s4565_s18, 4294967280  ;;  %s21_s22 = sadd.s32 1, %s6893_s22   ;;  %s8308_s28 = sld [smem:[#allocation8_spill]] }
 0x353   : > { %p18_p12 = scmp.ge.s32.totalorder %s21_s22, 6   ;;  %s8309_s6 = sld [smem:[#allocation9_spill]] }
 0x354   : > { %s8310_s15 = smov %s6869_s16  ;;  %s8311_s16 = smov %s6873_s17 }
 0x355   : > { %s8312_s17 = smov %s6991_s7  ;;  %s8313_s18 = smov %s6885_s20 }
 0x356   : > { %s8314_s19 = smov %s6889_s21  ;;  %20 = sbr.rel (!%p18_p12) target bundleno = 7 (0x7), region = 96 }
 0x358   : > { %s8315_s20 = smov %s8308_s28 }
 0x359   : > { %s8316_s21 = smov %s8309_s6 }
 0x35d   :  { %4569 = vsyncpa [#allocation3], 1 }
 0x35e   :  { %4571 = vsyncpa [#allocation3 + $0x1], 1 }
 0x35f   :  { %4572 = vsyncpa [#allocation5], 1 }
 0x360   :  { %4574 = vsyncpa [#allocation5 + $0x1], 1 }

</bundles_post_ra>
